<compile_context>
chip_gen: v7x
topology: tpu7x:2x2x1
jax: 0.10.0
libtpu: 0.0.40
codegen_flags: <defaults>
</compile_context>

<pallas_src>
import functools

import numpy as np
import jax
import jax.numpy as jnp
from jax.experimental import pallas as pl
from jax.experimental.pallas import tpu as pltpu

# ----------------------------- configuration --------------------------------
N_CHANNELS = 16            # encoder channels
HIDDEN = 32                # TCN hidden channels
OUT_CHANNELS = 24          # speaker embedding dim (ref_dim)
SHORT_KERNEL = 4
STRIDE = SHORT_KERNEL // 2
N_RESNET = 2
N_SPEAKERS = 10
N_STACKED = 2
N_TCN = 2
MEMORY_SIZE = (2 ** N_TCN) * N_TCN          # default: 2**n_tcn * n_tcn = 8
CHUNK_LEN = 34
TIME_DIM = (CHUNK_LEN - SHORT_KERNEL) // STRIDE + 1     # 16 (version-3 time_dim)
LN_EPS = 1e-5
GLN_EPS = 1e-8
F32 = jnp.float32


# ------------------------ in-kernel math helpers -----------------------------
def _prelu(v, a):
    # a: (1, 1) learnable slope
    return jnp.where(v > 0, v, v * a)


def _layernorm_rows(v, g, b):
    # nn.LayerNorm over channels (lane axis); v: (N, C), g/b: (1, C)
    mu = jnp.mean(v, axis=-1, keepdims=True)
    d = v - mu
    var = jnp.mean(d * d, axis=-1, keepdims=True)
    return d * jax.lax.rsqrt(var + LN_EPS) * g + b


def _gln2(v, g, b, bsum, inv_n):
    # global layer norm over (time, channels) per batch sample, on flat rows.
    # bsum: (BT, BT) same-batch indicator -> per-batch pooling via the MXU.
    rs = jnp.sum(v, axis=-1, keepdims=True)                       # (BT, 1)
    mu = jnp.dot(bsum, rs, preferred_element_type=F32) * inv_n    # (BT, 1)
    d = v - mu
    vs = jnp.sum(d * d, axis=-1, keepdims=True)
    var = jnp.dot(bsum, vs, preferred_element_type=F32) * inv_n
    return d * jax.lax.rsqrt(var + GLN_EPS) * g + b


def _tcn_block(pb, y2, bsum, s_minus, s_plus, t_dim,
               refv_rows=None, mem2=None, residual=True):
    """TCNBlock / TCNBlockRef: conv1x1 -> PReLU -> gLN -> depthwise dilated conv
    -> PReLU -> gLN -> conv1x1 (+ residual).  The speaker embedding / memory
    channel concatenations are realized via pre-split input weights (w1r/w1m);
    the dilated time shifts via constant shift matrices (s_minus/s_plus)."""
    hidden = pb["w1"].shape[1]
    inv_n = 1.0 / float(t_dim * hidden)

    h = jnp.dot(y2, pb["w1"][...], preferred_element_type=F32) + pb["b1"][...]
    if mem2 is not None:
        h = h + jnp.dot(mem2, pb["w1m"][...], preferred_element_type=F32)
    if refv_rows is not None:
        h = h + jnp.dot(refv_rows, pb["w1r"][...], preferred_element_type=F32)
    h = _prelu(h, pb["a1"][...])
    h = _gln2(h, pb["g1"][...], pb["be1"][...], bsum, inv_n)

    # depthwise dilated conv (kernel 3, "same" padding) as shift-matmuls
    hm = jnp.dot(s_minus, h, preferred_element_type=F32)          # h[t - d]
    hp = jnp.dot(s_plus, h, preferred_element_type=F32)           # h[t + d]
    acc = (h * pb["dw1"][...] + hm * pb["dw0"][...] + hp * pb["dw2"][...]
           + pb["db"][...])
    acc = _prelu(acc, pb["a2"][...])
    acc = _gln2(acc, pb["g2"][...], pb["be2"][...], bsum, inv_n)

    out = jnp.dot(acc, pb["w2"][...], preferred_element_type=F32) + pb["b2"][...]
    if residual:
        out = out + y2
    return out


# ------------------------------ fused kernels --------------------------------
def _ref_kernel(treedef, n_w, *refs):
    """Reference path: speech encoder + speaker encoder + classifier."""
    frames_ref = refs[0]
    w_refs = refs[1:1 + n_w]
    refvec_ref = refs[1 + n_w]
    logits_ref = refs[2 + n_w]

    tree = jax.tree_util.tree_unflatten(treedef, list(w_refs))
    p, c = tree["p"], tree["c"]

    f2 = frames_ref[...]                                          # (B*T, K)
    x = jnp.maximum(
        jnp.dot(f2, p["enc_w"][...], preferred_element_type=F32) + p["enc_b"][...], 0.0)
    y = _layernorm_rows(x, p["ln_g"][...], p["ln_b"][...])
    y = jnp.dot(y, p["proj_w"][...], preferred_element_type=F32) + p["proj_b"][...]
    for rb in p["res"]:
        h = _prelu(jnp.dot(y, rb["w1"][...], preferred_element_type=F32) + rb["b1"][...],
                   rb["a1"][...])
        h = jnp.dot(h, rb["w2"][...], preferred_element_type=F32) + rb["b2"][...]
        y = _prelu(y + h, rb["a2"][...])
    y = jnp.dot(y, p["out_w"][...], preferred_element_type=F32) + p["out_b"][...]

    ref_vec = jnp.dot(c["mean"][...], y, preferred_element_type=F32)   # mean over time
    logits = jnp.dot(ref_vec, p["cls_w"][...], preferred_element_type=F32) + p["cls_b"][...]
    refvec_ref[...] = ref_vec
    logits_ref[...] = logits


def _chunk_kernel(treedef, n_w, t_dim, *refs):
    """One grid step == one chunk: encoder -> extractor (version 3, GRU-like
    memory + FMS caches carried in VMEM scratch) -> mask -> decoder matmul."""
    frames_ref = refs[0]
    refv_ref = refs[1]
    w_refs = refs[2:2 + n_w]
    out_ref = refs[2 + n_w]
    mem_ref = refs[3 + n_w]
    cache_refs = refs[4 + n_w:4 + n_w + N_STACKED]

    tree = jax.tree_util.tree_unflatten(treedef, list(w_refs))
    p, c = tree["p"], tree["c"]

    step = pl.program_id(0)

    @pl.when(step == 0)
    def _init():
        # first chunk: memory <- zeros, FMS caches <- ones (version == 3)
        mem_ref[...] = jnp.zeros_like(mem_ref)
        for cr in cache_refs:
            cr[...] = jnp.ones_like(cr)

    bsum = c["bsum"][...]          # (BT, BT) same-batch indicator
    rexp = c["rexp"][...]          # (BT, B)  row expansion per batch
    poolb = c["poolb"][...]        # (B, BT)  row pooling per batch
    ttile = c["ttile"][...]        # (BT, T)  tiles a length-T vector over batch
    shift = c["shift"]

    # ---- speech encoder (fused in) ----
    frames = frames_ref[...]                                       # (BT, K)
    x = jnp.maximum(
        jnp.dot(frames, p["enc_w"][...], preferred_element_type=F32) + p["enc_b"][...], 0.0)

    # ---- extractor front-end ----
    y = _layernorm_rows(x, p["ln_g"][...], p["ln_b"][...])
    y = jnp.dot(y, p["conv1_w"][...], preferred_element_type=F32) + p["conv1_b"][...]

    refv_rows = jnp.dot(rexp, refv_ref[...], preferred_element_type=F32)   # (BT, ref_dim)
    mem_old = mem_ref[...]                                                  # (BT, M)

    # ---- stacked TCN blocks with FMS gating across chunks (version 3) ----
    for i in range(N_STACKED):
        old_cache = cache_refs[i][...]                                      # (BT, C)
        w_rows = jnp.dot(ttile, p["fms"][i]["w"][...], preferred_element_type=F32)   # (BT, 1)
        s_pre = (jnp.dot(poolb, old_cache * w_rows, preferred_element_type=F32)
                 + p["fms"][i]["b"][...])                                   # (B, C)
        scale_rows = jnp.dot(rexp, jax.nn.sigmoid(s_pre), preferred_element_type=F32)  # (BT, C)
        cache_refs[i][...] = y                      # cache the pre-scaling activations
        y = y * scale_rows

        blocks = p["stacks"][i]
        if i == N_STACKED - 1:
            y = _tcn_block(blocks[0], y, bsum, shift[1]["m"][...], shift[1]["p"][...],
                           t_dim, refv_rows=refv_rows, mem2=mem_old, residual=False)
        else:
            y = _tcn_block(blocks[0], y, bsum, shift[1]["m"][...], shift[1]["p"][...],
                           t_dim, refv_rows=refv_rows, residual=True)
        for j in range(1, N_TCN):
            d = 2 ** j
            y = _tcn_block(blocks[j], y, bsum, shift[d]["m"][...], shift[d]["p"][...],
                           t_dim, residual=True)

    # ---- GRU-like memory update ----
    z = jax.nn.sigmoid(
        jnp.dot(y, p["gate_w"][...], preferred_element_type=F32) + p["gate_b"][...])
    n = _tcn_block(p["make_memory"], y, bsum, shift[1]["m"][...], shift[1]["p"][...],
                   t_dim, residual=False)
    mem_ref[...] = (1.0 - z) * n + z * mem_old

    # ---- mask, apply, decoder matmul (fused in) ----
    m = jnp.maximum(
        jnp.dot(y, p["mask_w"][...], preferred_element_type=F32) + p["mask_b"][...], 0.0)
    encs1 = x * m
    out_ref[...] = jnp.dot(encs1, p["dec_w"][...], preferred_element_type=F32)


# --------------------------- constant matrices --------------------------------
def _np_shift_matrix(off, batch, t_dim):
    bt = batch * t_dim
    m = np.zeros((bt, bt), np.float32)
    r = np.arange(bt)
    t = r % t_dim
    ok = (t + off >= 0) & (t + off < t_dim)
    m[r[ok], r[ok] + off] = 1.0
    return jnp.asarray(m)


def _np_same_batch(batch, t_dim):
    b = np.arange(batch * t_dim) // t_dim
    return jnp.asarray((b[:, None] == b[None, :]).astype(np.float32))


def _np_row_expand(batch, t_dim):            # (BT, B)
    b = np.arange(batch * t_dim) // t_dim
    return jnp.asarray((b[:, None] == np.arange(batch)[None, :]).astype(np.float32))


def _np_row_pool(batch, t_dim):              # (B, BT)
    b = np.arange(batch * t_dim) // t_dim
    return jnp.asarray((np.arange(batch)[:, None] == b[None, :]).astype(np.float32))


def _np_time_tile(batch, t_dim):             # (BT, T)
    t = np.arange(batch * t_dim) % t_dim
    return jnp.asarray((t[:, None] == np.arange(t_dim)[None, :]).astype(np.float32))


def _const_index(ndim, c):
    return (0,) * ndim


# ------------------------------- forward --------------------------------------
def _frame_signal(sig):
    n, length = sig.shape
    t_dim = (length - SHORT_KERNEL) // STRIDE + 1
    idx = jnp.arange(t_dim)[:, None] * STRIDE + jnp.arange(SHORT_KERNEL)[None, :]
    return sig[:, idx]                           # (n, T, K)  -- framing glue


def spexplus_forward(params, x, ref):
    """SpexPlusShortGRUModel.forward (have_relevant_speakers=True, one_chunk=False)."""
    batch = ref.shape[0]
    n_chunks = x.shape[0] // batch

    # ---------------- reference path: one fused kernel ----------------
    ref_frames = _frame_signal(ref)                              # (B, T, K)
    b, t_ref, _ = ref_frames.shape
    spk_tree = dict(p=params["spk"],
                    c=dict(mean=_np_row_pool(b, t_ref) / float(t_ref)))
    spk_flat, spk_treedef = jax.tree_util.tree_flatten(spk_tree)
    ref_vec, logits = pl.pallas_call(
        functools.partial(_ref_kernel, spk_treedef, len(spk_flat)),
        out_shape=(jax.ShapeDtypeStruct((b, OUT_CHANNELS), F32),
                   jax.ShapeDtypeStruct((b, N_SPEAKERS), F32)),
        in_specs=[pl.BlockSpec(memory_space=pltpu.MemorySpace.VMEM)] * (1 + len(spk_flat)),
        out_specs=(pl.BlockSpec(memory_space=pltpu.MemorySpace.VMEM),
                   pl.BlockSpec(memory_space=pltpu.MemorySpace.VMEM)),
    )(ref_frames.reshape(b * t_ref, SHORT_KERNEL), *spk_flat)

    # ---------------- chunk path: one fused kernel, grid over chunks ----------------
    mix_frames = _frame_signal(x)                                # (n_chunks*B, T, K)
    t_dim = mix_frames.shape[1]
    assert t_dim == TIME_DIM, "version 3 requires time_dim == framed chunk length"
    bt = batch * t_dim
    frames_all = mix_frames.reshape(n_chunks, batch, t_dim, SHORT_KERNEL).reshape(
        n_chunks * bt, SHORT_KERNEL)

    dils = sorted({2 ** j for j in range(N_TCN)} | {1})
    consts = dict(
        bsum=_np_same_batch(batch, t_dim),
        rexp=_np_row_expand(batch, t_dim),
        poolb=_np_row_pool(batch, t_dim),
        ttile=_np_time_tile(batch, t_dim),
        shift={d: dict(m=_np_shift_matrix(-d, batch, t_dim),
                       p=_np_shift_matrix(d, batch, t_dim)) for d in dils},
    )
    ext_tree = dict(p=params["ext"], c=consts)
    ext_flat, ext_treedef = jax.tree_util.tree_flatten(ext_tree)

    in_specs = [pl.BlockSpec((bt, SHORT_KERNEL), lambda c: (c, 0)),       # chunk frames
                pl.BlockSpec((batch, OUT_CHANNELS), lambda c: (0, 0))]    # speaker embedding
    for w in ext_flat:                                                    # weights: resident
        in_specs.append(pl.BlockSpec(w.shape, functools.partial(_const_index, w.ndim)))

    grid_spec = pltpu.PrefetchScalarGridSpec(
        num_scalar_prefetch=0,
        grid=(n_chunks,),
        in_specs=in_specs,
        out_specs=pl.BlockSpec((bt, SHORT_KERNEL), lambda c: (c, 0)),
        scratch_shapes=[pltpu.VMEM((bt, MEMORY_SIZE), F32)]               # GRU-like memory
                       + [pltpu.VMEM((bt, N_CHANNELS), F32)               # FMS caches
                          for _ in range(N_STACKED)],
    )
    dec_frames = pl.pallas_call(
        functools.partial(_chunk_kernel, ext_treedef, len(ext_flat), t_dim),
        out_shape=jax.ShapeDtypeStruct((n_chunks * bt, SHORT_KERNEL), F32),
        grid_spec=grid_spec,
        compiler_params=pltpu.CompilerParams(dimension_semantics=("arbitrary",)),
    )(frames_all, ref_vec, *ext_flat)

    # ---------------- overlap-add decoder tail (glue) ----------------
    init_len = x.shape[1]
    out_len = (t_dim - 1) * STRIDE + SHORT_KERNEL
    fr = dec_frames.reshape(n_chunks * batch, t_dim * SHORT_KERNEL)
    pos = (jnp.arange(t_dim)[:, None] * STRIDE + jnp.arange(SHORT_KERNEL)[None, :]).reshape(-1)
    s1 = jnp.zeros((n_chunks * batch, out_len), F32).at[:, pos].add(fr)
    s1 = s1 + params["dec_b"][0, 0]
    if out_len >= init_len:
        s1 = s1[:, :init_len]
    else:
        s1 = jnp.pad(s1, ((0, 0), (0, init_len - out_len)))
    return s1, logits


# ----------------------------- parameter init ---------------------------------
class _KeyGen:
    def __init__(self, seed):
        self._key = jax.random.PRNGKey(seed)

    def __call__(self):
        self._key, sub = jax.random.split(self._key)
        return sub


def _init(key, shape, scale=0.1):
    return scale * jax.random.normal(key, shape, dtype=F32)


def _rowv(key, n):
    return _init(key, (1, n))


def init_params(seed=1234):
    kg = _KeyGen(seed)

    enc_w = _init(kg(), (SHORT_KERNEL, N_CHANNELS))
    enc_b = _rowv(kg(), N_CHANNELS)
    dec_w = _init(kg(), (N_CHANNELS, SHORT_KERNEL))
    dec_b = _init(kg(), (1, 1))

    def tcn(cin, cout, with_ref=False, with_mem=False):
        blk = dict(
            w1=_init(kg(), (cin, HIDDEN)), b1=_rowv(kg(), HIDDEN),
            a1=jnp.full((1, 1), 0.25, F32),
            g1=jnp.ones((1, HIDDEN), F32), be1=jnp.zeros((1, HIDDEN), F32),
            dw0=_init(kg(), (1, HIDDEN)), dw1=_init(kg(), (1, HIDDEN)),
            dw2=_init(kg(), (1, HIDDEN)), db=_rowv(kg(), HIDDEN),
            a2=jnp.full((1, 1), 0.25, F32),
            g2=jnp.ones((1, HIDDEN), F32), be2=jnp.zeros((1, HIDDEN), F32),
            w2=_init(kg(), (HIDDEN, cout)), b2=_rowv(kg(), cout),
        )
        if with_ref:    # input-channel slice of conv1x1 for the concatenated ref embedding
            blk["w1r"] = _init(kg(), (OUT_CHANNELS, HIDDEN))
        if with_mem:    # input-channel slice of conv1x1 for the concatenated memory
            blk["w1m"] = _init(kg(), (MEMORY_SIZE, HIDDEN))
        return blk

    stacks = []
    for s in range(N_STACKED):
        blocks = [tcn(N_CHANNELS, N_CHANNELS, with_ref=True,
                      with_mem=(s == N_STACKED - 1))]
        for _ in range(1, N_TCN):
            blocks.append(tcn(N_CHANNELS, N_CHANNELS))
        stacks.append(blocks)

    ext = dict(
        enc_w=enc_w, enc_b=enc_b, dec_w=dec_w,
        ln_g=jnp.ones((1, N_CHANNELS), F32), ln_b=jnp.zeros((1, N_CHANNELS), F32),
        conv1_w=_init(kg(), (N_CHANNELS, N_CHANNELS)), conv1_b=_rowv(kg(), N_CHANNELS),
        stacks=stacks,
        fms=[dict(w=_init(kg(), (TIME_DIM, 1)), b=_init(kg(), (1, 1)))
             for _ in range(N_STACKED)],
        gate_w=_init(kg(), (N_CHANNELS, MEMORY_SIZE)), gate_b=_rowv(kg(), MEMORY_SIZE),
        make_memory=tcn(N_CHANNELS, MEMORY_SIZE),
        mask_w=_init(kg(), (N_CHANNELS, N_CHANNELS)), mask_b=_rowv(kg(), N_CHANNELS),
    )

    spk = dict(
        enc_w=enc_w, enc_b=enc_b,
        ln_g=jnp.ones((1, N_CHANNELS), F32), ln_b=jnp.zeros((1, N_CHANNELS), F32),
        proj_w=_init(kg(), (N_CHANNELS, OUT_CHANNELS)), proj_b=_rowv(kg(), OUT_CHANNELS),
        res=[dict(w1=_init(kg(), (OUT_CHANNELS, OUT_CHANNELS)), b1=_rowv(kg(), OUT_CHANNELS),
                  a1=jnp.full((1, 1), 0.25, F32),
                  w2=_init(kg(), (OUT_CHANNELS, OUT_CHANNELS)), b2=_rowv(kg(), OUT_CHANNELS),
                  a2=jnp.full((1, 1), 0.25, F32)) for _ in range(N_RESNET)],
        out_w=_init(kg(), (OUT_CHANNELS, OUT_CHANNELS)), out_b=_rowv(kg(), OUT_CHANNELS),
        cls_w=_init(kg(), (OUT_CHANNELS, N_SPEAKERS)), cls_b=_rowv(kg(), N_SPEAKERS),
    )
    return dict(spk=spk, ext=ext, dec_b=dec_b)


# ----------------------------------- main --------------------------------------
if __name__ == "__main__":
    key = jax.random.PRNGKey(0)
    kx, kr = jax.random.split(key)
    batch, n_chunks = 2, 2
    x = jax.random.normal(kx, (batch * n_chunks, CHUNK_LEN), F32)   # mixture chunks
    ref = jax.random.normal(kr, (batch, CHUNK_LEN), F32)            # reference speech
    params = init_params(1234)

    forward = jax.jit(spexplus_forward)
    s1, speaker_logits = forward(params, x, ref)
    jax.block_until_ready((s1, speaker_logits))

    assert s1.shape == (batch * n_chunks, CHUNK_LEN)
    assert speaker_logits.shape == (batch, N_SPEAKERS)
    assert bool(jnp.all(jnp.isfinite(s1))) and bool(jnp.all(jnp.isfinite(speaker_logits)))
    print("KERNEL_OK")
</pallas_src>

<mosaic_0001>
module attributes {stable_mosaic.version = 11 : i64} {
  func.func @_chunk_kernel(%arg0: i32, %arg1: memref<32x4xf32, #tpu.memory_space<vmem>>, %arg2: memref<2x24xf32, #tpu.memory_space<vmem>>, %arg3: memref<32x32xf32, #tpu.memory_space<vmem>>, %arg4: memref<2x32xf32, #tpu.memory_space<vmem>>, %arg5: memref<32x2xf32, #tpu.memory_space<vmem>>, %arg6: memref<32x32xf32, #tpu.memory_space<vmem>>, %arg7: memref<32x32xf32, #tpu.memory_space<vmem>>, %arg8: memref<32x32xf32, #tpu.memory_space<vmem>>, %arg9: memref<32x32xf32, #tpu.memory_space<vmem>>, %arg10: memref<32x16xf32, #tpu.memory_space<vmem>>, %arg11: memref<1x16xf32, #tpu.memory_space<vmem>>, %arg12: memref<16x16xf32, #tpu.memory_space<vmem>>, %arg13: memref<16x4xf32, #tpu.memory_space<vmem>>, %arg14: memref<1x16xf32, #tpu.memory_space<vmem>>, %arg15: memref<4x16xf32, #tpu.memory_space<vmem>>, %arg16: memref<1x1xf32, #tpu.memory_space<vmem>>, %arg17: memref<16x1xf32, #tpu.memory_space<vmem>>, %arg18: memref<1x1xf32, #tpu.memory_space<vmem>>, %arg19: memref<16x1xf32, #tpu.memory_space<vmem>>, %arg20: memref<1x8xf32, #tpu.memory_space<vmem>>, %arg21: memref<16x8xf32, #tpu.memory_space<vmem>>, %arg22: memref<1x16xf32, #tpu.memory_space<vmem>>, %arg23: memref<1x16xf32, #tpu.memory_space<vmem>>, %arg24: memref<1x1xf32, #tpu.memory_space<vmem>>, %arg25: memref<1x1xf32, #tpu.memory_space<vmem>>, %arg26: memref<1x32xf32, #tpu.memory_space<vmem>>, %arg27: memref<1x8xf32, #tpu.memory_space<vmem>>, %arg28: memref<1x32xf32, #tpu.memory_space<vmem>>, %arg29: memref<1x32xf32, #tpu.memory_space<vmem>>, %arg30: memref<1x32xf32, #tpu.memory_space<vmem>>, %arg31: memref<1x32xf32, #tpu.memory_space<vmem>>, %arg32: memref<1x32xf32, #tpu.memory_space<vmem>>, %arg33: memref<1x32xf32, #tpu.memory_space<vmem>>, %arg34: memref<1x32xf32, #tpu.memory_space<vmem>>, %arg35: memref<1x32xf32, #tpu.memory_space<vmem>>, %arg36: memref<16x32xf32, #tpu.memory_space<vmem>>, %arg37: memref<32x8xf32, #tpu.memory_space<vmem>>, %arg38: memref<1x16xf32, #tpu.memory_space<vmem>>, %arg39: memref<16x16xf32, #tpu.memory_space<vmem>>, %arg40: memref<1x1xf32, #tpu.memory_space<vmem>>, %arg41: memref<1x1xf32, #tpu.memory_space<vmem>>, %arg42: memref<1x32xf32, #tpu.memory_space<vmem>>, %arg43: memref<1x16xf32, #tpu.memory_space<vmem>>, %arg44: memref<1x32xf32, #tpu.memory_space<vmem>>, %arg45: memref<1x32xf32, #tpu.memory_space<vmem>>, %arg46: memref<1x32xf32, #tpu.memory_space<vmem>>, %arg47: memref<1x32xf32, #tpu.memory_space<vmem>>, %arg48: memref<1x32xf32, #tpu.memory_space<vmem>>, %arg49: memref<1x32xf32, #tpu.memory_space<vmem>>, %arg50: memref<1x32xf32, #tpu.memory_space<vmem>>, %arg51: memref<1x32xf32, #tpu.memory_space<vmem>>, %arg52: memref<16x32xf32, #tpu.memory_space<vmem>>, %arg53: memref<24x32xf32, #tpu.memory_space<vmem>>, %arg54: memref<32x16xf32, #tpu.memory_space<vmem>>, %arg55: memref<1x1xf32, #tpu.memory_space<vmem>>, %arg56: memref<1x1xf32, #tpu.memory_space<vmem>>, %arg57: memref<1x32xf32, #tpu.memory_space<vmem>>, %arg58: memref<1x16xf32, #tpu.memory_space<vmem>>, %arg59: memref<1x32xf32, #tpu.memory_space<vmem>>, %arg60: memref<1x32xf32, #tpu.memory_space<vmem>>, %arg61: memref<1x32xf32, #tpu.memory_space<vmem>>, %arg62: memref<1x32xf32, #tpu.memory_space<vmem>>, %arg63: memref<1x32xf32, #tpu.memory_space<vmem>>, %arg64: memref<1x32xf32, #tpu.memory_space<vmem>>, %arg65: memref<1x32xf32, #tpu.memory_space<vmem>>, %arg66: memref<1x32xf32, #tpu.memory_space<vmem>>, %arg67: memref<16x32xf32, #tpu.memory_space<vmem>>, %arg68: memref<32x16xf32, #tpu.memory_space<vmem>>, %arg69: memref<1x1xf32, #tpu.memory_space<vmem>>, %arg70: memref<1x1xf32, #tpu.memory_space<vmem>>, %arg71: memref<1x32xf32, #tpu.memory_space<vmem>>, %arg72: memref<1x16xf32, #tpu.memory_space<vmem>>, %arg73: memref<1x32xf32, #tpu.memory_space<vmem>>, %arg74: memref<1x32xf32, #tpu.memory_space<vmem>>, %arg75: memref<1x32xf32, #tpu.memory_space<vmem>>, %arg76: memref<1x32xf32, #tpu.memory_space<vmem>>, %arg77: memref<1x32xf32, #tpu.memory_space<vmem>>, %arg78: memref<1x32xf32, #tpu.memory_space<vmem>>, %arg79: memref<1x32xf32, #tpu.memory_space<vmem>>, %arg80: memref<1x32xf32, #tpu.memory_space<vmem>>, %arg81: memref<16x32xf32, #tpu.memory_space<vmem>>, %arg82: memref<8x32xf32, #tpu.memory_space<vmem>>, %arg83: memref<24x32xf32, #tpu.memory_space<vmem>>, %arg84: memref<32x16xf32, #tpu.memory_space<vmem>>, %arg85: memref<1x1xf32, #tpu.memory_space<vmem>>, %arg86: memref<1x1xf32, #tpu.memory_space<vmem>>, %arg87: memref<1x32xf32, #tpu.memory_space<vmem>>, %arg88: memref<1x16xf32, #tpu.memory_space<vmem>>, %arg89: memref<1x32xf32, #tpu.memory_space<vmem>>, %arg90: memref<1x32xf32, #tpu.memory_space<vmem>>, %arg91: memref<1x32xf32, #tpu.memory_space<vmem>>, %arg92: memref<1x32xf32, #tpu.memory_space<vmem>>, %arg93: memref<1x32xf32, #tpu.memory_space<vmem>>, %arg94: memref<1x32xf32, #tpu.memory_space<vmem>>, %arg95: memref<1x32xf32, #tpu.memory_space<vmem>>, %arg96: memref<1x32xf32, #tpu.memory_space<vmem>>, %arg97: memref<16x32xf32, #tpu.memory_space<vmem>>, %arg98: memref<32x16xf32, #tpu.memory_space<vmem>>, %arg99: memref<32x4xf32, #tpu.memory_space<vmem>>, %arg100: memref<32x8xf32, #tpu.memory_space<vmem>>, %arg101: memref<32x16xf32, #tpu.memory_space<vmem>>, %arg102: memref<32x16xf32, #tpu.memory_space<vmem>>) attributes {dimension_semantics = [#tpu.dimension_semantics<arbitrary>], iteration_bounds = array<i64: 2>, scalar_prefetch = 0 : i64, scratch_operands = 3 : i64, tpu.core_type = #tpu.core_type<tc>, window_params = [{transform_indices = @transform_0, window_bounds = array<i64: 32, 4>}, {pipeline_mode = #tpu.pipeline_mode<synchronous>, transform_indices = @transform_1, window_bounds = array<i64: 2, 24>}, {pipeline_mode = #tpu.pipeline_mode<synchronous>, transform_indices = @transform_2, window_bounds = array<i64: 32, 32>}, {pipeline_mode = #tpu.pipeline_mode<synchronous>, transform_indices = @transform_3, window_bounds = array<i64: 2, 32>}, {pipeline_mode = #tpu.pipeline_mode<synchronous>, transform_indices = @transform_4, window_bounds = array<i64: 32, 2>}, {pipeline_mode = #tpu.pipeline_mode<synchronous>, transform_indices = @transform_5, window_bounds = array<i64: 32, 32>}, {pipeline_mode = #tpu.pipeline_mode<synchronous>, transform_indices = @transform_6, window_bounds = array<i64: 32, 32>}, {pipeline_mode = #tpu.pipeline_mode<synchronous>, transform_indices = @transform_7, window_bounds = array<i64: 32, 32>}, {pipeline_mode = #tpu.pipeline_mode<synchronous>, transform_indices = @transform_8, window_bounds = array<i64: 32, 32>}, {pipeline_mode = #tpu.pipeline_mode<synchronous>, transform_indices = @transform_9, window_bounds = array<i64: 32, 16>}, {pipeline_mode = #tpu.pipeline_mode<synchronous>, transform_indices = @transform_10, window_bounds = array<i64: 1, 16>}, {pipeline_mode = #tpu.pipeline_mode<synchronous>, transform_indices = @transform_11, window_bounds = array<i64: 16, 16>}, {pipeline_mode = #tpu.pipeline_mode<synchronous>, transform_indices = @transform_12, window_bounds = array<i64: 16, 4>}, {pipeline_mode = #tpu.pipeline_mode<synchronous>, transform_indices = @transform_13, window_bounds = array<i64: 1, 16>}, {pipeline_mode = #tpu.pipeline_mode<synchronous>, transform_indices = @transform_14, window_bounds = array<i64: 4, 16>}, {pipeline_mode = #tpu.pipeline_mode<synchronous>, transform_indices = @transform_15, window_bounds = array<i64: 1, 1>}, {pipeline_mode = #tpu.pipeline_mode<synchronous>, transform_indices = @transform_16, window_bounds = array<i64: 16, 1>}, {pipeline_mode = #tpu.pipeline_mode<synchronous>, transform_indices = @transform_17, window_bounds = array<i64: 1, 1>}, {pipeline_mode = #tpu.pipeline_mode<synchronous>, transform_indices = @transform_18, window_bounds = array<i64: 16, 1>}, {pipeline_mode = #tpu.pipeline_mode<synchronous>, transform_indices = @transform_19, window_bounds = array<i64: 1, 8>}, {pipeline_mode = #tpu.pipeline_mode<synchronous>, transform_indices = @transform_20, window_bounds = array<i64: 16, 8>}, {pipeline_mode = #tpu.pipeline_mode<synchronous>, transform_indices = @transform_21, window_bounds = array<i64: 1, 16>}, {pipeline_mode = #tpu.pipeline_mode<synchronous>, transform_indices = @transform_22, window_bounds = array<i64: 1, 16>}, {pipeline_mode = #tpu.pipeline_mode<synchronous>, transform_indices = @transform_23, window_bounds = array<i64: 1, 1>}, {pipeline_mode = #tpu.pipeline_mode<synchronous>, transform_indices = @transform_24, window_bounds = array<i64: 1, 1>}, {pipeline_mode = #tpu.pipeline_mode<synchronous>, transform_indices = @transform_25, window_bounds = array<i64: 1, 32>}, {pipeline_mode = #tpu.pipeline_mode<synchronous>, transform_indices = @transform_26, window_bounds = array<i64: 1, 8>}, {pipeline_mode = #tpu.pipeline_mode<synchronous>, transform_indices = @transform_27, window_bounds = array<i64: 1, 32>}, {pipeline_mode = #tpu.pipeline_mode<synchronous>, transform_indices = @transform_28, window_bounds = array<i64: 1, 32>}, {pipeline_mode = #tpu.pipeline_mode<synchronous>, transform_indices = @transform_29, window_bounds = array<i64: 1, 32>}, {pipeline_mode = #tpu.pipeline_mode<synchronous>, transform_indices = @transform_30, window_bounds = array<i64: 1, 32>}, {pipeline_mode = #tpu.pipeline_mode<synchronous>, transform_indices = @transform_31, window_bounds = array<i64: 1, 32>}, {pipeline_mode = #tpu.pipeline_mode<synchronous>, transform_indices = @transform_32, window_bounds = array<i64: 1, 32>}, {pipeline_mode = #tpu.pipeline_mode<synchronous>, transform_indices = @transform_33, window_bounds = array<i64: 1, 32>}, {pipeline_mode = #tpu.pipeline_mode<synchronous>, transform_indices = @transform_34, window_bounds = array<i64: 1, 32>}, {pipeline_mode = #tpu.pipeline_mode<synchronous>, transform_indices = @transform_35, window_bounds = array<i64: 16, 32>}, {pipeline_mode = #tpu.pipeline_mode<synchronous>, transform_indices = @transform_36, window_bounds = array<i64: 32, 8>}, {pipeline_mode = #tpu.pipeline_mode<synchronous>, transform_indices = @transform_37, window_bounds = array<i64: 1, 16>}, {pipeline_mode = #tpu.pipeline_mode<synchronous>, transform_indices = @transform_38, window_bounds = array<i64: 16, 16>}, {pipeline_mode = #tpu.pipeline_mode<synchronous>, transform_indices = @transform_39, window_bounds = array<i64: 1, 1>}, {pipeline_mode = #tpu.pipeline_mode<synchronous>, transform_indices = @transform_40, window_bounds = array<i64: 1, 1>}, {pipeline_mode = #tpu.pipeline_mode<synchronous>, transform_indices = @transform_41, window_bounds = array<i64: 1, 32>}, {pipeline_mode = #tpu.pipeline_mode<synchronous>, transform_indices = @transform_42, window_bounds = array<i64: 1, 16>}, {pipeline_mode = #tpu.pipeline_mode<synchronous>, transform_indices = @transform_43, window_bounds = array<i64: 1, 32>}, {pipeline_mode = #tpu.pipeline_mode<synchronous>, transform_indices = @transform_44, window_bounds = array<i64: 1, 32>}, {pipeline_mode = #tpu.pipeline_mode<synchronous>, transform_indices = @transform_45, window_bounds = array<i64: 1, 32>}, {pipeline_mode = #tpu.pipeline_mode<synchronous>, transform_indices = @transform_46, window_bounds = array<i64: 1, 32>}, {pipeline_mode = #tpu.pipeline_mode<synchronous>, transform_indices = @transform_47, window_bounds = array<i64: 1, 32>}, {pipeline_mode = #tpu.pipeline_mode<synchronous>, transform_indices = @transform_48, window_bounds = array<i64: 1, 32>}, {pipeline_mode = #tpu.pipeline_mode<synchronous>, transform_indices = @transform_49, window_bounds = array<i64: 1, 32>}, {pipeline_mode = #tpu.pipeline_mode<synchronous>, transform_indices = @transform_50, window_bounds = array<i64: 1, 32>}, {pipeline_mode = #tpu.pipeline_mode<synchronous>, transform_indices = @transform_51, window_bounds = array<i64: 16, 32>}, {pipeline_mode = #tpu.pipeline_mode<synchronous>, transform_indices = @transform_52, window_bounds = array<i64: 24, 32>}, {pipeline_mode = #tpu.pipeline_mode<synchronous>, transform_indices = @transform_53, window_bounds = array<i64: 32, 16>}, {pipeline_mode = #tpu.pipeline_mode<synchronous>, transform_indices = @transform_54, window_bounds = array<i64: 1, 1>}, {pipeline_mode = #tpu.pipeline_mode<synchronous>, transform_indices = @transform_55, window_bounds = array<i64: 1, 1>}, {pipeline_mode = #tpu.pipeline_mode<synchronous>, transform_indices = @transform_56, window_bounds = array<i64: 1, 32>}, {pipeline_mode = #tpu.pipeline_mode<synchronous>, transform_indices = @transform_57, window_bounds = array<i64: 1, 16>}, {pipeline_mode = #tpu.pipeline_mode<synchronous>, transform_indices = @transform_58, window_bounds = array<i64: 1, 32>}, {pipeline_mode = #tpu.pipeline_mode<synchronous>, transform_indices = @transform_59, window_bounds = array<i64: 1, 32>}, {pipeline_mode = #tpu.pipeline_mode<synchronous>, transform_indices = @transform_60, window_bounds = array<i64: 1, 32>}, {pipeline_mode = #tpu.pipeline_mode<synchronous>, transform_indices = @transform_61, window_bounds = array<i64: 1, 32>}, {pipeline_mode = #tpu.pipeline_mode<synchronous>, transform_indices = @transform_62, window_bounds = array<i64: 1, 32>}, {pipeline_mode = #tpu.pipeline_mode<synchronous>, transform_indices = @transform_63, window_bounds = array<i64: 1, 32>}, {pipeline_mode = #tpu.pipeline_mode<synchronous>, transform_indices = @transform_64, window_bounds = array<i64: 1, 32>}, {pipeline_mode = #tpu.pipeline_mode<synchronous>, transform_indices = @transform_65, window_bounds = array<i64: 1, 32>}, {pipeline_mode = #tpu.pipeline_mode<synchronous>, transform_indices = @transform_66, window_bounds = array<i64: 16, 32>}, {pipeline_mode = #tpu.pipeline_mode<synchronous>, transform_indices = @transform_67, window_bounds = array<i64: 32, 16>}, {pipeline_mode = #tpu.pipeline_mode<synchronous>, transform_indices = @transform_68, window_bounds = array<i64: 1, 1>}, {pipeline_mode = #tpu.pipeline_mode<synchronous>, transform_indices = @transform_69, window_bounds = array<i64: 1, 1>}, {pipeline_mode = #tpu.pipeline_mode<synchronous>, transform_indices = @transform_70, window_bounds = array<i64: 1, 32>}, {pipeline_mode = #tpu.pipeline_mode<synchronous>, transform_indices = @transform_71, window_bounds = array<i64: 1, 16>}, {pipeline_mode = #tpu.pipeline_mode<synchronous>, transform_indices = @transform_72, window_bounds = array<i64: 1, 32>}, {pipeline_mode = #tpu.pipeline_mode<synchronous>, transform_indices = @transform_73, window_bounds = array<i64: 1, 32>}, {pipeline_mode = #tpu.pipeline_mode<synchronous>, transform_indices = @transform_74, window_bounds = array<i64: 1, 32>}, {pipeline_mode = #tpu.pipeline_mode<synchronous>, transform_indices = @transform_75, window_bounds = array<i64: 1, 32>}, {pipeline_mode = #tpu.pipeline_mode<synchronous>, transform_indices = @transform_76, window_bounds = array<i64: 1, 32>}, {pipeline_mode = #tpu.pipeline_mode<synchronous>, transform_indices = @transform_77, window_bounds = array<i64: 1, 32>}, {pipeline_mode = #tpu.pipeline_mode<synchronous>, transform_indices = @transform_78, window_bounds = array<i64: 1, 32>}, {pipeline_mode = #tpu.pipeline_mode<synchronous>, transform_indices = @transform_79, window_bounds = array<i64: 1, 32>}, {pipeline_mode = #tpu.pipeline_mode<synchronous>, transform_indices = @transform_80, window_bounds = array<i64: 16, 32>}, {pipeline_mode = #tpu.pipeline_mode<synchronous>, transform_indices = @transform_81, window_bounds = array<i64: 8, 32>}, {pipeline_mode = #tpu.pipeline_mode<synchronous>, transform_indices = @transform_82, window_bounds = array<i64: 24, 32>}, {pipeline_mode = #tpu.pipeline_mode<synchronous>, transform_indices = @transform_83, window_bounds = array<i64: 32, 16>}, {pipeline_mode = #tpu.pipeline_mode<synchronous>, transform_indices = @transform_84, window_bounds = array<i64: 1, 1>}, {pipeline_mode = #tpu.pipeline_mode<synchronous>, transform_indices = @transform_85, window_bounds = array<i64: 1, 1>}, {pipeline_mode = #tpu.pipeline_mode<synchronous>, transform_indices = @transform_86, window_bounds = array<i64: 1, 32>}, {pipeline_mode = #tpu.pipeline_mode<synchronous>, transform_indices = @transform_87, window_bounds = array<i64: 1, 16>}, {pipeline_mode = #tpu.pipeline_mode<synchronous>, transform_indices = @transform_88, window_bounds = array<i64: 1, 32>}, {pipeline_mode = #tpu.pipeline_mode<synchronous>, transform_indices = @transform_89, window_bounds = array<i64: 1, 32>}, {pipeline_mode = #tpu.pipeline_mode<synchronous>, transform_indices = @transform_90, window_bounds = array<i64: 1, 32>}, {pipeline_mode = #tpu.pipeline_mode<synchronous>, transform_indices = @transform_91, window_bounds = array<i64: 1, 32>}, {pipeline_mode = #tpu.pipeline_mode<synchronous>, transform_indices = @transform_92, window_bounds = array<i64: 1, 32>}, {pipeline_mode = #tpu.pipeline_mode<synchronous>, transform_indices = @transform_93, window_bounds = array<i64: 1, 32>}, {pipeline_mode = #tpu.pipeline_mode<synchronous>, transform_indices = @transform_94, window_bounds = array<i64: 1, 32>}, {pipeline_mode = #tpu.pipeline_mode<synchronous>, transform_indices = @transform_95, window_bounds = array<i64: 1, 32>}, {pipeline_mode = #tpu.pipeline_mode<synchronous>, transform_indices = @transform_96, window_bounds = array<i64: 16, 32>}, {pipeline_mode = #tpu.pipeline_mode<synchronous>, transform_indices = @transform_97, window_bounds = array<i64: 32, 16>}, {transform_indices = @transform_98, window_bounds = array<i64: 32, 4>}]} {
    %c0_i32 = arith.constant 0 : i32
    %0 = arith.cmpi eq, %arg0, %c0_i32 : i32
    %1 = arith.extui %0 : i1 to i32
    %c0_i32_0 = arith.constant 0 : i32
    %2 = arith.cmpi ne, %1, %c0_i32_0 : i32
    scf.if %2 {
      %cst_347 = arith.constant 0.000000e+00 : f32
      %558 = vector.broadcast %cst_347 : f32 to vector<32x8xf32>
      %c0_348 = arith.constant 0 : index
      %c0_349 = arith.constant 0 : index
      %559 = vector.load %arg100[%c0_348, %c0_349] : memref<32x8xf32, #tpu.memory_space<vmem>>, vector<32x8xf32>
      tpu.vector_store %arg100[%c0_348, %c0_349], %558 {strides = array<i32>} : memref<32x8xf32, #tpu.memory_space<vmem>>, vector<32x8xf32>,
      %cst_350 = arith.constant 1.000000e+00 : f32
      %560 = vector.broadcast %cst_350 : f32 to vector<32x16xf32>
      %c0_351 = arith.constant 0 : index
      %c0_352 = arith.constant 0 : index
      %561 = vector.load %arg101[%c0_351, %c0_352] : memref<32x16xf32, #tpu.memory_space<vmem>>, vector<32x16xf32>
      tpu.vector_store %arg101[%c0_351, %c0_352], %560 {strides = array<i32>} : memref<32x16xf32, #tpu.memory_space<vmem>>, vector<32x16xf32>,
      %cst_353 = arith.constant 1.000000e+00 : f32
      %562 = vector.broadcast %cst_353 : f32 to vector<32x16xf32>
      %c0_354 = arith.constant 0 : index
      %c0_355 = arith.constant 0 : index
      %563 = vector.load %arg102[%c0_354, %c0_355] : memref<32x16xf32, #tpu.memory_space<vmem>>, vector<32x16xf32>
      tpu.vector_store %arg102[%c0_354, %c0_355], %562 {strides = array<i32>} : memref<32x16xf32, #tpu.memory_space<vmem>>, vector<32x16xf32>,
    } else {
    }
    %c0 = arith.constant 0 : index
    %c0_1 = arith.constant 0 : index
    %3 = vector.load %arg3[%c0, %c0_1] : memref<32x32xf32, #tpu.memory_space<vmem>>, vector<32x32xf32>
    %c0_2 = arith.constant 0 : index
    %c0_3 = arith.constant 0 : index
    %4 = vector.load %arg5[%c0_2, %c0_3] : memref<32x2xf32, #tpu.memory_space<vmem>>, vector<32x2xf32>
    %c0_4 = arith.constant 0 : index
    %c0_5 = arith.constant 0 : index
    %5 = vector.load %arg4[%c0_4, %c0_5] : memref<2x32xf32, #tpu.memory_space<vmem>>, vector<2x32xf32>
    %c0_6 = arith.constant 0 : index
    %c0_7 = arith.constant 0 : index
    %6 = vector.load %arg10[%c0_6, %c0_7] : memref<32x16xf32, #tpu.memory_space<vmem>>, vector<32x16xf32>
    %c0_8 = arith.constant 0 : index
    %c0_9 = arith.constant 0 : index
    %7 = vector.load %arg1[%c0_8, %c0_9] : memref<32x4xf32, #tpu.memory_space<vmem>>, vector<32x4xf32>
    %c0_10 = arith.constant 0 : index
    %c0_11 = arith.constant 0 : index
    %8 = vector.load %arg15[%c0_10, %c0_11] : memref<4x16xf32, #tpu.memory_space<vmem>>, vector<4x16xf32>
    %cst = arith.constant dense<0.000000e+00> : vector<32x16xf32>
    %9 = tpu.matmul %7, %8, %cst {dimension_numbers = #tpu.dot_dimension_numbers<[1], [0], [0], [1], [0, 0, 1, 1], [], []>} : vector<32x4xf32>, vector<4x16xf32>, vector<32x16xf32> -> vector<32x16xf32>
    %c0_12 = arith.constant 0 : index
    %c0_13 = arith.constant 0 : index
    %10 = vector.load %arg14[%c0_12, %c0_13] : memref<1x16xf32, #tpu.memory_space<vmem>>, vector<1x16xf32>
    %11 = vector.broadcast %10 : vector<1x16xf32> to vector<32x16xf32>
    %12 = arith.addf %9, %11 : vector<32x16xf32>
    %cst_14 = arith.constant 0.000000e+00 : f32
    %13 = vector.broadcast %cst_14 : f32 to vector<32x16xf32>
    %14 = arith.maximumf %12, %13 : vector<32x16xf32>
    %c0_15 = arith.constant 0 : index
    %c0_16 = arith.constant 0 : index
    %15 = vector.load %arg23[%c0_15, %c0_16] : memref<1x16xf32, #tpu.memory_space<vmem>>, vector<1x16xf32>
    %c0_17 = arith.constant 0 : index
    %c0_18 = arith.constant 0 : index
    %16 = vector.load %arg22[%c0_17, %c0_18] : memref<1x16xf32, #tpu.memory_space<vmem>>, vector<1x16xf32>
    %cst_19 = arith.constant dense<0.000000e+00> : vector<32xf32>
    %17 = vector.multi_reduction <add>, %14, %cst_19 [1] : vector<32x16xf32> to vector<32xf32>
    %18 = vector.shape_cast %17 : vector<32xf32> to vector<32x1xf32>
    %cst_20 = arith.constant 1.600000e+01 : f32
    %19 = vector.broadcast %cst_20 : f32 to vector<32x1xf32>
    %20 = arith.divf %18, %19 : vector<32x1xf32>
    %21 = vector.broadcast %20 : vector<32x1xf32> to vector<32x16xf32>
    %22 = arith.subf %14, %21 : vector<32x16xf32>
    %23 = arith.mulf %22, %22 : vector<32x16xf32>
    %cst_21 = arith.constant dense<0.000000e+00> : vector<32xf32>
    %24 = vector.multi_reduction <add>, %23, %cst_21 [1] : vector<32x16xf32> to vector<32xf32>
    %25 = vector.shape_cast %24 : vector<32xf32> to vector<32x1xf32>
    %cst_22 = arith.constant 1.600000e+01 : f32
    %26 = vector.broadcast %cst_22 : f32 to vector<32x1xf32>
    %27 = arith.divf %25, %26 : vector<32x1xf32>
    %cst_23 = arith.constant 9.99999974E-6 : f32
    %28 = vector.broadcast %cst_23 : f32 to vector<32x1xf32>
    %29 = arith.addf %27, %28 : vector<32x1xf32>
    %30 = math.rsqrt %29 : vector<32x1xf32>
    %31 = vector.broadcast %30 : vector<32x1xf32> to vector<32x16xf32>
    %32 = arith.mulf %22, %31 : vector<32x16xf32>
    %33 = vector.broadcast %15 : vector<1x16xf32> to vector<32x16xf32>
    %34 = arith.mulf %32, %33 : vector<32x16xf32>
    %35 = vector.broadcast %16 : vector<1x16xf32> to vector<32x16xf32>
    %36 = arith.addf %34, %35 : vector<32x16xf32>
    %c0_24 = arith.constant 0 : index
    %c0_25 = arith.constant 0 : index
    %37 = vector.load %arg12[%c0_24, %c0_25] : memref<16x16xf32, #tpu.memory_space<vmem>>, vector<16x16xf32>
    %cst_26 = arith.constant dense<0.000000e+00> : vector<32x16xf32>
    %38 = tpu.matmul %36, %37, %cst_26 {dimension_numbers = #tpu.dot_dimension_numbers<[1], [0], [0], [1], [0, 0, 1, 1], [], []>} : vector<32x16xf32>, vector<16x16xf32>, vector<32x16xf32> -> vector<32x16xf32>
    %c0_27 = arith.constant 0 : index
    %c0_28 = arith.constant 0 : index
    %39 = vector.load %arg11[%c0_27, %c0_28] : memref<1x16xf32, #tpu.memory_space<vmem>>, vector<1x16xf32>
    %40 = vector.broadcast %39 : vector<1x16xf32> to vector<32x16xf32>
    %41 = arith.addf %38, %40 : vector<32x16xf32>
    %c0_29 = arith.constant 0 : index
    %c0_30 = arith.constant 0 : index
    %42 = vector.load %arg2[%c0_29, %c0_30] : memref<2x24xf32, #tpu.memory_space<vmem>>, vector<2x24xf32>
    %cst_31 = arith.constant dense<0.000000e+00> : vector<32x24xf32>
    %43 = tpu.matmul %4, %42, %cst_31 {dimension_numbers = #tpu.dot_dimension_numbers<[1], [0], [0], [1], [0, 0, 1, 1], [], []>} : vector<32x2xf32>, vector<2x24xf32>, vector<32x24xf32> -> vector<32x24xf32>
    %c0_32 = arith.constant 0 : index
    %c0_33 = arith.constant 0 : index
    %44 = vector.load %arg100[%c0_32, %c0_33] : memref<32x8xf32, #tpu.memory_space<vmem>>, vector<32x8xf32>
    %c0_34 = arith.constant 0 : index
    %c0_35 = arith.constant 0 : index
    %45 = vector.load %arg101[%c0_34, %c0_35] : memref<32x16xf32, #tpu.memory_space<vmem>>, vector<32x16xf32>
    %c0_36 = arith.constant 0 : index
    %c0_37 = arith.constant 0 : index
    %46 = vector.load %arg17[%c0_36, %c0_37] : memref<16x1xf32, #tpu.memory_space<vmem>>, vector<16x1xf32>
    %cst_38 = arith.constant dense<0.000000e+00> : vector<32x1xf32>
    %47 = tpu.matmul %6, %46, %cst_38 {dimension_numbers = #tpu.dot_dimension_numbers<[1], [0], [0], [1], [0, 0, 1, 1], [], []>} : vector<32x16xf32>, vector<16x1xf32>, vector<32x1xf32> -> vector<32x1xf32>
    %48 = vector.broadcast %47 : vector<32x1xf32> to vector<32x16xf32>
    %49 = arith.mulf %45, %48 : vector<32x16xf32>
    %cst_39 = arith.constant dense<0.000000e+00> : vector<2x16xf32>
    %50 = tpu.matmul %5, %49, %cst_39 {dimension_numbers = #tpu.dot_dimension_numbers<[1], [0], [0], [1], [0, 0, 1, 1], [], []>} : vector<2x32xf32>, vector<32x16xf32>, vector<2x16xf32> -> vector<2x16xf32>
    %c0_40 = arith.constant 0 : index
    %c0_41 = arith.constant 0 : index
    %51 = vector.load %arg16[%c0_40, %c0_41] : memref<1x1xf32, #tpu.memory_space<vmem>>, vector<1x1xf32>
    %52 = vector.broadcast %51 : vector<1x1xf32> to vector<2x16xf32>
    %53 = arith.addf %50, %52 : vector<2x16xf32>
    %54 = arith.negf %53 : vector<2x16xf32>
    %55 = math.exp %54 : vector<2x16xf32>
    %cst_42 = arith.constant 1.000000e+00 : f32
    %56 = vector.broadcast %cst_42 : f32 to vector<2x16xf32>
    %57 = arith.addf %56, %55 : vector<2x16xf32>
    %58 = arith.divf %56, %57 : vector<2x16xf32>
    %cst_43 = arith.constant dense<0.000000e+00> : vector<32x16xf32>
    %59 = tpu.matmul %4, %58, %cst_43 {dimension_numbers = #tpu.dot_dimension_numbers<[1], [0], [0], [1], [0, 0, 1, 1], [], []>} : vector<32x2xf32>, vector<2x16xf32>, vector<32x16xf32> -> vector<32x16xf32>
    %c0_44 = arith.constant 0 : index
    %c0_45 = arith.constant 0 : index
    %60 = vector.load %arg101[%c0_44, %c0_45] : memref<32x16xf32, #tpu.memory_space<vmem>>, vector<32x16xf32>
    tpu.vector_store %arg101[%c0_44, %c0_45], %41 {strides = array<i32>} : memref<32x16xf32, #tpu.memory_space<vmem>>, vector<32x16xf32>,
    %61 = arith.mulf %41, %59 : vector<32x16xf32>
    %c0_46 = arith.constant 0 : index
    %c0_47 = arith.constant 0 : index
    %62 = vector.load %arg6[%c0_46, %c0_47] : memref<32x32xf32, #tpu.memory_space<vmem>>, vector<32x32xf32>
    %c0_48 = arith.constant 0 : index
    %c0_49 = arith.constant 0 : index
    %63 = vector.load %arg7[%c0_48, %c0_49] : memref<32x32xf32, #tpu.memory_space<vmem>>, vector<32x32xf32>
    %c0_50 = arith.constant 0 : index
    %c0_51 = arith.constant 0 : index
    %64 = vector.load %arg52[%c0_50, %c0_51] : memref<16x32xf32, #tpu.memory_space<vmem>>, vector<16x32xf32>
    %cst_52 = arith.constant dense<0.000000e+00> : vector<32x32xf32>
    %65 = tpu.matmul %61, %64, %cst_52 {dimension_numbers = #tpu.dot_dimension_numbers<[1], [0], [0], [1], [0, 0, 1, 1], [], []>} : vector<32x16xf32>, vector<16x32xf32>, vector<32x32xf32> -> vector<32x32xf32>
    %c0_53 = arith.constant 0 : index
    %c0_54 = arith.constant 0 : index
    %66 = vector.load %arg42[%c0_53, %c0_54] : memref<1x32xf32, #tpu.memory_space<vmem>>, vector<1x32xf32>
    %67 = vector.broadcast %66 : vector<1x32xf32> to vector<32x32xf32>
    %68 = arith.addf %65, %67 : vector<32x32xf32>
    %c0_55 = arith.constant 0 : index
    %c0_56 = arith.constant 0 : index
    %69 = vector.load %arg53[%c0_55, %c0_56] : memref<24x32xf32, #tpu.memory_space<vmem>>, vector<24x32xf32>
    %cst_57 = arith.constant dense<0.000000e+00> : vector<32x32xf32>
    %70 = tpu.matmul %43, %69, %cst_57 {dimension_numbers = #tpu.dot_dimension_numbers<[1], [0], [0], [1], [0, 0, 1, 1], [], []>} : vector<32x24xf32>, vector<24x32xf32>, vector<32x32xf32> -> vector<32x32xf32>
    %71 = arith.addf %68, %70 : vector<32x32xf32>
    %c0_58 = arith.constant 0 : index
    %c0_59 = arith.constant 0 : index
    %72 = vector.load %arg40[%c0_58, %c0_59] : memref<1x1xf32, #tpu.memory_space<vmem>>, vector<1x1xf32>
    %cst_60 = arith.constant 0.000000e+00 : f32
    %73 = vector.broadcast %cst_60 : f32 to vector<32x32xf32>
    %74 = arith.cmpf ogt, %71, %73 : vector<32x32xf32>
    %75 = vector.broadcast %72 : vector<1x1xf32> to vector<32x32xf32>
    %76 = arith.mulf %71, %75 : vector<32x32xf32>
    %77 = arith.select %74, %71, %76 : vector<32x32xi1>, vector<32x32xf32>
    %c0_61 = arith.constant 0 : index
    %c0_62 = arith.constant 0 : index
    %78 = vector.load %arg50[%c0_61, %c0_62] : memref<1x32xf32, #tpu.memory_space<vmem>>, vector<1x32xf32>
    %c0_63 = arith.constant 0 : index
    %c0_64 = arith.constant 0 : index
    %79 = vector.load %arg44[%c0_63, %c0_64] : memref<1x32xf32, #tpu.memory_space<vmem>>, vector<1x32xf32>
    %cst_65 = arith.constant dense<0.000000e+00> : vector<32xf32>
    %80 = vector.multi_reduction <add>, %77, %cst_65 [1] : vector<32x32xf32> to vector<32xf32>
    %81 = vector.shape_cast %80 : vector<32xf32> to vector<32x1xf32>
    %cst_66 = arith.constant dense<0.000000e+00> : vector<32x1xf32>
    %82 = tpu.matmul %3, %81, %cst_66 {dimension_numbers = #tpu.dot_dimension_numbers<[1], [0], [0], [1], [0, 0, 1, 1], [], []>} : vector<32x32xf32>, vector<32x1xf32>, vector<32x1xf32> -> vector<32x1xf32>
    %cst_67 = arith.constant 0.001953125 : f32
    %83 = vector.broadcast %cst_67 : f32 to vector<32x1xf32>
    %84 = arith.mulf %82, %83 : vector<32x1xf32>
    %85 = vector.broadcast %84 : vector<32x1xf32> to vector<32x32xf32>
    %86 = arith.subf %77, %85 : vector<32x32xf32>
    %87 = arith.mulf %86, %86 : vector<32x32xf32>
    %cst_68 = arith.constant dense<0.000000e+00> : vector<32xf32>
    %88 = vector.multi_reduction <add>, %87, %cst_68 [1] : vector<32x32xf32> to vector<32xf32>
    %89 = vector.shape_cast %88 : vector<32xf32> to vector<32x1xf32>
    %cst_69 = arith.constant dense<0.000000e+00> : vector<32x1xf32>
    %90 = tpu.matmul %3, %89, %cst_69 {dimension_numbers = #tpu.dot_dimension_numbers<[1], [0], [0], [1], [0, 0, 1, 1], [], []>} : vector<32x32xf32>, vector<32x1xf32>, vector<32x1xf32> -> vector<32x1xf32>
    %cst_70 = arith.constant 0.001953125 : f32
    %91 = vector.broadcast %cst_70 : f32 to vector<32x1xf32>
    %92 = arith.mulf %90, %91 : vector<32x1xf32>
    %cst_71 = arith.constant 9.99999993E-9 : f32
    %93 = vector.broadcast %cst_71 : f32 to vector<32x1xf32>
    %94 = arith.addf %92, %93 : vector<32x1xf32>
    %95 = math.rsqrt %94 : vector<32x1xf32>
    %96 = vector.broadcast %95 : vector<32x1xf32> to vector<32x32xf32>
    %97 = arith.mulf %86, %96 : vector<32x32xf32>
    %98 = vector.broadcast %78 : vector<1x32xf32> to vector<32x32xf32>
    %99 = arith.mulf %97, %98 : vector<32x32xf32>
    %100 = vector.broadcast %79 : vector<1x32xf32> to vector<32x32xf32>
    %101 = arith.addf %99, %100 : vector<32x32xf32>
    %cst_72 = arith.constant dense<0.000000e+00> : vector<32x32xf32>
    %102 = tpu.matmul %62, %101, %cst_72 {dimension_numbers = #tpu.dot_dimension_numbers<[1], [0], [0], [1], [0, 0, 1, 1], [], []>} : vector<32x32xf32>, vector<32x32xf32>, vector<32x32xf32> -> vector<32x32xf32>
    %cst_73 = arith.constant dense<0.000000e+00> : vector<32x32xf32>
    %103 = tpu.matmul %63, %101, %cst_73 {dimension_numbers = #tpu.dot_dimension_numbers<[1], [0], [0], [1], [0, 0, 1, 1], [], []>} : vector<32x32xf32>, vector<32x32xf32>, vector<32x32xf32> -> vector<32x32xf32>
    %c0_74 = arith.constant 0 : index
    %c0_75 = arith.constant 0 : index
    %104 = vector.load %arg48[%c0_74, %c0_75] : memref<1x32xf32, #tpu.memory_space<vmem>>, vector<1x32xf32>
    %105 = vector.broadcast %104 : vector<1x32xf32> to vector<32x32xf32>
    %106 = arith.mulf %101, %105 : vector<32x32xf32>
    %c0_76 = arith.constant 0 : index
    %c0_77 = arith.constant 0 : index
    %107 = vector.load %arg47[%c0_76, %c0_77] : memref<1x32xf32, #tpu.memory_space<vmem>>, vector<1x32xf32>
    %108 = vector.broadcast %107 : vector<1x32xf32> to vector<32x32xf32>
    %109 = arith.mulf %102, %108 : vector<32x32xf32>
    %110 = arith.addf %106, %109 : vector<32x32xf32>
    %c0_78 = arith.constant 0 : index
    %c0_79 = arith.constant 0 : index
    %111 = vector.load %arg49[%c0_78, %c0_79] : memref<1x32xf32, #tpu.memory_space<vmem>>, vector<1x32xf32>
    %112 = vector.broadcast %111 : vector<1x32xf32> to vector<32x32xf32>
    %113 = arith.mulf %103, %112 : vector<32x32xf32>
    %114 = arith.addf %110, %113 : vector<32x32xf32>
    %c0_80 = arith.constant 0 : index
    %c0_81 = arith.constant 0 : index
    %115 = vector.load %arg46[%c0_80, %c0_81] : memref<1x32xf32, #tpu.memory_space<vmem>>, vector<1x32xf32>
    %116 = vector.broadcast %115 : vector<1x32xf32> to vector<32x32xf32>
    %117 = arith.addf %114, %116 : vector<32x32xf32>
    %c0_82 = arith.constant 0 : index
    %c0_83 = arith.constant 0 : index
    %118 = vector.load %arg41[%c0_82, %c0_83] : memref<1x1xf32, #tpu.memory_space<vmem>>, vector<1x1xf32>
    %cst_84 = arith.constant 0.000000e+00 : f32
    %119 = vector.broadcast %cst_84 : f32 to vector<32x32xf32>
    %120 = arith.cmpf ogt, %117, %119 : vector<32x32xf32>
    %121 = vector.broadcast %118 : vector<1x1xf32> to vector<32x32xf32>
    %122 = arith.mulf %117, %121 : vector<32x32xf32>
    %123 = arith.select %120, %117, %122 : vector<32x32xi1>, vector<32x32xf32>
    %c0_85 = arith.constant 0 : index
    %c0_86 = arith.constant 0 : index
    %124 = vector.load %arg51[%c0_85, %c0_86] : memref<1x32xf32, #tpu.memory_space<vmem>>, vector<1x32xf32>
    %c0_87 = arith.constant 0 : index
    %c0_88 = arith.constant 0 : index
    %125 = vector.load %arg45[%c0_87, %c0_88] : memref<1x32xf32, #tpu.memory_space<vmem>>, vector<1x32xf32>
    %cst_89 = arith.constant dense<0.000000e+00> : vector<32xf32>
    %126 = vector.multi_reduction <add>, %123, %cst_89 [1] : vector<32x32xf32> to vector<32xf32>
    %127 = vector.shape_cast %126 : vector<32xf32> to vector<32x1xf32>
    %cst_90 = arith.constant dense<0.000000e+00> : vector<32x1xf32>
    %128 = tpu.matmul %3, %127, %cst_90 {dimension_numbers = #tpu.dot_dimension_numbers<[1], [0], [0], [1], [0, 0, 1, 1], [], []>} : vector<32x32xf32>, vector<32x1xf32>, vector<32x1xf32> -> vector<32x1xf32>
    %cst_91 = arith.constant 0.001953125 : f32
    %129 = vector.broadcast %cst_91 : f32 to vector<32x1xf32>
    %130 = arith.mulf %128, %129 : vector<32x1xf32>
    %131 = vector.broadcast %130 : vector<32x1xf32> to vector<32x32xf32>
    %132 = arith.subf %123, %131 : vector<32x32xf32>
    %133 = arith.mulf %132, %132 : vector<32x32xf32>
    %cst_92 = arith.constant dense<0.000000e+00> : vector<32xf32>
    %134 = vector.multi_reduction <add>, %133, %cst_92 [1] : vector<32x32xf32> to vector<32xf32>
    %135 = vector.shape_cast %134 : vector<32xf32> to vector<32x1xf32>
    %cst_93 = arith.constant dense<0.000000e+00> : vector<32x1xf32>
    %136 = tpu.matmul %3, %135, %cst_93 {dimension_numbers = #tpu.dot_dimension_numbers<[1], [0], [0], [1], [0, 0, 1, 1], [], []>} : vector<32x32xf32>, vector<32x1xf32>, vector<32x1xf32> -> vector<32x1xf32>
    %cst_94 = arith.constant 0.001953125 : f32
    %137 = vector.broadcast %cst_94 : f32 to vector<32x1xf32>
    %138 = arith.mulf %136, %137 : vector<32x1xf32>
    %cst_95 = arith.constant 9.99999993E-9 : f32
    %139 = vector.broadcast %cst_95 : f32 to vector<32x1xf32>
    %140 = arith.addf %138, %139 : vector<32x1xf32>
    %141 = math.rsqrt %140 : vector<32x1xf32>
    %142 = vector.broadcast %141 : vector<32x1xf32> to vector<32x32xf32>
    %143 = arith.mulf %132, %142 : vector<32x32xf32>
    %144 = vector.broadcast %124 : vector<1x32xf32> to vector<32x32xf32>
    %145 = arith.mulf %143, %144 : vector<32x32xf32>
    %146 = vector.broadcast %125 : vector<1x32xf32> to vector<32x32xf32>
    %147 = arith.addf %145, %146 : vector<32x32xf32>
    %c0_96 = arith.constant 0 : index
    %c0_97 = arith.constant 0 : index
    %148 = vector.load %arg54[%c0_96, %c0_97] : memref<32x16xf32, #tpu.memory_space<vmem>>, vector<32x16xf32>
    %cst_98 = arith.constant dense<0.000000e+00> : vector<32x16xf32>
    %149 = tpu.matmul %147, %148, %cst_98 {dimension_numbers = #tpu.dot_dimension_numbers<[1], [0], [0], [1], [0, 0, 1, 1], [], []>} : vector<32x32xf32>, vector<32x16xf32>, vector<32x16xf32> -> vector<32x16xf32>
    %c0_99 = arith.constant 0 : index
    %c0_100 = arith.constant 0 : index
    %150 = vector.load %arg43[%c0_99, %c0_100] : memref<1x16xf32, #tpu.memory_space<vmem>>, vector<1x16xf32>
    %151 = vector.broadcast %150 : vector<1x16xf32> to vector<32x16xf32>
    %152 = arith.addf %149, %151 : vector<32x16xf32>
    %153 = arith.addf %152, %61 : vector<32x16xf32>
    %c0_101 = arith.constant 0 : index
    %c0_102 = arith.constant 0 : index
    %154 = vector.load %arg8[%c0_101, %c0_102] : memref<32x32xf32, #tpu.memory_space<vmem>>, vector<32x32xf32>
    %c0_103 = arith.constant 0 : index
    %c0_104 = arith.constant 0 : index
    %155 = vector.load %arg9[%c0_103, %c0_104] : memref<32x32xf32, #tpu.memory_space<vmem>>, vector<32x32xf32>
    %c0_105 = arith.constant 0 : index
    %c0_106 = arith.constant 0 : index
    %156 = vector.load %arg67[%c0_105, %c0_106] : memref<16x32xf32, #tpu.memory_space<vmem>>, vector<16x32xf32>
    %cst_107 = arith.constant dense<0.000000e+00> : vector<32x32xf32>
    %157 = tpu.matmul %153, %156, %cst_107 {dimension_numbers = #tpu.dot_dimension_numbers<[1], [0], [0], [1], [0, 0, 1, 1], [], []>} : vector<32x16xf32>, vector<16x32xf32>, vector<32x32xf32> -> vector<32x32xf32>
    %c0_108 = arith.constant 0 : index
    %c0_109 = arith.constant 0 : index
    %158 = vector.load %arg57[%c0_108, %c0_109] : memref<1x32xf32, #tpu.memory_space<vmem>>, vector<1x32xf32>
    %159 = vector.broadcast %158 : vector<1x32xf32> to vector<32x32xf32>
    %160 = arith.addf %157, %159 : vector<32x32xf32>
    %c0_110 = arith.constant 0 : index
    %c0_111 = arith.constant 0 : index
    %161 = vector.load %arg55[%c0_110, %c0_111] : memref<1x1xf32, #tpu.memory_space<vmem>>, vector<1x1xf32>
    %cst_112 = arith.constant 0.000000e+00 : f32
    %162 = vector.broadcast %cst_112 : f32 to vector<32x32xf32>
    %163 = arith.cmpf ogt, %160, %162 : vector<32x32xf32>
    %164 = vector.broadcast %161 : vector<1x1xf32> to vector<32x32xf32>
    %165 = arith.mulf %160, %164 : vector<32x32xf32>
    %166 = arith.select %163, %160, %165 : vector<32x32xi1>, vector<32x32xf32>
    %c0_113 = arith.constant 0 : index
    %c0_114 = arith.constant 0 : index
    %167 = vector.load %arg65[%c0_113, %c0_114] : memref<1x32xf32, #tpu.memory_space<vmem>>, vector<1x32xf32>
    %c0_115 = arith.constant 0 : index
    %c0_116 = arith.constant 0 : index
    %168 = vector.load %arg59[%c0_115, %c0_116] : memref<1x32xf32, #tpu.memory_space<vmem>>, vector<1x32xf32>
    %cst_117 = arith.constant dense<0.000000e+00> : vector<32xf32>
    %169 = vector.multi_reduction <add>, %166, %cst_117 [1] : vector<32x32xf32> to vector<32xf32>
    %170 = vector.shape_cast %169 : vector<32xf32> to vector<32x1xf32>
    %cst_118 = arith.constant dense<0.000000e+00> : vector<32x1xf32>
    %171 = tpu.matmul %3, %170, %cst_118 {dimension_numbers = #tpu.dot_dimension_numbers<[1], [0], [0], [1], [0, 0, 1, 1], [], []>} : vector<32x32xf32>, vector<32x1xf32>, vector<32x1xf32> -> vector<32x1xf32>
    %cst_119 = arith.constant 0.001953125 : f32
    %172 = vector.broadcast %cst_119 : f32 to vector<32x1xf32>
    %173 = arith.mulf %171, %172 : vector<32x1xf32>
    %174 = vector.broadcast %173 : vector<32x1xf32> to vector<32x32xf32>
    %175 = arith.subf %166, %174 : vector<32x32xf32>
    %176 = arith.mulf %175, %175 : vector<32x32xf32>
    %cst_120 = arith.constant dense<0.000000e+00> : vector<32xf32>
    %177 = vector.multi_reduction <add>, %176, %cst_120 [1] : vector<32x32xf32> to vector<32xf32>
    %178 = vector.shape_cast %177 : vector<32xf32> to vector<32x1xf32>
    %cst_121 = arith.constant dense<0.000000e+00> : vector<32x1xf32>
    %179 = tpu.matmul %3, %178, %cst_121 {dimension_numbers = #tpu.dot_dimension_numbers<[1], [0], [0], [1], [0, 0, 1, 1], [], []>} : vector<32x32xf32>, vector<32x1xf32>, vector<32x1xf32> -> vector<32x1xf32>
    %cst_122 = arith.constant 0.001953125 : f32
    %180 = vector.broadcast %cst_122 : f32 to vector<32x1xf32>
    %181 = arith.mulf %179, %180 : vector<32x1xf32>
    %cst_123 = arith.constant 9.99999993E-9 : f32
    %182 = vector.broadcast %cst_123 : f32 to vector<32x1xf32>
    %183 = arith.addf %181, %182 : vector<32x1xf32>
    %184 = math.rsqrt %183 : vector<32x1xf32>
    %185 = vector.broadcast %184 : vector<32x1xf32> to vector<32x32xf32>
    %186 = arith.mulf %175, %185 : vector<32x32xf32>
    %187 = vector.broadcast %167 : vector<1x32xf32> to vector<32x32xf32>
    %188 = arith.mulf %186, %187 : vector<32x32xf32>
    %189 = vector.broadcast %168 : vector<1x32xf32> to vector<32x32xf32>
    %190 = arith.addf %188, %189 : vector<32x32xf32>
    %cst_124 = arith.constant dense<0.000000e+00> : vector<32x32xf32>
    %191 = tpu.matmul %154, %190, %cst_124 {dimension_numbers = #tpu.dot_dimension_numbers<[1], [0], [0], [1], [0, 0, 1, 1], [], []>} : vector<32x32xf32>, vector<32x32xf32>, vector<32x32xf32> -> vector<32x32xf32>
    %cst_125 = arith.constant dense<0.000000e+00> : vector<32x32xf32>
    %192 = tpu.matmul %155, %190, %cst_125 {dimension_numbers = #tpu.dot_dimension_numbers<[1], [0], [0], [1], [0, 0, 1, 1], [], []>} : vector<32x32xf32>, vector<32x32xf32>, vector<32x32xf32> -> vector<32x32xf32>
    %c0_126 = arith.constant 0 : index
    %c0_127 = arith.constant 0 : index
    %193 = vector.load %arg63[%c0_126, %c0_127] : memref<1x32xf32, #tpu.memory_space<vmem>>, vector<1x32xf32>
    %194 = vector.broadcast %193 : vector<1x32xf32> to vector<32x32xf32>
    %195 = arith.mulf %190, %194 : vector<32x32xf32>
    %c0_128 = arith.constant 0 : index
    %c0_129 = arith.constant 0 : index
    %196 = vector.load %arg62[%c0_128, %c0_129] : memref<1x32xf32, #tpu.memory_space<vmem>>, vector<1x32xf32>
    %197 = vector.broadcast %196 : vector<1x32xf32> to vector<32x32xf32>
    %198 = arith.mulf %191, %197 : vector<32x32xf32>
    %199 = arith.addf %195, %198 : vector<32x32xf32>
    %c0_130 = arith.constant 0 : index
    %c0_131 = arith.constant 0 : index
    %200 = vector.load %arg64[%c0_130, %c0_131] : memref<1x32xf32, #tpu.memory_space<vmem>>, vector<1x32xf32>
    %201 = vector.broadcast %200 : vector<1x32xf32> to vector<32x32xf32>
    %202 = arith.mulf %192, %201 : vector<32x32xf32>
    %203 = arith.addf %199, %202 : vector<32x32xf32>
    %c0_132 = arith.constant 0 : index
    %c0_133 = arith.constant 0 : index
    %204 = vector.load %arg61[%c0_132, %c0_133] : memref<1x32xf32, #tpu.memory_space<vmem>>, vector<1x32xf32>
    %205 = vector.broadcast %204 : vector<1x32xf32> to vector<32x32xf32>
    %206 = arith.addf %203, %205 : vector<32x32xf32>
    %c0_134 = arith.constant 0 : index
    %c0_135 = arith.constant 0 : index
    %207 = vector.load %arg56[%c0_134, %c0_135] : memref<1x1xf32, #tpu.memory_space<vmem>>, vector<1x1xf32>
    %cst_136 = arith.constant 0.000000e+00 : f32
    %208 = vector.broadcast %cst_136 : f32 to vector<32x32xf32>
    %209 = arith.cmpf ogt, %206, %208 : vector<32x32xf32>
    %210 = vector.broadcast %207 : vector<1x1xf32> to vector<32x32xf32>
    %211 = arith.mulf %206, %210 : vector<32x32xf32>
    %212 = arith.select %209, %206, %211 : vector<32x32xi1>, vector<32x32xf32>
    %c0_137 = arith.constant 0 : index
    %c0_138 = arith.constant 0 : index
    %213 = vector.load %arg66[%c0_137, %c0_138] : memref<1x32xf32, #tpu.memory_space<vmem>>, vector<1x32xf32>
    %c0_139 = arith.constant 0 : index
    %c0_140 = arith.constant 0 : index
    %214 = vector.load %arg60[%c0_139, %c0_140] : memref<1x32xf32, #tpu.memory_space<vmem>>, vector<1x32xf32>
    %cst_141 = arith.constant dense<0.000000e+00> : vector<32xf32>
    %215 = vector.multi_reduction <add>, %212, %cst_141 [1] : vector<32x32xf32> to vector<32xf32>
    %216 = vector.shape_cast %215 : vector<32xf32> to vector<32x1xf32>
    %cst_142 = arith.constant dense<0.000000e+00> : vector<32x1xf32>
    %217 = tpu.matmul %3, %216, %cst_142 {dimension_numbers = #tpu.dot_dimension_numbers<[1], [0], [0], [1], [0, 0, 1, 1], [], []>} : vector<32x32xf32>, vector<32x1xf32>, vector<32x1xf32> -> vector<32x1xf32>
    %cst_143 = arith.constant 0.001953125 : f32
    %218 = vector.broadcast %cst_143 : f32 to vector<32x1xf32>
    %219 = arith.mulf %217, %218 : vector<32x1xf32>
    %220 = vector.broadcast %219 : vector<32x1xf32> to vector<32x32xf32>
    %221 = arith.subf %212, %220 : vector<32x32xf32>
    %222 = arith.mulf %221, %221 : vector<32x32xf32>
    %cst_144 = arith.constant dense<0.000000e+00> : vector<32xf32>
    %223 = vector.multi_reduction <add>, %222, %cst_144 [1] : vector<32x32xf32> to vector<32xf32>
    %224 = vector.shape_cast %223 : vector<32xf32> to vector<32x1xf32>
    %cst_145 = arith.constant dense<0.000000e+00> : vector<32x1xf32>
    %225 = tpu.matmul %3, %224, %cst_145 {dimension_numbers = #tpu.dot_dimension_numbers<[1], [0], [0], [1], [0, 0, 1, 1], [], []>} : vector<32x32xf32>, vector<32x1xf32>, vector<32x1xf32> -> vector<32x1xf32>
    %cst_146 = arith.constant 0.001953125 : f32
    %226 = vector.broadcast %cst_146 : f32 to vector<32x1xf32>
    %227 = arith.mulf %225, %226 : vector<32x1xf32>
    %cst_147 = arith.constant 9.99999993E-9 : f32
    %228 = vector.broadcast %cst_147 : f32 to vector<32x1xf32>
    %229 = arith.addf %227, %228 : vector<32x1xf32>
    %230 = math.rsqrt %229 : vector<32x1xf32>
    %231 = vector.broadcast %230 : vector<32x1xf32> to vector<32x32xf32>
    %232 = arith.mulf %221, %231 : vector<32x32xf32>
    %233 = vector.broadcast %213 : vector<1x32xf32> to vector<32x32xf32>
    %234 = arith.mulf %232, %233 : vector<32x32xf32>
    %235 = vector.broadcast %214 : vector<1x32xf32> to vector<32x32xf32>
    %236 = arith.addf %234, %235 : vector<32x32xf32>
    %c0_148 = arith.constant 0 : index
    %c0_149 = arith.constant 0 : index
    %237 = vector.load %arg68[%c0_148, %c0_149] : memref<32x16xf32, #tpu.memory_space<vmem>>, vector<32x16xf32>
    %cst_150 = arith.constant dense<0.000000e+00> : vector<32x16xf32>
    %238 = tpu.matmul %236, %237, %cst_150 {dimension_numbers = #tpu.dot_dimension_numbers<[1], [0], [0], [1], [0, 0, 1, 1], [], []>} : vector<32x32xf32>, vector<32x16xf32>, vector<32x16xf32> -> vector<32x16xf32>
    %c0_151 = arith.constant 0 : index
    %c0_152 = arith.constant 0 : index
    %239 = vector.load %arg58[%c0_151, %c0_152] : memref<1x16xf32, #tpu.memory_space<vmem>>, vector<1x16xf32>
    %240 = vector.broadcast %239 : vector<1x16xf32> to vector<32x16xf32>
    %241 = arith.addf %238, %240 : vector<32x16xf32>
    %242 = arith.addf %241, %153 : vector<32x16xf32>
    %c0_153 = arith.constant 0 : index
    %c0_154 = arith.constant 0 : index
    %243 = vector.load %arg102[%c0_153, %c0_154] : memref<32x16xf32, #tpu.memory_space<vmem>>, vector<32x16xf32>
    %c0_155 = arith.constant 0 : index
    %c0_156 = arith.constant 0 : index
    %244 = vector.load %arg19[%c0_155, %c0_156] : memref<16x1xf32, #tpu.memory_space<vmem>>, vector<16x1xf32>
    %cst_157 = arith.constant dense<0.000000e+00> : vector<32x1xf32>
    %245 = tpu.matmul %6, %244, %cst_157 {dimension_numbers = #tpu.dot_dimension_numbers<[1], [0], [0], [1], [0, 0, 1, 1], [], []>} : vector<32x16xf32>, vector<16x1xf32>, vector<32x1xf32> -> vector<32x1xf32>
    %246 = vector.broadcast %245 : vector<32x1xf32> to vector<32x16xf32>
    %247 = arith.mulf %243, %246 : vector<32x16xf32>
    %cst_158 = arith.constant dense<0.000000e+00> : vector<2x16xf32>
    %248 = tpu.matmul %5, %247, %cst_158 {dimension_numbers = #tpu.dot_dimension_numbers<[1], [0], [0], [1], [0, 0, 1, 1], [], []>} : vector<2x32xf32>, vector<32x16xf32>, vector<2x16xf32> -> vector<2x16xf32>
    %c0_159 = arith.constant 0 : index
    %c0_160 = arith.constant 0 : index
    %249 = vector.load %arg18[%c0_159, %c0_160] : memref<1x1xf32, #tpu.memory_space<vmem>>, vector<1x1xf32>
    %250 = vector.broadcast %249 : vector<1x1xf32> to vector<2x16xf32>
    %251 = arith.addf %248, %250 : vector<2x16xf32>
    %252 = arith.negf %251 : vector<2x16xf32>
    %253 = math.exp %252 : vector<2x16xf32>
    %cst_161 = arith.constant 1.000000e+00 : f32
    %254 = vector.broadcast %cst_161 : f32 to vector<2x16xf32>
    %255 = arith.addf %254, %253 : vector<2x16xf32>
    %256 = arith.divf %254, %255 : vector<2x16xf32>
    %cst_162 = arith.constant dense<0.000000e+00> : vector<32x16xf32>
    %257 = tpu.matmul %4, %256, %cst_162 {dimension_numbers = #tpu.dot_dimension_numbers<[1], [0], [0], [1], [0, 0, 1, 1], [], []>} : vector<32x2xf32>, vector<2x16xf32>, vector<32x16xf32> -> vector<32x16xf32>
    %c0_163 = arith.constant 0 : index
    %c0_164 = arith.constant 0 : index
    %258 = vector.load %arg102[%c0_163, %c0_164] : memref<32x16xf32, #tpu.memory_space<vmem>>, vector<32x16xf32>
    tpu.vector_store %arg102[%c0_163, %c0_164], %242 {strides = array<i32>} : memref<32x16xf32, #tpu.memory_space<vmem>>, vector<32x16xf32>,
    %259 = arith.mulf %242, %257 : vector<32x16xf32>
    %c0_165 = arith.constant 0 : index
    %c0_166 = arith.constant 0 : index
    %260 = vector.load %arg6[%c0_165, %c0_166] : memref<32x32xf32, #tpu.memory_space<vmem>>, vector<32x32xf32>
    %c0_167 = arith.constant 0 : index
    %c0_168 = arith.constant 0 : index
    %261 = vector.load %arg7[%c0_167, %c0_168] : memref<32x32xf32, #tpu.memory_space<vmem>>, vector<32x32xf32>
    %c0_169 = arith.constant 0 : index
    %c0_170 = arith.constant 0 : index
    %262 = vector.load %arg81[%c0_169, %c0_170] : memref<16x32xf32, #tpu.memory_space<vmem>>, vector<16x32xf32>
    %cst_171 = arith.constant dense<0.000000e+00> : vector<32x32xf32>
    %263 = tpu.matmul %259, %262, %cst_171 {dimension_numbers = #tpu.dot_dimension_numbers<[1], [0], [0], [1], [0, 0, 1, 1], [], []>} : vector<32x16xf32>, vector<16x32xf32>, vector<32x32xf32> -> vector<32x32xf32>
    %c0_172 = arith.constant 0 : index
    %c0_173 = arith.constant 0 : index
    %264 = vector.load %arg71[%c0_172, %c0_173] : memref<1x32xf32, #tpu.memory_space<vmem>>, vector<1x32xf32>
    %265 = vector.broadcast %264 : vector<1x32xf32> to vector<32x32xf32>
    %266 = arith.addf %263, %265 : vector<32x32xf32>
    %c0_174 = arith.constant 0 : index
    %c0_175 = arith.constant 0 : index
    %267 = vector.load %arg82[%c0_174, %c0_175] : memref<8x32xf32, #tpu.memory_space<vmem>>, vector<8x32xf32>
    %cst_176 = arith.constant dense<0.000000e+00> : vector<32x32xf32>
    %268 = tpu.matmul %44, %267, %cst_176 {dimension_numbers = #tpu.dot_dimension_numbers<[1], [0], [0], [1], [0, 0, 1, 1], [], []>} : vector<32x8xf32>, vector<8x32xf32>, vector<32x32xf32> -> vector<32x32xf32>
    %269 = arith.addf %266, %268 : vector<32x32xf32>
    %c0_177 = arith.constant 0 : index
    %c0_178 = arith.constant 0 : index
    %270 = vector.load %arg83[%c0_177, %c0_178] : memref<24x32xf32, #tpu.memory_space<vmem>>, vector<24x32xf32>
    %cst_179 = arith.constant dense<0.000000e+00> : vector<32x32xf32>
    %271 = tpu.matmul %43, %270, %cst_179 {dimension_numbers = #tpu.dot_dimension_numbers<[1], [0], [0], [1], [0, 0, 1, 1], [], []>} : vector<32x24xf32>, vector<24x32xf32>, vector<32x32xf32> -> vector<32x32xf32>
    %272 = arith.addf %269, %271 : vector<32x32xf32>
    %c0_180 = arith.constant 0 : index
    %c0_181 = arith.constant 0 : index
    %273 = vector.load %arg69[%c0_180, %c0_181] : memref<1x1xf32, #tpu.memory_space<vmem>>, vector<1x1xf32>
    %cst_182 = arith.constant 0.000000e+00 : f32
    %274 = vector.broadcast %cst_182 : f32 to vector<32x32xf32>
    %275 = arith.cmpf ogt, %272, %274 : vector<32x32xf32>
    %276 = vector.broadcast %273 : vector<1x1xf32> to vector<32x32xf32>
    %277 = arith.mulf %272, %276 : vector<32x32xf32>
    %278 = arith.select %275, %272, %277 : vector<32x32xi1>, vector<32x32xf32>
    %c0_183 = arith.constant 0 : index
    %c0_184 = arith.constant 0 : index
    %279 = vector.load %arg79[%c0_183, %c0_184] : memref<1x32xf32, #tpu.memory_space<vmem>>, vector<1x32xf32>
    %c0_185 = arith.constant 0 : index
    %c0_186 = arith.constant 0 : index
    %280 = vector.load %arg73[%c0_185, %c0_186] : memref<1x32xf32, #tpu.memory_space<vmem>>, vector<1x32xf32>
    %cst_187 = arith.constant dense<0.000000e+00> : vector<32xf32>
    %281 = vector.multi_reduction <add>, %278, %cst_187 [1] : vector<32x32xf32> to vector<32xf32>
    %282 = vector.shape_cast %281 : vector<32xf32> to vector<32x1xf32>
    %cst_188 = arith.constant dense<0.000000e+00> : vector<32x1xf32>
    %283 = tpu.matmul %3, %282, %cst_188 {dimension_numbers = #tpu.dot_dimension_numbers<[1], [0], [0], [1], [0, 0, 1, 1], [], []>} : vector<32x32xf32>, vector<32x1xf32>, vector<32x1xf32> -> vector<32x1xf32>
    %cst_189 = arith.constant 0.001953125 : f32
    %284 = vector.broadcast %cst_189 : f32 to vector<32x1xf32>
    %285 = arith.mulf %283, %284 : vector<32x1xf32>
    %286 = vector.broadcast %285 : vector<32x1xf32> to vector<32x32xf32>
    %287 = arith.subf %278, %286 : vector<32x32xf32>
    %288 = arith.mulf %287, %287 : vector<32x32xf32>
    %cst_190 = arith.constant dense<0.000000e+00> : vector<32xf32>
    %289 = vector.multi_reduction <add>, %288, %cst_190 [1] : vector<32x32xf32> to vector<32xf32>
    %290 = vector.shape_cast %289 : vector<32xf32> to vector<32x1xf32>
    %cst_191 = arith.constant dense<0.000000e+00> : vector<32x1xf32>
    %291 = tpu.matmul %3, %290, %cst_191 {dimension_numbers = #tpu.dot_dimension_numbers<[1], [0], [0], [1], [0, 0, 1, 1], [], []>} : vector<32x32xf32>, vector<32x1xf32>, vector<32x1xf32> -> vector<32x1xf32>
    %cst_192 = arith.constant 0.001953125 : f32
    %292 = vector.broadcast %cst_192 : f32 to vector<32x1xf32>
    %293 = arith.mulf %291, %292 : vector<32x1xf32>
    %cst_193 = arith.constant 9.99999993E-9 : f32
    %294 = vector.broadcast %cst_193 : f32 to vector<32x1xf32>
    %295 = arith.addf %293, %294 : vector<32x1xf32>
    %296 = math.rsqrt %295 : vector<32x1xf32>
    %297 = vector.broadcast %296 : vector<32x1xf32> to vector<32x32xf32>
    %298 = arith.mulf %287, %297 : vector<32x32xf32>
    %299 = vector.broadcast %279 : vector<1x32xf32> to vector<32x32xf32>
    %300 = arith.mulf %298, %299 : vector<32x32xf32>
    %301 = vector.broadcast %280 : vector<1x32xf32> to vector<32x32xf32>
    %302 = arith.addf %300, %301 : vector<32x32xf32>
    %cst_194 = arith.constant dense<0.000000e+00> : vector<32x32xf32>
    %303 = tpu.matmul %260, %302, %cst_194 {dimension_numbers = #tpu.dot_dimension_numbers<[1], [0], [0], [1], [0, 0, 1, 1], [], []>} : vector<32x32xf32>, vector<32x32xf32>, vector<32x32xf32> -> vector<32x32xf32>
    %cst_195 = arith.constant dense<0.000000e+00> : vector<32x32xf32>
    %304 = tpu.matmul %261, %302, %cst_195 {dimension_numbers = #tpu.dot_dimension_numbers<[1], [0], [0], [1], [0, 0, 1, 1], [], []>} : vector<32x32xf32>, vector<32x32xf32>, vector<32x32xf32> -> vector<32x32xf32>
    %c0_196 = arith.constant 0 : index
    %c0_197 = arith.constant 0 : index
    %305 = vector.load %arg77[%c0_196, %c0_197] : memref<1x32xf32, #tpu.memory_space<vmem>>, vector<1x32xf32>
    %306 = vector.broadcast %305 : vector<1x32xf32> to vector<32x32xf32>
    %307 = arith.mulf %302, %306 : vector<32x32xf32>
    %c0_198 = arith.constant 0 : index
    %c0_199 = arith.constant 0 : index
    %308 = vector.load %arg76[%c0_198, %c0_199] : memref<1x32xf32, #tpu.memory_space<vmem>>, vector<1x32xf32>
    %309 = vector.broadcast %308 : vector<1x32xf32> to vector<32x32xf32>
    %310 = arith.mulf %303, %309 : vector<32x32xf32>
    %311 = arith.addf %307, %310 : vector<32x32xf32>
    %c0_200 = arith.constant 0 : index
    %c0_201 = arith.constant 0 : index
    %312 = vector.load %arg78[%c0_200, %c0_201] : memref<1x32xf32, #tpu.memory_space<vmem>>, vector<1x32xf32>
    %313 = vector.broadcast %312 : vector<1x32xf32> to vector<32x32xf32>
    %314 = arith.mulf %304, %313 : vector<32x32xf32>
    %315 = arith.addf %311, %314 : vector<32x32xf32>
    %c0_202 = arith.constant 0 : index
    %c0_203 = arith.constant 0 : index
    %316 = vector.load %arg75[%c0_202, %c0_203] : memref<1x32xf32, #tpu.memory_space<vmem>>, vector<1x32xf32>
    %317 = vector.broadcast %316 : vector<1x32xf32> to vector<32x32xf32>
    %318 = arith.addf %315, %317 : vector<32x32xf32>
    %c0_204 = arith.constant 0 : index
    %c0_205 = arith.constant 0 : index
    %319 = vector.load %arg70[%c0_204, %c0_205] : memref<1x1xf32, #tpu.memory_space<vmem>>, vector<1x1xf32>
    %cst_206 = arith.constant 0.000000e+00 : f32
    %320 = vector.broadcast %cst_206 : f32 to vector<32x32xf32>
    %321 = arith.cmpf ogt, %318, %320 : vector<32x32xf32>
    %322 = vector.broadcast %319 : vector<1x1xf32> to vector<32x32xf32>
    %323 = arith.mulf %318, %322 : vector<32x32xf32>
    %324 = arith.select %321, %318, %323 : vector<32x32xi1>, vector<32x32xf32>
    %c0_207 = arith.constant 0 : index
    %c0_208 = arith.constant 0 : index
    %325 = vector.load %arg80[%c0_207, %c0_208] : memref<1x32xf32, #tpu.memory_space<vmem>>, vector<1x32xf32>
    %c0_209 = arith.constant 0 : index
    %c0_210 = arith.constant 0 : index
    %326 = vector.load %arg74[%c0_209, %c0_210] : memref<1x32xf32, #tpu.memory_space<vmem>>, vector<1x32xf32>
    %cst_211 = arith.constant dense<0.000000e+00> : vector<32xf32>
    %327 = vector.multi_reduction <add>, %324, %cst_211 [1] : vector<32x32xf32> to vector<32xf32>
    %328 = vector.shape_cast %327 : vector<32xf32> to vector<32x1xf32>
    %cst_212 = arith.constant dense<0.000000e+00> : vector<32x1xf32>
    %329 = tpu.matmul %3, %328, %cst_212 {dimension_numbers = #tpu.dot_dimension_numbers<[1], [0], [0], [1], [0, 0, 1, 1], [], []>} : vector<32x32xf32>, vector<32x1xf32>, vector<32x1xf32> -> vector<32x1xf32>
    %cst_213 = arith.constant 0.001953125 : f32
    %330 = vector.broadcast %cst_213 : f32 to vector<32x1xf32>
    %331 = arith.mulf %329, %330 : vector<32x1xf32>
    %332 = vector.broadcast %331 : vector<32x1xf32> to vector<32x32xf32>
    %333 = arith.subf %324, %332 : vector<32x32xf32>
    %334 = arith.mulf %333, %333 : vector<32x32xf32>
    %cst_214 = arith.constant dense<0.000000e+00> : vector<32xf32>
    %335 = vector.multi_reduction <add>, %334, %cst_214 [1] : vector<32x32xf32> to vector<32xf32>
    %336 = vector.shape_cast %335 : vector<32xf32> to vector<32x1xf32>
    %cst_215 = arith.constant dense<0.000000e+00> : vector<32x1xf32>
    %337 = tpu.matmul %3, %336, %cst_215 {dimension_numbers = #tpu.dot_dimension_numbers<[1], [0], [0], [1], [0, 0, 1, 1], [], []>} : vector<32x32xf32>, vector<32x1xf32>, vector<32x1xf32> -> vector<32x1xf32>
    %cst_216 = arith.constant 0.001953125 : f32
    %338 = vector.broadcast %cst_216 : f32 to vector<32x1xf32>
    %339 = arith.mulf %337, %338 : vector<32x1xf32>
    %cst_217 = arith.constant 9.99999993E-9 : f32
    %340 = vector.broadcast %cst_217 : f32 to vector<32x1xf32>
    %341 = arith.addf %339, %340 : vector<32x1xf32>
    %342 = math.rsqrt %341 : vector<32x1xf32>
    %343 = vector.broadcast %342 : vector<32x1xf32> to vector<32x32xf32>
    %344 = arith.mulf %333, %343 : vector<32x32xf32>
    %345 = vector.broadcast %325 : vector<1x32xf32> to vector<32x32xf32>
    %346 = arith.mulf %344, %345 : vector<32x32xf32>
    %347 = vector.broadcast %326 : vector<1x32xf32> to vector<32x32xf32>
    %348 = arith.addf %346, %347 : vector<32x32xf32>
    %c0_218 = arith.constant 0 : index
    %c0_219 = arith.constant 0 : index
    %349 = vector.load %arg84[%c0_218, %c0_219] : memref<32x16xf32, #tpu.memory_space<vmem>>, vector<32x16xf32>
    %cst_220 = arith.constant dense<0.000000e+00> : vector<32x16xf32>
    %350 = tpu.matmul %348, %349, %cst_220 {dimension_numbers = #tpu.dot_dimension_numbers<[1], [0], [0], [1], [0, 0, 1, 1], [], []>} : vector<32x32xf32>, vector<32x16xf32>, vector<32x16xf32> -> vector<32x16xf32>
    %c0_221 = arith.constant 0 : index
    %c0_222 = arith.constant 0 : index
    %351 = vector.load %arg72[%c0_221, %c0_222] : memref<1x16xf32, #tpu.memory_space<vmem>>, vector<1x16xf32>
    %352 = vector.broadcast %351 : vector<1x16xf32> to vector<32x16xf32>
    %353 = arith.addf %350, %352 : vector<32x16xf32>
    %c0_223 = arith.constant 0 : index
    %c0_224 = arith.constant 0 : index
    %354 = vector.load %arg8[%c0_223, %c0_224] : memref<32x32xf32, #tpu.memory_space<vmem>>, vector<32x32xf32>
    %c0_225 = arith.constant 0 : index
    %c0_226 = arith.constant 0 : index
    %355 = vector.load %arg9[%c0_225, %c0_226] : memref<32x32xf32, #tpu.memory_space<vmem>>, vector<32x32xf32>
    %c0_227 = arith.constant 0 : index
    %c0_228 = arith.constant 0 : index
    %356 = vector.load %arg97[%c0_227, %c0_228] : memref<16x32xf32, #tpu.memory_space<vmem>>, vector<16x32xf32>
    %cst_229 = arith.constant dense<0.000000e+00> : vector<32x32xf32>
    %357 = tpu.matmul %353, %356, %cst_229 {dimension_numbers = #tpu.dot_dimension_numbers<[1], [0], [0], [1], [0, 0, 1, 1], [], []>} : vector<32x16xf32>, vector<16x32xf32>, vector<32x32xf32> -> vector<32x32xf32>
    %c0_230 = arith.constant 0 : index
    %c0_231 = arith.constant 0 : index
    %358 = vector.load %arg87[%c0_230, %c0_231] : memref<1x32xf32, #tpu.memory_space<vmem>>, vector<1x32xf32>
    %359 = vector.broadcast %358 : vector<1x32xf32> to vector<32x32xf32>
    %360 = arith.addf %357, %359 : vector<32x32xf32>
    %c0_232 = arith.constant 0 : index
    %c0_233 = arith.constant 0 : index
    %361 = vector.load %arg85[%c0_232, %c0_233] : memref<1x1xf32, #tpu.memory_space<vmem>>, vector<1x1xf32>
    %cst_234 = arith.constant 0.000000e+00 : f32
    %362 = vector.broadcast %cst_234 : f32 to vector<32x32xf32>
    %363 = arith.cmpf ogt, %360, %362 : vector<32x32xf32>
    %364 = vector.broadcast %361 : vector<1x1xf32> to vector<32x32xf32>
    %365 = arith.mulf %360, %364 : vector<32x32xf32>
    %366 = arith.select %363, %360, %365 : vector<32x32xi1>, vector<32x32xf32>
    %c0_235 = arith.constant 0 : index
    %c0_236 = arith.constant 0 : index
    %367 = vector.load %arg95[%c0_235, %c0_236] : memref<1x32xf32, #tpu.memory_space<vmem>>, vector<1x32xf32>
    %c0_237 = arith.constant 0 : index
    %c0_238 = arith.constant 0 : index
    %368 = vector.load %arg89[%c0_237, %c0_238] : memref<1x32xf32, #tpu.memory_space<vmem>>, vector<1x32xf32>
    %cst_239 = arith.constant dense<0.000000e+00> : vector<32xf32>
    %369 = vector.multi_reduction <add>, %366, %cst_239 [1] : vector<32x32xf32> to vector<32xf32>
    %370 = vector.shape_cast %369 : vector<32xf32> to vector<32x1xf32>
    %cst_240 = arith.constant dense<0.000000e+00> : vector<32x1xf32>
    %371 = tpu.matmul %3, %370, %cst_240 {dimension_numbers = #tpu.dot_dimension_numbers<[1], [0], [0], [1], [0, 0, 1, 1], [], []>} : vector<32x32xf32>, vector<32x1xf32>, vector<32x1xf32> -> vector<32x1xf32>
    %cst_241 = arith.constant 0.001953125 : f32
    %372 = vector.broadcast %cst_241 : f32 to vector<32x1xf32>
    %373 = arith.mulf %371, %372 : vector<32x1xf32>
    %374 = vector.broadcast %373 : vector<32x1xf32> to vector<32x32xf32>
    %375 = arith.subf %366, %374 : vector<32x32xf32>
    %376 = arith.mulf %375, %375 : vector<32x32xf32>
    %cst_242 = arith.constant dense<0.000000e+00> : vector<32xf32>
    %377 = vector.multi_reduction <add>, %376, %cst_242 [1] : vector<32x32xf32> to vector<32xf32>
    %378 = vector.shape_cast %377 : vector<32xf32> to vector<32x1xf32>
    %cst_243 = arith.constant dense<0.000000e+00> : vector<32x1xf32>
    %379 = tpu.matmul %3, %378, %cst_243 {dimension_numbers = #tpu.dot_dimension_numbers<[1], [0], [0], [1], [0, 0, 1, 1], [], []>} : vector<32x32xf32>, vector<32x1xf32>, vector<32x1xf32> -> vector<32x1xf32>
    %cst_244 = arith.constant 0.001953125 : f32
    %380 = vector.broadcast %cst_244 : f32 to vector<32x1xf32>
    %381 = arith.mulf %379, %380 : vector<32x1xf32>
    %cst_245 = arith.constant 9.99999993E-9 : f32
    %382 = vector.broadcast %cst_245 : f32 to vector<32x1xf32>
    %383 = arith.addf %381, %382 : vector<32x1xf32>
    %384 = math.rsqrt %383 : vector<32x1xf32>
    %385 = vector.broadcast %384 : vector<32x1xf32> to vector<32x32xf32>
    %386 = arith.mulf %375, %385 : vector<32x32xf32>
    %387 = vector.broadcast %367 : vector<1x32xf32> to vector<32x32xf32>
    %388 = arith.mulf %386, %387 : vector<32x32xf32>
    %389 = vector.broadcast %368 : vector<1x32xf32> to vector<32x32xf32>
    %390 = arith.addf %388, %389 : vector<32x32xf32>
    %cst_246 = arith.constant dense<0.000000e+00> : vector<32x32xf32>
    %391 = tpu.matmul %354, %390, %cst_246 {dimension_numbers = #tpu.dot_dimension_numbers<[1], [0], [0], [1], [0, 0, 1, 1], [], []>} : vector<32x32xf32>, vector<32x32xf32>, vector<32x32xf32> -> vector<32x32xf32>
    %cst_247 = arith.constant dense<0.000000e+00> : vector<32x32xf32>
    %392 = tpu.matmul %355, %390, %cst_247 {dimension_numbers = #tpu.dot_dimension_numbers<[1], [0], [0], [1], [0, 0, 1, 1], [], []>} : vector<32x32xf32>, vector<32x32xf32>, vector<32x32xf32> -> vector<32x32xf32>
    %c0_248 = arith.constant 0 : index
    %c0_249 = arith.constant 0 : index
    %393 = vector.load %arg93[%c0_248, %c0_249] : memref<1x32xf32, #tpu.memory_space<vmem>>, vector<1x32xf32>
    %394 = vector.broadcast %393 : vector<1x32xf32> to vector<32x32xf32>
    %395 = arith.mulf %390, %394 : vector<32x32xf32>
    %c0_250 = arith.constant 0 : index
    %c0_251 = arith.constant 0 : index
    %396 = vector.load %arg92[%c0_250, %c0_251] : memref<1x32xf32, #tpu.memory_space<vmem>>, vector<1x32xf32>
    %397 = vector.broadcast %396 : vector<1x32xf32> to vector<32x32xf32>
    %398 = arith.mulf %391, %397 : vector<32x32xf32>
    %399 = arith.addf %395, %398 : vector<32x32xf32>
    %c0_252 = arith.constant 0 : index
    %c0_253 = arith.constant 0 : index
    %400 = vector.load %arg94[%c0_252, %c0_253] : memref<1x32xf32, #tpu.memory_space<vmem>>, vector<1x32xf32>
    %401 = vector.broadcast %400 : vector<1x32xf32> to vector<32x32xf32>
    %402 = arith.mulf %392, %401 : vector<32x32xf32>
    %403 = arith.addf %399, %402 : vector<32x32xf32>
    %c0_254 = arith.constant 0 : index
    %c0_255 = arith.constant 0 : index
    %404 = vector.load %arg91[%c0_254, %c0_255] : memref<1x32xf32, #tpu.memory_space<vmem>>, vector<1x32xf32>
    %405 = vector.broadcast %404 : vector<1x32xf32> to vector<32x32xf32>
    %406 = arith.addf %403, %405 : vector<32x32xf32>
    %c0_256 = arith.constant 0 : index
    %c0_257 = arith.constant 0 : index
    %407 = vector.load %arg86[%c0_256, %c0_257] : memref<1x1xf32, #tpu.memory_space<vmem>>, vector<1x1xf32>
    %cst_258 = arith.constant 0.000000e+00 : f32
    %408 = vector.broadcast %cst_258 : f32 to vector<32x32xf32>
    %409 = arith.cmpf ogt, %406, %408 : vector<32x32xf32>
    %410 = vector.broadcast %407 : vector<1x1xf32> to vector<32x32xf32>
    %411 = arith.mulf %406, %410 : vector<32x32xf32>
    %412 = arith.select %409, %406, %411 : vector<32x32xi1>, vector<32x32xf32>
    %c0_259 = arith.constant 0 : index
    %c0_260 = arith.constant 0 : index
    %413 = vector.load %arg96[%c0_259, %c0_260] : memref<1x32xf32, #tpu.memory_space<vmem>>, vector<1x32xf32>
    %c0_261 = arith.constant 0 : index
    %c0_262 = arith.constant 0 : index
    %414 = vector.load %arg90[%c0_261, %c0_262] : memref<1x32xf32, #tpu.memory_space<vmem>>, vector<1x32xf32>
    %cst_263 = arith.constant dense<0.000000e+00> : vector<32xf32>
    %415 = vector.multi_reduction <add>, %412, %cst_263 [1] : vector<32x32xf32> to vector<32xf32>
    %416 = vector.shape_cast %415 : vector<32xf32> to vector<32x1xf32>
    %cst_264 = arith.constant dense<0.000000e+00> : vector<32x1xf32>
    %417 = tpu.matmul %3, %416, %cst_264 {dimension_numbers = #tpu.dot_dimension_numbers<[1], [0], [0], [1], [0, 0, 1, 1], [], []>} : vector<32x32xf32>, vector<32x1xf32>, vector<32x1xf32> -> vector<32x1xf32>
    %cst_265 = arith.constant 0.001953125 : f32
    %418 = vector.broadcast %cst_265 : f32 to vector<32x1xf32>
    %419 = arith.mulf %417, %418 : vector<32x1xf32>
    %420 = vector.broadcast %419 : vector<32x1xf32> to vector<32x32xf32>
    %421 = arith.subf %412, %420 : vector<32x32xf32>
    %422 = arith.mulf %421, %421 : vector<32x32xf32>
    %cst_266 = arith.constant dense<0.000000e+00> : vector<32xf32>
    %423 = vector.multi_reduction <add>, %422, %cst_266 [1] : vector<32x32xf32> to vector<32xf32>
    %424 = vector.shape_cast %423 : vector<32xf32> to vector<32x1xf32>
    %cst_267 = arith.constant dense<0.000000e+00> : vector<32x1xf32>
    %425 = tpu.matmul %3, %424, %cst_267 {dimension_numbers = #tpu.dot_dimension_numbers<[1], [0], [0], [1], [0, 0, 1, 1], [], []>} : vector<32x32xf32>, vector<32x1xf32>, vector<32x1xf32> -> vector<32x1xf32>
    %cst_268 = arith.constant 0.001953125 : f32
    %426 = vector.broadcast %cst_268 : f32 to vector<32x1xf32>
    %427 = arith.mulf %425, %426 : vector<32x1xf32>
    %cst_269 = arith.constant 9.99999993E-9 : f32
    %428 = vector.broadcast %cst_269 : f32 to vector<32x1xf32>
    %429 = arith.addf %427, %428 : vector<32x1xf32>
    %430 = math.rsqrt %429 : vector<32x1xf32>
    %431 = vector.broadcast %430 : vector<32x1xf32> to vector<32x32xf32>
    %432 = arith.mulf %421, %431 : vector<32x32xf32>
    %433 = vector.broadcast %413 : vector<1x32xf32> to vector<32x32xf32>
    %434 = arith.mulf %432, %433 : vector<32x32xf32>
    %435 = vector.broadcast %414 : vector<1x32xf32> to vector<32x32xf32>
    %436 = arith.addf %434, %435 : vector<32x32xf32>
    %c0_270 = arith.constant 0 : index
    %c0_271 = arith.constant 0 : index
    %437 = vector.load %arg98[%c0_270, %c0_271] : memref<32x16xf32, #tpu.memory_space<vmem>>, vector<32x16xf32>
    %cst_272 = arith.constant dense<0.000000e+00> : vector<32x16xf32>
    %438 = tpu.matmul %436, %437, %cst_272 {dimension_numbers = #tpu.dot_dimension_numbers<[1], [0], [0], [1], [0, 0, 1, 1], [], []>} : vector<32x32xf32>, vector<32x16xf32>, vector<32x16xf32> -> vector<32x16xf32>
    %c0_273 = arith.constant 0 : index
    %c0_274 = arith.constant 0 : index
    %439 = vector.load %arg88[%c0_273, %c0_274] : memref<1x16xf32, #tpu.memory_space<vmem>>, vector<1x16xf32>
    %440 = vector.broadcast %439 : vector<1x16xf32> to vector<32x16xf32>
    %441 = arith.addf %438, %440 : vector<32x16xf32>
    %442 = arith.addf %441, %353 : vector<32x16xf32>
    %c0_275 = arith.constant 0 : index
    %c0_276 = arith.constant 0 : index
    %443 = vector.load %arg21[%c0_275, %c0_276] : memref<16x8xf32, #tpu.memory_space<vmem>>, vector<16x8xf32>
    %cst_277 = arith.constant dense<0.000000e+00> : vector<32x8xf32>
    %444 = tpu.matmul %442, %443, %cst_277 {dimension_numbers = #tpu.dot_dimension_numbers<[1], [0], [0], [1], [0, 0, 1, 1], [], []>} : vector<32x16xf32>, vector<16x8xf32>, vector<32x8xf32> -> vector<32x8xf32>
    %c0_278 = arith.constant 0 : index
    %c0_279 = arith.constant 0 : index
    %445 = vector.load %arg20[%c0_278, %c0_279] : memref<1x8xf32, #tpu.memory_space<vmem>>, vector<1x8xf32>
    %446 = vector.broadcast %445 : vector<1x8xf32> to vector<32x8xf32>
    %447 = arith.addf %444, %446 : vector<32x8xf32>
    %448 = arith.negf %447 : vector<32x8xf32>
    %449 = math.exp %448 : vector<32x8xf32>
    %cst_280 = arith.constant 1.000000e+00 : f32
    %450 = vector.broadcast %cst_280 : f32 to vector<32x8xf32>
    %451 = arith.addf %450, %449 : vector<32x8xf32>
    %452 = arith.divf %450, %451 : vector<32x8xf32>
    %c0_281 = arith.constant 0 : index
    %c0_282 = arith.constant 0 : index
    %453 = vector.load %arg6[%c0_281, %c0_282] : memref<32x32xf32, #tpu.memory_space<vmem>>, vector<32x32xf32>
    %c0_283 = arith.constant 0 : index
    %c0_284 = arith.constant 0 : index
    %454 = vector.load %arg7[%c0_283, %c0_284] : memref<32x32xf32, #tpu.memory_space<vmem>>, vector<32x32xf32>
    %c0_285 = arith.constant 0 : index
    %c0_286 = arith.constant 0 : index
    %455 = vector.load %arg36[%c0_285, %c0_286] : memref<16x32xf32, #tpu.memory_space<vmem>>, vector<16x32xf32>
    %cst_287 = arith.constant dense<0.000000e+00> : vector<32x32xf32>
    %456 = tpu.matmul %442, %455, %cst_287 {dimension_numbers = #tpu.dot_dimension_numbers<[1], [0], [0], [1], [0, 0, 1, 1], [], []>} : vector<32x16xf32>, vector<16x32xf32>, vector<32x32xf32> -> vector<32x32xf32>
    %c0_288 = arith.constant 0 : index
    %c0_289 = arith.constant 0 : index
    %457 = vector.load %arg26[%c0_288, %c0_289] : memref<1x32xf32, #tpu.memory_space<vmem>>, vector<1x32xf32>
    %458 = vector.broadcast %457 : vector<1x32xf32> to vector<32x32xf32>
    %459 = arith.addf %456, %458 : vector<32x32xf32>
    %c0_290 = arith.constant 0 : index
    %c0_291 = arith.constant 0 : index
    %460 = vector.load %arg24[%c0_290, %c0_291] : memref<1x1xf32, #tpu.memory_space<vmem>>, vector<1x1xf32>
    %cst_292 = arith.constant 0.000000e+00 : f32
    %461 = vector.broadcast %cst_292 : f32 to vector<32x32xf32>
    %462 = arith.cmpf ogt, %459, %461 : vector<32x32xf32>
    %463 = vector.broadcast %460 : vector<1x1xf32> to vector<32x32xf32>
    %464 = arith.mulf %459, %463 : vector<32x32xf32>
    %465 = arith.select %462, %459, %464 : vector<32x32xi1>, vector<32x32xf32>
    %c0_293 = arith.constant 0 : index
    %c0_294 = arith.constant 0 : index
    %466 = vector.load %arg34[%c0_293, %c0_294] : memref<1x32xf32, #tpu.memory_space<vmem>>, vector<1x32xf32>
    %c0_295 = arith.constant 0 : index
    %c0_296 = arith.constant 0 : index
    %467 = vector.load %arg28[%c0_295, %c0_296] : memref<1x32xf32, #tpu.memory_space<vmem>>, vector<1x32xf32>
    %cst_297 = arith.constant dense<0.000000e+00> : vector<32xf32>
    %468 = vector.multi_reduction <add>, %465, %cst_297 [1] : vector<32x32xf32> to vector<32xf32>
    %469 = vector.shape_cast %468 : vector<32xf32> to vector<32x1xf32>
    %cst_298 = arith.constant dense<0.000000e+00> : vector<32x1xf32>
    %470 = tpu.matmul %3, %469, %cst_298 {dimension_numbers = #tpu.dot_dimension_numbers<[1], [0], [0], [1], [0, 0, 1, 1], [], []>} : vector<32x32xf32>, vector<32x1xf32>, vector<32x1xf32> -> vector<32x1xf32>
    %cst_299 = arith.constant 0.001953125 : f32
    %471 = vector.broadcast %cst_299 : f32 to vector<32x1xf32>
    %472 = arith.mulf %470, %471 : vector<32x1xf32>
    %473 = vector.broadcast %472 : vector<32x1xf32> to vector<32x32xf32>
    %474 = arith.subf %465, %473 : vector<32x32xf32>
    %475 = arith.mulf %474, %474 : vector<32x32xf32>
    %cst_300 = arith.constant dense<0.000000e+00> : vector<32xf32>
    %476 = vector.multi_reduction <add>, %475, %cst_300 [1] : vector<32x32xf32> to vector<32xf32>
    %477 = vector.shape_cast %476 : vector<32xf32> to vector<32x1xf32>
    %cst_301 = arith.constant dense<0.000000e+00> : vector<32x1xf32>
    %478 = tpu.matmul %3, %477, %cst_301 {dimension_numbers = #tpu.dot_dimension_numbers<[1], [0], [0], [1], [0, 0, 1, 1], [], []>} : vector<32x32xf32>, vector<32x1xf32>, vector<32x1xf32> -> vector<32x1xf32>
    %cst_302 = arith.constant 0.001953125 : f32
    %479 = vector.broadcast %cst_302 : f32 to vector<32x1xf32>
    %480 = arith.mulf %478, %479 : vector<32x1xf32>
    %cst_303 = arith.constant 9.99999993E-9 : f32
    %481 = vector.broadcast %cst_303 : f32 to vector<32x1xf32>
    %482 = arith.addf %480, %481 : vector<32x1xf32>
    %483 = math.rsqrt %482 : vector<32x1xf32>
    %484 = vector.broadcast %483 : vector<32x1xf32> to vector<32x32xf32>
    %485 = arith.mulf %474, %484 : vector<32x32xf32>
    %486 = vector.broadcast %466 : vector<1x32xf32> to vector<32x32xf32>
    %487 = arith.mulf %485, %486 : vector<32x32xf32>
    %488 = vector.broadcast %467 : vector<1x32xf32> to vector<32x32xf32>
    %489 = arith.addf %487, %488 : vector<32x32xf32>
    %cst_304 = arith.constant dense<0.000000e+00> : vector<32x32xf32>
    %490 = tpu.matmul %453, %489, %cst_304 {dimension_numbers = #tpu.dot_dimension_numbers<[1], [0], [0], [1], [0, 0, 1, 1], [], []>} : vector<32x32xf32>, vector<32x32xf32>, vector<32x32xf32> -> vector<32x32xf32>
    %cst_305 = arith.constant dense<0.000000e+00> : vector<32x32xf32>
    %491 = tpu.matmul %454, %489, %cst_305 {dimension_numbers = #tpu.dot_dimension_numbers<[1], [0], [0], [1], [0, 0, 1, 1], [], []>} : vector<32x32xf32>, vector<32x32xf32>, vector<32x32xf32> -> vector<32x32xf32>
    %c0_306 = arith.constant 0 : index
    %c0_307 = arith.constant 0 : index
    %492 = vector.load %arg32[%c0_306, %c0_307] : memref<1x32xf32, #tpu.memory_space<vmem>>, vector<1x32xf32>
    %493 = vector.broadcast %492 : vector<1x32xf32> to vector<32x32xf32>
    %494 = arith.mulf %489, %493 : vector<32x32xf32>
    %c0_308 = arith.constant 0 : index
    %c0_309 = arith.constant 0 : index
    %495 = vector.load %arg31[%c0_308, %c0_309] : memref<1x32xf32, #tpu.memory_space<vmem>>, vector<1x32xf32>
    %496 = vector.broadcast %495 : vector<1x32xf32> to vector<32x32xf32>
    %497 = arith.mulf %490, %496 : vector<32x32xf32>
    %498 = arith.addf %494, %497 : vector<32x32xf32>
    %c0_310 = arith.constant 0 : index
    %c0_311 = arith.constant 0 : index
    %499 = vector.load %arg33[%c0_310, %c0_311] : memref<1x32xf32, #tpu.memory_space<vmem>>, vector<1x32xf32>
    %500 = vector.broadcast %499 : vector<1x32xf32> to vector<32x32xf32>
    %501 = arith.mulf %491, %500 : vector<32x32xf32>
    %502 = arith.addf %498, %501 : vector<32x32xf32>
    %c0_312 = arith.constant 0 : index
    %c0_313 = arith.constant 0 : index
    %503 = vector.load %arg30[%c0_312, %c0_313] : memref<1x32xf32, #tpu.memory_space<vmem>>, vector<1x32xf32>
    %504 = vector.broadcast %503 : vector<1x32xf32> to vector<32x32xf32>
    %505 = arith.addf %502, %504 : vector<32x32xf32>
    %c0_314 = arith.constant 0 : index
    %c0_315 = arith.constant 0 : index
    %506 = vector.load %arg25[%c0_314, %c0_315] : memref<1x1xf32, #tpu.memory_space<vmem>>, vector<1x1xf32>
    %cst_316 = arith.constant 0.000000e+00 : f32
    %507 = vector.broadcast %cst_316 : f32 to vector<32x32xf32>
    %508 = arith.cmpf ogt, %505, %507 : vector<32x32xf32>
    %509 = vector.broadcast %506 : vector<1x1xf32> to vector<32x32xf32>
    %510 = arith.mulf %505, %509 : vector<32x32xf32>
    %511 = arith.select %508, %505, %510 : vector<32x32xi1>, vector<32x32xf32>
    %c0_317 = arith.constant 0 : index
    %c0_318 = arith.constant 0 : index
    %512 = vector.load %arg35[%c0_317, %c0_318] : memref<1x32xf32, #tpu.memory_space<vmem>>, vector<1x32xf32>
    %c0_319 = arith.constant 0 : index
    %c0_320 = arith.constant 0 : index
    %513 = vector.load %arg29[%c0_319, %c0_320] : memref<1x32xf32, #tpu.memory_space<vmem>>, vector<1x32xf32>
    %cst_321 = arith.constant dense<0.000000e+00> : vector<32xf32>
    %514 = vector.multi_reduction <add>, %511, %cst_321 [1] : vector<32x32xf32> to vector<32xf32>
    %515 = vector.shape_cast %514 : vector<32xf32> to vector<32x1xf32>
    %cst_322 = arith.constant dense<0.000000e+00> : vector<32x1xf32>
    %516 = tpu.matmul %3, %515, %cst_322 {dimension_numbers = #tpu.dot_dimension_numbers<[1], [0], [0], [1], [0, 0, 1, 1], [], []>} : vector<32x32xf32>, vector<32x1xf32>, vector<32x1xf32> -> vector<32x1xf32>
    %cst_323 = arith.constant 0.001953125 : f32
    %517 = vector.broadcast %cst_323 : f32 to vector<32x1xf32>
    %518 = arith.mulf %516, %517 : vector<32x1xf32>
    %519 = vector.broadcast %518 : vector<32x1xf32> to vector<32x32xf32>
    %520 = arith.subf %511, %519 : vector<32x32xf32>
    %521 = arith.mulf %520, %520 : vector<32x32xf32>
    %cst_324 = arith.constant dense<0.000000e+00> : vector<32xf32>
    %522 = vector.multi_reduction <add>, %521, %cst_324 [1] : vector<32x32xf32> to vector<32xf32>
    %523 = vector.shape_cast %522 : vector<32xf32> to vector<32x1xf32>
    %cst_325 = arith.constant dense<0.000000e+00> : vector<32x1xf32>
    %524 = tpu.matmul %3, %523, %cst_325 {dimension_numbers = #tpu.dot_dimension_numbers<[1], [0], [0], [1], [0, 0, 1, 1], [], []>} : vector<32x32xf32>, vector<32x1xf32>, vector<32x1xf32> -> vector<32x1xf32>
    %cst_326 = arith.constant 0.001953125 : f32
    %525 = vector.broadcast %cst_326 : f32 to vector<32x1xf32>
    %526 = arith.mulf %524, %525 : vector<32x1xf32>
    %cst_327 = arith.constant 9.99999993E-9 : f32
    %527 = vector.broadcast %cst_327 : f32 to vector<32x1xf32>
    %528 = arith.addf %526, %527 : vector<32x1xf32>
    %529 = math.rsqrt %528 : vector<32x1xf32>
    %530 = vector.broadcast %529 : vector<32x1xf32> to vector<32x32xf32>
    %531 = arith.mulf %520, %530 : vector<32x32xf32>
    %532 = vector.broadcast %512 : vector<1x32xf32> to vector<32x32xf32>
    %533 = arith.mulf %531, %532 : vector<32x32xf32>
    %534 = vector.broadcast %513 : vector<1x32xf32> to vector<32x32xf32>
    %535 = arith.addf %533, %534 : vector<32x32xf32>
    %c0_328 = arith.constant 0 : index
    %c0_329 = arith.constant 0 : index
    %536 = vector.load %arg37[%c0_328, %c0_329] : memref<32x8xf32, #tpu.memory_space<vmem>>, vector<32x8xf32>
    %cst_330 = arith.constant dense<0.000000e+00> : vector<32x8xf32>
    %537 = tpu.matmul %535, %536, %cst_330 {dimension_numbers = #tpu.dot_dimension_numbers<[1], [0], [0], [1], [0, 0, 1, 1], [], []>} : vector<32x32xf32>, vector<32x8xf32>, vector<32x8xf32> -> vector<32x8xf32>
    %c0_331 = arith.constant 0 : index
    %c0_332 = arith.constant 0 : index
    %538 = vector.load %arg27[%c0_331, %c0_332] : memref<1x8xf32, #tpu.memory_space<vmem>>, vector<1x8xf32>
    %539 = vector.broadcast %538 : vector<1x8xf32> to vector<32x8xf32>
    %540 = arith.addf %537, %539 : vector<32x8xf32>
    %cst_333 = arith.constant 1.000000e+00 : f32
    %541 = vector.broadcast %cst_333 : f32 to vector<32x8xf32>
    %542 = arith.subf %541, %452 : vector<32x8xf32>
    %543 = arith.mulf %542, %540 : vector<32x8xf32>
    %544 = arith.mulf %452, %44 : vector<32x8xf32>
    %545 = arith.addf %543, %544 : vector<32x8xf32>
    %c0_334 = arith.constant 0 : index
    %c0_335 = arith.constant 0 : index
    %546 = vector.load %arg100[%c0_334, %c0_335] : memref<32x8xf32, #tpu.memory_space<vmem>>, vector<32x8xf32>
    tpu.vector_store %arg100[%c0_334, %c0_335], %545 {strides = array<i32>} : memref<32x8xf32, #tpu.memory_space<vmem>>, vector<32x8xf32>,
    %c0_336 = arith.constant 0 : index
    %c0_337 = arith.constant 0 : index
    %547 = vector.load %arg39[%c0_336, %c0_337] : memref<16x16xf32, #tpu.memory_space<vmem>>, vector<16x16xf32>
    %cst_338 = arith.constant dense<0.000000e+00> : vector<32x16xf32>
    %548 = tpu.matmul %442, %547, %cst_338 {dimension_numbers = #tpu.dot_dimension_numbers<[1], [0], [0], [1], [0, 0, 1, 1], [], []>} : vector<32x16xf32>, vector<16x16xf32>, vector<32x16xf32> -> vector<32x16xf32>
    %c0_339 = arith.constant 0 : index
    %c0_340 = arith.constant 0 : index
    %549 = vector.load %arg38[%c0_339, %c0_340] : memref<1x16xf32, #tpu.memory_space<vmem>>, vector<1x16xf32>
    %550 = vector.broadcast %549 : vector<1x16xf32> to vector<32x16xf32>
    %551 = arith.addf %548, %550 : vector<32x16xf32>
    %cst_341 = arith.constant 0.000000e+00 : f32
    %552 = vector.broadcast %cst_341 : f32 to vector<32x16xf32>
    %553 = arith.maximumf %551, %552 : vector<32x16xf32>
    %554 = arith.mulf %14, %553 : vector<32x16xf32>
    %c0_342 = arith.constant 0 : index
    %c0_343 = arith.constant 0 : index
    %555 = vector.load %arg13[%c0_342, %c0_343] : memref<16x4xf32, #tpu.memory_space<vmem>>, vector<16x4xf32>
    %cst_344 = arith.constant dense<0.000000e+00> : vector<32x4xf32>
    %556 = tpu.matmul %554, %555, %cst_344 {dimension_numbers = #tpu.dot_dimension_numbers<[1], [0], [0], [1], [0, 0, 1, 1], [], []>} : vector<32x16xf32>, vector<16x4xf32>, vector<32x4xf32> -> vector<32x4xf32>
    %c0_345 = arith.constant 0 : index
    %c0_346 = arith.constant 0 : index
    %557 = vector.load %arg99[%c0_345, %c0_346] : memref<32x4xf32, #tpu.memory_space<vmem>>, vector<32x4xf32>
    tpu.vector_store %arg99[%c0_345, %c0_346], %556 {strides = array<i32>} : memref<32x4xf32, #tpu.memory_space<vmem>>, vector<32x4xf32>,
    return
  }
  func.func @transform_0(%arg0: i32) -> (i32, i32) {
    %c0_i32 = arith.constant 0 : i32
    %c0_i32_0 = arith.constant 0 : i32
    return %arg0, %c0_i32 : i32, i32
  }
  func.func @transform_1(%arg0: i32) -> (i32, i32) {
    %c0_i32 = arith.constant 0 : i32
    %c0_i32_0 = arith.constant 0 : i32
    %c0_i32_1 = arith.constant 0 : i32
    return %c0_i32, %c0_i32_0 : i32, i32
  }
  func.func @transform_2(%arg0: i32) -> (i32, i32) {
    %c0_i32 = arith.constant 0 : i32
    %c0_i32_0 = arith.constant 0 : i32
    %c0_i32_1 = arith.constant 0 : i32
    return %c0_i32, %c0_i32_0 : i32, i32
  }
  func.func @transform_3(%arg0: i32) -> (i32, i32) {
    %c0_i32 = arith.constant 0 : i32
    %c0_i32_0 = arith.constant 0 : i32
    %c0_i32_1 = arith.constant 0 : i32
    return %c0_i32, %c0_i32_0 : i32, i32
  }
  func.func @transform_4(%arg0: i32) -> (i32, i32) {
    %c0_i32 = arith.constant 0 : i32
    %c0_i32_0 = arith.constant 0 : i32
    %c0_i32_1 = arith.constant 0 : i32
    return %c0_i32, %c0_i32_0 : i32, i32
  }
  func.func @transform_5(%arg0: i32) -> (i32, i32) {
    %c0_i32 = arith.constant 0 : i32
    %c0_i32_0 = arith.constant 0 : i32
    %c0_i32_1 = arith.constant 0 : i32
    return %c0_i32, %c0_i32_0 : i32, i32
  }
  func.func @transform_6(%arg0: i32) -> (i32, i32) {
    %c0_i32 = arith.constant 0 : i32
    %c0_i32_0 = arith.constant 0 : i32
    %c0_i32_1 = arith.constant 0 : i32
    return %c0_i32, %c0_i32_0 : i32, i32
  }
  func.func @transform_7(%arg0: i32) -> (i32, i32) {
    %c0_i32 = arith.constant 0 : i32
    %c0_i32_0 = arith.constant 0 : i32
    %c0_i32_1 = arith.constant 0 : i32
    return %c0_i32, %c0_i32_0 : i32, i32
  }
  func.func @transform_8(%arg0: i32) -> (i32, i32) {
    %c0_i32 = arith.constant 0 : i32
    %c0_i32_0 = arith.constant 0 : i32
    %c0_i32_1 = arith.constant 0 : i32
    return %c0_i32, %c0_i32_0 : i32, i32
  }
  func.func @transform_9(%arg0: i32) -> (i32, i32) {
    %c0_i32 = arith.constant 0 : i32
    %c0_i32_0 = arith.constant 0 : i32
    %c0_i32_1 = arith.constant 0 : i32
    return %c0_i32, %c0_i32_0 : i32, i32
  }
  func.func @transform_10(%arg0: i32) -> (i32, i32) {
    %c0_i32 = arith.constant 0 : i32
    %c0_i32_0 = arith.constant 0 : i32
    %c0_i32_1 = arith.constant 0 : i32
    return %c0_i32, %c0_i32_0 : i32, i32
  }
  func.func @transform_11(%arg0: i32) -> (i32, i32) {
    %c0_i32 = arith.constant 0 : i32
    %c0_i32_0 = arith.constant 0 : i32
    %c0_i32_1 = arith.constant 0 : i32
    return %c0_i32, %c0_i32_0 : i32, i32
  }
  func.func @transform_12(%arg0: i32) -> (i32, i32) {
    %c0_i32 = arith.constant 0 : i32
    %c0_i32_0 = arith.constant 0 : i32
    %c0_i32_1 = arith.constant 0 : i32
    return %c0_i32, %c0_i32_0 : i32, i32
  }
  func.func @transform_13(%arg0: i32) -> (i32, i32) {
    %c0_i32 = arith.constant 0 : i32
    %c0_i32_0 = arith.constant 0 : i32
    %c0_i32_1 = arith.constant 0 : i32
    return %c0_i32, %c0_i32_0 : i32, i32
  }
  func.func @transform_14(%arg0: i32) -> (i32, i32) {
    %c0_i32 = arith.constant 0 : i32
    %c0_i32_0 = arith.constant 0 : i32
    %c0_i32_1 = arith.constant 0 : i32
    return %c0_i32, %c0_i32_0 : i32, i32
  }
  func.func @transform_15(%arg0: i32) -> (i32, i32) {
    %c0_i32 = arith.constant 0 : i32
    %c0_i32_0 = arith.constant 0 : i32
    %c0_i32_1 = arith.constant 0 : i32
    return %c0_i32, %c0_i32_0 : i32, i32
  }
  func.func @transform_16(%arg0: i32) -> (i32, i32) {
    %c0_i32 = arith.constant 0 : i32
    %c0_i32_0 = arith.constant 0 : i32
    %c0_i32_1 = arith.constant 0 : i32
    return %c0_i32, %c0_i32_0 : i32, i32
  }
  func.func @transform_17(%arg0: i32) -> (i32, i32) {
    %c0_i32 = arith.constant 0 : i32
    %c0_i32_0 = arith.constant 0 : i32
    %c0_i32_1 = arith.constant 0 : i32
    return %c0_i32, %c0_i32_0 : i32, i32
  }
  func.func @transform_18(%arg0: i32) -> (i32, i32) {
    %c0_i32 = arith.constant 0 : i32
    %c0_i32_0 = arith.constant 0 : i32
    %c0_i32_1 = arith.constant 0 : i32
    return %c0_i32, %c0_i32_0 : i32, i32
  }
  func.func @transform_19(%arg0: i32) -> (i32, i32) {
    %c0_i32 = arith.constant 0 : i32
    %c0_i32_0 = arith.constant 0 : i32
    %c0_i32_1 = arith.constant 0 : i32
    return %c0_i32, %c0_i32_0 : i32, i32
  }
  func.func @transform_20(%arg0: i32) -> (i32, i32) {
    %c0_i32 = arith.constant 0 : i32
    %c0_i32_0 = arith.constant 0 : i32
    %c0_i32_1 = arith.constant 0 : i32
    return %c0_i32, %c0_i32_0 : i32, i32
  }
  func.func @transform_21(%arg0: i32) -> (i32, i32) {
    %c0_i32 = arith.constant 0 : i32
    %c0_i32_0 = arith.constant 0 : i32
    %c0_i32_1 = arith.constant 0 : i32
    return %c0_i32, %c0_i32_0 : i32, i32
  }
  func.func @transform_22(%arg0: i32) -> (i32, i32) {
    %c0_i32 = arith.constant 0 : i32
    %c0_i32_0 = arith.constant 0 : i32
    %c0_i32_1 = arith.constant 0 : i32
    return %c0_i32, %c0_i32_0 : i32, i32
  }
  func.func @transform_23(%arg0: i32) -> (i32, i32) {
    %c0_i32 = arith.constant 0 : i32
    %c0_i32_0 = arith.constant 0 : i32
    %c0_i32_1 = arith.constant 0 : i32
    return %c0_i32, %c0_i32_0 : i32, i32
  }
  func.func @transform_24(%arg0: i32) -> (i32, i32) {
    %c0_i32 = arith.constant 0 : i32
    %c0_i32_0 = arith.constant 0 : i32
    %c0_i32_1 = arith.constant 0 : i32
    return %c0_i32, %c0_i32_0 : i32, i32
  }
  func.func @transform_25(%arg0: i32) -> (i32, i32) {
    %c0_i32 = arith.constant 0 : i32
    %c0_i32_0 = arith.constant 0 : i32
    %c0_i32_1 = arith.constant 0 : i32
    return %c0_i32, %c0_i32_0 : i32, i32
  }
  func.func @transform_26(%arg0: i32) -> (i32, i32) {
    %c0_i32 = arith.constant 0 : i32
    %c0_i32_0 = arith.constant 0 : i32
    %c0_i32_1 = arith.constant 0 : i32
    return %c0_i32, %c0_i32_0 : i32, i32
  }
  func.func @transform_27(%arg0: i32) -> (i32, i32) {
    %c0_i32 = arith.constant 0 : i32
    %c0_i32_0 = arith.constant 0 : i32
    %c0_i32_1 = arith.constant 0 : i32
    return %c0_i32, %c0_i32_0 : i32, i32
  }
  func.func @transform_28(%arg0: i32) -> (i32, i32) {
    %c0_i32 = arith.constant 0 : i32
    %c0_i32_0 = arith.constant 0 : i32
    %c0_i32_1 = arith.constant 0 : i32
    return %c0_i32, %c0_i32_0 : i32, i32
  }
  func.func @transform_29(%arg0: i32) -> (i32, i32) {
    %c0_i32 = arith.constant 0 : i32
    %c0_i32_0 = arith.constant 0 : i32
    %c0_i32_1 = arith.constant 0 : i32
    return %c0_i32, %c0_i32_0 : i32, i32
  }
  func.func @transform_30(%arg0: i32) -> (i32, i32) {
    %c0_i32 = arith.constant 0 : i32
    %c0_i32_0 = arith.constant 0 : i32
    %c0_i32_1 = arith.constant 0 : i32
    return %c0_i32, %c0_i32_0 : i32, i32
  }
  func.func @transform_31(%arg0: i32) -> (i32, i32) {
    %c0_i32 = arith.constant 0 : i32
    %c0_i32_0 = arith.constant 0 : i32
    %c0_i32_1 = arith.constant 0 : i32
    return %c0_i32, %c0_i32_0 : i32, i32
  }
  func.func @transform_32(%arg0: i32) -> (i32, i32) {
    %c0_i32 = arith.constant 0 : i32
    %c0_i32_0 = arith.constant 0 : i32
    %c0_i32_1 = arith.constant 0 : i32
    return %c0_i32, %c0_i32_0 : i32, i32
  }
  func.func @transform_33(%arg0: i32) -> (i32, i32) {
    %c0_i32 = arith.constant 0 : i32
    %c0_i32_0 = arith.constant 0 : i32
    %c0_i32_1 = arith.constant 0 : i32
    return %c0_i32, %c0_i32_0 : i32, i32
  }
  func.func @transform_34(%arg0: i32) -> (i32, i32) {
    %c0_i32 = arith.constant 0 : i32
    %c0_i32_0 = arith.constant 0 : i32
    %c0_i32_1 = arith.constant 0 : i32
    return %c0_i32, %c0_i32_0 : i32, i32
  }
  func.func @transform_35(%arg0: i32) -> (i32, i32) {
    %c0_i32 = arith.constant 0 : i32
    %c0_i32_0 = arith.constant 0 : i32
    %c0_i32_1 = arith.constant 0 : i32
    return %c0_i32, %c0_i32_0 : i32, i32
  }
  func.func @transform_36(%arg0: i32) -> (i32, i32) {
    %c0_i32 = arith.constant 0 : i32
    %c0_i32_0 = arith.constant 0 : i32
    %c0_i32_1 = arith.constant 0 : i32
    return %c0_i32, %c0_i32_0 : i32, i32
  }
  func.func @transform_37(%arg0: i32) -> (i32, i32) {
    %c0_i32 = arith.constant 0 : i32
    %c0_i32_0 = arith.constant 0 : i32
    %c0_i32_1 = arith.constant 0 : i32
    return %c0_i32, %c0_i32_0 : i32, i32
  }
  func.func @transform_38(%arg0: i32) -> (i32, i32) {
    %c0_i32 = arith.constant 0 : i32
    %c0_i32_0 = arith.constant 0 : i32
    %c0_i32_1 = arith.constant 0 : i32
    return %c0_i32, %c0_i32_0 : i32, i32
  }
  func.func @transform_39(%arg0: i32) -> (i32, i32) {
    %c0_i32 = arith.constant 0 : i32
    %c0_i32_0 = arith.constant 0 : i32
    %c0_i32_1 = arith.constant 0 : i32
    return %c0_i32, %c0_i32_0 : i32, i32
  }
  func.func @transform_40(%arg0: i32) -> (i32, i32) {
    %c0_i32 = arith.constant 0 : i32
    %c0_i32_0 = arith.constant 0 : i32
    %c0_i32_1 = arith.constant 0 : i32
    return %c0_i32, %c0_i32_0 : i32, i32
  }
  func.func @transform_41(%arg0: i32) -> (i32, i32) {
    %c0_i32 = arith.constant 0 : i32
    %c0_i32_0 = arith.constant 0 : i32
    %c0_i32_1 = arith.constant 0 : i32
    return %c0_i32, %c0_i32_0 : i32, i32
  }
  func.func @transform_42(%arg0: i32) -> (i32, i32) {
    %c0_i32 = arith.constant 0 : i32
    %c0_i32_0 = arith.constant 0 : i32
    %c0_i32_1 = arith.constant 0 : i32
    return %c0_i32, %c0_i32_0 : i32, i32
  }
  func.func @transform_43(%arg0: i32) -> (i32, i32) {
    %c0_i32 = arith.constant 0 : i32
    %c0_i32_0 = arith.constant 0 : i32
    %c0_i32_1 = arith.constant 0 : i32
    return %c0_i32, %c0_i32_0 : i32, i32
  }
  func.func @transform_44(%arg0: i32) -> (i32, i32) {
    %c0_i32 = arith.constant 0 : i32
    %c0_i32_0 = arith.constant 0 : i32
    %c0_i32_1 = arith.constant 0 : i32
    return %c0_i32, %c0_i32_0 : i32, i32
  }
  func.func @transform_45(%arg0: i32) -> (i32, i32) {
    %c0_i32 = arith.constant 0 : i32
    %c0_i32_0 = arith.constant 0 : i32
    %c0_i32_1 = arith.constant 0 : i32
    return %c0_i32, %c0_i32_0 : i32, i32
  }
  func.func @transform_46(%arg0: i32) -> (i32, i32) {
    %c0_i32 = arith.constant 0 : i32
    %c0_i32_0 = arith.constant 0 : i32
    %c0_i32_1 = arith.constant 0 : i32
    return %c0_i32, %c0_i32_0 : i32, i32
  }
  func.func @transform_47(%arg0: i32) -> (i32, i32) {
    %c0_i32 = arith.constant 0 : i32
    %c0_i32_0 = arith.constant 0 : i32
    %c0_i32_1 = arith.constant 0 : i32
    return %c0_i32, %c0_i32_0 : i32, i32
  }
  func.func @transform_48(%arg0: i32) -> (i32, i32) {
    %c0_i32 = arith.constant 0 : i32
    %c0_i32_0 = arith.constant 0 : i32
    %c0_i32_1 = arith.constant 0 : i32
    return %c0_i32, %c0_i32_0 : i32, i32
  }
  func.func @transform_49(%arg0: i32) -> (i32, i32) {
    %c0_i32 = arith.constant 0 : i32
    %c0_i32_0 = arith.constant 0 : i32
    %c0_i32_1 = arith.constant 0 : i32
    return %c0_i32, %c0_i32_0 : i32, i32
  }
  func.func @transform_50(%arg0: i32) -> (i32, i32) {
    %c0_i32 = arith.constant 0 : i32
    %c0_i32_0 = arith.constant 0 : i32
    %c0_i32_1 = arith.constant 0 : i32
    return %c0_i32, %c0_i32_0 : i32, i32
  }
  func.func @transform_51(%arg0: i32) -> (i32, i32) {
    %c0_i32 = arith.constant 0 : i32
    %c0_i32_0 = arith.constant 0 : i32
    %c0_i32_1 = arith.constant 0 : i32
    return %c0_i32, %c0_i32_0 : i32, i32
  }
  func.func @transform_52(%arg0: i32) -> (i32, i32) {
    %c0_i32 = arith.constant 0 : i32
    %c0_i32_0 = arith.constant 0 : i32
    %c0_i32_1 = arith.constant 0 : i32
    return %c0_i32, %c0_i32_0 : i32, i32
  }
  func.func @transform_53(%arg0: i32) -> (i32, i32) {
    %c0_i32 = arith.constant 0 : i32
    %c0_i32_0 = arith.constant 0 : i32
    %c0_i32_1 = arith.constant 0 : i32
    return %c0_i32, %c0_i32_0 : i32, i32
  }
  func.func @transform_54(%arg0: i32) -> (i32, i32) {
    %c0_i32 = arith.constant 0 : i32
    %c0_i32_0 = arith.constant 0 : i32
    %c0_i32_1 = arith.constant 0 : i32
    return %c0_i32, %c0_i32_0 : i32, i32
  }
  func.func @transform_55(%arg0: i32) -> (i32, i32) {
    %c0_i32 = arith.constant 0 : i32
    %c0_i32_0 = arith.constant 0 : i32
    %c0_i32_1 = arith.constant 0 : i32
    return %c0_i32, %c0_i32_0 : i32, i32
  }
  func.func @transform_56(%arg0: i32) -> (i32, i32) {
    %c0_i32 = arith.constant 0 : i32
    %c0_i32_0 = arith.constant 0 : i32
    %c0_i32_1 = arith.constant 0 : i32
    return %c0_i32, %c0_i32_0 : i32, i32
  }
  func.func @transform_57(%arg0: i32) -> (i32, i32) {
    %c0_i32 = arith.constant 0 : i32
    %c0_i32_0 = arith.constant 0 : i32
    %c0_i32_1 = arith.constant 0 : i32
    return %c0_i32, %c0_i32_0 : i32, i32
  }
  func.func @transform_58(%arg0: i32) -> (i32, i32) {
    %c0_i32 = arith.constant 0 : i32
    %c0_i32_0 = arith.constant 0 : i32
    %c0_i32_1 = arith.constant 0 : i32
    return %c0_i32, %c0_i32_0 : i32, i32
  }
  func.func @transform_59(%arg0: i32) -> (i32, i32) {
    %c0_i32 = arith.constant 0 : i32
    %c0_i32_0 = arith.constant 0 : i32
    %c0_i32_1 = arith.constant 0 : i32
    return %c0_i32, %c0_i32_0 : i32, i32
  }
  func.func @transform_60(%arg0: i32) -> (i32, i32) {
    %c0_i32 = arith.constant 0 : i32
    %c0_i32_0 = arith.constant 0 : i32
    %c0_i32_1 = arith.constant 0 : i32
    return %c0_i32, %c0_i32_0 : i32, i32
  }
  func.func @transform_61(%arg0: i32) -> (i32, i32) {
    %c0_i32 = arith.constant 0 : i32
    %c0_i32_0 = arith.constant 0 : i32
    %c0_i32_1 = arith.constant 0 : i32
    return %c0_i32, %c0_i32_0 : i32, i32
  }
  func.func @transform_62(%arg0: i32) -> (i32, i32) {
    %c0_i32 = arith.constant 0 : i32
    %c0_i32_0 = arith.constant 0 : i32
    %c0_i32_1 = arith.constant 0 : i32
    return %c0_i32, %c0_i32_0 : i32, i32
  }
  func.func @transform_63(%arg0: i32) -> (i32, i32) {
    %c0_i32 = arith.constant 0 : i32
    %c0_i32_0 = arith.constant 0 : i32
    %c0_i32_1 = arith.constant 0 : i32
    return %c0_i32, %c0_i32_0 : i32, i32
  }
  func.func @transform_64(%arg0: i32) -> (i32, i32) {
    %c0_i32 = arith.constant 0 : i32
    %c0_i32_0 = arith.constant 0 : i32
    %c0_i32_1 = arith.constant 0 : i32
    return %c0_i32, %c0_i32_0 : i32, i32
  }
  func.func @transform_65(%arg0: i32) -> (i32, i32) {
    %c0_i32 = arith.constant 0 : i32
    %c0_i32_0 = arith.constant 0 : i32
    %c0_i32_1 = arith.constant 0 : i32
    return %c0_i32, %c0_i32_0 : i32, i32
  }
  func.func @transform_66(%arg0: i32) -> (i32, i32) {
    %c0_i32 = arith.constant 0 : i32
    %c0_i32_0 = arith.constant 0 : i32
    %c0_i32_1 = arith.constant 0 : i32
    return %c0_i32, %c0_i32_0 : i32, i32
  }
  func.func @transform_67(%arg0: i32) -> (i32, i32) {
    %c0_i32 = arith.constant 0 : i32
    %c0_i32_0 = arith.constant 0 : i32
    %c0_i32_1 = arith.constant 0 : i32
    return %c0_i32, %c0_i32_0 : i32, i32
  }
  func.func @transform_68(%arg0: i32) -> (i32, i32) {
    %c0_i32 = arith.constant 0 : i32
    %c0_i32_0 = arith.constant 0 : i32
    %c0_i32_1 = arith.constant 0 : i32
    return %c0_i32, %c0_i32_0 : i32, i32
  }
  func.func @transform_69(%arg0: i32) -> (i32, i32) {
    %c0_i32 = arith.constant 0 : i32
    %c0_i32_0 = arith.constant 0 : i32
    %c0_i32_1 = arith.constant 0 : i32
    return %c0_i32, %c0_i32_0 : i32, i32
  }
  func.func @transform_70(%arg0: i32) -> (i32, i32) {
    %c0_i32 = arith.constant 0 : i32
    %c0_i32_0 = arith.constant 0 : i32
    %c0_i32_1 = arith.constant 0 : i32
    return %c0_i32, %c0_i32_0 : i32, i32
  }
  func.func @transform_71(%arg0: i32) -> (i32, i32) {
    %c0_i32 = arith.constant 0 : i32
    %c0_i32_0 = arith.constant 0 : i32
    %c0_i32_1 = arith.constant 0 : i32
    return %c0_i32, %c0_i32_0 : i32, i32
  }
  func.func @transform_72(%arg0: i32) -> (i32, i32) {
    %c0_i32 = arith.constant 0 : i32
    %c0_i32_0 = arith.constant 0 : i32
    %c0_i32_1 = arith.constant 0 : i32
    return %c0_i32, %c0_i32_0 : i32, i32
  }
  func.func @transform_73(%arg0: i32) -> (i32, i32) {
    %c0_i32 = arith.constant 0 : i32
    %c0_i32_0 = arith.constant 0 : i32
    %c0_i32_1 = arith.constant 0 : i32
    return %c0_i32, %c0_i32_0 : i32, i32
  }
  func.func @transform_74(%arg0: i32) -> (i32, i32) {
    %c0_i32 = arith.constant 0 : i32
    %c0_i32_0 = arith.constant 0 : i32
    %c0_i32_1 = arith.constant 0 : i32
    return %c0_i32, %c0_i32_0 : i32, i32
  }
  func.func @transform_75(%arg0: i32) -> (i32, i32) {
    %c0_i32 = arith.constant 0 : i32
    %c0_i32_0 = arith.constant 0 : i32
    %c0_i32_1 = arith.constant 0 : i32
    return %c0_i32, %c0_i32_0 : i32, i32
  }
  func.func @transform_76(%arg0: i32) -> (i32, i32) {
    %c0_i32 = arith.constant 0 : i32
    %c0_i32_0 = arith.constant 0 : i32
    %c0_i32_1 = arith.constant 0 : i32
    return %c0_i32, %c0_i32_0 : i32, i32
  }
  func.func @transform_77(%arg0: i32) -> (i32, i32) {
    %c0_i32 = arith.constant 0 : i32
    %c0_i32_0 = arith.constant 0 : i32
    %c0_i32_1 = arith.constant 0 : i32
    return %c0_i32, %c0_i32_0 : i32, i32
  }
  func.func @transform_78(%arg0: i32) -> (i32, i32) {
    %c0_i32 = arith.constant 0 : i32
    %c0_i32_0 = arith.constant 0 : i32
    %c0_i32_1 = arith.constant 0 : i32
    return %c0_i32, %c0_i32_0 : i32, i32
  }
  func.func @transform_79(%arg0: i32) -> (i32, i32) {
    %c0_i32 = arith.constant 0 : i32
    %c0_i32_0 = arith.constant 0 : i32
    %c0_i32_1 = arith.constant 0 : i32
    return %c0_i32, %c0_i32_0 : i32, i32
  }
  func.func @transform_80(%arg0: i32) -> (i32, i32) {
    %c0_i32 = arith.constant 0 : i32
    %c0_i32_0 = arith.constant 0 : i32
    %c0_i32_1 = arith.constant 0 : i32
    return %c0_i32, %c0_i32_0 : i32, i32
  }
  func.func @transform_81(%arg0: i32) -> (i32, i32) {
    %c0_i32 = arith.constant 0 : i32
    %c0_i32_0 = arith.constant 0 : i32
    %c0_i32_1 = arith.constant 0 : i32
    return %c0_i32, %c0_i32_0 : i32, i32
  }
  func.func @transform_82(%arg0: i32) -> (i32, i32) {
    %c0_i32 = arith.constant 0 : i32
    %c0_i32_0 = arith.constant 0 : i32
    %c0_i32_1 = arith.constant 0 : i32
    return %c0_i32, %c0_i32_0 : i32, i32
  }
  func.func @transform_83(%arg0: i32) -> (i32, i32) {
    %c0_i32 = arith.constant 0 : i32
    %c0_i32_0 = arith.constant 0 : i32
    %c0_i32_1 = arith.constant 0 : i32
    return %c0_i32, %c0_i32_0 : i32, i32
  }
  func.func @transform_84(%arg0: i32) -> (i32, i32) {
    %c0_i32 = arith.constant 0 : i32
    %c0_i32_0 = arith.constant 0 : i32
    %c0_i32_1 = arith.constant 0 : i32
    return %c0_i32, %c0_i32_0 : i32, i32
  }
  func.func @transform_85(%arg0: i32) -> (i32, i32) {
    %c0_i32 = arith.constant 0 : i32
    %c0_i32_0 = arith.constant 0 : i32
    %c0_i32_1 = arith.constant 0 : i32
    return %c0_i32, %c0_i32_0 : i32, i32
  }
  func.func @transform_86(%arg0: i32) -> (i32, i32) {
    %c0_i32 = arith.constant 0 : i32
    %c0_i32_0 = arith.constant 0 : i32
    %c0_i32_1 = arith.constant 0 : i32
    return %c0_i32, %c0_i32_0 : i32, i32
  }
  func.func @transform_87(%arg0: i32) -> (i32, i32) {
    %c0_i32 = arith.constant 0 : i32
    %c0_i32_0 = arith.constant 0 : i32
    %c0_i32_1 = arith.constant 0 : i32
    return %c0_i32, %c0_i32_0 : i32, i32
  }
  func.func @transform_88(%arg0: i32) -> (i32, i32) {
    %c0_i32 = arith.constant 0 : i32
    %c0_i32_0 = arith.constant 0 : i32
    %c0_i32_1 = arith.constant 0 : i32
    return %c0_i32, %c0_i32_0 : i32, i32
  }
  func.func @transform_89(%arg0: i32) -> (i32, i32) {
    %c0_i32 = arith.constant 0 : i32
    %c0_i32_0 = arith.constant 0 : i32
    %c0_i32_1 = arith.constant 0 : i32
    return %c0_i32, %c0_i32_0 : i32, i32
  }
  func.func @transform_90(%arg0: i32) -> (i32, i32) {
    %c0_i32 = arith.constant 0 : i32
    %c0_i32_0 = arith.constant 0 : i32
    %c0_i32_1 = arith.constant 0 : i32
    return %c0_i32, %c0_i32_0 : i32, i32
  }
  func.func @transform_91(%arg0: i32) -> (i32, i32) {
    %c0_i32 = arith.constant 0 : i32
    %c0_i32_0 = arith.constant 0 : i32
    %c0_i32_1 = arith.constant 0 : i32
    return %c0_i32, %c0_i32_0 : i32, i32
  }
  func.func @transform_92(%arg0: i32) -> (i32, i32) {
    %c0_i32 = arith.constant 0 : i32
    %c0_i32_0 = arith.constant 0 : i32
    %c0_i32_1 = arith.constant 0 : i32
    return %c0_i32, %c0_i32_0 : i32, i32
  }
  func.func @transform_93(%arg0: i32) -> (i32, i32) {
    %c0_i32 = arith.constant 0 : i32
    %c0_i32_0 = arith.constant 0 : i32
    %c0_i32_1 = arith.constant 0 : i32
    return %c0_i32, %c0_i32_0 : i32, i32
  }
  func.func @transform_94(%arg0: i32) -> (i32, i32) {
    %c0_i32 = arith.constant 0 : i32
    %c0_i32_0 = arith.constant 0 : i32
    %c0_i32_1 = arith.constant 0 : i32
    return %c0_i32, %c0_i32_0 : i32, i32
  }
  func.func @transform_95(%arg0: i32) -> (i32, i32) {
    %c0_i32 = arith.constant 0 : i32
    %c0_i32_0 = arith.constant 0 : i32
    %c0_i32_1 = arith.constant 0 : i32
    return %c0_i32, %c0_i32_0 : i32, i32
  }
  func.func @transform_96(%arg0: i32) -> (i32, i32) {
    %c0_i32 = arith.constant 0 : i32
    %c0_i32_0 = arith.constant 0 : i32
    %c0_i32_1 = arith.constant 0 : i32
    return %c0_i32, %c0_i32_0 : i32, i32
  }
  func.func @transform_97(%arg0: i32) -> (i32, i32) {
    %c0_i32 = arith.constant 0 : i32
    %c0_i32_0 = arith.constant 0 : i32
    %c0_i32_1 = arith.constant 0 : i32
    return %c0_i32, %c0_i32_0 : i32, i32
  }
  func.func @transform_98(%arg0: i32) -> (i32, i32) {
    %c0_i32 = arith.constant 0 : i32
    %c0_i32_0 = arith.constant 0 : i32
    return %arg0, %c0_i32 : i32, i32
  }
}

module attributes {stable_mosaic.version = 11 : i64} {
  func.func @_ref_kernel(%arg0: memref<32x4xf32, #tpu.memory_space<vmem>>, %arg1: memref<2x32xf32, #tpu.memory_space<vmem>>, %arg2: memref<1x10xf32, #tpu.memory_space<vmem>>, %arg3: memref<24x10xf32, #tpu.memory_space<vmem>>, %arg4: memref<1x16xf32, #tpu.memory_space<vmem>>, %arg5: memref<4x16xf32, #tpu.memory_space<vmem>>, %arg6: memref<1x16xf32, #tpu.memory_space<vmem>>, %arg7: memref<1x16xf32, #tpu.memory_space<vmem>>, %arg8: memref<1x24xf32, #tpu.memory_space<vmem>>, %arg9: memref<24x24xf32, #tpu.memory_space<vmem>>, %arg10: memref<1x24xf32, #tpu.memory_space<vmem>>, %arg11: memref<16x24xf32, #tpu.memory_space<vmem>>, %arg12: memref<1x1xf32, #tpu.memory_space<vmem>>, %arg13: memref<1x1xf32, #tpu.memory_space<vmem>>, %arg14: memref<1x24xf32, #tpu.memory_space<vmem>>, %arg15: memref<1x24xf32, #tpu.memory_space<vmem>>, %arg16: memref<24x24xf32, #tpu.memory_space<vmem>>, %arg17: memref<24x24xf32, #tpu.memory_space<vmem>>, %arg18: memref<1x1xf32, #tpu.memory_space<vmem>>, %arg19: memref<1x1xf32, #tpu.memory_space<vmem>>, %arg20: memref<1x24xf32, #tpu.memory_space<vmem>>, %arg21: memref<1x24xf32, #tpu.memory_space<vmem>>, %arg22: memref<24x24xf32, #tpu.memory_space<vmem>>, %arg23: memref<24x24xf32, #tpu.memory_space<vmem>>, %arg24: memref<2x24xf32, #tpu.memory_space<vmem>>, %arg25: memref<2x10xf32, #tpu.memory_space<vmem>>) attributes {dimension_semantics = [], scalar_prefetch = 0 : i64, scratch_operands = 0 : i64, tpu.core_type = #tpu.core_type<tc>} {
    %c0 = arith.constant 0 : index
    %c0_0 = arith.constant 0 : index
    %0 = vector.load %arg0[%c0, %c0_0] : memref<32x4xf32, #tpu.memory_space<vmem>>, vector<32x4xf32>
    %c0_1 = arith.constant 0 : index
    %c0_2 = arith.constant 0 : index
    %1 = vector.load %arg5[%c0_1, %c0_2] : memref<4x16xf32, #tpu.memory_space<vmem>>, vector<4x16xf32>
    %cst = arith.constant dense<0.000000e+00> : vector<32x16xf32>
    %2 = tpu.matmul %0, %1, %cst {dimension_numbers = #tpu.dot_dimension_numbers<[1], [0], [0], [1], [0, 0, 1, 1], [], []>} : vector<32x4xf32>, vector<4x16xf32>, vector<32x16xf32> -> vector<32x16xf32>
    %c0_3 = arith.constant 0 : index
    %c0_4 = arith.constant 0 : index
    %3 = vector.load %arg4[%c0_3, %c0_4] : memref<1x16xf32, #tpu.memory_space<vmem>>, vector<1x16xf32>
    %4 = vector.broadcast %3 : vector<1x16xf32> to vector<32x16xf32>
    %5 = arith.addf %2, %4 : vector<32x16xf32>
    %cst_5 = arith.constant 0.000000e+00 : f32
    %6 = vector.broadcast %cst_5 : f32 to vector<32x16xf32>
    %7 = arith.maximumf %5, %6 : vector<32x16xf32>
    %c0_6 = arith.constant 0 : index
    %c0_7 = arith.constant 0 : index
    %8 = vector.load %arg7[%c0_6, %c0_7] : memref<1x16xf32, #tpu.memory_space<vmem>>, vector<1x16xf32>
    %c0_8 = arith.constant 0 : index
    %c0_9 = arith.constant 0 : index
    %9 = vector.load %arg6[%c0_8, %c0_9] : memref<1x16xf32, #tpu.memory_space<vmem>>, vector<1x16xf32>
    %cst_10 = arith.constant dense<0.000000e+00> : vector<32xf32>
    %10 = vector.multi_reduction <add>, %7, %cst_10 [1] : vector<32x16xf32> to vector<32xf32>
    %11 = vector.shape_cast %10 : vector<32xf32> to vector<32x1xf32>
    %cst_11 = arith.constant 1.600000e+01 : f32
    %12 = vector.broadcast %cst_11 : f32 to vector<32x1xf32>
    %13 = arith.divf %11, %12 : vector<32x1xf32>
    %14 = vector.broadcast %13 : vector<32x1xf32> to vector<32x16xf32>
    %15 = arith.subf %7, %14 : vector<32x16xf32>
    %16 = arith.mulf %15, %15 : vector<32x16xf32>
    %cst_12 = arith.constant dense<0.000000e+00> : vector<32xf32>
    %17 = vector.multi_reduction <add>, %16, %cst_12 [1] : vector<32x16xf32> to vector<32xf32>
    %18 = vector.shape_cast %17 : vector<32xf32> to vector<32x1xf32>
    %cst_13 = arith.constant 1.600000e+01 : f32
    %19 = vector.broadcast %cst_13 : f32 to vector<32x1xf32>
    %20 = arith.divf %18, %19 : vector<32x1xf32>
    %cst_14 = arith.constant 9.99999974E-6 : f32
    %21 = vector.broadcast %cst_14 : f32 to vector<32x1xf32>
    %22 = arith.addf %20, %21 : vector<32x1xf32>
    %23 = math.rsqrt %22 : vector<32x1xf32>
    %24 = vector.broadcast %23 : vector<32x1xf32> to vector<32x16xf32>
    %25 = arith.mulf %15, %24 : vector<32x16xf32>
    %26 = vector.broadcast %8 : vector<1x16xf32> to vector<32x16xf32>
    %27 = arith.mulf %25, %26 : vector<32x16xf32>
    %28 = vector.broadcast %9 : vector<1x16xf32> to vector<32x16xf32>
    %29 = arith.addf %27, %28 : vector<32x16xf32>
    %c0_15 = arith.constant 0 : index
    %c0_16 = arith.constant 0 : index
    %30 = vector.load %arg11[%c0_15, %c0_16] : memref<16x24xf32, #tpu.memory_space<vmem>>, vector<16x24xf32>
    %cst_17 = arith.constant dense<0.000000e+00> : vector<32x24xf32>
    %31 = tpu.matmul %29, %30, %cst_17 {dimension_numbers = #tpu.dot_dimension_numbers<[1], [0], [0], [1], [0, 0, 1, 1], [], []>} : vector<32x16xf32>, vector<16x24xf32>, vector<32x24xf32> -> vector<32x24xf32>
    %c0_18 = arith.constant 0 : index
    %c0_19 = arith.constant 0 : index
    %32 = vector.load %arg10[%c0_18, %c0_19] : memref<1x24xf32, #tpu.memory_space<vmem>>, vector<1x24xf32>
    %33 = vector.broadcast %32 : vector<1x24xf32> to vector<32x24xf32>
    %34 = arith.addf %31, %33 : vector<32x24xf32>
    %c0_20 = arith.constant 0 : index
    %c0_21 = arith.constant 0 : index
    %35 = vector.load %arg16[%c0_20, %c0_21] : memref<24x24xf32, #tpu.memory_space<vmem>>, vector<24x24xf32>
    %cst_22 = arith.constant dense<0.000000e+00> : vector<32x24xf32>
    %36 = tpu.matmul %34, %35, %cst_22 {dimension_numbers = #tpu.dot_dimension_numbers<[1], [0], [0], [1], [0, 0, 1, 1], [], []>} : vector<32x24xf32>, vector<24x24xf32>, vector<32x24xf32> -> vector<32x24xf32>
    %c0_23 = arith.constant 0 : index
    %c0_24 = arith.constant 0 : index
    %37 = vector.load %arg14[%c0_23, %c0_24] : memref<1x24xf32, #tpu.memory_space<vmem>>, vector<1x24xf32>
    %38 = vector.broadcast %37 : vector<1x24xf32> to vector<32x24xf32>
    %39 = arith.addf %36, %38 : vector<32x24xf32>
    %c0_25 = arith.constant 0 : index
    %c0_26 = arith.constant 0 : index
    %40 = vector.load %arg12[%c0_25, %c0_26] : memref<1x1xf32, #tpu.memory_space<vmem>>, vector<1x1xf32>
    %cst_27 = arith.constant 0.000000e+00 : f32
    %41 = vector.broadcast %cst_27 : f32 to vector<32x24xf32>
    %42 = arith.cmpf ogt, %39, %41 : vector<32x24xf32>
    %43 = vector.broadcast %40 : vector<1x1xf32> to vector<32x24xf32>
    %44 = arith.mulf %39, %43 : vector<32x24xf32>
    %45 = arith.select %42, %39, %44 : vector<32x24xi1>, vector<32x24xf32>
    %c0_28 = arith.constant 0 : index
    %c0_29 = arith.constant 0 : index
    %46 = vector.load %arg17[%c0_28, %c0_29] : memref<24x24xf32, #tpu.memory_space<vmem>>, vector<24x24xf32>
    %cst_30 = arith.constant dense<0.000000e+00> : vector<32x24xf32>
    %47 = tpu.matmul %45, %46, %cst_30 {dimension_numbers = #tpu.dot_dimension_numbers<[1], [0], [0], [1], [0, 0, 1, 1], [], []>} : vector<32x24xf32>, vector<24x24xf32>, vector<32x24xf32> -> vector<32x24xf32>
    %c0_31 = arith.constant 0 : index
    %c0_32 = arith.constant 0 : index
    %48 = vector.load %arg15[%c0_31, %c0_32] : memref<1x24xf32, #tpu.memory_space<vmem>>, vector<1x24xf32>
    %49 = vector.broadcast %48 : vector<1x24xf32> to vector<32x24xf32>
    %50 = arith.addf %47, %49 : vector<32x24xf32>
    %51 = arith.addf %34, %50 : vector<32x24xf32>
    %c0_33 = arith.constant 0 : index
    %c0_34 = arith.constant 0 : index
    %52 = vector.load %arg13[%c0_33, %c0_34] : memref<1x1xf32, #tpu.memory_space<vmem>>, vector<1x1xf32>
    %cst_35 = arith.constant 0.000000e+00 : f32
    %53 = vector.broadcast %cst_35 : f32 to vector<32x24xf32>
    %54 = arith.cmpf ogt, %51, %53 : vector<32x24xf32>
    %55 = vector.broadcast %52 : vector<1x1xf32> to vector<32x24xf32>
    %56 = arith.mulf %51, %55 : vector<32x24xf32>
    %57 = arith.select %54, %51, %56 : vector<32x24xi1>, vector<32x24xf32>
    %c0_36 = arith.constant 0 : index
    %c0_37 = arith.constant 0 : index
    %58 = vector.load %arg22[%c0_36, %c0_37] : memref<24x24xf32, #tpu.memory_space<vmem>>, vector<24x24xf32>
    %cst_38 = arith.constant dense<0.000000e+00> : vector<32x24xf32>
    %59 = tpu.matmul %57, %58, %cst_38 {dimension_numbers = #tpu.dot_dimension_numbers<[1], [0], [0], [1], [0, 0, 1, 1], [], []>} : vector<32x24xf32>, vector<24x24xf32>, vector<32x24xf32> -> vector<32x24xf32>
    %c0_39 = arith.constant 0 : index
    %c0_40 = arith.constant 0 : index
    %60 = vector.load %arg20[%c0_39, %c0_40] : memref<1x24xf32, #tpu.memory_space<vmem>>, vector<1x24xf32>
    %61 = vector.broadcast %60 : vector<1x24xf32> to vector<32x24xf32>
    %62 = arith.addf %59, %61 : vector<32x24xf32>
    %c0_41 = arith.constant 0 : index
    %c0_42 = arith.constant 0 : index
    %63 = vector.load %arg18[%c0_41, %c0_42] : memref<1x1xf32, #tpu.memory_space<vmem>>, vector<1x1xf32>
    %cst_43 = arith.constant 0.000000e+00 : f32
    %64 = vector.broadcast %cst_43 : f32 to vector<32x24xf32>
    %65 = arith.cmpf ogt, %62, %64 : vector<32x24xf32>
    %66 = vector.broadcast %63 : vector<1x1xf32> to vector<32x24xf32>
    %67 = arith.mulf %62, %66 : vector<32x24xf32>
    %68 = arith.select %65, %62, %67 : vector<32x24xi1>, vector<32x24xf32>
    %c0_44 = arith.constant 0 : index
    %c0_45 = arith.constant 0 : index
    %69 = vector.load %arg23[%c0_44, %c0_45] : memref<24x24xf32, #tpu.memory_space<vmem>>, vector<24x24xf32>
    %cst_46 = arith.constant dense<0.000000e+00> : vector<32x24xf32>
    %70 = tpu.matmul %68, %69, %cst_46 {dimension_numbers = #tpu.dot_dimension_numbers<[1], [0], [0], [1], [0, 0, 1, 1], [], []>} : vector<32x24xf32>, vector<24x24xf32>, vector<32x24xf32> -> vector<32x24xf32>
    %c0_47 = arith.constant 0 : index
    %c0_48 = arith.constant 0 : index
    %71 = vector.load %arg21[%c0_47, %c0_48] : memref<1x24xf32, #tpu.memory_space<vmem>>, vector<1x24xf32>
    %72 = vector.broadcast %71 : vector<1x24xf32> to vector<32x24xf32>
    %73 = arith.addf %70, %72 : vector<32x24xf32>
    %74 = arith.addf %57, %73 : vector<32x24xf32>
    %c0_49 = arith.constant 0 : index
    %c0_50 = arith.constant 0 : index
    %75 = vector.load %arg19[%c0_49, %c0_50] : memref<1x1xf32, #tpu.memory_space<vmem>>, vector<1x1xf32>
    %cst_51 = arith.constant 0.000000e+00 : f32
    %76 = vector.broadcast %cst_51 : f32 to vector<32x24xf32>
    %77 = arith.cmpf ogt, %74, %76 : vector<32x24xf32>
    %78 = vector.broadcast %75 : vector<1x1xf32> to vector<32x24xf32>
    %79 = arith.mulf %74, %78 : vector<32x24xf32>
    %80 = arith.select %77, %74, %79 : vector<32x24xi1>, vector<32x24xf32>
    %c0_52 = arith.constant 0 : index
    %c0_53 = arith.constant 0 : index
    %81 = vector.load %arg9[%c0_52, %c0_53] : memref<24x24xf32, #tpu.memory_space<vmem>>, vector<24x24xf32>
    %cst_54 = arith.constant dense<0.000000e+00> : vector<32x24xf32>
    %82 = tpu.matmul %80, %81, %cst_54 {dimension_numbers = #tpu.dot_dimension_numbers<[1], [0], [0], [1], [0, 0, 1, 1], [], []>} : vector<32x24xf32>, vector<24x24xf32>, vector<32x24xf32> -> vector<32x24xf32>
    %c0_55 = arith.constant 0 : index
    %c0_56 = arith.constant 0 : index
    %83 = vector.load %arg8[%c0_55, %c0_56] : memref<1x24xf32, #tpu.memory_space<vmem>>, vector<1x24xf32>
    %84 = vector.broadcast %83 : vector<1x24xf32> to vector<32x24xf32>
    %85 = arith.addf %82, %84 : vector<32x24xf32>
    %c0_57 = arith.constant 0 : index
    %c0_58 = arith.constant 0 : index
    %86 = vector.load %arg1[%c0_57, %c0_58] : memref<2x32xf32, #tpu.memory_space<vmem>>, vector<2x32xf32>
    %cst_59 = arith.constant dense<0.000000e+00> : vector<2x24xf32>
    %87 = tpu.matmul %86, %85, %cst_59 {dimension_numbers = #tpu.dot_dimension_numbers<[1], [0], [0], [1], [0, 0, 1, 1], [], []>} : vector<2x32xf32>, vector<32x24xf32>, vector<2x24xf32> -> vector<2x24xf32>
    %c0_60 = arith.constant 0 : index
    %c0_61 = arith.constant 0 : index
    %88 = vector.load %arg3[%c0_60, %c0_61] : memref<24x10xf32, #tpu.memory_space<vmem>>, vector<24x10xf32>
    %cst_62 = arith.constant dense<0.000000e+00> : vector<2x10xf32>
    %89 = tpu.matmul %87, %88, %cst_62 {dimension_numbers = #tpu.dot_dimension_numbers<[1], [0], [0], [1], [0, 0, 1, 1], [], []>} : vector<2x24xf32>, vector<24x10xf32>, vector<2x10xf32> -> vector<2x10xf32>
    %c0_63 = arith.constant 0 : index
    %c0_64 = arith.constant 0 : index
    %90 = vector.load %arg2[%c0_63, %c0_64] : memref<1x10xf32, #tpu.memory_space<vmem>>, vector<1x10xf32>
    %91 = vector.broadcast %90 : vector<1x10xf32> to vector<2x10xf32>
    %92 = arith.addf %89, %91 : vector<2x10xf32>
    %c0_65 = arith.constant 0 : index
    %c0_66 = arith.constant 0 : index
    %93 = vector.load %arg24[%c0_65, %c0_66] : memref<2x24xf32, #tpu.memory_space<vmem>>, vector<2x24xf32>
    tpu.vector_store %arg24[%c0_65, %c0_66], %87 {strides = array<i32>} : memref<2x24xf32, #tpu.memory_space<vmem>>, vector<2x24xf32>,
    %c0_67 = arith.constant 0 : index
    %c0_68 = arith.constant 0 : index
    %94 = vector.load %arg25[%c0_67, %c0_68] : memref<2x10xf32, #tpu.memory_space<vmem>>, vector<2x10xf32>
    tpu.vector_store %arg25[%c0_67, %c0_68], %92 {strides = array<i32>} : memref<2x10xf32, #tpu.memory_space<vmem>>, vector<2x10xf32>,
    return
  }
}

</mosaic_0001>

<bundles_post_ra>
// kernel: spexplus_forward.2
= control target key start
LH: loop header
LB: loop body
LE: loop exit
PB: predicated region body
PF: predicated region fallthrough
CT: control target
= control target key end

     0   :  { %s1789_s0 = inlined_call_operand.vmem [shape: f32[32,4], index: 0, kind: input, shape index: {}]   ;;  %s1790_s1 = inlined_call_operand.vmem [shape: f32[2,32], index: 1, kind: input, shape index: {}]   ;;  %s1791_s2 = inlined_call_operand.vmem [shape: f32[1,10], index: 2, kind: input, shape index: {}]   ;;  %s1792_s3 = inlined_call_operand.vmem [shape: f32[24,10], index: 3, kind: input, shape index: {}]   ;;  %s1793_s4 = inlined_call_operand.vmem [shape: f32[1,16], index: 4, kind: input, shape index: {}]   ;;  %s1794_s5 = inlined_call_operand.vmem [shape: f32[4,16], index: 5, kind: input, shape index: {}]   ;;  %s1795_s6 = inlined_call_operand.vmem [shape: f32[1,16], index: 6, kind: input, shape index: {}]   ;;  %s1796_s7 = inlined_call_operand.vmem [shape: f32[1,16], index: 7, kind: input, shape index: {}]   ;;  %s1797_s8 = inlined_call_operand.vmem [shape: f32[1,24], index: 8, kind: input, shape index: {}]   ;;  %s1798_s9 = inlined_call_operand.vmem [shape: f32[24,24], index: 9, kind: input, shape index: {}]   ;;  %s1799_s10 = inlined_call_operand.vmem [shape: f32[1,24], index: 10, kind: input, shape index: {}]   ;;  %s1800_s11 = inlined_call_operand.vmem [shape: f32[16,24], index: 11, kind: input, shape index: {}]   ;;  %s1801_s12 = inlined_call_operand.<no memory space> [shape: f32[1,1], index: 12, kind: input, shape index: {}]   ;;  %s1802_s14 = inlined_call_operand.vmem [shape: f32[1,24], index: 14, kind: input, shape index: {}]   ;;  %s1803_s15 = inlined_call_operand.vmem [shape: f32[1,24], index: 15, kind: input, shape index: {}]   ;;  %s1804_s16 = inlined_call_operand.vmem [shape: f32[24,24], index: 16, kind: input, shape index: {}]   ;;  %s1805_s17 = inlined_call_operand.vmem [shape: f32[24,24], index: 17, kind: input, shape index: {}]   ;;  %s1806_s20 = inlined_call_operand.vmem [shape: f32[1,24], index: 20, kind: input, shape index: {}]   ;;  %s1807_s21 = inlined_call_operand.vmem [shape: f32[1,24], index: 21, kind: input, shape index: {}]   ;;  %s1808_s22 = inlined_call_operand.vmem [shape: f32[24,24], index: 22, kind: input, shape index: {}]   ;;  %s1809_s23 = inlined_call_operand.vmem [shape: f32[24,24], index: 23, kind: input, shape index: {}]   ;;  %s1810_s24 = inlined_call_operand.vmem [shape: f32[2,24], index: 24, kind: output, shape index: {0}]   ;;  %s1811_s25 = inlined_call_operand.hbm [shape: f32[2,10], index: 25, kind: output, shape index: {1}]   ;;  %s1812_s13 = inlined_call_operand.<no memory space> [shape: f32[1,1], index: 13, kind: input, shape index: {}]   ;;  %s1813_s18 = inlined_call_operand.<no memory space> [shape: f32[1,1], index: 18, kind: input, shape index: {}]   ;;  %s1814_s19 = inlined_call_operand.<no memory space> [shape: f32[1,1], index: 19, kind: input, shape index: {}]  }
   0x1   :  { %1818 = sst [smem:[#allocation9_spill]] %s1789_s0  ;;  %v31_v0 = vstv %s1801_s12  ;;  %v33_v1 = vstv %s1812_s13  ;;  %v35_v2 = vstv %s1813_s18  ;;  %v37_v3 = vstv %s1814_s19 }
   0x2   :  { %1819 = sst [smem:[#allocation10_spill]] %s1790_s1  ;;  %32 = vst [vmem:[#allocation2] sm:$0x1] %v31_v0  ;;  %34 = vst [vmem:[#allocation3] sm:$0x1] %v33_v1 }
   0x3   :  { %1820 = sst [smem:[#allocation11_spill]] %s1791_s2  ;;  %36 = vst [vmem:[#allocation4] sm:$0x1] %v35_v2  ;;  %38 = vst [vmem:[#allocation5] sm:$0x1] %v37_v3 }
   0x4   :  { %1821 = sst [smem:[#allocation12_spill]] %s1792_s3 }
   0x5   :  { %1822 = sst [smem:[#allocation13_spill]] %s1793_s4 }
   0x6   :  { %1823 = sst [smem:[#allocation14_spill]] %s1794_s5 }
   0x7   :  { %1824 = sst [smem:[#allocation15_spill]] %s1795_s6 }
   0x8   :  { %1825 = sst [smem:[#allocation16_spill]] %s1796_s7 }
   0x9   :  { %1826 = sst [smem:[#allocation17_spill]] %s1797_s8 }
   0xa   :  { %1827 = sst [smem:[#allocation18_spill]] %s1798_s9 }
   0xb   :  { %s1828_s4 = sld [smem:[#allocation14_spill]]  ;;  %vm113_vm0 = vcmask 1043456   ;;  %s1829_s13 = sld [smem:[#allocation9_spill]]  ;;  %vm100_vm1 = vcmask 31744  }
  0x11   :  { %v92_v4 = vld [vmem:[%s1828_s4] sm:$0xf]  ;;  %v89_v6 = vld [vmem:[%s1829_s13 + $0x8] sm:$0xff]  ;;  %v90_v7 = vld [vmem:[%s1829_s13 + $0x10] sm:$0xff] }
  0x12   :  { %v88_v5 = vld [vmem:[%s1829_s13] sm:$0xff]  ;;  %1300 = vmatprep.subr.msk.mxu0 %vm113_vm0, %v92_v4 }
  0x13   :  { %1302 = vmatprep.mubr.msk.f32.mxu0 %vm100_vm1, %v88_v5 }
  0x14   :  { %39 = vsyncpa [#allocation7], 0  ;;  %1301 = vmatpush3.msk.msra.mxu0 %vm113_vm0, %v92_v4  ;;  %v91_v8 = vld [vmem:[%s1829_s13 + $0x18] sm:$0xff]  ;;  %s1830_s30 = sld [smem:[#allocation13_spill]]  ;;  %vm208_vm2 = vcmask 130048   ;;  %v282_v46 = vld [vmem:[%s1800_s11] sm:$0xff] }
  0x15   :  { %1303 = vmatmul.mubr.msk.f32.vlgmr.msra.gmra.mrb[0].mxu0 %vm100_vm1, %v89_v6  ;;  %v283_v47 = vld [vmem:[%s1800_s11 + $0x8] sm:$0xff]  ;;  %v388_v49 = vld [vmem:[%s1804_s16] sm:$0xff]  ;;  %s1831_s13 = sld [smem:[#allocation16_spill]]  ;;  %s1832_s19 = sld [smem:[#allocation15_spill]]  ;;  %vm398_vm3 = vcmask 195584  }
  0x16   :  { %1305 = vmatprep.mubr.msk.f32.mxu0 %vm100_vm1, %v90_v7  ;;  %v1398_v48 = vpack.c.bf16 %v283_v47, %v282_v46  ;;  %v389_v50 = vld [vmem:[%s1804_s16 + $0x8] sm:$0xff]  ;;  %s1833_s29 = sld [smem:[#allocation18_spill]]  ;;  %s1834_s26 = sld [smem:[#allocation12_spill]] }
  0x17   :  { %v1402_v51 = vpack.c.bf16 %v389_v50, %v388_v49  ;;  %s1835_s12 = sld [smem:[#allocation17_spill]]  ;;  %s1474_s5 = smov [#allocation6]  }
  0x18   :  { %1399 = vmatprep.subr.bf16.mxu1 %v1398_v48  ;;  %s1190_s0 = sshll.u32 %s1474_s5, 4  ;;  %s1191_s0 = int_to_ptr.vmem [resolvable:$true] %s1190_s0 }
  0x19   :  { %1306 = vmatmul.mubr.msk.f32.gmra.mrb[2].mxu0 %vm100_vm1, %v91_v8  ;;  %1401 = vmatpush3.bf16.msra.mxu1 %v1398_v48  ;;  %p1451_p1 = scmp.lt.s32.totalorder %s1191_s0, %s1191_s0 }
  0x1a   :  { %v1200_v9 = vld [vmem:[%s1830_s30] ss:$0 sm:$0xff]  ;;  %1403 = vmatprep.subr.bf16.mxu0 %v1402_v51 }
  0x1b   :  { %1405 = vmatpush3.bf16.msra.mxu0 %v1402_v51  ;;  %v1206_v1 = vld [vmem:[%s1831_s13] ss:$0 sm:$0xff] }
  0x1c   :  { %v1207_v3 = vld [vmem:[%s1832_s19] ss:$0 sm:$0xff]  ;;  %s1837_s19 = sld [smem:[#allocation11_spill]] }
  0xe8   :  { %v1304_v10 = vpop.f32.mrb[0].mxu0 }
  0xe9   :  { %v183_v11 = vpop.f32.mrb[1].mxu0  ;;  %v189_v12 = vadd.f32 %v1304_v10, %v1200_v9 }
  0xea   :  { %v184_v13 = vadd.f32 %v1200_v9, %v183_v11 }
  0xeb   :  { %v203_v17 = vmax.f32 %v189_v12, 0.0 }
  0xec   :  { %v202_v14 = vmax.f32 %v184_v13, 0.0  ;;  %v1307_v15 = vpop.f32.mrb[2].mxu0 }
  0xed   :  { %v193_v16 = vpop.f32.mrb[3].mxu0  ;;  %v199_v18 = vadd.f32 %v1307_v15, %v1200_v9  ;;  %v212_v24 = vsel %vm208_vm2, %v203_v17, 0.0 }
  0xee   :  { %v194_v19 = vadd.f32 %v1200_v9, %v193_v16  ;;  %v209_v20 = vsel %vm208_vm2, %v202_v14, 0.0 }
  0xef   :  { %210 = vadd.xlane.f32.xlu0 %v209_v20  ;;  %v205_v22 = vmax.f32 %v199_v18, 0.0  ;;  %v390_v18 = vld [vmem:[%s1804_s16 + $0x10] sm:$0xff]  ;;  %v1470_v20 = vmov 0  }
  0xf0   :  { %v204_v21 = vmax.f32 %v194_v19, 0.0  ;;  %1322 = vmatprep.subr.mxu0 %v390_v18  ;;  %v1218_v19 = vld [vmem:[#allocation2] ss:$0 sm:$0xff]  ;;  %1436 = vset.pattern.permute.xlu0 %v1470_v20 }
  0xf1   :  { %v218_v25 = vsel %vm208_vm2, %v205_v22, 0.0  ;;  %1323 = vmatpush3.msra.mxu0 %v390_v18  ;;  %1437 = vset.pattern.permute.xlu1 %v1470_v20  ;;  %v781_v18 = vld [vmem:[%s1809_s23 + $0x8] sm:$0xff]  ;;  %v782_v20 = vld [vmem:[%s1809_s23 + $0x10] sm:$0xff] }
  0xf2   :  { %v215_v23 = vsel %vm208_vm2, %v204_v21, 0.0 }
  0xf3   :  { %216 = vadd.xlane.f32.xlu1 %v215_v23  ;;  %213 = vadd.xlane.f32.xlu0 %v212_v24 }
  0xf7   :  { %219 = vadd.xlane.f32.xlu1 %v218_v25 }
 0x17c   :  { %v211_v26 = vpop.xlane.xlu0 %210 }
 0x17d   :  { %v222_v27 = vmul.f32 0.0625, %v211_v26 }
 0x17f   :  { %v226_v28 = vsub.f32 %v202_v14, %v222_v27 }
 0x180   :  { %v217_v29 = vpop.xlane.xlu1 %216  ;;  %v214_v30 = vpop.xlane.xlu0 %213 }
 0x181   :  { %v224_v31 = vmul.f32 0.0625, %v217_v29  ;;  %v223_v32 = vmul.f32 0.0625, %v214_v30  ;;  %v230_v33 = vmul.f32 %v226_v28, %v226_v28  ;;  %v518_v30 = vld [vmem:[%s1805_s17] sm:$0xff] }
 0x183   :  { %v228_v34 = vsub.f32 %v204_v21, %v224_v31  ;;  %v227_v35 = vsub.f32 %v203_v17, %v223_v32  ;;  %v234_v36 = vsel %vm208_vm2, %v230_v33, 0.0  ;;  %v1208_v21 = vld [vmem:[%s1799_s10] ss:$0 sm:$0xff]  ;;  %v519_v31 = vld [vmem:[%s1805_s17 + $0x8] sm:$0xff]  ;;  %v520_v33 = vld [vmem:[%s1805_s17 + $0x10] sm:$0xff] }
 0x184   :  { %v220_v37 = vpop.xlane.xlu1 %219  ;;  %235 = vadd.xlane.f32.xlu0 %v234_v36  ;;  %v1406_v32 = vpack.c.bf16 %v519_v31, %v518_v30  ;;  %v1236_v36 = vld [vmem:[#allocation5] ss:$0 sm:$0xff] }
 0x185   :  { %v225_v38 = vmul.f32 0.0625, %v220_v37  ;;  %v232_v39 = vmul.f32 %v228_v34, %v228_v34  ;;  %v231_v40 = vmul.f32 %v227_v35, %v227_v35  ;;  %v1213_v37 = vld [vmem:[%s1802_s14] ss:$0 sm:$0xff] }
 0x186   :  { %1407 = vmatprep.subr.bf16.mxu1 %v1406_v32 }
 0x187   :  { %v229_v41 = vsub.f32 %v205_v22, %v225_v38  ;;  %v240_v42 = vsel %vm208_vm2, %v232_v39, 0.0  ;;  %v237_v43 = vsel %vm208_vm2, %v231_v40, 0.0 }
 0x188   :  { %241 = vadd.xlane.f32.xlu0 %v240_v42  ;;  %238 = vadd.xlane.f32.xlu1 %v237_v43 }
 0x189   :  { %v233_v44 = vmul.f32 %v229_v41, %v229_v41 }
 0x18b   :  { %v243_v45 = vsel %vm208_vm2, %v233_v44, 0.0 }
 0x18c   :  { %244 = vadd.xlane.f32.xlu1 %v243_v45 }
 0x19e   :  { %507 = vperm.xlu0 %1436, %v1218_v19  }
 0x211   :  { %v236_v52 = vpop.xlane.xlu0 %235 }
 0x212   :  { %v246_v53 = vmul.f32 0.0625, %v236_v52 }
 0x214   :  { %v250_v54 = vadd.f32 1e-05, %v246_v53 }
 0x215   :  { %v239_v55 = vpop.xlane.xlu1 %238  ;;  %v242_v56 = vpop.xlane.xlu0 %241 }
 0x216   :  { %1438 = vrsqrt.f32 %v250_v54  ;;  %v247_v57 = vmul.f32 0.0625, %v239_v55  ;;  %v248_v58 = vmul.f32 0.0625, %v242_v56  ;;  %v651_v55 = vld [vmem:[%s1808_s22] sm:$0xff]  ;;  %v652_v56 = vld [vmem:[%s1808_s22 + $0x8] sm:$0xff] }
 0x218   :  { %v251_v59 = vadd.f32 1e-05, %v247_v57  ;;  %v252_v60 = vadd.f32 1e-05, %v248_v58  ;;  %v1410_v57 = vpack.c.bf16 %v652_v56, %v651_v55  ;;  %v653_v58 = vld [vmem:[%s1808_s22 + $0x10] sm:$0xff] }
 0x219   :  { %v245_v61 = vpop.xlane.xlu1 %244 }
 0x21a   :  { %1440 = vrsqrt.f32 %v251_v59  ;;  %v249_v62 = vmul.f32 0.0625, %v245_v61  ;;  %1411 = vmatprep.subr.bf16.mxu0 %v1410_v57  ;;  %v1219_v59 = vld [vmem:[%s1803_s15] ss:$0 sm:$0xff]  ;;  %s1836_s15 = sld [smem:[#allocation10_spill]] }
 0x21b   :  { %1442 = vrsqrt.f32 %v252_v60 }
 0x21c   :  { %v253_v63 = vadd.f32 1e-05, %v249_v62 }
 0x21d   :  { %v508_v39 = vpop.permute.xlu0 %507 }
 0x21e   :  { %1444 = vrsqrt.f32 %v253_v63 }
 0x220   :  { %v1439_v0 = vpop.eup %1438 }
 0x221   :  { %v258_v2 = vmul.f32 %v1439_v0, %v226_v28 }
 0x223   :  { %v268_v4 = vmul.f32 %v1206_v1, %v258_v2 }
 0x224   :  { %v1441_v5 = vpop.eup %1440 }
 0x225   :  { %v1443_v6 = vpop.eup %1442  ;;  %v278_v7 = vadd.f32 %v1207_v3, %v268_v4  ;;  %v259_v8 = vmul.f32 %v1441_v5, %v227_v35  ;;  %v1230_v35 = vld [vmem:[#allocation4] ss:$0 sm:$0xff] }
 0x226   :  { %v260_v9 = vmul.f32 %v1443_v6, %v228_v34  ;;  %v1224_v34 = vld [vmem:[#allocation3] ss:$0 sm:$0xff] }
 0x227   :  { %1312 = vmatprep.mubr.msk.f32.mxu1 %vm208_vm2, %v278_v7  ;;  %v269_v10 = vmul.f32 %v1206_v1, %v259_v8  ;;  %640 = vperm.xlu1 %1437, %v1224_v34  }
 0x228   :  { %v1445_v11 = vpop.eup %1444  ;;  %v270_v12 = vmul.f32 %v1206_v1, %v260_v9 }
 0x229   :  { %v279_v13 = vadd.f32 %v1207_v3, %v269_v10  ;;  %v261_v14 = vmul.f32 %v1445_v11, %v229_v41 }
 0x22a   :  { %v280_v15 = vadd.f32 %v1207_v3, %v270_v12 }
 0x22b   :  { %1313 = vmatmul.mubr.msk.f32.vlgmr.msra.gmra.mrb[0].mxu1 %vm208_vm2, %v279_v13  ;;  %v271_v16 = vmul.f32 %v1206_v1, %v261_v14  ;;  %769 = vperm.xlu1 %1437, %v1230_v35  }
 0x22c   :  { %1315 = vmatprep.mubr.msk.f32.mxu1 %vm208_vm2, %v280_v15  ;;  %1409 = vmatpush3.bf16.msra.mxu1 %v1406_v32 }
 0x22d   :  { %v281_v17 = vadd.f32 %v1207_v3, %v271_v16  ;;  %1334 = vmatprep.subr.mxu1 %v520_v33 }
 0x22f   :  { %1316 = vmatmul.mubr.msk.f32.gmra.mrb[2].mxu1 %vm208_vm2, %v281_v17  ;;  %902 = vperm.xlu1 %1437, %v1236_v36   ;;  %v780_v17 = vld [vmem:[%s1809_s23] sm:$0xff] }
 0x230   :  { %1335 = vmatpush3.msra.mxu1 %v520_v33  ;;  %v1414_v19 = vpack.c.bf16 %v781_v18, %v780_v17  ;;  %v1020_v18 = vld [vmem:[%s1836_s15] sm:$0x3] }
 0x232   :  { %1415 = vmatprep.subr.bf16.mxu1 %v1414_v19 }
 0x2a6   :  { %v641_v1 = vpop.permute.xlu1 %640 }
 0x2fe   :  { %v1314_v22 = vpop.f32.mrb[0].mxu1 }
 0x2ff   :  { %v369_v23 = vpop.f32.mrb[1].mxu1  ;;  %v375_v25 = vadd.f32 %v1314_v22, %v1208_v21 }
 0x300   :  { %v1671_v24 = vadd.f32 %v1208_v21, %v369_v23 }
 0x302   :  { %v1317_v26 = vpop.f32.mrb[2].mxu1  ;;  %1324 = vmatprep.mubr.msk.f32.mxu0 %vm398_vm3, %v1671_v24 }
 0x303   :  { %v379_v27 = vpop.f32.mrb[3].mxu1  ;;  %1325 = vmatmul.mubr.msk.f32.vlgmr.msra.gmra.mrb[4].mxu0 %vm398_vm3, %v375_v25  ;;  %v1678_v29 = vadd.f32 %v1317_v26, %v1208_v21 }
 0x304   :  { %v1676_v28 = vadd.f32 %v1208_v21, %v379_v27  ;;  %1413 = vmatpush3.bf16.msra.mxu0 %v1410_v57  ;;  %v1225_v21 = vld [vmem:[%s1806_s20] ss:$0 sm:$0xff]  ;;  %s1446_s20 = scalar_lea.vmem %s1191_s0, 32 }
 0x305   :  { %1346 = vmatprep.subr.mxu0 %v653_v58  ;;  %p1447_p0 = scmp.ne.s32.totalorder %s1191_s0, %s1446_s20  ;;  %p1452_p2 = scmp.lt.s32.totalorder %s1446_s20, %s1446_s20 }
 0x306   :  { %1327 = vmatprep.mubr.msk.f32.mxu0 %vm398_vm3, %v1676_v28 }
 0x307   :  { %1328 = vmatmul.mubr.msk.f32.gmra.mrb[6].mxu0 %vm398_vm3, %v1678_v29  ;;  %p1453_p3 = por %p1452_p2, %p1451_p1 }
 0x308   :  { %1347 = vmatpush3.msra.mxu0 %v653_v58 }
 0x309   :  { %p1454_p4 = pnand %p1453_p3, %p1447_p0 }
 0x3d6   :  { %v1326_v38 = vpop.f32.mrb[4].mxu0 }
 0x3d7   :  { %v483_v40 = vadd.f32 %v1326_v38, %v1213_v37  ;;  %v477_v41 = vpop.f32.mrb[5].mxu0 }
 0x3d8   :  { %v478_v42 = vadd.f32 %v1213_v37, %v477_v41 }
 0x3d9   :  { %v511_v43 = vmul.f32 %v508_v39, %v483_v40  ;;  %vm498_vm4 = vcmp.gt.f32.partialorder %v483_v40, 0.0 }
 0x3da   :  { %vm497_vm5 = vcmp.gt.f32.partialorder %v478_v42, 0.0  ;;  %v510_v44 = vmul.f32 %v508_v39, %v478_v42  ;;  %v1329_v45 = vpop.f32.mrb[6].mxu0 }
 0x3db   :  { %v493_v46 = vadd.f32 %v1329_v45, %v1213_v37  ;;  %v487_v47 = vpop.f32.mrb[7].mxu0  ;;  %v515_v50 = vsel %vm498_vm4, %v483_v40, %v511_v43  ;;  %v914_v40 = vld [vmem:[%s1833_s29 + $0x8] sm:$0xff]  ;;  %v1231_v43 = vld [vmem:[%s1807_s21] ss:$0 sm:$0xff] }
 0x3dc   :  { %v488_v48 = vadd.f32 %v1213_v37, %v487_v47  ;;  %v514_v49 = vsel %vm497_vm5, %v478_v42, %v510_v44  ;;  %v915_v42 = vld [vmem:[%s1833_s29 + $0x10] sm:$0xff]  ;;  %vm1472_vm5 = vmmov 0  }
 0x3dd   :  { %v513_v51 = vmul.f32 %v508_v39, %v493_v46  ;;  %1336 = vmatprep.mubr.msk.f32.mxu1 %vm398_vm3, %v514_v49  ;;  %vm500_vm6 = vcmp.gt.f32.partialorder %v493_v46, 0.0 }
 0x3de   :  { %vm499_vm7 = vcmp.gt.f32.partialorder %v488_v48, 0.0  ;;  %v512_v52 = vmul.f32 %v508_v39, %v488_v48  ;;  %1337 = vmatmul.mubr.msk.f32.vlgmr.msra.gmra.mrb[4].mxu1 %vm398_vm3, %v515_v50  ;;  %v913_v39 = vld [vmem:[%s1833_s29] sm:$0xff] }
 0x3df   :  { %v517_v54 = vsel %vm500_vm6, %v493_v46, %v513_v51  ;;  %1417 = vmatpush3.bf16.msra.mxu1 %v1414_v19  ;;  %v1418_v41 = vpack.c.bf16 %v914_v40, %v913_v39  ;;  %vm1021_vm6 = vcmask 261120  }
 0x3e0   :  { %v516_v53 = vsel %vm499_vm7, %v488_v48, %v512_v52  ;;  %1358 = vmatprep.subr.mxu1 %v782_v20  ;;  %vm1178_vm7 = vcmask 189440  }
 0x3e1   :  { %1339 = vmatprep.mubr.msk.f32.mxu1 %vm398_vm3, %v516_v53  ;;  %1419 = vmatprep.subr.bf16.mxu0 %v1418_v41 }
 0x3e2   :  { %1340 = vmatmul.mubr.msk.f32.gmra.mrb[6].mxu1 %vm398_vm3, %v517_v54 }
 0x3e3   :  { %1359 = vmatpush3.msra.mxu1 %v782_v20 }
 0x4b1   :  { %v1338_v60 = vpop.f32.mrb[4].mxu1 }
 0x4b2   :  { %v612_v61 = vadd.f32 %v1338_v60, %v1219_v59  ;;  %v606_v62 = vpop.f32.mrb[5].mxu1 }
 0x4b3   :  { %v607_v63 = vadd.f32 %v1219_v59, %v606_v62 }
 0x4b4   :  { %v626_v0 = vadd.f32 %v612_v61, %v375_v25  ;;  %v770_v25 = vpop.permute.xlu1 %769 }
 0x4b5   :  { %v625_v2 = vadd.f32 %v607_v63, %v1671_v24  ;;  %v1341_v3 = vpop.f32.mrb[6].mxu1 }
 0x4b6   :  { %v644_v4 = vmul.f32 %v641_v1, %v626_v0  ;;  %v622_v5 = vadd.f32 %v1341_v3, %v1219_v59  ;;  %v616_v6 = vpop.f32.mrb[7].mxu1  ;;  %vm631_vm8 = vcmp.gt.f32.partialorder %v626_v0, 0.0  ;;  %v1095_v3 = vld [vmem:[%s1834_s26] sm:$0xff] }
 0x4b7   :  { %v643_v7 = vmul.f32 %v641_v1, %v625_v2  ;;  %v617_v8 = vadd.f32 %v1219_v59, %v616_v6  ;;  %vm630_vm9 = vcmp.gt.f32.partialorder %v625_v2, 0.0  ;;  %v1097_v6 = vld [vmem:[%s1834_s26 + $0x10] sm:$0xff] }
 0x4b8   :  { %v628_v9 = vadd.f32 %v622_v5, %v1678_v29  ;;  %v648_v12 = vsel %vm631_vm8, %v626_v0, %v644_v4  ;;  %v903_v49 = vpop.permute.xlu1 %902  ;;  %v1096_v4 = vld [vmem:[%s1834_s26 + $0x8] sm:$0xff]  ;;  %vm1180_vm8 = vcmask 74752  }
 0x4b9   :  { %v627_v10 = vadd.f32 %v617_v8, %v1676_v28  ;;  %v647_v11 = vsel %vm630_vm9, %v625_v2, %v643_v7  ;;  %v1473_v2 = vmov 0.0   ;;  %v1429_v5 = vpack.c.bf16 %v1096_v4, %v1095_v3  ;;  %v1237_v7 = vld [vmem:[%s1835_s12] ss:$0 sm:$0xff] }
 0x4ba   :  { %v646_v13 = vmul.f32 %v641_v1, %v628_v9  ;;  %1348 = vmatprep.mubr.msk.f32.mxu0 %vm398_vm3, %v647_v11  ;;  %vm633_vm11 = vcmp.gt.f32.partialorder %v628_v9, 0.0 }
 0x4bb   :  { %v645_v14 = vmul.f32 %v641_v1, %v627_v10  ;;  %1349 = vmatmul.mubr.msk.f32.vlgmr.msra.gmra.mrb[8].mxu0 %vm398_vm3, %v648_v12  ;;  %vm632_vm10 = vcmp.gt.f32.partialorder %v627_v10, 0.0  ;;  %v1471_v1 = vmov 0.0|0.0  }
 0x4bc   :  { %v650_v16 = vsel %vm633_vm11, %v628_v9, %v646_v13  ;;  %1421 = vmatpush3.bf16.msra.mxu0 %v1418_v41  ;;  %1422 = vmatprep.subr.bf16.mxu1 %v1471_v1 }
 0x4bd   :  { %v1717_v15 = vsel %vm632_vm10, %v627_v10, %v645_v14  ;;  %1370 = vmatprep.subr.mxu0 %v915_v42 }
 0x4be   :  { %1351 = vmatprep.mubr.msk.f32.mxu0 %vm398_vm3, %v1717_v15 }
 0x4bf   :  { %1352 = vmatmul.mubr.msk.f32.gmra.mrb[10].mxu0 %vm398_vm3, %v650_v16 }
 0x4c0   :  { %1371 = vmatpush3.msra.mxu0 %v915_v42 }
 0x4c1   :  { %1428 = vmatprep.subr.bf16.mxu0 %v1471_v1 }
 0x58e   :  { %v1350_v22 = vpop.f32.mrb[8].mxu0 }
 0x58f   :  { %v745_v23 = vadd.f32 %v1350_v22, %v1225_v21  ;;  %v739_v24 = vpop.f32.mrb[9].mxu0 }
 0x590   :  { %v740_v26 = vadd.f32 %v1225_v21, %v739_v24 }
 0x591   :  { %v773_v27 = vmul.f32 %v770_v25, %v745_v23  ;;  %vm760_vm12 = vcmp.gt.f32.partialorder %v745_v23, 0.0 }
 0x592   :  { %vm759_vm13 = vcmp.gt.f32.partialorder %v740_v26, 0.0  ;;  %v772_v28 = vmul.f32 %v770_v25, %v740_v26  ;;  %v1353_v29 = vpop.f32.mrb[10].mxu0 }
 0x593   :  { %v755_v30 = vadd.f32 %v1353_v29, %v1225_v21  ;;  %v749_v31 = vpop.f32.mrb[11].mxu0  ;;  %v777_v34 = vsel %vm760_vm12, %v745_v23, %v773_v27 }
 0x594   :  { %v750_v32 = vadd.f32 %v1225_v21, %v749_v31  ;;  %v776_v33 = vsel %vm759_vm13, %v740_v26, %v772_v28  ;;  %v1243_v21 = vld [vmem:[%s1837_s19] ss:$0 sm:$0xff] }
 0x595   :  { %v775_v35 = vmul.f32 %v770_v25, %v755_v30  ;;  %1360 = vmatprep.mubr.msk.f32.mxu1 %vm398_vm3, %v776_v33  ;;  %vm762_vm14 = vcmp.gt.f32.partialorder %v755_v30, 0.0 }
 0x596   :  { %vm761_vm15 = vcmp.gt.f32.partialorder %v750_v32, 0.0  ;;  %v774_v36 = vmul.f32 %v770_v25, %v750_v32  ;;  %1361 = vmatmul.mubr.msk.f32.vlgmr.msra.gmra.mrb[8].mxu1 %vm398_vm3, %v777_v34 }
 0x597   :  { %v779_v38 = vsel %vm762_vm14, %v755_v30, %v775_v35 }
 0x598   :  { %v778_v37 = vsel %vm761_vm15, %v750_v32, %v774_v36 }
 0x599   :  { %1363 = vmatprep.mubr.msk.f32.mxu1 %vm398_vm3, %v778_v37 }
 0x59a   :  { %1364 = vmatmul.mubr.msk.f32.gmra.mrb[10].mxu1 %vm398_vm3, %v779_v38 }
 0x59b   :  { %1386 = vmatprep.mubr.msk.f32.mxu1 %vm1472_vm5, %v1473_v2 }
 0x669   :  { %v1362_v44 = vpop.f32.mrb[8].mxu1 }
 0x66a   :  { %v874_v45 = vadd.f32 %v1362_v44, %v1231_v43  ;;  %v868_v46 = vpop.f32.mrb[9].mxu1 }
 0x66b   :  { %v869_v47 = vadd.f32 %v1231_v43, %v868_v46 }
 0x66c   :  { %v888_v48 = vadd.f32 %v874_v45, %v648_v12 }
 0x66d   :  { %v887_v50 = vadd.f32 %v869_v47, %v647_v11  ;;  %v1365_v51 = vpop.f32.mrb[10].mxu1 }
 0x66e   :  { %v906_v52 = vmul.f32 %v903_v49, %v888_v48  ;;  %v884_v53 = vadd.f32 %v1365_v51, %v1231_v43  ;;  %v878_v54 = vpop.f32.mrb[11].mxu1  ;;  %vm893_vm0 = vcmp.gt.f32.partialorder %v888_v48, 0.0 }
 0x66f   :  { %v905_v55 = vmul.f32 %v903_v49, %v887_v50  ;;  %v879_v56 = vadd.f32 %v1231_v43, %v878_v54  ;;  %vm892_vm1 = vcmp.gt.f32.partialorder %v887_v50, 0.0 }
 0x670   :  { %v890_v57 = vadd.f32 %v884_v53, %v650_v16  ;;  %v910_v60 = vsel %vm893_vm0, %v888_v48, %v906_v52 }
 0x671   :  { %v889_v58 = vadd.f32 %v879_v56, %v1717_v15  ;;  %v909_v59 = vsel %vm892_vm1, %v887_v50, %v905_v55 }
 0x672   :  { %v908_v61 = vmul.f32 %v903_v49, %v890_v57  ;;  %1372 = vmatprep.mubr.msk.f32.mxu0 %vm398_vm3, %v909_v59  ;;  %vm895_vm4 = vcmp.gt.f32.partialorder %v890_v57, 0.0 }
 0x673   :  { %v907_v62 = vmul.f32 %v903_v49, %v889_v58  ;;  %1373 = vmatmul.mubr.msk.f32.vlgmr.msra.gmra.mrb[12].mxu0 %vm398_vm3, %v910_v60  ;;  %vm894_vm2 = vcmp.gt.f32.partialorder %v889_v58, 0.0 }
 0x674   :  { %v912_v0 = vsel %vm895_vm4, %v890_v57, %v908_v61  ;;  %1430 = vmatpush3.bf16.msra.mxu0 %v1429_v5 }
 0x675   :  { %v911_v63 = vsel %vm894_vm2, %v889_v58, %v907_v62  ;;  %1393 = vmatprep.subr.mxu0 %v1473_v2 }
 0x676   :  { %1375 = vmatprep.mubr.msk.f32.mxu0 %vm398_vm3, %v911_v63 }
 0x677   :  { %1376 = vmatmul.mubr.msk.f32.gmra.mrb[14].mxu0 %vm398_vm3, %v912_v0 }
 0x678   :  { %1395 = vmatprep.mubr.msk.f32.mxu0 %vm1472_vm5, %v1473_v2  ;;  %1394 = vmatpush3.msra.mxu0 %v1097_v6 }
 0x746   :  { %v1374_v8 = vpop.f32.mrb[12].mxu0 }
 0x747   :  { %v1007_v9 = vadd.f32 %v1374_v8, %v1237_v7  ;;  %v1001_v10 = vpop.f32.mrb[13].mxu0 }
 0x748   :  { %v1002_v11 = vadd.f32 %v1237_v7, %v1001_v10 }
 0x74a   :  { %v1423_v12 = vpack.c.bf16 %v1007_v9, %v1002_v11  ;;  %v1377_v13 = vpop.f32.mrb[14].mxu0 }
 0x74b   :  { %v1017_v14 = vadd.f32 %v1377_v13, %v1237_v7  ;;  %v1011_v15 = vpop.f32.mrb[15].mxu0 }
 0x74c   :  { %v1012_v16 = vadd.f32 %v1237_v7, %v1011_v15  ;;  %1424 = vmatpush3.bf16.msra.mxu1 %v1423_v12 }
 0x74d   :  { %1425 = vmatprep.subr.bf16.mxu1 %v1471_v1 }
 0x74e   :  { %v1426_v17 = vpack.c.bf16 %v1017_v14, %v1012_v16 }
 0x750   :  { %1427 = vmatpush3.bf16.msra.mxu1 %v1426_v17 }
 0x753   :  { %1387 = vmatmul.mubr.msk.f32.vlgmr.msra.gmra.mrb[12].mxu1 %vm1021_vm6, %v1020_v18 }
 0x826   :  { %v1091_v19 = vpop.f32.mrb[12].mxu1 }
 0x827   :  { %1179 = vst.msk [vmem:[%s1810_s24] sm:$0x3] %vm1178_vm7, %v1091_v19  ;;  %v1388_v20 = vpop.f32.mrb[13].mxu1  ;;  %1396 = vmatmul.mubr.msk.f32.vlgmr.msra.gmra.mrb[16].mxu0 %vm398_vm3, %v1091_v19 }
 0x8fa   :  { %v1174_v22 = vpop.f32.mrb[16].mxu0 }
 0x8fb   :  { %v1175_v23 = vadd.f32 %v1243_v21, %v1174_v22  ;;  %v1397_v24 = vpop.f32.mrb[17].mxu0 }
 0x8fd   :  { %1181 = vst.msk [vmem:[#allocation6] sm:$0x3] %vm1180_vm8, %v1175_v23 }
 0x8fe   :  { %1457 = shalt.err (!%p1454_p4)
}
 0x8ff   :  { %s1458_s29 = scalar_lea.hbm %s1811_s25, 32 }
 0x900   :  { %p1459_p5 = scmp.ne.s32.totalorder %s1811_s25, %s1458_s29  ;;  %p1462_p6 = scmp.lt.u32.totalorder %s1458_s29, %s1811_s25 }
 0x902   :  { %p1464_p7 = pnand %p1462_p6, %p1459_p5 }
 0x904   :  { %1467 = shalt.err (!%p1464_p7)
}
 0x905   :  { %1193 = dma.vmem_to_hbm [thread:$0]  %s1191_s0, 32, %s1811_s25, [#allocation7]  }
 0x906   :  { %1468 = dma.done.wait [#allocation7], 32  }
 0x907   :  { %1469 = vsyncadd [#allocation7], 4294967264 }
 0x908   :  { %1199 = vsyncpa [#allocation7], 1 }

// kernel: spexplus_forward.3
= control target key start
LH: loop header
LB: loop body
LE: loop exit
PB: predicated region body
PF: predicated region fallthrough
CT: control target
= control target key end

     0   :  { %s14656_s6 = smov 1   ;;  %s14657_s10 = smov 2   ;;  %s16727_s0 = inlined_call_operand.smem [shape: u32[99], index: -1, kind: input, shape index: {}] }
   0x1   :  { %s14811_s5 = sld [smem:[%s16727_s0]]   ;;  %s14658_s14 = smov 3  }
   0x2   :  { %s14816_s9 = sld [smem:[%s16727_s0 + %s14656_s6]]   ;;  %s14659_s18 = smov 4  }
   0x3   :  { %s14821_s13 = sld [smem:[%s16727_s0 + %s14657_s10]]   ;;  %s14660_s22 = smov 5  }
   0x4   :  { %s14826_s17 = sld [smem:[%s16727_s0 + %s14658_s14]]   ;;  %s14661_s26 = smov 6  }
   0x5   :  { %s14831_s21 = sld [smem:[%s16727_s0 + %s14659_s18]]   ;;  %s14662_s30 = smov 7  }
   0x6   :  { %s14836_s25 = sld [smem:[%s16727_s0 + %s14660_s22]]   ;;  %s14663_s4 = smov 8  }
   0x7   :  { %16829 = sst [smem:[#allocation104_spill]] %s14811_s5  ;;  %s14664_s10 = smov 9  }
   0x8   :  { %16830 = sst [smem:[#allocation105_spill]] %s14816_s9  ;;  %s14665_s15 = smov 10  }
   0x9   :  { %16831 = sst [smem:[#allocation106_spill]] %s14821_s13  ;;  %s14666_s20 = smov 11  }
   0xa   :  { %16832 = sst [smem:[#allocation107_spill]] %s14826_s17  ;;  %s14668_s1 = smov 13  }
   0xb   :  { %16833 = sst [smem:[#allocation108_spill]] %s14831_s21  ;;  %s14669_s7 = smov 14  }
   0xc   :  { %16834 = sst [smem:[#allocation109_spill]] %s14836_s25  ;;  %s14671_s22 = smov 16  }
   0xd   :  { %s14841_s29 = sld [smem:[%s16727_s0 + %s14661_s26]]   ;;  %s14667_s26 = smov 12  }
   0xe   :  { %s14846_s3 = sld [smem:[%s16727_s0 + %s14662_s30]]   ;;  %s14672_s28 = smov 18  }
   0xf   :  { %s14851_s8 = sld [smem:[%s16727_s0 + %s14663_s4]]   ;;  %s14674_s16 = smov 20  }
  0x10   :  { %s14856_s14 = sld [smem:[%s16727_s0 + %s14664_s10]]   ;;  %s14673_s10 = smov 19  }
  0x11   :  { %s14861_s19 = sld [smem:[%s16727_s0 + %s14665_s15]]   ;;  %s14670_s15 = smov 15  }
  0x12   :  { %s14866_s24 = sld [smem:[%s16727_s0 + %s14666_s20]]   ;;  %s14679_s23 = smov 27  }
  0x13   :  { %16835 = sst [smem:[#allocation110_spill]] %s14841_s29  ;;  %s14747_s18 = smov 40  }
  0x14   :  { %16836 = sst [smem:[#allocation111_spill]] %s14846_s3 }
  0x15   :  { %16837 = sst [smem:[#allocation112_spill]] %s14851_s8 }
  0x16   :  { %16838 = sst [smem:[#allocation113_spill]] %s14856_s14 }
  0x17   :  { %16839 = sst [smem:[#allocation114_spill]] %s14861_s19 }
  0x18   :  { %16840 = sst [smem:[#allocation115_spill]] %s14866_s24 }
  0x19   :  { %s14871_s30 = sld [smem:[%s16727_s0 + %s14667_s26]]  }
  0x1a   :  { %s14876_s6 = sld [smem:[%s16727_s0 + %s14668_s1]]   ;;  %s14744_s1 = smov 23  }
  0x1b   :  { %s14881_s12 = sld [smem:[%s16727_s0 + %s14669_s7]]  }
  0x1c   :  { %s10964_s20 = sld [smem:[%s16727_s0 + %s14670_s15]]  }
  0x1d   :  { %s14889_s27 = sld [smem:[%s16727_s0 + %s14671_s22]]   ;;  %s14675_s22 = smov 21  }
  0x1e   :  { %s14894_s4 = sld [smem:[%s16727_s0 + %s14672_s28]]   ;;  %s14676_s28 = smov 22  }
  0x1f   :  { %16841 = sst [smem:[#allocation116_spill]] %s14871_s30 }
  0x20   :  { %16842 = sst [smem:[#allocation117_spill]] %s14876_s6 }
  0x21   :  { %16843 = sst [smem:[#allocation118_spill]] %s14881_s12 }
  0x22   :  { %s14899_s30 = sld [smem:[%s16727_s0 + %s14673_s10]]   ;;  %v202_v0 = vstv %s10964_s20  ;;  %s14677_s10 = smov 25  }
  0x23   :  { %16844 = sst [smem:[#allocation119_spill]] %s14889_s27  ;;  %203 = vst [vmem:[#allocation5] sm:$0x1] %v202_v0  ;;  %s14680_s20 = smov 28  }
  0x24   :  { %16845 = sst [smem:[#allocation120_spill]] %s14894_s4 }
  0x25   :  { %s14904_s8 = sld [smem:[%s16727_s0 + %s14674_s16]]   ;;  %s14678_s16 = smov 26  }
  0x26   :  { %s14909_s3 = sld [smem:[%s16727_s0 + %s14675_s22]]  }
  0x27   :  { %s14914_s4 = sld [smem:[%s16727_s0 + %s14676_s28]]  }
  0x28   :  { %16846 = sst [smem:[#allocation121_spill]] %s14899_s30  ;;  %s14682_s30 = smov 30  }
  0x29   :  { %s14919_s15 = sld [smem:[%s16727_s0 + %s14677_s10]]   ;;  %s14681_s10 = smov 29  }
  0x2a   :  { %s14924_s22 = sld [smem:[%s16727_s0 + %s14678_s16]]  }
  0x2b   :  { %16847 = sst [smem:[#allocation122_spill]] %s14904_s8  ;;  %s14683_s8 = smov 31  }
  0x2c   :  { %16848 = sst [smem:[#allocation123_spill]] %s14909_s3 }
  0x2d   :  { %16849 = sst [smem:[#allocation124_spill]] %s14914_s4 }
  0x2e   :  { %s14929_s28 = sld [smem:[%s16727_s0 + %s14679_s23]]   ;;  %s14748_s23 = smov 54  }
  0x2f   :  { %16850 = sst [smem:[#allocation125_spill]] %s14919_s15  ;;  %s14685_s15 = smov 33  }
  0x30   :  { %16851 = sst [smem:[#allocation126_spill]] %s14924_s22 }
  0x31   :  { %s14934_s7 = sld [smem:[%s16727_s0 + %s14680_s20]]   ;;  %s14684_s20 = smov 32  }
  0x32   :  { %s14939_s29 = sld [smem:[%s16727_s0 + %s14681_s10]]  }
  0x33   :  { %s14944_s22 = sld [smem:[%s16727_s0 + %s14682_s30]]   ;;  %s14686_s30 = smov 34  }
  0x34   :  { %16852 = sst [smem:[#allocation127_spill]] %s14929_s28 }
  0x35   :  { %s14949_s28 = sld [smem:[%s16727_s0 + %s14683_s8]]   ;;  %s14687_s8 = smov 35  }
  0x37   :  { %16853 = sst [smem:[#allocation128_spill]] %s14934_s7 }
  0x38   :  { %16854 = sst [smem:[#allocation129_spill]] %s14939_s29 }
  0x39   :  { %16855 = sst [smem:[#allocation130_spill]] %s14944_s22 }
  0x3a   :  { %s14954_s7 = sld [smem:[%s16727_s0 + %s14684_s20]]   ;;  %s14688_s20 = smov 36  }
  0x3b   :  { %16856 = sst [smem:[#allocation131_spill]] %s14949_s28 }
  0x3c   :  { %s14959_s29 = sld [smem:[%s16727_s0 + %s14685_s15]]   ;;  %s14689_s15 = smov 37  }
  0x3d   :  { %s14964_s22 = sld [smem:[%s16727_s0 + %s14686_s30]]   ;;  %s14690_s30 = smov 38  }
  0x3e   :  { %s14969_s28 = sld [smem:[%s16727_s0 + %s14687_s8]]   ;;  %s14691_s8 = smov 41  }
  0x3f   :  { %s14979_s25 = sld [smem:[%s16727_s0 + %s14689_s15]]   ;;  %s14693_s15 = smov 43  }
  0x40   :  { %16857 = sst [smem:[#allocation132_spill]] %s14954_s7 }
  0x41   :  { %s14974_s7 = sld [smem:[%s16727_s0 + %s14688_s20]]   ;;  %s14692_s20 = smov 42  }
  0x42   :  { %16858 = sst [smem:[#allocation133_spill]] %s14959_s29 }
  0x43   :  { %s14984_s13 = sld [smem:[%s16727_s0 + %s14690_s30]]   ;;  %s14694_s30 = smov 44  }
  0x44   :  { %16859 = sst [smem:[#allocation134_spill]] %s14969_s28 }
  0x45   :  { %16861 = sst [smem:[#allocation136_spill]] %s14979_s25 }
  0x46   :  { %s14989_s28 = sld [smem:[%s16727_s0 + %s14691_s8]]   ;;  %s14695_s8 = smov 45  }
  0x47   :  { %16860 = sst [smem:[#allocation135_spill]] %s14974_s7 }
  0x48   :  { %s14994_s7 = sld [smem:[%s16727_s0 + %s14692_s20]]   ;;  %s14696_s20 = smov 46  }
  0x49   :  { %16862 = sst [smem:[#allocation137_spill]] %s14984_s13 }
  0x4a   :  { %s14999_s17 = sld [smem:[%s16727_s0 + %s14693_s15]]   ;;  %s14697_s15 = smov 47  }
  0x4b   :  { %s15004_s13 = sld [smem:[%s16727_s0 + %s14694_s30]]   ;;  %s14698_s30 = smov 48  }
  0x4c   :  { %s15009_s21 = sld [smem:[%s16727_s0 + %s14695_s8]]   ;;  %s14699_s8 = smov 49  }
  0x4d   :  { %s15014_s9 = sld [smem:[%s16727_s0 + %s14696_s20]]   ;;  %s14700_s20 = smov 50  }
  0x4e   :  { %16863 = sst [smem:[#allocation138_spill]] %s14994_s7 }
  0x4f   :  { %s15019_s19 = sld [smem:[%s16727_s0 + %s14697_s15]]   ;;  %s14701_s15 = smov 51  }
  0x50   :  { %s15024_s14 = sld [smem:[%s16727_s0 + %s14698_s30]]   ;;  %s14702_s30 = smov 52  }
  0x51   :  { %16864 = sst [smem:[#allocation139_spill]] %s15004_s13 }
  0x52   :  { %s15029_s3 = sld [smem:[%s16727_s0 + %s14699_s8]]   ;;  %s14703_s8 = smov 53  }
  0x53   :  { %16865 = sst [smem:[#allocation140_spill]] %s15014_s9 }
  0x54   :  { %s15034_s4 = sld [smem:[%s16727_s0 + %s14700_s20]]   ;;  %s14704_s20 = smov 56  }
  0x55   :  { %s15039_s27 = sld [smem:[%s16727_s0 + %s14701_s15]]   ;;  %s14705_s15 = smov 57  }
  0x56   :  { %16866 = sst [smem:[#allocation141_spill]] %s15024_s14 }
  0x57   :  { %s15044_s24 = sld [smem:[%s16727_s0 + %s14702_s30]]   ;;  %s14706_s30 = smov 58  }
  0x58   :  { %16867 = sst [smem:[#allocation142_spill]] %s15029_s3 }
  0x59   :  { %s15049_s6 = sld [smem:[%s16727_s0 + %s14703_s8]]   ;;  %s14707_s8 = smov 59  }
  0x5a   :  { %16868 = sst [smem:[#allocation143_spill]] %s15034_s4 }
  0x5b   :  { %16869 = sst [smem:[#allocation144_spill]] %s15039_s27 }
  0x5c   :  { %s15054_s12 = sld [smem:[%s16727_s0 + %s14704_s20]]   ;;  %s14708_s20 = smov 60  }
  0x5d   :  { %16870 = sst [smem:[#allocation145_spill]] %s15044_s24 }
  0x5e   :  { %s15059_s27 = sld [smem:[%s16727_s0 + %s14705_s15]]   ;;  %s14709_s15 = smov 61  }
  0x5f   :  { %16871 = sst [smem:[#allocation146_spill]] %s15049_s6 }
  0x60   :  { %s15064_s24 = sld [smem:[%s16727_s0 + %s14706_s30]]   ;;  %s14710_s30 = smov 62  }
  0x61   :  { %s15069_s6 = sld [smem:[%s16727_s0 + %s14707_s8]]   ;;  %s14711_s8 = smov 63  }
  0x62   :  { %s15074_s5 = sld [smem:[%s16727_s0 + %s14708_s20]]   ;;  %s14712_s20 = smov 64  }
  0x63   :  { %s15084_s4 = sld [smem:[%s16727_s0 + %s14710_s30]]   ;;  %s14714_s30 = smov 66  }
  0x64   :  { %16872 = sst [smem:[#allocation147_spill]] %s15059_s27 }
  0x65   :  { %s15079_s27 = sld [smem:[%s16727_s0 + %s14709_s15]]   ;;  %s14713_s15 = smov 65  }
  0x66   :  { %s15094_s14 = sld [smem:[%s16727_s0 + %s14712_s20]]   ;;  %s14716_s20 = smov 70  }
  0x67   :  { %16873 = sst [smem:[#allocation148_spill]] %s15069_s6 }
  0x68   :  { %16874 = sst [smem:[#allocation149_spill]] %s15074_s5 }
  0x69   :  { %16876 = sst [smem:[#allocation151_spill]] %s15084_s4 }
  0x6a   :  { %s15089_s6 = sld [smem:[%s16727_s0 + %s14711_s8]]   ;;  %s14715_s8 = smov 67  }
  0x6b   :  { %16875 = sst [smem:[#allocation150_spill]] %s15079_s27 }
  0x6c   :  { %16878 = sst [smem:[#allocation153_spill]] %s15094_s14 }
  0x6d   :  { %s15099_s27 = sld [smem:[%s16727_s0 + %s14713_s15]]   ;;  %s14717_s15 = smov 71  }
  0x6e   :  { %s15104_s9 = sld [smem:[%s16727_s0 + %s14714_s30]]   ;;  %s14718_s30 = smov 72  }
  0x6f   :  { %s15114_s13 = sld [smem:[%s16727_s0 + %s14716_s20]]   ;;  %s14720_s20 = smov 74  }
  0x70   :  { %16877 = sst [smem:[#allocation152_spill]] %s15089_s6 }
  0x71   :  { %s15109_s6 = sld [smem:[%s16727_s0 + %s14715_s8]]   ;;  %s14719_s8 = smov 73  }
  0x72   :  { %s15134_s7 = sld [smem:[%s16727_s0 + %s14720_s20]]   ;;  %s14724_s20 = smov 78  }
  0x73   :  { %16879 = sst [smem:[#allocation154_spill]] %s15099_s27 }
  0x74   :  { %16880 = sst [smem:[#allocation155_spill]] %s15104_s9 }
  0x75   :  { %16882 = sst [smem:[#allocation157_spill]] %s15114_s13  ;;  %s14751_s13 = smov 69  }
  0x76   :  { %s15119_s27 = sld [smem:[%s16727_s0 + %s14717_s15]]   ;;  %s14721_s15 = smov 75  }
  0x77   :  { %16881 = sst [smem:[#allocation156_spill]] %s15109_s6 }
  0x78   :  { %s15124_s9 = sld [smem:[%s16727_s0 + %s14718_s30]]   ;;  %s14722_s30 = smov 76  }
  0x79   :  { %s15129_s6 = sld [smem:[%s16727_s0 + %s14719_s8]]   ;;  %s14723_s8 = smov 77  }
  0x7a   :  { %16886 = sst [smem:[#allocation161_spill]] %s15134_s7  ;;  %s14745_s7 = smov 24  }
  0x7b   :  { %s15144_s25 = sld [smem:[%s16727_s0 + %s14722_s30]]   ;;  %s14726_s30 = smov 80  }
  0x7c   :  { %16883 = sst [smem:[#allocation158_spill]] %s15119_s27 }
  0x7d   :  { %s15139_s27 = sld [smem:[%s16727_s0 + %s14721_s15]]   ;;  %s14725_s15 = smov 79  }
  0x7e   :  { %16884 = sst [smem:[#allocation159_spill]] %s15124_s9  ;;  %s14750_s9 = smov 68  }
  0x7f   :  { %16885 = sst [smem:[#allocation160_spill]] %s15129_s6 }
  0x80   :  { %s15149_s6 = sld [smem:[%s16727_s0 + %s14723_s8]]   ;;  %s14727_s8 = smov 81  }
  0x81   :  { %16888 = sst [smem:[#allocation163_spill]] %s15144_s25 }
  0x82   :  { %s15154_s29 = sld [smem:[%s16727_s0 + %s14724_s20]]   ;;  %s14728_s20 = smov 82  }
  0x83   :  { %16887 = sst [smem:[#allocation162_spill]] %s15139_s27 }
  0x84   :  { %s15159_s27 = sld [smem:[%s16727_s0 + %s14725_s15]]   ;;  %s14729_s15 = smov 83  }
  0x85   :  { %s15164_s25 = sld [smem:[%s16727_s0 + %s14726_s30]]   ;;  %s14730_s30 = smov 86  }
  0x86   :  { %16889 = sst [smem:[#allocation164_spill]] %s15149_s6 }
  0x87   :  { %s15169_s6 = sld [smem:[%s16727_s0 + %s14727_s8]]   ;;  %s14731_s8 = smov 87  }
  0x88   :  { %16890 = sst [smem:[#allocation165_spill]] %s15154_s29 }
  0x89   :  { %s15174_s29 = sld [smem:[%s16727_s0 + %s14728_s20]]   ;;  %s14732_s20 = smov 88  }
  0x8a   :  { %16891 = sst [smem:[#allocation166_spill]] %s15159_s27 }
  0x8b   :  { %16892 = sst [smem:[#allocation167_spill]] %s15164_s25 }
  0x8c   :  { %s15179_s27 = sld [smem:[%s16727_s0 + %s14729_s15]]   ;;  %s14733_s15 = smov 89  }
  0x8d   :  { %16893 = sst [smem:[#allocation168_spill]] %s15169_s6 }
  0x8e   :  { %s15184_s25 = sld [smem:[%s16727_s0 + %s14730_s30]]   ;;  %s14734_s30 = smov 90  }
  0x8f   :  { %16894 = sst [smem:[#allocation169_spill]] %s15174_s29 }
  0x90   :  { %s15189_s6 = sld [smem:[%s16727_s0 + %s14731_s8]]   ;;  %s14735_s8 = smov 91  }
  0x91   :  { %s15194_s29 = sld [smem:[%s16727_s0 + %s14732_s20]]   ;;  %s14736_s20 = smov 92  }
  0x92   :  { %16895 = sst [smem:[#allocation170_spill]] %s15179_s27 }
  0x93   :  { %s15199_s27 = sld [smem:[%s16727_s0 + %s14733_s15]]   ;;  %s14737_s15 = smov 93  }
  0x94   :  { %16896 = sst [smem:[#allocation171_spill]] %s15184_s25 }
  0x95   :  { %s15204_s25 = sld [smem:[%s16727_s0 + %s14734_s30]]   ;;  %s14738_s30 = smov 94  }
  0x96   :  { %16897 = sst [smem:[#allocation172_spill]] %s15189_s6 }
  0x97   :  { %16898 = sst [smem:[#allocation173_spill]] %s15194_s29 }
  0x98   :  { %s15209_s6 = sld [smem:[%s16727_s0 + %s14735_s8]]   ;;  %s14739_s8 = smov 95  }
  0x99   :  { %16899 = sst [smem:[#allocation174_spill]] %s15199_s27 }
  0x9a   :  { %s15214_s29 = sld [smem:[%s16727_s0 + %s14736_s20]]   ;;  %s14740_s20 = smov 96  }
  0x9b   :  { %16900 = sst [smem:[#allocation175_spill]] %s15204_s25 }
  0x9c   :  { %s15219_s27 = sld [smem:[%s16727_s0 + %s14737_s15]]   ;;  %s14741_s15 = smov 97  }
  0x9d   :  { %s15224_s25 = sld [smem:[%s16727_s0 + %s14738_s30]]   ;;  %s14742_s30 = smov 98  }
  0x9e   :  { %16901 = sst [smem:[#allocation176_spill]] %s15209_s6 }
  0x9f   :  { %s15229_s6 = sld [smem:[%s16727_s0 + %s14739_s8]]   ;;  %s14743_s8 = smov 17  }
  0xa0   :  { %16902 = sst [smem:[#allocation177_spill]] %s15214_s29 }
  0xa1   :  { %s15234_s29 = sld [smem:[%s16727_s0 + %s14740_s20]]   ;;  %s14749_s20 = smov 55  }
  0xa2   :  { %16903 = sst [smem:[#allocation178_spill]] %s15219_s27 }
  0xa3   :  { %16904 = sst [smem:[#allocation179_spill]] %s15224_s25 }
  0xa4   :  { %s15239_s27 = sld [smem:[%s16727_s0 + %s14741_s15]]  }
  0xa5   :  { %16905 = sst [smem:[#allocation180_spill]] %s15229_s6 }
  0xa6   :  { %s15244_s25 = sld [smem:[%s16727_s0 + %s14742_s30]]  }
  0xa7   :  { %16906 = sst [smem:[#allocation181_spill]] %s15234_s29 }
  0xa8   :  { %s10966_s6 = sld [smem:[%s16727_s0 + %s14743_s8]]  }
  0xa9   :  { %s10972_s29 = sld [smem:[%s16727_s0 + %s14744_s1]]  }
  0xaa   :  { %16907 = sst [smem:[#allocation182_spill]] %s15239_s27  ;;  %s14746_s27 = smov 39  }
  0xab   :  { %s10973_s11 = sld [smem:[%s16727_s0 + %s14745_s7]]  }
  0xac   :  { %16908 = sst [smem:[#allocation183_spill]] %s15244_s25 }
  0xad   :  { %s10988_s30 = sld [smem:[%s16727_s0 + %s14746_s27]]  }
  0xae   :  { %s10989_s8 = sld [smem:[%s16727_s0 + %s14747_s18]]   ;;  %v204_v1 = vstv %s10966_s6  ;;  %s14752_s6 = smov 84  }
  0xaf   :  { %s11003_s1 = sld [smem:[%s16727_s0 + %s14748_s23]]   ;;  %205 = vst [vmem:[#allocation6] sm:$0x1] %v204_v1  ;;  %v206_v2 = vstv %s10972_s29  ;;  %s14753_s29 = smov 85  }
  0xb0   :  { %s11004_s7 = sld [smem:[%s16727_s0 + %s14749_s20]]   ;;  %207 = vst [vmem:[#allocation7] sm:$0x1] %v206_v2 }
  0xb1   :  { %s11017_s16 = sld [smem:[%s16727_s0 + %s14750_s9]]   ;;  %v208_v3 = vstv %s10973_s11 }
  0xb2   :  { %s11018_s14 = sld [smem:[%s16727_s0 + %s14751_s13]]   ;;  %209 = vst [vmem:[#allocation8] sm:$0x1] %v208_v3 }
  0xb3   :  { %v210_v4 = vstv %s10988_s30  ;;  %s11033_s20 = sld [smem:[%s16727_s0 + %s14752_s6]]  }
  0xb4   :  { %211 = vst [vmem:[#allocation9] sm:$0x1] %v210_v4  ;;  %v212_v5 = vstv %s10989_s8  ;;  %s11034_s9 = sld [smem:[%s16727_s0 + %s14753_s29]]  }
  0xb5   :  { %213 = vst [vmem:[#allocation10] sm:$0x1] %v212_v5  ;;  %v214_v6 = vstv %s11003_s1 }
  0xb6   :  { %215 = vst [vmem:[#allocation11] sm:$0x1] %v214_v6  ;;  %v216_v7 = vstv %s11004_s7 }
  0xb7   :  { %217 = vst [vmem:[#allocation12] sm:$0x1] %v216_v7  ;;  %v218_v8 = vstv %s11017_s16 }
  0xb8   :  { %219 = vst [vmem:[#allocation13] sm:$0x1] %v218_v8  ;;  %v220_v9 = vstv %s11018_s14 }
  0xb9   :  { %221 = vst [vmem:[#allocation14] sm:$0x1] %v220_v9  ;;  %v222_v10 = vstv %s11033_s20 }
  0xba   :  { %223 = vst [vmem:[#allocation15] sm:$0x1] %v222_v10  ;;  %v224_v11 = vstv %s11034_s9 }
  0xbb   :  { %225 = vst [vmem:[#allocation16] sm:$0x1] %v224_v11 }
  0xbc   :  { %226 = vsyncpa [#allocation18], 0 }
  0xbd   :  { %227 = vsyncpa [#allocation20], 0 }
  0xbe   :  { %228 = vsyncpa [#allocation23], 0 }
  0xbf   :  { %229 = vsyncpa [#allocation26], 0 }
  0xc0   :  { %230 = vsyncpa [#allocation29], 0 }
  0xc1   :  { %231 = vsyncpa [#allocation32], 0 }
  0xc2   :  { %232 = vsyncpa [#allocation35], 0 }
  0xc3   :  { %233 = vsyncpa [#allocation38], 0 }
  0xc4   :  { %234 = vsyncpa [#allocation41], 0 }
  0xc5   :  { %235 = vsyncpa [#allocation44], 0 }
  0xc6   :  { %236 = vsyncpa [#allocation47], 0 }
  0xc7   :  { %237 = vsyncpa [#allocation50], 0 }
  0xc8   :  { %238 = vsyncpa [#allocation53], 0 }
  0xc9   :  { %239 = vsyncpa [#allocation56], 0 }
  0xca   :  { %240 = vsyncpa [#allocation59], 0 }
  0xcb   :  { %241 = vsyncpa [#allocation62], 0 }
  0xcc   :  { %242 = vsyncpa [#allocation65], 0 }
  0xcd   :  { %243 = vsyncpa [#allocation68], 0 }
  0xce   :  { %244 = vsyncpa [#allocation71], 0 }
  0xcf   :  { %245 = vsyncpa [#allocation74], 0 }
  0xd0   :  { %246 = vsyncpa [#allocation77], 0 }
  0xd1   :  { %247 = vsyncpa [#allocation80], 0  ;;  %s15279_s0 = smov 0  }
  0xd2 LB: > { %s16909_s5 = sld [smem:[#allocation149_spill]]  ;;  %s16910_s4 = sld [smem:[#allocation151_spill]]  ;;  %s14654_s0 = sphi %s15279_s0, %s253_s0  }
  0xd3   : > { %s16911_s3 = sld [smem:[#allocation142_spill]]  ;;  %s15285_s11 = sadd.s32 4294967295, %s14654_s0  }
  0xd4   : > { %p11050_p0 = scmp.ge.s32.totalorder %s14654_s0, 1  ;;  %p2347_p1 = scmp.lt.s32.totalorder %s14654_s0, 3 }
  0xd6   : > { %p15289_p2 = pnand %p11050_p0, %p2347_p1 }
  0xd7   : > { %p13055_p3 = scmp.eq.s32.totalorder (!%p15289_p2), %s15285_s11, 0  ;;  %s14754_s8 = smov (!%p15289_p2), [#allocation19]  }
  0xd8   : > { %2351 = sbr.rel (%p15289_p2) target bundleno = 1293 (0x50d), region = 12  ;;  %s2467_s1 = sshll.u32 (!%p15289_p2), %s14754_s8, 4  ;;  %s2468_s1 = int_to_ptr.vmem [resolvable:$true] %s2467_s1 }
  0xd9   : > { %s14755_s7 = smov (!%p15289_p2), [#allocation22]   ;;  %s13442_s15 = scalar_lea.hbm (!%p15289_p2), %s14964_s22, 16 }
  0xda   : > { %s2504_s27 = sshll.u32 (!%p15289_p2), %s14755_s7, 4  ;;  %p13443_p4 = scmp.ne.s32.totalorder (!%p15289_p2), %s14964_s22, %s13442_s15  ;;  %s2505_s27 = int_to_ptr.vmem [resolvable:$true] %s2504_s27 }
  0xdb   : > { %p13448_p7 = scmp.lt.u32.totalorder (!%p15289_p2), %s13442_s15, %s14964_s22 }
  0xdc   : > { %p13444_p5 = pnand (!%p15289_p2), %p13443_p4, %p13055_p3 }
  0xde   : > { %p13445_p6 = pneg (!%p15289_p2), %p13444_p5 }
  0xe0   : > { %p13450_p8 = pnand %p13448_p7, %p13445_p6 }
  0xe2   : > { %13453 = shalt.err (!%p13450_p8)
}
  0xe3   : > { %s13454_s16 = scalar_lea.vmem %s2468_s1, 16  ;;  %s13460_s13 = scalar_lea.vmem %s2468_s1, 32 }
  0xe4   : > { %p13455_p9 = scmp.ne.s32.totalorder %s2468_s1, %s13454_s16  ;;  %p13461_p12 = scmp.lt.s32.totalorder %s2468_s1, %s2468_s1 }
  0xe5   : > { %p13462_p13 = scmp.lt.s32.totalorder %s13460_s13, %s13454_s16 }
  0xe6   : > { %p13456_p10 = pnand %p13455_p9, %p13055_p3 }
  0xe7   : > { %p13463_p0 = por %p13462_p13, %p13461_p12 }
  0xe8   : > { %p13457_p11 = pneg %p13456_p10 }
  0xea   : > { %p13464_p1 = pnand %p13463_p0, %p13457_p11 }
  0xec   : > { %13467 = shalt.err (!%p13464_p1)
}
  0xed   : > { %12886 = dma.hbm_to_vmem [thread:$0]  (%p13055_p3), %s14964_s22, 16, %s2468_s1, [#allocation20]  }
  0xee   : > { %s13468_s25 = scalar_lea.hbm %s14989_s28, 16 }
  0xef   : > { %p13469_p4 = scmp.ne.s32.totalorder %s14989_s28, %s13468_s25  ;;  %p13474_p7 = scmp.lt.u32.totalorder %s13468_s25, %s14989_s28 }
  0xf1   : > { %p13470_p5 = pnand %p13469_p4, %p13055_p3 }
  0xf3   : > { %p13471_p6 = pneg %p13470_p5 }
  0xf5   : > { %p13476_p8 = pnand %p13474_p7, %p13471_p6 }
  0xf7   : > { %13479 = shalt.err (!%p13476_p8)
}
  0xf8   : > { %s13480_s18 = scalar_lea.vmem %s2505_s27, 16  ;;  %s13486_s14 = scalar_lea.vmem %s2505_s27, 32 }
  0xf9   : > { %p13481_p9 = scmp.ne.s32.totalorder %s2505_s27, %s13480_s18  ;;  %p13487_p12 = scmp.lt.s32.totalorder %s2505_s27, %s2505_s27 }
  0xfa   : > { %p13488_p13 = scmp.lt.s32.totalorder %s13486_s14, %s13480_s18 }
  0xfb   : > { %p13482_p10 = pnand %p13481_p9, %p13055_p3 }
  0xfc   : > { %p13489_p0 = por %p13488_p13, %p13487_p12 }
  0xfd   : > { %p13483_p11 = pneg %p13482_p10 }
  0xff   : > { %p13490_p1 = pnand %p13489_p0, %p13483_p11 }
 0x101   : > { %13493 = shalt.err (!%p13490_p1)
}
 0x102   : > { %12890 = dma.hbm_to_vmem [thread:$0]  (%p13055_p3), %s14989_s28, 16, %s2505_s27, [#allocation23]  }
 0x103   : > { %s14756_s6 = smov [#allocation25]   ;;  %s14757_s26 = smov [#allocation28]  }
 0x104   : > { %s2526_s23 = sshll.u32 %s14756_s6, 4  ;;  %s2548_s20 = sshll.u32 %s14757_s26, 4  ;;  %s2527_s23 = int_to_ptr.vmem [resolvable:$true] %s2526_s23  ;;  %s2549_s20 = int_to_ptr.vmem [resolvable:$true] %s2548_s20 }
 0x105   : > { %s13494_s29 = scalar_lea.hbm %s14999_s17, 16 }
 0x106   : > { %p13495_p4 = scmp.ne.s32.totalorder %s14999_s17, %s13494_s29  ;;  %p13500_p7 = scmp.lt.u32.totalorder %s13494_s29, %s14999_s17 }
 0x108   : > { %p13496_p5 = pnand %p13495_p4, %p13055_p3 }
 0x10a   : > { %p13497_p6 = pneg %p13496_p5 }
 0x10c   : > { %p13502_p8 = pnand %p13500_p7, %p13497_p6 }
 0x10e   : > { %13505 = shalt.err (!%p13502_p8)
}
 0x10f   : > { %s13506_s2 = scalar_lea.vmem %s2527_s23, 16  ;;  %s13512_s10 = scalar_lea.vmem %s2527_s23, 32 }
 0x110   : > { %p13507_p9 = scmp.ne.s32.totalorder %s2527_s23, %s13506_s2  ;;  %p13513_p12 = scmp.lt.s32.totalorder %s2527_s23, %s2527_s23 }
 0x111   : > { %p13514_p13 = scmp.lt.s32.totalorder %s13512_s10, %s13506_s2 }
 0x112   : > { %p13508_p10 = pnand %p13507_p9, %p13055_p3 }
 0x113   : > { %p13515_p0 = por %p13514_p13, %p13513_p12 }
 0x114   : > { %p13509_p11 = pneg %p13508_p10 }
 0x116   : > { %p13516_p1 = pnand %p13515_p0, %p13509_p11 }
 0x118   : > { %13519 = shalt.err (!%p13516_p1)
}
 0x119   : > { %12894 = dma.hbm_to_vmem [thread:$0]  (%p13055_p3), %s14999_s17, 16, %s2527_s23, [#allocation26]  }
 0x11a   : > { %s13520_s9 = scalar_lea.hbm %s15009_s21, 16 }
 0x11b   : > { %p13521_p4 = scmp.ne.s32.totalorder %s15009_s21, %s13520_s9  ;;  %p13526_p7 = scmp.lt.u32.totalorder %s13520_s9, %s15009_s21 }
 0x11d   : > { %p13522_p5 = pnand %p13521_p4, %p13055_p3 }
 0x11f   : > { %p13523_p6 = pneg %p13522_p5 }
 0x121   : > { %p13528_p8 = pnand %p13526_p7, %p13523_p6 }
 0x123   : > { %13531 = shalt.err (!%p13528_p8)
}
 0x124   : > { %s13532_s8 = scalar_lea.vmem %s2549_s20, 16  ;;  %s13538_s1 = scalar_lea.vmem %s2549_s20, 32 }
 0x125   : > { %p13533_p9 = scmp.ne.s32.totalorder %s2549_s20, %s13532_s8  ;;  %p13539_p12 = scmp.lt.s32.totalorder %s2549_s20, %s2549_s20 }
 0x126   : > { %p13540_p13 = scmp.lt.s32.totalorder %s13538_s1, %s13532_s8 }
 0x127   : > { %p13534_p10 = pnand %p13533_p9, %p13055_p3 }
 0x128   : > { %p13541_p0 = por %p13540_p13, %p13539_p12 }
 0x129   : > { %p13535_p11 = pneg %p13534_p10 }
 0x12b   : > { %p13542_p1 = pnand %p13541_p0, %p13535_p11 }
 0x12d   : > { %13545 = shalt.err (!%p13542_p1)
}
 0x12e   : > { %12898 = dma.hbm_to_vmem [thread:$0]  (%p13055_p3), %s15009_s21, 16, %s2549_s20, [#allocation29]  }
 0x12f   : > { %s14758_s7 = smov [#allocation31]   ;;  %s14759_s15 = smov [#allocation34]  }
 0x130   : > { %s2570_s27 = sshll.u32 %s14758_s7, 4  ;;  %s2592_s16 = sshll.u32 %s14759_s15, 4  ;;  %s2571_s27 = int_to_ptr.vmem [resolvable:$true] %s2570_s27  ;;  %s2593_s16 = int_to_ptr.vmem [resolvable:$true] %s2592_s16 }
 0x131   : > { %s13546_s13 = scalar_lea.hbm %s15019_s19, 16 }
 0x132   : > { %p13547_p4 = scmp.ne.s32.totalorder %s15019_s19, %s13546_s13  ;;  %p13552_p7 = scmp.lt.u32.totalorder %s13546_s13, %s15019_s19 }
 0x134   : > { %p13548_p5 = pnand %p13547_p4, %p13055_p3 }
 0x136   : > { %p13549_p6 = pneg %p13548_p5 }
 0x138   : > { %p13554_p8 = pnand %p13552_p7, %p13549_p6 }
 0x13a   : > { %13557 = shalt.err (!%p13554_p8)
}
 0x13b   : > { %s13558_s25 = scalar_lea.vmem %s2571_s27, 16  ;;  %s13564_s18 = scalar_lea.vmem %s2571_s27, 32 }
 0x13c   : > { %p13559_p9 = scmp.ne.s32.totalorder %s2571_s27, %s13558_s25  ;;  %p13565_p12 = scmp.lt.s32.totalorder %s2571_s27, %s2571_s27 }
 0x13d   : > { %p13566_p13 = scmp.lt.s32.totalorder %s13564_s18, %s13558_s25 }
 0x13e   : > { %p13560_p10 = pnand %p13559_p9, %p13055_p3 }
 0x13f   : > { %p13567_p0 = por %p13566_p13, %p13565_p12 }
 0x140   : > { %p13561_p11 = pneg %p13560_p10 }
 0x142   : > { %p13568_p1 = pnand %p13567_p0, %p13561_p11 }
 0x144   : > { %13571 = shalt.err (!%p13568_p1)
}
 0x145   : > { %12902 = dma.hbm_to_vmem [thread:$0]  (%p13055_p3), %s15019_s19, 16, %s2571_s27, [#allocation32]  }
 0x146   : > { %s13572_s14 = scalar_lea.hbm %s16911_s3, 16 }
 0x147   : > { %p13573_p4 = scmp.ne.s32.totalorder %s16911_s3, %s13572_s14  ;;  %p13578_p7 = scmp.lt.u32.totalorder %s13572_s14, %s16911_s3 }
 0x149   : > { %p13574_p5 = pnand %p13573_p4, %p13055_p3 }
 0x14b   : > { %p13575_p6 = pneg %p13574_p5 }
 0x14d   : > { %p13580_p8 = pnand %p13578_p7, %p13575_p6 }
 0x14f   : > { %13583 = shalt.err (!%p13580_p8)
}
 0x150   : > { %s13584_s6 = scalar_lea.vmem %s2593_s16, 16  ;;  %s13590_s23 = scalar_lea.vmem %s2593_s16, 32 }
 0x151   : > { %p13585_p9 = scmp.ne.s32.totalorder %s2593_s16, %s13584_s6  ;;  %p13591_p12 = scmp.lt.s32.totalorder %s2593_s16, %s2593_s16 }
 0x152   : > { %p13592_p13 = scmp.lt.s32.totalorder %s13590_s23, %s13584_s6 }
 0x153   : > { %p13586_p10 = pnand %p13585_p9, %p13055_p3 }
 0x154   : > { %p13593_p0 = por %p13592_p13, %p13591_p12 }
 0x155   : > { %p13587_p11 = pneg %p13586_p10 }
 0x157   : > { %p13594_p1 = pnand %p13593_p0, %p13587_p11 }
 0x159   : > { %13597 = shalt.err (!%p13594_p1)
}
 0x15a   : > { %12906 = dma.hbm_to_vmem [thread:$0]  (%p13055_p3), %s16911_s3, 16, %s2593_s16, [#allocation35]  }
 0x15b   : > { %s14760_s26 = smov [#allocation37]   ;;  %s14761_s29 = smov [#allocation40]  }
 0x15c   : > { %s2629_s20 = sshll.u32 %s14760_s26, 4  ;;  %s2651_s2 = sshll.u32 %s14761_s29, 4  ;;  %s2630_s20 = int_to_ptr.vmem [resolvable:$true] %s2629_s20  ;;  %s2652_s2 = int_to_ptr.vmem [resolvable:$true] %s2651_s2 }
 0x15d   : > { %s13598_s10 = scalar_lea.hbm %s15054_s12, 16 }
 0x15e   : > { %p13599_p4 = scmp.ne.s32.totalorder %s15054_s12, %s13598_s10  ;;  %p13604_p7 = scmp.lt.u32.totalorder %s13598_s10, %s15054_s12 }
 0x160   : > { %p13600_p5 = pnand %p13599_p4, %p13055_p3 }
 0x162   : > { %p13601_p6 = pneg %p13600_p5 }
 0x164   : > { %p13606_p8 = pnand %p13604_p7, %p13601_p6 }
 0x166   : > { %13609 = shalt.err (!%p13606_p8)
}
 0x167   : > { %s13610_s9 = scalar_lea.vmem %s2630_s20, 16  ;;  %s13616_s8 = scalar_lea.vmem %s2630_s20, 32 }
 0x168   : > { %p13611_p9 = scmp.ne.s32.totalorder %s2630_s20, %s13610_s9  ;;  %p13617_p12 = scmp.lt.s32.totalorder %s2630_s20, %s2630_s20 }
 0x169   : > { %p13618_p13 = scmp.lt.s32.totalorder %s13616_s8, %s13610_s9 }
 0x16a   : > { %p13612_p10 = pnand %p13611_p9, %p13055_p3 }
 0x16b   : > { %p13619_p0 = por %p13618_p13, %p13617_p12 }
 0x16c   : > { %p13613_p11 = pneg %p13612_p10 }
 0x16e   : > { %p13620_p1 = pnand %p13619_p0, %p13613_p11 }
 0x170   : > { %13623 = shalt.err (!%p13620_p1)
}
 0x171   : > { %12910 = dma.hbm_to_vmem [thread:$0]  (%p13055_p3), %s15054_s12, 16, %s2630_s20, [#allocation38]  }
 0x172   : > { %s13624_s1 = scalar_lea.hbm %s15064_s24, 16 }
 0x173   : > { %p13625_p4 = scmp.ne.s32.totalorder %s15064_s24, %s13624_s1  ;;  %p13630_p7 = scmp.lt.u32.totalorder %s13624_s1, %s15064_s24 }
 0x175   : > { %p13626_p5 = pnand %p13625_p4, %p13055_p3 }
 0x177   : > { %p13627_p6 = pneg %p13626_p5 }
 0x179   : > { %p13632_p8 = pnand %p13630_p7, %p13627_p6 }
 0x17b   : > { %13635 = shalt.err (!%p13632_p8)
}
 0x17c   : > { %s13636_s7 = scalar_lea.vmem %s2652_s2, 16  ;;  %s13642_s27 = scalar_lea.vmem %s2652_s2, 32 }
 0x17d   : > { %p13637_p9 = scmp.ne.s32.totalorder %s2652_s2, %s13636_s7  ;;  %p13643_p12 = scmp.lt.s32.totalorder %s2652_s2, %s2652_s2 }
 0x17e   : > { %p13644_p13 = scmp.lt.s32.totalorder %s13642_s27, %s13636_s7 }
 0x17f   : > { %p13638_p10 = pnand %p13637_p9, %p13055_p3 }
 0x180   : > { %p13645_p0 = por %p13644_p13, %p13643_p12 }
 0x181   : > { %p13639_p11 = pneg %p13638_p10 }
 0x183   : > { %p13646_p1 = pnand %p13645_p0, %p13639_p11 }
 0x185   : > { %13649 = shalt.err (!%p13646_p1)
}
 0x186   : > { %12914 = dma.hbm_to_vmem [thread:$0]  (%p13055_p3), %s15064_s24, 16, %s2652_s2, [#allocation41]  }
 0x187   : > { %s14762_s15 = smov [#allocation43]   ;;  %s14763_s13 = smov [#allocation46]  }
 0x188   : > { %s2673_s16 = sshll.u32 %s14762_s15, 4  ;;  %s2695_s25 = sshll.u32 %s14763_s13, 4  ;;  %s2674_s16 = int_to_ptr.vmem [resolvable:$true] %s2673_s16  ;;  %s2696_s25 = int_to_ptr.vmem [resolvable:$true] %s2695_s25 }
 0x189   : > { %s13650_s18 = scalar_lea.hbm %s16909_s5, 16 }
 0x18a   : > { %p13651_p4 = scmp.ne.s32.totalorder %s16909_s5, %s13650_s18  ;;  %p13656_p7 = scmp.lt.u32.totalorder %s13650_s18, %s16909_s5 }
 0x18c   : > { %p13652_p5 = pnand %p13651_p4, %p13055_p3 }
 0x18e   : > { %p13653_p6 = pneg %p13652_p5 }
 0x190   : > { %p13658_p8 = pnand %p13656_p7, %p13653_p6 }
 0x192   : > { %13661 = shalt.err (!%p13658_p8)
}
 0x193   : > { %s13662_s14 = scalar_lea.vmem %s2674_s16, 16  ;;  %s13668_s6 = scalar_lea.vmem %s2674_s16, 32 }
 0x194   : > { %p13663_p9 = scmp.ne.s32.totalorder %s2674_s16, %s13662_s14  ;;  %p13669_p12 = scmp.lt.s32.totalorder %s2674_s16, %s2674_s16 }
 0x195   : > { %p13670_p13 = scmp.lt.s32.totalorder %s13668_s6, %s13662_s14 }
 0x196   : > { %p13664_p10 = pnand %p13663_p9, %p13055_p3 }
 0x197   : > { %p13671_p0 = por %p13670_p13, %p13669_p12 }
 0x198   : > { %p13665_p11 = pneg %p13664_p10 }
 0x19a   : > { %p13672_p1 = pnand %p13671_p0, %p13665_p11 }
 0x19c   : > { %13675 = shalt.err (!%p13672_p1)
}
 0x19d   : > { %12918 = dma.hbm_to_vmem [thread:$0]  (%p13055_p3), %s16909_s5, 16, %s2674_s16, [#allocation44]  }
 0x19e   : > { %s13676_s23 = scalar_lea.hbm %s16910_s4, 16 }
 0x19f   : > { %p13677_p4 = scmp.ne.s32.totalorder %s16910_s4, %s13676_s23  ;;  %p13682_p7 = scmp.lt.u32.totalorder %s13676_s23, %s16910_s4 }
 0x1a1   : > { %p13678_p5 = pnand %p13677_p4, %p13055_p3 }
 0x1a3   : > { %p13679_p6 = pneg %p13678_p5 }
 0x1a5   : > { %p13684_p8 = pnand %p13682_p7, %p13679_p6 }
 0x1a7   : > { %13687 = shalt.err (!%p13684_p8)
}
 0x1a8   : > { %s13688_s26 = scalar_lea.vmem %s2696_s25, 16  ;;  %s13694_s20 = scalar_lea.vmem %s2696_s25, 32 }
 0x1a9   : > { %p13689_p9 = scmp.ne.s32.totalorder %s2696_s25, %s13688_s26  ;;  %p13695_p12 = scmp.lt.s32.totalorder %s2696_s25, %s2696_s25 }
 0x1aa   : > { %p13696_p13 = scmp.lt.s32.totalorder %s13694_s20, %s13688_s26 }
 0x1ab   : > { %p13690_p10 = pnand %p13689_p9, %p13055_p3 }
 0x1ac   : > { %p13697_p0 = por %p13696_p13, %p13695_p12 }
 0x1ad   : > { %p13691_p11 = pneg %p13690_p10 }
 0x1af   : > { %p13698_p1 = pnand %p13697_p0, %p13691_p11 }
 0x1b1   : > { %13701 = shalt.err (!%p13698_p1)
}
 0x1b2   : > { %s16913_s29 = sld [smem:[#allocation153_spill]]  ;;  %s14764_s2 = smov [#allocation49]  }
 0x1b3   : > { %12922 = dma.hbm_to_vmem [thread:$0]  (%p13055_p3), %s16910_s4, 16, %s2696_s25, [#allocation47]  }
 0x1b4   : > { %s2717_s10 = sshll.u32 %s14764_s2, 4  ;;  %s14765_s9 = smov [#allocation52]   ;;  %s2718_s10 = int_to_ptr.vmem [resolvable:$true] %s2717_s10 }
 0x1b5   : > { %s2751_s8 = sshll.u32 %s14765_s9, 4  ;;  %s2752_s8 = int_to_ptr.vmem [resolvable:$true] %s2751_s8 }
 0x1b8   : > { %s13702_s1 = scalar_lea.hbm %s16913_s29, 16 }
 0x1b9   : > { %p13703_p4 = scmp.ne.s32.totalorder %s16913_s29, %s13702_s1  ;;  %p13708_p7 = scmp.lt.u32.totalorder %s13702_s1, %s16913_s29 }
 0x1bb   : > { %p13704_p5 = pnand %p13703_p4, %p13055_p3 }
 0x1bd   : > { %p13705_p6 = pneg %p13704_p5 }
 0x1bf   : > { %p13710_p8 = pnand %p13708_p7, %p13705_p6 }
 0x1c1   : > { %13713 = shalt.err (!%p13710_p8)
}
 0x1c2   : > { %s13714_s7 = scalar_lea.vmem %s2718_s10, 16  ;;  %s13720_s27 = scalar_lea.vmem %s2718_s10, 32 }
 0x1c3   : > { %p13715_p9 = scmp.ne.s32.totalorder %s2718_s10, %s13714_s7  ;;  %p13721_p12 = scmp.lt.s32.totalorder %s2718_s10, %s2718_s10 }
 0x1c4   : > { %p13722_p13 = scmp.lt.s32.totalorder %s13720_s27, %s13714_s7 }
 0x1c5   : > { %p13716_p10 = pnand %p13715_p9, %p13055_p3 }
 0x1c6   : > { %p13723_p0 = por %p13722_p13, %p13721_p12 }
 0x1c7   : > { %p13717_p11 = pneg %p13716_p10 }
 0x1c9   : > { %p13724_p1 = pnand %p13723_p0, %p13717_p11 }
 0x1cb   : > { %13727 = shalt.err (!%p13724_p1)
}
 0x1cc   : > { %s16914_s15 = sld [smem:[#allocation157_spill]] }
 0x1cd   : > { %12926 = dma.hbm_to_vmem [thread:$0]  (%p13055_p3), %s16913_s29, 16, %s2718_s10, [#allocation50]  }
 0x1d2   : > { %s13728_s16 = scalar_lea.hbm %s16914_s15, 16 }
 0x1d3   : > { %p13729_p4 = scmp.ne.s32.totalorder %s16914_s15, %s13728_s16  ;;  %p13734_p7 = scmp.lt.u32.totalorder %s13728_s16, %s16914_s15 }
 0x1d5   : > { %p13730_p5 = pnand %p13729_p4, %p13055_p3 }
 0x1d7   : > { %p13731_p6 = pneg %p13730_p5 }
 0x1d9   : > { %p13736_p8 = pnand %p13734_p7, %p13731_p6 }
 0x1db   : > { %13739 = shalt.err (!%p13736_p8)
}
 0x1dc   : > { %s13740_s13 = scalar_lea.vmem %s2752_s8, 16  ;;  %s13746_s25 = scalar_lea.vmem %s2752_s8, 32 }
 0x1dd   : > { %p13741_p9 = scmp.ne.s32.totalorder %s2752_s8, %s13740_s13  ;;  %p13747_p12 = scmp.lt.s32.totalorder %s2752_s8, %s2752_s8 }
 0x1de   : > { %p13748_p13 = scmp.lt.s32.totalorder %s13746_s25, %s13740_s13 }
 0x1df   : > { %p13742_p10 = pnand %p13741_p9, %p13055_p3 }
 0x1e0   : > { %p13749_p0 = por %p13748_p13, %p13747_p12 }
 0x1e1   : > { %p13743_p11 = pneg %p13742_p10 }
 0x1e3   : > { %p13750_p1 = pnand %p13749_p0, %p13743_p11 }
 0x1e5   : > { %13753 = shalt.err (!%p13750_p1)
}
 0x1e6   : > { %s16915_s18 = sld [smem:[#allocation159_spill]]  ;;  %s14766_s14 = smov [#allocation55]  }
 0x1e7   : > { %12930 = dma.hbm_to_vmem [thread:$0]  (%p13055_p3), %s16914_s15, 16, %s2752_s8, [#allocation53]  }
 0x1e8   : > { %s2773_s6 = sshll.u32 %s14766_s14, 4  ;;  %s14767_s23 = smov [#allocation58]   ;;  %s2774_s6 = int_to_ptr.vmem [resolvable:$true] %s2773_s6 }
 0x1e9   : > { %s2795_s26 = sshll.u32 %s14767_s23, 4  ;;  %s2796_s26 = int_to_ptr.vmem [resolvable:$true] %s2795_s26 }
 0x1ec   : > { %s13754_s20 = scalar_lea.hbm %s16915_s18, 16 }
 0x1ed   : > { %p13755_p4 = scmp.ne.s32.totalorder %s16915_s18, %s13754_s20  ;;  %p13760_p7 = scmp.lt.u32.totalorder %s13754_s20, %s16915_s18 }
 0x1ef   : > { %p13756_p5 = pnand %p13755_p4, %p13055_p3 }
 0x1f1   : > { %p13757_p6 = pneg %p13756_p5 }
 0x1f3   : > { %p13762_p8 = pnand %p13760_p7, %p13757_p6 }
 0x1f5   : > { %13765 = shalt.err (!%p13762_p8)
}
 0x1f6   : > { %s13766_s2 = scalar_lea.vmem %s2774_s6, 16  ;;  %s13772_s10 = scalar_lea.vmem %s2774_s6, 32 }
 0x1f7   : > { %p13767_p9 = scmp.ne.s32.totalorder %s2774_s6, %s13766_s2  ;;  %p13773_p12 = scmp.lt.s32.totalorder %s2774_s6, %s2774_s6 }
 0x1f8   : > { %p13774_p13 = scmp.lt.s32.totalorder %s13772_s10, %s13766_s2 }
 0x1f9   : > { %p13768_p10 = pnand %p13767_p9, %p13055_p3 }
 0x1fa   : > { %p13775_p0 = por %p13774_p13, %p13773_p12 }
 0x1fb   : > { %p13769_p11 = pneg %p13768_p10 }
 0x1fd   : > { %p13776_p1 = pnand %p13775_p0, %p13769_p11 }
 0x1ff   : > { %13779 = shalt.err (!%p13776_p1)
}
 0x200   : > { %s16916_s9 = sld [smem:[#allocation161_spill]] }
 0x201   : > { %12934 = dma.hbm_to_vmem [thread:$0]  (%p13055_p3), %s16915_s18, 16, %s2774_s6, [#allocation56]  }
 0x206   : > { %s13780_s8 = scalar_lea.hbm %s16916_s9, 16 }
 0x207   : > { %p13781_p4 = scmp.ne.s32.totalorder %s16916_s9, %s13780_s8  ;;  %p13786_p7 = scmp.lt.u32.totalorder %s13780_s8, %s16916_s9 }
 0x209   : > { %p13782_p5 = pnand %p13781_p4, %p13055_p3 }
 0x20b   : > { %p13783_p6 = pneg %p13782_p5 }
 0x20d   : > { %p13788_p8 = pnand %p13786_p7, %p13783_p6 }
 0x20f   : > { %13791 = shalt.err (!%p13788_p8)
}
 0x210   : > { %s13792_s1 = scalar_lea.vmem %s2796_s26, 16  ;;  %s13798_s7 = scalar_lea.vmem %s2796_s26, 32 }
 0x211   : > { %p13793_p9 = scmp.ne.s32.totalorder %s2796_s26, %s13792_s1  ;;  %p13799_p12 = scmp.lt.s32.totalorder %s2796_s26, %s2796_s26 }
 0x212   : > { %p13800_p13 = scmp.lt.s32.totalorder %s13798_s7, %s13792_s1 }
 0x213   : > { %p13794_p10 = pnand %p13793_p9, %p13055_p3 }
 0x214   : > { %p13801_p0 = por %p13800_p13, %p13799_p12 }
 0x215   : > { %p13795_p11 = pneg %p13794_p10 }
 0x217   : > { %p13802_p1 = pnand %p13801_p0, %p13795_p11 }
 0x219   : > { %13805 = shalt.err (!%p13802_p1)
}
 0x21a   : > { %s16917_s27 = sld [smem:[#allocation163_spill]]  ;;  %s14768_s16 = smov [#allocation61]  }
 0x21b   : > { %12938 = dma.hbm_to_vmem [thread:$0]  (%p13055_p3), %s16916_s9, 16, %s2796_s26, [#allocation59]  }
 0x21c   : > { %s2817_s13 = sshll.u32 %s14768_s16, 4  ;;  %s14769_s25 = smov [#allocation64]   ;;  %s2818_s13 = int_to_ptr.vmem [resolvable:$true] %s2817_s13 }
 0x21d   : > { %s2839_s14 = sshll.u32 %s14769_s25, 4  ;;  %s2840_s14 = int_to_ptr.vmem [resolvable:$true] %s2839_s14 }
 0x220   : > { %s13806_s6 = scalar_lea.hbm %s16917_s27, 16 }
 0x221   : > { %p13807_p4 = scmp.ne.s32.totalorder %s16917_s27, %s13806_s6  ;;  %p13812_p7 = scmp.lt.u32.totalorder %s13806_s6, %s16917_s27 }
 0x223   : > { %p13808_p5 = pnand %p13807_p4, %p13055_p3 }
 0x225   : > { %p13809_p6 = pneg %p13808_p5 }
 0x227   : > { %p13814_p8 = pnand %p13812_p7, %p13809_p6 }
 0x229   : > { %13817 = shalt.err (!%p13814_p8)
}
 0x22a   : > { %s13818_s23 = scalar_lea.vmem %s2818_s13, 16  ;;  %s13824_s26 = scalar_lea.vmem %s2818_s13, 32 }
 0x22b   : > { %p13819_p9 = scmp.ne.s32.totalorder %s2818_s13, %s13818_s23  ;;  %p13825_p12 = scmp.lt.s32.totalorder %s2818_s13, %s2818_s13 }
 0x22c   : > { %p13826_p13 = scmp.lt.s32.totalorder %s13824_s26, %s13818_s23 }
 0x22d   : > { %p13820_p10 = pnand %p13819_p9, %p13055_p3 }
 0x22e   : > { %p13827_p0 = por %p13826_p13, %p13825_p12 }
 0x22f   : > { %p13821_p11 = pneg %p13820_p10 }
 0x231   : > { %p13828_p1 = pnand %p13827_p0, %p13821_p11 }
 0x233   : > { %13831 = shalt.err (!%p13828_p1)
}
 0x234   : > { %s16918_s20 = sld [smem:[#allocation165_spill]] }
 0x235   : > { %12942 = dma.hbm_to_vmem [thread:$0]  (%p13055_p3), %s16917_s27, 16, %s2818_s13, [#allocation62]  }
 0x23a   : > { %s13832_s2 = scalar_lea.hbm %s16918_s20, 16 }
 0x23b   : > { %p13833_p4 = scmp.ne.s32.totalorder %s16918_s20, %s13832_s2  ;;  %p13838_p7 = scmp.lt.u32.totalorder %s13832_s2, %s16918_s20 }
 0x23d   : > { %p13834_p5 = pnand %p13833_p4, %p13055_p3 }
 0x23f   : > { %p13835_p6 = pneg %p13834_p5 }
 0x241   : > { %p13840_p8 = pnand %p13838_p7, %p13835_p6 }
 0x243   : > { %13843 = shalt.err (!%p13840_p8)
}
 0x244   : > { %s13844_s10 = scalar_lea.vmem %s2840_s14, 16  ;;  %s13850_s8 = scalar_lea.vmem %s2840_s14, 32 }
 0x245   : > { %p13845_p9 = scmp.ne.s32.totalorder %s2840_s14, %s13844_s10  ;;  %p13851_p12 = scmp.lt.s32.totalorder %s2840_s14, %s2840_s14 }
 0x246   : > { %p13852_p13 = scmp.lt.s32.totalorder %s13850_s8, %s13844_s10 }
 0x247   : > { %p13846_p10 = pnand %p13845_p9, %p13055_p3 }
 0x248   : > { %p13853_p0 = por %p13852_p13, %p13851_p12 }
 0x249   : > { %p13847_p11 = pneg %p13846_p10 }
 0x24b   : > { %p13854_p1 = pnand %p13853_p0, %p13847_p11 }
 0x24d   : > { %13857 = shalt.err (!%p13854_p1)
}
 0x24e   : > { %s16919_s1 = sld [smem:[#allocation171_spill]]  ;;  %s14770_s7 = smov [#allocation67]  }
 0x24f   : > { %12946 = dma.hbm_to_vmem [thread:$0]  (%p13055_p3), %s16918_s20, 16, %s2840_s14, [#allocation65]  }
 0x250   : > { %s2879_s16 = sshll.u32 %s14770_s7, 4  ;;  %s14771_s13 = smov [#allocation70]   ;;  %s2880_s16 = int_to_ptr.vmem [resolvable:$true] %s2879_s16 }
 0x251   : > { %s2901_s25 = sshll.u32 %s14771_s13, 4  ;;  %s2902_s25 = int_to_ptr.vmem [resolvable:$true] %s2901_s25 }
 0x254   : > { %s13858_s6 = scalar_lea.hbm %s16919_s1, 16 }
 0x255   : > { %p13859_p4 = scmp.ne.s32.totalorder %s16919_s1, %s13858_s6  ;;  %p13864_p7 = scmp.lt.u32.totalorder %s13858_s6, %s16919_s1 }
 0x257   : > { %p13860_p5 = pnand %p13859_p4, %p13055_p3 }
 0x259   : > { %p13861_p6 = pneg %p13860_p5 }
 0x25b   : > { %p13866_p8 = pnand %p13864_p7, %p13861_p6 }
 0x25d   : > { %13869 = shalt.err (!%p13866_p8)
}
 0x25e   : > { %s13870_s23 = scalar_lea.vmem %s2880_s16, 16  ;;  %s13876_s14 = scalar_lea.vmem %s2880_s16, 32 }
 0x25f   : > { %p13871_p9 = scmp.ne.s32.totalorder %s2880_s16, %s13870_s23  ;;  %p13877_p12 = scmp.lt.s32.totalorder %s2880_s16, %s2880_s16 }
 0x260   : > { %p13878_p13 = scmp.lt.s32.totalorder %s13876_s14, %s13870_s23 }
 0x261   : > { %p13872_p10 = pnand %p13871_p9, %p13055_p3 }
 0x262   : > { %p13879_p0 = por %p13878_p13, %p13877_p12 }
 0x263   : > { %p13873_p11 = pneg %p13872_p10 }
 0x265   : > { %p13880_p1 = pnand %p13879_p0, %p13873_p11 }
 0x267   : > { %13883 = shalt.err (!%p13880_p1)
}
 0x268   : > { %s16920_s26 = sld [smem:[#allocation173_spill]] }
 0x269   : > { %12950 = dma.hbm_to_vmem [thread:$0]  (%p13055_p3), %s16919_s1, 16, %s2880_s16, [#allocation68]  }
 0x26e   : > { %s13884_s2 = scalar_lea.hbm %s16920_s26, 16 }
 0x26f   : > { %p13885_p4 = scmp.ne.s32.totalorder %s16920_s26, %s13884_s2  ;;  %p13890_p7 = scmp.lt.u32.totalorder %s13884_s2, %s16920_s26 }
 0x271   : > { %p13886_p5 = pnand %p13885_p4, %p13055_p3 }
 0x273   : > { %p13887_p6 = pneg %p13886_p5 }
 0x275   : > { %p13892_p8 = pnand %p13890_p7, %p13887_p6 }
 0x277   : > { %13895 = shalt.err (!%p13892_p8)
}
 0x278   : > { %s13896_s10 = scalar_lea.vmem %s2902_s25, 16  ;;  %s13902_s8 = scalar_lea.vmem %s2902_s25, 32 }
 0x279   : > { %p13897_p9 = scmp.ne.s32.totalorder %s2902_s25, %s13896_s10  ;;  %p13903_p12 = scmp.lt.s32.totalorder %s2902_s25, %s2902_s25 }
 0x27a   : > { %p13904_p13 = scmp.lt.s32.totalorder %s13902_s8, %s13896_s10 }
 0x27b   : > { %p13898_p10 = pnand %p13897_p9, %p13055_p3 }
 0x27c   : > { %p13905_p0 = por %p13904_p13, %p13903_p12 }
 0x27d   : > { %p13899_p11 = pneg %p13898_p10 }
 0x27f   : > { %p13906_p1 = pnand %p13905_p0, %p13899_p11 }
 0x281   : > { %13909 = shalt.err (!%p13906_p1)
}
 0x282   : > { %s16921_s7 = sld [smem:[#allocation175_spill]]  ;;  %s14772_s16 = smov [#allocation73]  }
 0x283   : > { %12954 = dma.hbm_to_vmem [thread:$0]  (%p13055_p3), %s16920_s26, 16, %s2902_s25, [#allocation71]  }
 0x284   : > { %s2923_s13 = sshll.u32 %s14772_s16, 4  ;;  %s14773_s6 = smov [#allocation76]   ;;  %s2924_s13 = int_to_ptr.vmem [resolvable:$true] %s2923_s13 }
 0x285   : > { %s2945_s23 = sshll.u32 %s14773_s6, 4  ;;  %s2946_s23 = int_to_ptr.vmem [resolvable:$true] %s2945_s23 }
 0x288   : > { %s13910_s14 = scalar_lea.hbm %s16921_s7, 16 }
 0x289   : > { %p13911_p4 = scmp.ne.s32.totalorder %s16921_s7, %s13910_s14  ;;  %p13916_p7 = scmp.lt.u32.totalorder %s13910_s14, %s16921_s7 }
 0x28b   : > { %p13912_p5 = pnand %p13911_p4, %p13055_p3 }
 0x28d   : > { %p13913_p6 = pneg %p13912_p5 }
 0x28f   : > { %p13918_p8 = pnand %p13916_p7, %p13913_p6 }
 0x291   : > { %13921 = shalt.err (!%p13918_p8)
}
 0x292   : > { %s13922_s2 = scalar_lea.vmem %s2924_s13, 16  ;;  %s13928_s25 = scalar_lea.vmem %s2924_s13, 32 }
 0x293   : > { %p13923_p9 = scmp.ne.s32.totalorder %s2924_s13, %s13922_s2  ;;  %p13929_p12 = scmp.lt.s32.totalorder %s2924_s13, %s2924_s13 }
 0x294   : > { %p13930_p13 = scmp.lt.s32.totalorder %s13928_s25, %s13922_s2 }
 0x295   : > { %p13924_p10 = pnand %p13923_p9, %p13055_p3 }
 0x296   : > { %p13931_p0 = por %p13930_p13, %p13929_p12 }
 0x297   : > { %p13925_p11 = pneg %p13924_p10 }
 0x299   : > { %p13932_p1 = pnand %p13931_p0, %p13925_p11 }
 0x29b   : > { %13935 = shalt.err (!%p13932_p1)
}
 0x29c   : > { %s16922_s10 = sld [smem:[#allocation177_spill]] }
 0x29d   : > { %12958 = dma.hbm_to_vmem [thread:$0]  (%p13055_p3), %s16921_s7, 16, %s2924_s13, [#allocation74]  }
 0x2a2   : > { %s13936_s8 = scalar_lea.hbm %s16922_s10, 16 }
 0x2a3   : > { %p13937_p4 = scmp.ne.s32.totalorder %s16922_s10, %s13936_s8  ;;  %p13942_p7 = scmp.lt.u32.totalorder %s13936_s8, %s16922_s10 }
 0x2a5   : > { %p13938_p5 = pnand %p13937_p4, %p13055_p3 }
 0x2a7   : > { %p13939_p6 = pneg %p13938_p5 }
 0x2a9   : > { %p13944_p8 = pnand %p13942_p7, %p13939_p6 }
 0x2ab   : > { %13947 = shalt.err (!%p13944_p8)
}
 0x2ac   : > { %s13948_s16 = scalar_lea.vmem %s2946_s23, 16  ;;  %s13954_s6 = scalar_lea.vmem %s2946_s23, 32 }
 0x2ad   : > { %p13949_p9 = scmp.ne.s32.totalorder %s2946_s23, %s13948_s16  ;;  %p13955_p12 = scmp.lt.s32.totalorder %s2946_s23, %s2946_s23 }
 0x2ae   : > { %p13956_p13 = scmp.lt.s32.totalorder %s13954_s6, %s13948_s16 }
 0x2af   : > { %p13950_p10 = pnand %p13949_p9, %p13055_p3 }
 0x2b0   : > { %p13957_p0 = por %p13956_p13, %p13955_p12 }
 0x2b1   : > { %p13951_p11 = pneg %p13950_p10 }
 0x2b3   : > { %p13958_p1 = pnand %p13957_p0, %p13951_p11 }
 0x2b5   : > { %13961 = shalt.err (!%p13958_p1)
}
 0x2b6   : > { %s16923_s13 = sld [smem:[#allocation179_spill]]  ;;  %s14774_s14 = smov [#allocation79]  }
 0x2b7   : > { %12962 = dma.hbm_to_vmem [thread:$0]  (%p13055_p3), %s16922_s10, 16, %s2946_s23, [#allocation77]  }
 0x2b8   : > { %s2967_s2 = sshll.u32 %s14774_s14, 4  ;;  %s2968_s2 = int_to_ptr.vmem [resolvable:$true] %s2967_s2 }
 0x2bc   : > { %s13962_s25 = scalar_lea.hbm %s16923_s13, 16 }
 0x2bd   : > { %p13963_p4 = scmp.ne.s32.totalorder %s16923_s13, %s13962_s25  ;;  %p13968_p7 = scmp.lt.u32.totalorder %s13962_s25, %s16923_s13 }
 0x2bf   : > { %p13964_p5 = pnand %p13963_p4, %p13055_p3 }
 0x2c1   : > { %p13965_p6 = pneg %p13964_p5 }
 0x2c3   : > { %p13970_p8 = pnand %p13968_p7, %p13965_p6 }
 0x2c5   : > { %13973 = shalt.err (!%p13970_p8)
}
 0x2c6   : > { %s13974_s8 = scalar_lea.vmem %s2968_s2, 16  ;;  %s13980_s16 = scalar_lea.vmem %s2968_s2, 32 }
 0x2c7   : > { %p13975_p9 = scmp.ne.s32.totalorder %s2968_s2, %s13974_s8  ;;  %p13981_p12 = scmp.lt.s32.totalorder %s2968_s2, %s2968_s2 }
 0x2c8   : > { %p13982_p13 = scmp.lt.s32.totalorder %s13980_s16, %s13974_s8 }
 0x2c9   : > { %p13976_p10 = pnand %p13975_p9, %p13055_p3 }
 0x2ca   : > { %p13983_p0 = por %p13982_p13, %p13981_p12 }
 0x2cb   : > { %p13977_p11 = pneg %p13976_p10 }
 0x2cd   : > { %p13984_p1 = pnand %p13983_p0, %p13977_p11 }
 0x2cf   : > { %13987 = shalt.err (!%p13984_p1)
}
 0x2d0   : > { %s16924_s23 = sld [smem:[#allocation133_spill]]  ;;  %s14775_s6 = smov [#allocation17]  }
 0x2d1   : > { %12966 = dma.hbm_to_vmem [thread:$0]  (%p13055_p3), %s16923_s13, 16, %s2968_s2, [#allocation80]  }
 0x2d2   : > { %s2456_s14 = sshll.u32 %s14775_s6, 4  ;;  %s14776_s25 = smov [#allocation21]   ;;  %s2457_s14 = int_to_ptr.vmem [resolvable:$true] %s2456_s14 }
 0x2d3   : > { %s2484_s1 = sshll.u32 %s14776_s25, 4  ;;  %s2485_s1 = int_to_ptr.vmem [resolvable:$true] %s2484_s1 }
 0x2d6   : > { %s13988_s3 = scalar_lea.hbm %s16924_s23, 16 }
 0x2d7   : > { %p13989_p4 = scmp.ne.s32.totalorder %s16924_s23, %s13988_s3  ;;  %p13994_p7 = scmp.lt.u32.totalorder %s13988_s3, %s16924_s23 }
 0x2d9   : > { %p13990_p5 = pnand %p13989_p4, %p13055_p3 }
 0x2db   : > { %p13991_p6 = pneg %p13990_p5 }
 0x2dd   : > { %p13996_p8 = pnand %p13994_p7, %p13991_p6 }
 0x2df   : > { %13999 = shalt.err (!%p13996_p8)
}
 0x2e0   : > { %s14000_s8 = scalar_lea.vmem %s2457_s14, 16  ;;  %s14006_s2 = scalar_lea.vmem %s2457_s14, 32 }
 0x2e1   : > { %p14001_p9 = scmp.ne.s32.totalorder %s2457_s14, %s14000_s8  ;;  %p14007_p12 = scmp.lt.s32.totalorder %s2457_s14, %s2457_s14 }
 0x2e2   : > { %p14008_p13 = scmp.lt.s32.totalorder %s14006_s2, %s14000_s8 }
 0x2e3   : > { %p14002_p10 = pnand %p14001_p9, %p13055_p3 }
 0x2e4   : > { %p14009_p0 = por %p14008_p13, %p14007_p12 }
 0x2e5   : > { %p14003_p11 = pneg %p14002_p10 }
 0x2e7   : > { %p14010_p1 = pnand %p14009_p0, %p14003_p11 }
 0x2e9   : > { %14013 = shalt.err (!%p14010_p1)
}
 0x2ea   : > { %s16925_s16 = sld [smem:[#allocation136_spill]] }
 0x2eb   : > { %12884 = dma.hbm_to_vmem [thread:$0]  (%p13055_p3), %s16924_s23, 16, %s2457_s14, [#allocation18]  }
 0x2f0   : > { %s14014_s3 = scalar_lea.hbm %s16925_s16, 16 }
 0x2f1   : > { %p14015_p4 = scmp.ne.s32.totalorder %s16925_s16, %s14014_s3  ;;  %p14020_p7 = scmp.lt.u32.totalorder %s14014_s3, %s16925_s16 }
 0x2f3   : > { %p14016_p5 = pnand %p14015_p4, %p13055_p3 }
 0x2f5   : > { %p14017_p6 = pneg %p14016_p5 }
 0x2f7   : > { %p14022_p8 = pnand %p14020_p7, %p14017_p6 }
 0x2f9   : > { %14025 = shalt.err (!%p14022_p8)
}
 0x2fa   : > { %s14026_s6 = scalar_lea.vmem %s2485_s1, 16  ;;  %s14032_s25 = scalar_lea.vmem %s2485_s1, 32 }
 0x2fb   : > { %p14027_p9 = scmp.ne.s32.totalorder %s2485_s1, %s14026_s6  ;;  %p14033_p12 = scmp.lt.s32.totalorder %s2485_s1, %s2485_s1 }
 0x2fc   : > { %p14034_p13 = scmp.lt.s32.totalorder %s14032_s25, %s14026_s6 }
 0x2fd   : > { %p14028_p10 = pnand %p14027_p9, %p13055_p3 }
 0x2fe   : > { %p14035_p0 = por %p14034_p13, %p14033_p12 }
 0x2ff   : > { %p14029_p11 = pneg %p14028_p10 }
 0x301   : > { %p14036_p1 = pnand %p14035_p0, %p14029_p11 }
 0x303   : > { %14039 = shalt.err (!%p14036_p1)
}
 0x304   : > { %s16926_s14 = sld [smem:[#allocation138_spill]]  ;;  %s14777_s8 = smov [#allocation24]  }
 0x305   : > { %12888 = dma.hbm_to_vmem [thread:$0]  (%p13055_p3), %s16925_s16, 16, %s2485_s1, [#allocation20]  }
 0x306   : > { %s2515_s2 = sshll.u32 %s14777_s8, 4  ;;  %s14778_s3 = smov [#allocation27]   ;;  %s2516_s2 = int_to_ptr.vmem [resolvable:$true] %s2515_s2 }
 0x307   : > { %s2537_s4 = sshll.u32 %s14778_s3, 4  ;;  %s2538_s4 = int_to_ptr.vmem [resolvable:$true] %s2537_s4 }
 0x30a   : > { %s14040_s5 = scalar_lea.hbm %s16926_s14, 16 }
 0x30b   : > { %p14041_p4 = scmp.ne.s32.totalorder %s16926_s14, %s14040_s5  ;;  %p14046_p7 = scmp.lt.u32.totalorder %s14040_s5, %s16926_s14 }
 0x30d   : > { %p14042_p5 = pnand %p14041_p4, %p13055_p3 }
 0x30f   : > { %p14043_p6 = pneg %p14042_p5 }
 0x311   : > { %p14048_p8 = pnand %p14046_p7, %p14043_p6 }
 0x313   : > { %14051 = shalt.err (!%p14048_p8)
}
 0x314   : > { %s14052_s6 = scalar_lea.vmem %s2516_s2, 16  ;;  %s14058_s1 = scalar_lea.vmem %s2516_s2, 32 }
 0x315   : > { %p14053_p9 = scmp.ne.s32.totalorder %s2516_s2, %s14052_s6  ;;  %p14059_p12 = scmp.lt.s32.totalorder %s2516_s2, %s2516_s2 }
 0x316   : > { %p14060_p13 = scmp.lt.s32.totalorder %s14058_s1, %s14052_s6 }
 0x317   : > { %p14054_p10 = pnand %p14053_p9, %p13055_p3 }
 0x318   : > { %p14061_p0 = por %p14060_p13, %p14059_p12 }
 0x319   : > { %p14055_p11 = pneg %p14054_p10 }
 0x31b   : > { %p14062_p1 = pnand %p14061_p0, %p14055_p11 }
 0x31d   : > { %14065 = shalt.err (!%p14062_p1)
}
 0x31e   : > { %s16927_s25 = sld [smem:[#allocation139_spill]] }
 0x31f   : > { %12892 = dma.hbm_to_vmem [thread:$0]  (%p13055_p3), %s16926_s14, 16, %s2516_s2, [#allocation23]  }
 0x324   : > { %s14066_s5 = scalar_lea.hbm %s16927_s25, 16 }
 0x325   : > { %p14067_p4 = scmp.ne.s32.totalorder %s16927_s25, %s14066_s5  ;;  %p14072_p7 = scmp.lt.u32.totalorder %s14066_s5, %s16927_s25 }
 0x327   : > { %p14068_p5 = pnand %p14067_p4, %p13055_p3 }
 0x329   : > { %p14069_p6 = pneg %p14068_p5 }
 0x32b   : > { %p14074_p8 = pnand %p14072_p7, %p14069_p6 }
 0x32d   : > { %14077 = shalt.err (!%p14074_p8)
}
 0x32e   : > { %s14078_s8 = scalar_lea.vmem %s2538_s4, 16  ;;  %s14084_s3 = scalar_lea.vmem %s2538_s4, 32 }
 0x32f   : > { %p14079_p9 = scmp.ne.s32.totalorder %s2538_s4, %s14078_s8  ;;  %p14085_p12 = scmp.lt.s32.totalorder %s2538_s4, %s2538_s4 }
 0x330   : > { %p14086_p13 = scmp.lt.s32.totalorder %s14084_s3, %s14078_s8 }
 0x331   : > { %p14080_p10 = pnand %p14079_p9, %p13055_p3 }
 0x332   : > { %p14087_p0 = por %p14086_p13, %p14085_p12 }
 0x333   : > { %p14081_p11 = pneg %p14080_p10 }
 0x335   : > { %p14088_p1 = pnand %p14087_p0, %p14081_p11 }
 0x337   : > { %14091 = shalt.err (!%p14088_p1)
}
 0x338   : > { %s16928_s2 = sld [smem:[#allocation140_spill]]  ;;  %s14779_s6 = smov [#allocation30]  }
 0x339   : > { %12896 = dma.hbm_to_vmem [thread:$0]  (%p13055_p3), %s16927_s25, 16, %s2538_s4, [#allocation26]  }
 0x33a   : > { %s2559_s1 = sshll.u32 %s14779_s6, 4  ;;  %s14780_s5 = smov [#allocation33]   ;;  %s2560_s1 = int_to_ptr.vmem [resolvable:$true] %s2559_s1 }
 0x33b   : > { %s2581_s7 = sshll.u32 %s14780_s5, 4  ;;  %s2582_s7 = int_to_ptr.vmem [resolvable:$true] %s2581_s7 }
 0x33e   : > { %s14092_s9 = scalar_lea.hbm %s16928_s2, 16 }
 0x33f   : > { %p14093_p4 = scmp.ne.s32.totalorder %s16928_s2, %s14092_s9  ;;  %p14098_p7 = scmp.lt.u32.totalorder %s14092_s9, %s16928_s2 }
 0x341   : > { %p14094_p5 = pnand %p14093_p4, %p13055_p3 }
 0x343   : > { %p14095_p6 = pneg %p14094_p5 }
 0x345   : > { %p14100_p8 = pnand %p14098_p7, %p14095_p6 }
 0x347   : > { %14103 = shalt.err (!%p14100_p8)
}
 0x348   : > { %s14104_s8 = scalar_lea.vmem %s2560_s1, 16  ;;  %s14110_s4 = scalar_lea.vmem %s2560_s1, 32 }
 0x349   : > { %p14105_p9 = scmp.ne.s32.totalorder %s2560_s1, %s14104_s8  ;;  %p14111_p12 = scmp.lt.s32.totalorder %s2560_s1, %s2560_s1 }
 0x34a   : > { %p14112_p13 = scmp.lt.s32.totalorder %s14110_s4, %s14104_s8 }
 0x34b   : > { %p14106_p10 = pnand %p14105_p9, %p13055_p3 }
 0x34c   : > { %p14113_p0 = por %p14112_p13, %p14111_p12 }
 0x34d   : > { %p14107_p11 = pneg %p14106_p10 }
 0x34f   : > { %p14114_p1 = pnand %p14113_p0, %p14107_p11 }
 0x351   : > { %14117 = shalt.err (!%p14114_p1)
}
 0x352   : > { %s16929_s3 = sld [smem:[#allocation141_spill]] }
 0x353   : > { %12900 = dma.hbm_to_vmem [thread:$0]  (%p13055_p3), %s16928_s2, 16, %s2560_s1, [#allocation29]  }
 0x358   : > { %s14118_s9 = scalar_lea.hbm %s16929_s3, 16 }
 0x359   : > { %p14119_p4 = scmp.ne.s32.totalorder %s16929_s3, %s14118_s9  ;;  %p14124_p7 = scmp.lt.u32.totalorder %s14118_s9, %s16929_s3 }
 0x35b   : > { %p14120_p5 = pnand %p14119_p4, %p13055_p3 }
 0x35d   : > { %p14121_p6 = pneg %p14120_p5 }
 0x35f   : > { %p14126_p8 = pnand %p14124_p7, %p14121_p6 }
 0x361   : > { %14129 = shalt.err (!%p14126_p8)
}
 0x362   : > { %s14130_s6 = scalar_lea.vmem %s2582_s7, 16  ;;  %s14136_s5 = scalar_lea.vmem %s2582_s7, 32 }
 0x363   : > { %p14131_p9 = scmp.ne.s32.totalorder %s2582_s7, %s14130_s6  ;;  %p14137_p12 = scmp.lt.s32.totalorder %s2582_s7, %s2582_s7 }
 0x364   : > { %p14138_p13 = scmp.lt.s32.totalorder %s14136_s5, %s14130_s6 }
 0x365   : > { %p14132_p10 = pnand %p14131_p9, %p13055_p3 }
 0x366   : > { %p14139_p0 = por %p14138_p13, %p14137_p12 }
 0x367   : > { %p14133_p11 = pneg %p14132_p10 }
 0x369   : > { %p14140_p1 = pnand %p14139_p0, %p14133_p11 }
 0x36b   : > { %14143 = shalt.err (!%p14140_p1)
}
 0x36c   : > { %s16930_s1 = sld [smem:[#allocation143_spill]]  ;;  %s14781_s8 = smov [#allocation36]  }
 0x36d   : > { %12904 = dma.hbm_to_vmem [thread:$0]  (%p13055_p3), %s16929_s3, 16, %s2582_s7, [#allocation32]  }
 0x36e   : > { %s2603_s4 = sshll.u32 %s14781_s8, 4  ;;  %s14782_s9 = smov [#allocation39]   ;;  %s2604_s4 = int_to_ptr.vmem [resolvable:$true] %s2603_s4 }
 0x36f   : > { %s2640_s2 = sshll.u32 %s14782_s9, 4  ;;  %s2641_s2 = int_to_ptr.vmem [resolvable:$true] %s2640_s2 }
 0x372   : > { %s14144_s10 = scalar_lea.hbm %s16930_s1, 16 }
 0x373   : > { %p14145_p4 = scmp.ne.s32.totalorder %s16930_s1, %s14144_s10  ;;  %p14150_p7 = scmp.lt.u32.totalorder %s14144_s10, %s16930_s1 }
 0x375   : > { %p14146_p5 = pnand %p14145_p4, %p13055_p3 }
 0x377   : > { %p14147_p6 = pneg %p14146_p5 }
 0x379   : > { %p14152_p8 = pnand %p14150_p7, %p14147_p6 }
 0x37b   : > { %14155 = shalt.err (!%p14152_p8)
}
 0x37c   : > { %s14156_s6 = scalar_lea.vmem %s2604_s4, 16  ;;  %s14162_s7 = scalar_lea.vmem %s2604_s4, 32 }
 0x37d   : > { %p14157_p9 = scmp.ne.s32.totalorder %s2604_s4, %s14156_s6  ;;  %p14163_p12 = scmp.lt.s32.totalorder %s2604_s4, %s2604_s4 }
 0x37e   : > { %p14164_p13 = scmp.lt.s32.totalorder %s14162_s7, %s14156_s6 }
 0x37f   : > { %p14158_p10 = pnand %p14157_p9, %p13055_p3 }
 0x380   : > { %p14165_p0 = por %p14164_p13, %p14163_p12 }
 0x381   : > { %p14159_p11 = pneg %p14158_p10 }
 0x383   : > { %p14166_p1 = pnand %p14165_p0, %p14159_p11 }
 0x385   : > { %14169 = shalt.err (!%p14166_p1)
}
 0x386   : > { %s16931_s5 = sld [smem:[#allocation147_spill]] }
 0x387   : > { %12908 = dma.hbm_to_vmem [thread:$0]  (%p13055_p3), %s16930_s1, 16, %s2604_s4, [#allocation35]  }
 0x38c   : > { %s14170_s10 = scalar_lea.hbm %s16931_s5, 16 }
 0x38d   : > { %p14171_p4 = scmp.ne.s32.totalorder %s16931_s5, %s14170_s10  ;;  %p14176_p7 = scmp.lt.u32.totalorder %s14170_s10, %s16931_s5 }
 0x38f   : > { %p14172_p5 = pnand %p14171_p4, %p13055_p3 }
 0x391   : > { %p14173_p6 = pneg %p14172_p5 }
 0x393   : > { %p14178_p8 = pnand %p14176_p7, %p14173_p6 }
 0x395   : > { %14181 = shalt.err (!%p14178_p8)
}
 0x396   : > { %s14182_s8 = scalar_lea.vmem %s2641_s2, 16  ;;  %s14188_s9 = scalar_lea.vmem %s2641_s2, 32 }
 0x397   : > { %p14183_p9 = scmp.ne.s32.totalorder %s2641_s2, %s14182_s8  ;;  %p14189_p12 = scmp.lt.s32.totalorder %s2641_s2, %s2641_s2 }
 0x398   : > { %p14190_p13 = scmp.lt.s32.totalorder %s14188_s9, %s14182_s8 }
 0x399   : > { %p14184_p10 = pnand %p14183_p9, %p13055_p3 }
 0x39a   : > { %p14191_p0 = por %p14190_p13, %p14189_p12 }
 0x39b   : > { %p14185_p11 = pneg %p14184_p10 }
 0x39d   : > { %p14192_p1 = pnand %p14191_p0, %p14185_p11 }
 0x39f   : > { %14195 = shalt.err (!%p14192_p1)
}
 0x3a0   : > { %s16932_s4 = sld [smem:[#allocation148_spill]]  ;;  %s14783_s6 = smov [#allocation42]  }
 0x3a1   : > { %12912 = dma.hbm_to_vmem [thread:$0]  (%p13055_p3), %s16931_s5, 16, %s2641_s2, [#allocation38]  }
 0x3a2   : > { %s2662_s7 = sshll.u32 %s14783_s6, 4  ;;  %s14784_s10 = smov [#allocation45]   ;;  %s2663_s7 = int_to_ptr.vmem [resolvable:$true] %s2662_s7 }
 0x3a3   : > { %s2684_s1 = sshll.u32 %s14784_s10, 4  ;;  %s2685_s1 = int_to_ptr.vmem [resolvable:$true] %s2684_s1 }
 0x3a6   : > { %s14196_s3 = scalar_lea.hbm %s16932_s4, 16 }
 0x3a7   : > { %p14197_p4 = scmp.ne.s32.totalorder %s16932_s4, %s14196_s3  ;;  %p14202_p7 = scmp.lt.u32.totalorder %s14196_s3, %s16932_s4 }
 0x3a9   : > { %p14198_p5 = pnand %p14197_p4, %p13055_p3 }
 0x3ab   : > { %p14199_p6 = pneg %p14198_p5 }
 0x3ad   : > { %p14204_p8 = pnand %p14202_p7, %p14199_p6 }
 0x3af   : > { %14207 = shalt.err (!%p14204_p8)
}
 0x3b0   : > { %s14208_s8 = scalar_lea.vmem %s2663_s7, 16  ;;  %s14214_s2 = scalar_lea.vmem %s2663_s7, 32 }
 0x3b1   : > { %p14209_p9 = scmp.ne.s32.totalorder %s2663_s7, %s14208_s8  ;;  %p14215_p12 = scmp.lt.s32.totalorder %s2663_s7, %s2663_s7 }
 0x3b2   : > { %p14216_p13 = scmp.lt.s32.totalorder %s14214_s2, %s14208_s8 }
 0x3b3   : > { %p14210_p10 = pnand %p14209_p9, %p13055_p3 }
 0x3b4   : > { %p14217_p0 = por %p14216_p13, %p14215_p12 }
 0x3b5   : > { %p14211_p11 = pneg %p14210_p10 }
 0x3b7   : > { %p14218_p1 = pnand %p14217_p0, %p14211_p11 }
 0x3b9   : > { %14221 = shalt.err (!%p14218_p1)
}
 0x3ba   : > { %s16933_s9 = sld [smem:[#allocation150_spill]] }
 0x3bb   : > { %12916 = dma.hbm_to_vmem [thread:$0]  (%p13055_p3), %s16932_s4, 16, %s2663_s7, [#allocation41]  }
 0x3c0   : > { %s14222_s3 = scalar_lea.hbm %s16933_s9, 16 }
 0x3c1   : > { %p14223_p4 = scmp.ne.s32.totalorder %s16933_s9, %s14222_s3  ;;  %p14228_p7 = scmp.lt.u32.totalorder %s14222_s3, %s16933_s9 }
 0x3c3   : > { %p14224_p5 = pnand %p14223_p4, %p13055_p3 }
 0x3c5   : > { %p14225_p6 = pneg %p14224_p5 }
 0x3c7   : > { %p14230_p8 = pnand %p14228_p7, %p14225_p6 }
 0x3c9   : > { %14233 = shalt.err (!%p14230_p8)
}
 0x3ca   : > { %s14234_s6 = scalar_lea.vmem %s2685_s1, 16  ;;  %s14240_s10 = scalar_lea.vmem %s2685_s1, 32 }
 0x3cb   : > { %p14235_p9 = scmp.ne.s32.totalorder %s2685_s1, %s14234_s6  ;;  %p14241_p12 = scmp.lt.s32.totalorder %s2685_s1, %s2685_s1 }
 0x3cc   : > { %p14242_p13 = scmp.lt.s32.totalorder %s14240_s10, %s14234_s6 }
 0x3cd   : > { %p14236_p10 = pnand %p14235_p9, %p13055_p3 }
 0x3ce   : > { %p14243_p0 = por %p14242_p13, %p14241_p12 }
 0x3cf   : > { %p14237_p11 = pneg %p14236_p10 }
 0x3d1   : > { %p14244_p1 = pnand %p14243_p0, %p14237_p11 }
 0x3d3   : > { %14247 = shalt.err (!%p14244_p1)
}
 0x3d4   : > { %s16934_s7 = sld [smem:[#allocation152_spill]]  ;;  %s14785_s8 = smov [#allocation48]  }
 0x3d5   : > { %12920 = dma.hbm_to_vmem [thread:$0]  (%p13055_p3), %s16933_s9, 16, %s2685_s1, [#allocation44]  }
 0x3d6   : > { %s2706_s2 = sshll.u32 %s14785_s8, 4  ;;  %s14786_s3 = smov [#allocation51]   ;;  %s2707_s2 = int_to_ptr.vmem [resolvable:$true] %s2706_s2 }
 0x3d7   : > { %s2728_s4 = sshll.u32 %s14786_s3, 4  ;;  %s2729_s4 = int_to_ptr.vmem [resolvable:$true] %s2728_s4 }
 0x3da   : > { %s14248_s5 = scalar_lea.hbm %s16934_s7, 16 }
 0x3db   : > { %p14249_p4 = scmp.ne.s32.totalorder %s16934_s7, %s14248_s5  ;;  %p14254_p7 = scmp.lt.u32.totalorder %s14248_s5, %s16934_s7 }
 0x3dd   : > { %p14250_p5 = pnand %p14249_p4, %p13055_p3 }
 0x3df   : > { %p14251_p6 = pneg %p14250_p5 }
 0x3e1   : > { %p14256_p8 = pnand %p14254_p7, %p14251_p6 }
 0x3e3   : > { %14259 = shalt.err (!%p14256_p8)
}
 0x3e4   : > { %s14260_s6 = scalar_lea.vmem %s2707_s2, 16  ;;  %s14266_s1 = scalar_lea.vmem %s2707_s2, 32 }
 0x3e5   : > { %p14261_p9 = scmp.ne.s32.totalorder %s2707_s2, %s14260_s6  ;;  %p14267_p12 = scmp.lt.s32.totalorder %s2707_s2, %s2707_s2 }
 0x3e6   : > { %p14268_p13 = scmp.lt.s32.totalorder %s14266_s1, %s14260_s6 }
 0x3e7   : > { %p14262_p10 = pnand %p14261_p9, %p13055_p3 }
 0x3e8   : > { %p14269_p0 = por %p14268_p13, %p14267_p12 }
 0x3e9   : > { %p14263_p11 = pneg %p14262_p10 }
 0x3eb   : > { %p14270_p1 = pnand %p14269_p0, %p14263_p11 }
 0x3ed   : > { %14273 = shalt.err (!%p14270_p1)
}
 0x3ee   : > { %s16935_s10 = sld [smem:[#allocation154_spill]] }
 0x3ef   : > { %12924 = dma.hbm_to_vmem [thread:$0]  (%p13055_p3), %s16934_s7, 16, %s2707_s2, [#allocation47]  }
 0x3f4   : > { %s14274_s5 = scalar_lea.hbm %s16935_s10, 16 }
 0x3f5   : > { %p14275_p4 = scmp.ne.s32.totalorder %s16935_s10, %s14274_s5  ;;  %p14280_p7 = scmp.lt.u32.totalorder %s14274_s5, %s16935_s10 }
 0x3f7   : > { %p14276_p5 = pnand %p14275_p4, %p13055_p3 }
 0x3f9   : > { %p14277_p6 = pneg %p14276_p5 }
 0x3fb   : > { %p14282_p8 = pnand %p14280_p7, %p14277_p6 }
 0x3fd   : > { %14285 = shalt.err (!%p14282_p8)
}
 0x3fe   : > { %s14286_s8 = scalar_lea.vmem %s2729_s4, 16  ;;  %s14292_s3 = scalar_lea.vmem %s2729_s4, 32 }
 0x3ff   : > { %p14287_p9 = scmp.ne.s32.totalorder %s2729_s4, %s14286_s8  ;;  %p14293_p12 = scmp.lt.s32.totalorder %s2729_s4, %s2729_s4 }
 0x400   : > { %p14294_p13 = scmp.lt.s32.totalorder %s14292_s3, %s14286_s8 }
 0x401   : > { %p14288_p10 = pnand %p14287_p9, %p13055_p3 }
 0x402   : > { %p14295_p0 = por %p14294_p13, %p14293_p12 }
 0x403   : > { %p14289_p11 = pneg %p14288_p10 }
 0x405   : > { %p14296_p1 = pnand %p14295_p0, %p14289_p11 }
 0x407   : > { %14299 = shalt.err (!%p14296_p1)
}
 0x408   : > { %s16936_s2 = sld [smem:[#allocation158_spill]]  ;;  %s14787_s6 = smov [#allocation54]  }
 0x409   : > { %12928 = dma.hbm_to_vmem [thread:$0]  (%p13055_p3), %s16935_s10, 16, %s2729_s4, [#allocation50]  }
 0x40a   : > { %s2762_s1 = sshll.u32 %s14787_s6, 4  ;;  %s14788_s5 = smov [#allocation57]   ;;  %s2763_s1 = int_to_ptr.vmem [resolvable:$true] %s2762_s1 }
 0x40b   : > { %s2784_s7 = sshll.u32 %s14788_s5, 4  ;;  %s2785_s7 = int_to_ptr.vmem [resolvable:$true] %s2784_s7 }
 0x40e   : > { %s14300_s9 = scalar_lea.hbm %s16936_s2, 16 }
 0x40f   : > { %p14301_p4 = scmp.ne.s32.totalorder %s16936_s2, %s14300_s9  ;;  %p14306_p7 = scmp.lt.u32.totalorder %s14300_s9, %s16936_s2 }
 0x411   : > { %p14302_p5 = pnand %p14301_p4, %p13055_p3 }
 0x413   : > { %p14303_p6 = pneg %p14302_p5 }
 0x415   : > { %p14308_p8 = pnand %p14306_p7, %p14303_p6 }
 0x417   : > { %14311 = shalt.err (!%p14308_p8)
}
 0x418   : > { %s14312_s8 = scalar_lea.vmem %s2763_s1, 16  ;;  %s14318_s4 = scalar_lea.vmem %s2763_s1, 32 }
 0x419   : > { %p14313_p9 = scmp.ne.s32.totalorder %s2763_s1, %s14312_s8  ;;  %p14319_p12 = scmp.lt.s32.totalorder %s2763_s1, %s2763_s1 }
 0x41a   : > { %p14320_p13 = scmp.lt.s32.totalorder %s14318_s4, %s14312_s8 }
 0x41b   : > { %p14314_p10 = pnand %p14313_p9, %p13055_p3 }
 0x41c   : > { %p14321_p0 = por %p14320_p13, %p14319_p12 }
 0x41d   : > { %p14315_p11 = pneg %p14314_p10 }
 0x41f   : > { %p14322_p1 = pnand %p14321_p0, %p14315_p11 }
 0x421   : > { %14325 = shalt.err (!%p14322_p1)
}
 0x422   : > { %s16937_s3 = sld [smem:[#allocation160_spill]] }
 0x423   : > { %12932 = dma.hbm_to_vmem [thread:$0]  (%p13055_p3), %s16936_s2, 16, %s2763_s1, [#allocation53]  }
 0x428   : > { %s14326_s9 = scalar_lea.hbm %s16937_s3, 16 }
 0x429   : > { %p14327_p4 = scmp.ne.s32.totalorder %s16937_s3, %s14326_s9  ;;  %p14332_p7 = scmp.lt.u32.totalorder %s14326_s9, %s16937_s3 }
 0x42b   : > { %p14328_p5 = pnand %p14327_p4, %p13055_p3 }
 0x42d   : > { %p14329_p6 = pneg %p14328_p5 }
 0x42f   : > { %p14334_p8 = pnand %p14332_p7, %p14329_p6 }
 0x431   : > { %14337 = shalt.err (!%p14334_p8)
}
 0x432   : > { %s14338_s6 = scalar_lea.vmem %s2785_s7, 16  ;;  %s14344_s5 = scalar_lea.vmem %s2785_s7, 32 }
 0x433   : > { %p14339_p9 = scmp.ne.s32.totalorder %s2785_s7, %s14338_s6  ;;  %p14345_p12 = scmp.lt.s32.totalorder %s2785_s7, %s2785_s7 }
 0x434   : > { %p14346_p13 = scmp.lt.s32.totalorder %s14344_s5, %s14338_s6 }
 0x435   : > { %p14340_p10 = pnand %p14339_p9, %p13055_p3 }
 0x436   : > { %p14347_p0 = por %p14346_p13, %p14345_p12 }
 0x437   : > { %p14341_p11 = pneg %p14340_p10 }
 0x439   : > { %p14348_p1 = pnand %p14347_p0, %p14341_p11 }
 0x43b   : > { %14351 = shalt.err (!%p14348_p1)
}
 0x43c   : > { %s16938_s1 = sld [smem:[#allocation162_spill]]  ;;  %s14789_s8 = smov [#allocation60]  }
 0x43d   : > { %12936 = dma.hbm_to_vmem [thread:$0]  (%p13055_p3), %s16937_s3, 16, %s2785_s7, [#allocation56]  }
 0x43e   : > { %s2806_s4 = sshll.u32 %s14789_s8, 4  ;;  %s14790_s9 = smov [#allocation63]   ;;  %s2807_s4 = int_to_ptr.vmem [resolvable:$true] %s2806_s4 }
 0x43f   : > { %s2828_s2 = sshll.u32 %s14790_s9, 4  ;;  %s2829_s2 = int_to_ptr.vmem [resolvable:$true] %s2828_s2 }
 0x442   : > { %s14352_s10 = scalar_lea.hbm %s16938_s1, 16 }
 0x443   : > { %p14353_p4 = scmp.ne.s32.totalorder %s16938_s1, %s14352_s10  ;;  %p14358_p7 = scmp.lt.u32.totalorder %s14352_s10, %s16938_s1 }
 0x445   : > { %p14354_p5 = pnand %p14353_p4, %p13055_p3 }
 0x447   : > { %p14355_p6 = pneg %p14354_p5 }
 0x449   : > { %p14360_p8 = pnand %p14358_p7, %p14355_p6 }
 0x44b   : > { %14363 = shalt.err (!%p14360_p8)
}
 0x44c   : > { %s14364_s6 = scalar_lea.vmem %s2807_s4, 16  ;;  %s14370_s7 = scalar_lea.vmem %s2807_s4, 32 }
 0x44d   : > { %p14365_p9 = scmp.ne.s32.totalorder %s2807_s4, %s14364_s6  ;;  %p14371_p12 = scmp.lt.s32.totalorder %s2807_s4, %s2807_s4 }
 0x44e   : > { %p14372_p13 = scmp.lt.s32.totalorder %s14370_s7, %s14364_s6 }
 0x44f   : > { %p14366_p10 = pnand %p14365_p9, %p13055_p3 }
 0x450   : > { %p14373_p0 = por %p14372_p13, %p14371_p12 }
 0x451   : > { %p14367_p11 = pneg %p14366_p10 }
 0x453   : > { %p14374_p1 = pnand %p14373_p0, %p14367_p11 }
 0x455   : > { %14377 = shalt.err (!%p14374_p1)
}
 0x456   : > { %s16939_s5 = sld [smem:[#allocation164_spill]] }
 0x457   : > { %12940 = dma.hbm_to_vmem [thread:$0]  (%p13055_p3), %s16938_s1, 16, %s2807_s4, [#allocation59]  }
 0x45c   : > { %s14378_s10 = scalar_lea.hbm %s16939_s5, 16 }
 0x45d   : > { %p14379_p4 = scmp.ne.s32.totalorder %s16939_s5, %s14378_s10  ;;  %p14384_p7 = scmp.lt.u32.totalorder %s14378_s10, %s16939_s5 }
 0x45f   : > { %p14380_p5 = pnand %p14379_p4, %p13055_p3 }
 0x461   : > { %p14381_p6 = pneg %p14380_p5 }
 0x463   : > { %p14386_p8 = pnand %p14384_p7, %p14381_p6 }
 0x465   : > { %14389 = shalt.err (!%p14386_p8)
}
 0x466   : > { %s14390_s8 = scalar_lea.vmem %s2829_s2, 16  ;;  %s14396_s9 = scalar_lea.vmem %s2829_s2, 32 }
 0x467   : > { %p14391_p9 = scmp.ne.s32.totalorder %s2829_s2, %s14390_s8  ;;  %p14397_p12 = scmp.lt.s32.totalorder %s2829_s2, %s2829_s2 }
 0x468   : > { %p14398_p13 = scmp.lt.s32.totalorder %s14396_s9, %s14390_s8 }
 0x469   : > { %p14392_p10 = pnand %p14391_p9, %p13055_p3 }
 0x46a   : > { %p14399_p0 = por %p14398_p13, %p14397_p12 }
 0x46b   : > { %p14393_p11 = pneg %p14392_p10 }
 0x46d   : > { %p14400_p1 = pnand %p14399_p0, %p14393_p11 }
 0x46f   : > { %14403 = shalt.err (!%p14400_p1)
}
 0x470   : > { %s16940_s4 = sld [smem:[#allocation166_spill]]  ;;  %s14791_s6 = smov [#allocation66]  }
 0x471   : > { %12944 = dma.hbm_to_vmem [thread:$0]  (%p13055_p3), %s16939_s5, 16, %s2829_s2, [#allocation62]  }
 0x472   : > { %s2850_s7 = sshll.u32 %s14791_s6, 4  ;;  %s14792_s10 = smov [#allocation69]   ;;  %s2851_s7 = int_to_ptr.vmem [resolvable:$true] %s2850_s7 }
 0x473   : > { %s2890_s1 = sshll.u32 %s14792_s10, 4  ;;  %s2891_s1 = int_to_ptr.vmem [resolvable:$true] %s2890_s1 }
 0x476   : > { %s14404_s3 = scalar_lea.hbm %s16940_s4, 16 }
 0x477   : > { %p14405_p4 = scmp.ne.s32.totalorder %s16940_s4, %s14404_s3  ;;  %p14410_p7 = scmp.lt.u32.totalorder %s14404_s3, %s16940_s4 }
 0x479   : > { %p14406_p5 = pnand %p14405_p4, %p13055_p3 }
 0x47b   : > { %p14407_p6 = pneg %p14406_p5 }
 0x47d   : > { %p14412_p8 = pnand %p14410_p7, %p14407_p6 }
 0x47f   : > { %14415 = shalt.err (!%p14412_p8)
}
 0x480   : > { %s14416_s8 = scalar_lea.vmem %s2851_s7, 16  ;;  %s14422_s2 = scalar_lea.vmem %s2851_s7, 32 }
 0x481   : > { %p14417_p9 = scmp.ne.s32.totalorder %s2851_s7, %s14416_s8  ;;  %p14423_p12 = scmp.lt.s32.totalorder %s2851_s7, %s2851_s7 }
 0x482   : > { %p14424_p13 = scmp.lt.s32.totalorder %s14422_s2, %s14416_s8 }
 0x483   : > { %p14418_p10 = pnand %p14417_p9, %p13055_p3 }
 0x484   : > { %p14425_p0 = por %p14424_p13, %p14423_p12 }
 0x485   : > { %p14419_p11 = pneg %p14418_p10 }
 0x487   : > { %p14426_p1 = pnand %p14425_p0, %p14419_p11 }
 0x489   : > { %14429 = shalt.err (!%p14426_p1)
}
 0x48a   : > { %s16941_s9 = sld [smem:[#allocation172_spill]] }
 0x48b   : > { %12948 = dma.hbm_to_vmem [thread:$0]  (%p13055_p3), %s16940_s4, 16, %s2851_s7, [#allocation65]  }
 0x490   : > { %s14430_s3 = scalar_lea.hbm %s16941_s9, 16 }
 0x491   : > { %p14431_p4 = scmp.ne.s32.totalorder %s16941_s9, %s14430_s3  ;;  %p14436_p7 = scmp.lt.u32.totalorder %s14430_s3, %s16941_s9 }
 0x493   : > { %p14432_p5 = pnand %p14431_p4, %p13055_p3 }
 0x495   : > { %p14433_p6 = pneg %p14432_p5 }
 0x497   : > { %p14438_p8 = pnand %p14436_p7, %p14433_p6 }
 0x499   : > { %14441 = shalt.err (!%p14438_p8)
}
 0x49a   : > { %s14442_s6 = scalar_lea.vmem %s2891_s1, 16  ;;  %s14448_s10 = scalar_lea.vmem %s2891_s1, 32 }
 0x49b   : > { %p14443_p9 = scmp.ne.s32.totalorder %s2891_s1, %s14442_s6  ;;  %p14449_p12 = scmp.lt.s32.totalorder %s2891_s1, %s2891_s1 }
 0x49c   : > { %p14450_p13 = scmp.lt.s32.totalorder %s14448_s10, %s14442_s6 }
 0x49d   : > { %p14444_p10 = pnand %p14443_p9, %p13055_p3 }
 0x49e   : > { %p14451_p0 = por %p14450_p13, %p14449_p12 }
 0x49f   : > { %p14445_p11 = pneg %p14444_p10 }
 0x4a1   : > { %p14452_p1 = pnand %p14451_p0, %p14445_p11 }
 0x4a3   : > { %14455 = shalt.err (!%p14452_p1)
}
 0x4a4   : > { %s16942_s7 = sld [smem:[#allocation174_spill]]  ;;  %s14793_s8 = smov [#allocation72]  }
 0x4a5   : > { %12952 = dma.hbm_to_vmem [thread:$0]  (%p13055_p3), %s16941_s9, 16, %s2891_s1, [#allocation68]  }
 0x4a6   : > { %s2912_s2 = sshll.u32 %s14793_s8, 4  ;;  %s14794_s3 = smov [#allocation75]   ;;  %s2913_s2 = int_to_ptr.vmem [resolvable:$true] %s2912_s2 }
 0x4a7   : > { %s2934_s4 = sshll.u32 %s14794_s3, 4  ;;  %s2935_s4 = int_to_ptr.vmem [resolvable:$true] %s2934_s4 }
 0x4aa   : > { %s14456_s5 = scalar_lea.hbm %s16942_s7, 16 }
 0x4ab   : > { %p14457_p4 = scmp.ne.s32.totalorder %s16942_s7, %s14456_s5  ;;  %p14462_p7 = scmp.lt.u32.totalorder %s14456_s5, %s16942_s7 }
 0x4ad   : > { %p14458_p5 = pnand %p14457_p4, %p13055_p3 }
 0x4af   : > { %p14459_p6 = pneg %p14458_p5 }
 0x4b1   : > { %p14464_p8 = pnand %p14462_p7, %p14459_p6 }
 0x4b3   : > { %14467 = shalt.err (!%p14464_p8)
}
 0x4b4   : > { %s14468_s6 = scalar_lea.vmem %s2913_s2, 16  ;;  %s14474_s1 = scalar_lea.vmem %s2913_s2, 32 }
 0x4b5   : > { %p14469_p9 = scmp.ne.s32.totalorder %s2913_s2, %s14468_s6  ;;  %p14475_p12 = scmp.lt.s32.totalorder %s2913_s2, %s2913_s2 }
 0x4b6   : > { %p14476_p13 = scmp.lt.s32.totalorder %s14474_s1, %s14468_s6 }
 0x4b7   : > { %p14470_p10 = pnand %p14469_p9, %p13055_p3 }
 0x4b8   : > { %p14477_p0 = por %p14476_p13, %p14475_p12 }
 0x4b9   : > { %p14471_p11 = pneg %p14470_p10 }
 0x4bb   : > { %p14478_p1 = pnand %p14477_p0, %p14471_p11 }
 0x4bd   : > { %14481 = shalt.err (!%p14478_p1)
}
 0x4be   : > { %s16943_s10 = sld [smem:[#allocation176_spill]] }
 0x4bf   : > { %12956 = dma.hbm_to_vmem [thread:$0]  (%p13055_p3), %s16942_s7, 16, %s2913_s2, [#allocation71]  }
 0x4c4   : > { %s14482_s5 = scalar_lea.hbm %s16943_s10, 16 }
 0x4c5   : > { %p14483_p4 = scmp.ne.s32.totalorder %s16943_s10, %s14482_s5  ;;  %p14488_p7 = scmp.lt.u32.totalorder %s14482_s5, %s16943_s10 }
 0x4c7   : > { %p14484_p5 = pnand %p14483_p4, %p13055_p3 }
 0x4c9   : > { %p14485_p6 = pneg %p14484_p5 }
 0x4cb   : > { %p14490_p8 = pnand %p14488_p7, %p14485_p6 }
 0x4cd   : > { %14493 = shalt.err (!%p14490_p8)
}
 0x4ce   : > { %s14494_s8 = scalar_lea.vmem %s2935_s4, 16  ;;  %s14500_s3 = scalar_lea.vmem %s2935_s4, 32 }
 0x4cf   : > { %p14495_p9 = scmp.ne.s32.totalorder %s2935_s4, %s14494_s8  ;;  %p14501_p12 = scmp.lt.s32.totalorder %s2935_s4, %s2935_s4 }
 0x4d0   : > { %p14502_p13 = scmp.lt.s32.totalorder %s14500_s3, %s14494_s8 }
 0x4d1   : > { %p14496_p10 = pnand %p14495_p9, %p13055_p3 }
 0x4d2   : > { %p14503_p0 = por %p14502_p13, %p14501_p12 }
 0x4d3   : > { %p14497_p11 = pneg %p14496_p10 }
 0x4d5   : > { %p14504_p1 = pnand %p14503_p0, %p14497_p11 }
 0x4d7   : > { %14507 = shalt.err (!%p14504_p1)
}
 0x4d8   : > { %s16944_s2 = sld [smem:[#allocation178_spill]]  ;;  %s14795_s6 = smov [#allocation78]  }
 0x4d9   : > { %12960 = dma.hbm_to_vmem [thread:$0]  (%p13055_p3), %s16943_s10, 16, %s2935_s4, [#allocation74]  }
 0x4da   : > { %s2956_s1 = sshll.u32 %s14795_s6, 4  ;;  %s14796_s5 = smov [#allocation81]   ;;  %s2957_s1 = int_to_ptr.vmem [resolvable:$true] %s2956_s1 }
 0x4db   : > { %s2978_s7 = sshll.u32 %s14796_s5, 4  ;;  %s2979_s7 = int_to_ptr.vmem [resolvable:$true] %s2978_s7 }
 0x4de   : > { %s14508_s9 = scalar_lea.hbm %s16944_s2, 16 }
 0x4df   : > { %p14509_p4 = scmp.ne.s32.totalorder %s16944_s2, %s14508_s9  ;;  %p14514_p7 = scmp.lt.u32.totalorder %s14508_s9, %s16944_s2 }
 0x4e1   : > { %p14510_p5 = pnand %p14509_p4, %p13055_p3 }
 0x4e3   : > { %p14511_p6 = pneg %p14510_p5 }
 0x4e5   : > { %p14516_p8 = pnand %p14514_p7, %p14511_p6 }
 0x4e7   : > { %14519 = shalt.err (!%p14516_p8)
}
 0x4e8   : > { %s14520_s8 = scalar_lea.vmem %s2957_s1, 16  ;;  %s14526_s4 = scalar_lea.vmem %s2957_s1, 32 }
 0x4e9   : > { %p14521_p9 = scmp.ne.s32.totalorder %s2957_s1, %s14520_s8  ;;  %p14527_p12 = scmp.lt.s32.totalorder %s2957_s1, %s2957_s1 }
 0x4ea   : > { %p14528_p13 = scmp.lt.s32.totalorder %s14526_s4, %s14520_s8 }
 0x4eb   : > { %p14522_p10 = pnand %p14521_p9, %p13055_p3 }
 0x4ec   : > { %p14529_p0 = por %p14528_p13, %p14527_p12 }
 0x4ed   : > { %p14523_p11 = pneg %p14522_p10 }
 0x4ef   : > { %p14530_p1 = pnand %p14529_p0, %p14523_p11 }
 0x4f1   : > { %14533 = shalt.err (!%p14530_p1)
}
 0x4f2   : > { %s16945_s3 = sld [smem:[#allocation180_spill]] }
 0x4f3   : > { %12964 = dma.hbm_to_vmem [thread:$0]  (%p13055_p3), %s16944_s2, 16, %s2957_s1, [#allocation77]  }
 0x4f8   : > { %s14534_s9 = scalar_lea.hbm %s16945_s3, 16 }
 0x4f9   : > { %p14535_p4 = scmp.ne.s32.totalorder %s16945_s3, %s14534_s9  ;;  %p14540_p7 = scmp.lt.u32.totalorder %s14534_s9, %s16945_s3 }
 0x4fb   : > { %p14536_p5 = pnand %p14535_p4, %p13055_p3 }
 0x4fd   : > { %p14537_p6 = pneg %p14536_p5 }
 0x4ff   : > { %p14542_p8 = pnand %p14540_p7, %p14537_p6 }
 0x501   : > { %14545 = shalt.err (!%p14542_p8)
}
 0x502   : > { %s14546_s6 = scalar_lea.vmem %s2979_s7, 16  ;;  %s14552_s5 = scalar_lea.vmem %s2979_s7, 32 }
 0x503   : > { %p14547_p9 = scmp.ne.s32.totalorder %s2979_s7, %s14546_s6  ;;  %p14553_p12 = scmp.lt.s32.totalorder %s2979_s7, %s2979_s7 }
 0x504   : > { %p14554_p13 = scmp.lt.s32.totalorder %s14552_s5, %s14546_s6 }
 0x505   : > { %p14548_p10 = pnand %p14547_p9, %p13055_p3 }
 0x506   : > { %p14555_p0 = por %p14554_p13, %p14553_p12 }
 0x507   : > { %p14549_p11 = pneg %p14548_p10 }
 0x509   : > { %p14556_p1 = pnand %p14555_p0, %p14549_p11 }
 0x50b   : > { %14559 = shalt.err (!%p14556_p1)
}
 0x50c   : > { %12968 = dma.hbm_to_vmem [thread:$0]  (%p13055_p3), %s16945_s3, 16, %s2979_s7, [#allocation80]  }
 0x50d PF: > { %3006 = sbr.rel (%p15289_p2) target bundleno = 16562 (0x40b2), region = 412  ;;  %p11096_p4 = scmp.ne.s32.totalorder (!%p15289_p2), %s15285_s11, 0 }
 0x50e   : > { %p13098_p5 = scmp.eq.s32.totalorder (!%p15289_p2), %s15285_s11, 0 }
 0x514   : > { %14565 = dma.done.wait (%p13098_p5), [#allocation18], 16  }
 0x515   : > { %14567 = vsyncadd (%p13098_p5), [#allocation18], 4294967280 }
 0x516   : > { %14569 = dma.done.wait (%p13098_p5), [#allocation20], 32  }
 0x517   : > { %14571 = vsyncadd (%p13098_p5), [#allocation20], 4294967264 }
 0x518   : > { %14573 = dma.done.wait (%p13098_p5), [#allocation23], 32  }
 0x519   : > { %14575 = vsyncadd (%p13098_p5), [#allocation23], 4294967264 }
 0x51a   : > { %14577 = dma.done.wait (%p13098_p5), [#allocation26], 32  }
 0x51b   : > { %14579 = vsyncadd (%p13098_p5), [#allocation26], 4294967264 }
 0x51c   : > { %14581 = dma.done.wait (%p13098_p5), [#allocation29], 32  }
 0x51d   : > { %14583 = vsyncadd (%p13098_p5), [#allocation29], 4294967264 }
 0x51e   : > { %14585 = dma.done.wait (%p13098_p5), [#allocation32], 32  }
 0x51f   : > { %14587 = vsyncadd (%p13098_p5), [#allocation32], 4294967264 }
 0x520   : > { %14589 = dma.done.wait (%p13098_p5), [#allocation35], 32  }
 0x521   : > { %14591 = vsyncadd (%p13098_p5), [#allocation35], 4294967264 }
 0x522   : > { %14593 = dma.done.wait (%p13098_p5), [#allocation38], 32  }
 0x523   : > { %14595 = vsyncadd (%p13098_p5), [#allocation38], 4294967264 }
 0x524   : > { %14597 = dma.done.wait (%p13098_p5), [#allocation41], 32  }
 0x525   : > { %14599 = vsyncadd (%p13098_p5), [#allocation41], 4294967264 }
 0x526   : > { %14601 = dma.done.wait (%p13098_p5), [#allocation44], 32  }
 0x527   : > { %14603 = vsyncadd (%p13098_p5), [#allocation44], 4294967264 }
 0x528   : > { %14605 = dma.done.wait (%p13098_p5), [#allocation47], 32  }
 0x529   : > { %14607 = vsyncadd (%p13098_p5), [#allocation47], 4294967264 }
 0x52a   : > { %14609 = dma.done.wait (%p13098_p5), [#allocation50], 32  }
 0x52b   : > { %14611 = vsyncadd (%p13098_p5), [#allocation50], 4294967264 }
 0x52c   : > { %14613 = dma.done.wait (%p13098_p5), [#allocation53], 32  }
 0x52d   : > { %14615 = vsyncadd (%p13098_p5), [#allocation53], 4294967264 }
 0x52e   : > { %14617 = dma.done.wait (%p13098_p5), [#allocation56], 32  }
 0x52f   : > { %14619 = vsyncadd (%p13098_p5), [#allocation56], 4294967264 }
 0x530   : > { %14621 = dma.done.wait (%p13098_p5), [#allocation59], 32  }
 0x531   : > { %14623 = vsyncadd (%p13098_p5), [#allocation59], 4294967264 }
 0x532   : > { %14625 = dma.done.wait (%p13098_p5), [#allocation62], 32  }
 0x533   : > { %14627 = vsyncadd (%p13098_p5), [#allocation62], 4294967264 }
 0x534   : > { %14629 = dma.done.wait (%p13098_p5), [#allocation65], 32  }
 0x535   : > { %14631 = vsyncadd (%p13098_p5), [#allocation65], 4294967264 }
 0x536   : > { %14633 = dma.done.wait (%p13098_p5), [#allocation68], 32  }
 0x537   : > { %14635 = vsyncadd (%p13098_p5), [#allocation68], 4294967264 }
 0x538   : > { %14637 = dma.done.wait (%p13098_p5), [#allocation71], 32  }
 0x539   : > { %14639 = vsyncadd (%p13098_p5), [#allocation71], 4294967264 }
 0x53a   : > { %14641 = dma.done.wait (%p13098_p5), [#allocation74], 32  }
 0x53b   : > { %14643 = vsyncadd (%p13098_p5), [#allocation74], 4294967264 }
 0x53c   : > { %14645 = dma.done.wait (%p13098_p5), [#allocation77], 32  }
 0x53d   : > { %14647 = vsyncadd (%p13098_p5), [#allocation77], 4294967264 }
 0x53e   : > { %14649 = dma.done.wait (%p13098_p5), [#allocation80], 32  }
 0x53f   : > { %14651 = vsyncadd (%p13098_p5), [#allocation80], 4294967264  ;;  %s16946_s30 = sld [smem:[#allocation104_spill]]  ;;  %s16947_s7 = sld [smem:[#allocation183_spill]]  ;;  %vm3404_vm0 = vcmask (!%p11096_p4), 64512   ;;  %vm3409_vm1 = vcmask (!%p11096_p4), 130048  }
 0x540   : > { %s11139_s1 = sshll.u32 %s15285_s11, 2  ;;  %3403 = sbr.rel (%p11096_p4) target bundleno = 1351 (0x547), region = 588  ;;  %v14797_v12 = vmov (!%p11096_p4), 0.0   ;;  %v14798_v13 = vmov (!%p11096_p4), 1.0  }
 0x541   : > { %p3389_p2 = scmp.lt.s32.totalorder %s11139_s1, 7  ;;  %3405 = vst.msk [vmem:[#allocation2] sm:$0xff] (!%p11096_p4), %vm3404_vm0, %v14797_v12  ;;  %3406 = vst.msk [vmem:[#allocation2 + $0x8] sm:$0xff] (!%p11096_p4), %vm3404_vm0, %v14797_v12 }
 0x542   : > { %3407 = vst.msk [vmem:[#allocation2 + $0x10] sm:$0xff] (!%p11096_p4), %vm3404_vm0, %v14797_v12  ;;  %3408 = vst.msk [vmem:[#allocation2 + $0x18] sm:$0xff] (!%p11096_p4), %vm3404_vm0, %v14797_v12 }
 0x543   : > { %s16991_s1 = smov (!%p3389_p2, %s11139_s1), 7  ;;  %3410 = vst.msk [vmem:[#allocation3] sm:$0xff] (!%p11096_p4), %vm3409_vm1, %v14798_v13  ;;  %3411 = vst.msk [vmem:[#allocation3 + $0x8] sm:$0xff] (!%p11096_p4), %vm3409_vm1, %v14798_v13 }
 0x544   : > { %s11140_s8 = sshll.u32 %s16991_s1, 3  ;;  %3412 = vst.msk [vmem:[#allocation3 + $0x10] sm:$0xff] (!%p11096_p4), %vm3409_vm1, %v14798_v13  ;;  %3413 = vst.msk [vmem:[#allocation3 + $0x18] sm:$0xff] (!%p11096_p4), %vm3409_vm1, %v14798_v13 }
 0x545   : > { %s15820_s4 = scalar_lea.vmem %s16946_s30, %s11140_s8  ;;  %s15823_s9 = scalar_lea.vmem %s16947_s7, %s11140_s8  ;;  %3414 = vst.msk [vmem:[#allocation4] sm:$0xff] (!%p11096_p4), %vm3409_vm1, %v14798_v13  ;;  %3415 = vst.msk [vmem:[#allocation4 + $0x8] sm:$0xff] (!%p11096_p4), %vm3409_vm1, %v14798_v13 }
 0x546   : > { %3416 = vst.msk [vmem:[#allocation4 + $0x10] sm:$0xff] (!%p11096_p4), %vm3409_vm1, %v14798_v13  ;;  %3417 = vst.msk [vmem:[#allocation4 + $0x18] sm:$0xff] (!%p11096_p4), %vm3409_vm1, %v14798_v13 }
 0x547 PF: > { %s16948_s6 = sld [smem:[#allocation118_spill]]  ;;  %s16949_s11 = sld [smem:[#allocation117_spill]]  ;;  %vm3456_vm2 = vcmask 1043456   ;;  %v3431_v15 = vld [vmem:[%s15820_s4] sm:$0xff]  ;;  %vm3443_vm3 = vcmask 31744   ;;  %v3432_v16 = vld [vmem:[%s15820_s4 + $0x8] sm:$0xff] }
 0x548   : > { %11835 = vmatprep.mubr.msk.f32.mxu0 %vm3443_vm3, %v3431_v15  ;;  %v3433_v17 = vld [vmem:[%s15820_s4 + $0x10] sm:$0xff]  ;;  %v3434_v18 = vld [vmem:[%s15820_s4 + $0x18] sm:$0xff]  ;;  %vm3551_vm4 = vcmask 130048   ;;  %s16950_s5 = sld [smem:[#allocation115_spill]]  ;;  %s16951_s30 = sld [smem:[#allocation119_spill]]  ;;  %vm3745_vm5 = vcmask 1041408  }
 0x549   : > { %s16952_s7 = sld [smem:[#allocation124_spill]]  ;;  %s16953_s1 = sld [smem:[#allocation123_spill]]  ;;  %vm3732_vm6 = vcmask 15360   ;;  %vm14801_vm7 = vmmov 0   ;;  %vm3975_vm8 = vcmask 261120   ;;  %vm4268_vm9 = vcmask 195584  }
 0x54a   : > { %s16954_s8 = sld [smem:[#allocation113_spill]]  ;;  %s16955_s4 = sld [smem:[#allocation114_spill]] }
 0x54b   : > { %s16963_s2 = sld [smem:[#allocation110_spill]]  ;;  %s16964_s3 = sld [smem:[#allocation146_spill]] }
 0x54d   : > { %v3435_v14 = vld [vmem:[%s16948_s6] sm:$0xf]  ;;  %s16956_s6 = sld [smem:[#allocation105_spill]] }
 0x54e   : > { %11833 = vmatprep.subr.msk.mxu0 %vm3456_vm2, %v3435_v14  ;;  %v11144_v19 = vld [vmem:[%s16949_s11] ss:$0 sm:$0xff]  ;;  %v3626_v57 = vld [vmem:[%s16950_s5 + $0x8] sm:$0xff]  ;;  %s16957_s11 = sld [smem:[#allocation108_spill]] }
 0x54f   : > { %11834 = vmatpush3.msk.msra.mxu0 %vm3456_vm2, %v3435_v14  ;;  %v3625_v56 = vld [vmem:[%s16950_s5] sm:$0xff]  ;;  %v3843_v60 = vld [vmem:[%s16951_s30 + $0x8] sm:$0xff]  ;;  %s16968_s5 = sld [smem:[#allocation120_spill]] }
 0x550   : > { %11836 = vmatmul.mubr.msk.f32.vlgmr.msra.gmra.mrb[0].mxu0 %vm3443_vm3, %v3432_v16  ;;  %v12519_v58 = vpack.c.bf16 %v3626_v57, %v3625_v56  ;;  %v3842_v59 = vld [vmem:[%s16951_s30] sm:$0xff]  ;;  %v14800_v56 = vmov 0.0|0.0  }
 0x551   : > { %11838 = vmatprep.mubr.msk.f32.mxu0 %vm3443_vm3, %v3433_v17  ;;  %v12523_v61 = vpack.c.bf16 %v3843_v60, %v3842_v59  ;;  %v11150_v11 = vld [vmem:[%s16952_s7] ss:$0 sm:$0xff]  ;;  %s16958_s7 = sld [smem:[#allocation107_spill]] }
 0x552   : > { %12520 = vmatprep.subr.bf16.mxu1 %v12519_v58  ;;  %v11151_v13 = vld [vmem:[%s16953_s1] ss:$0 sm:$0xff]  ;;  %s16959_s1 = sld [smem:[#allocation144_spill]] }
 0x553   : > { %12522 = vmatpush3.bf16.msra.mxu1 %v12519_v58  ;;  %v11166_v58 = vld [vmem:[#allocation5] ss:$0 sm:$0xff] }
 0x554   : > { %11839 = vmatmul.mubr.msk.f32.gmra.mrb[2].mxu0 %vm3443_vm3, %v3434_v18  ;;  %12524 = vmatprep.subr.bf16.mxu1 %v12523_v61  ;;  %v3423_v57 = vld [vmem:[%s16957_s11 + $0x8] sm:$0xff]  ;;  %v3424_v59 = vld [vmem:[%s16957_s11 + $0x10] sm:$0xff]  ;;  %v3425_v60 = vld [vmem:[%s16957_s11 + $0x18] sm:$0xff] }
 0x623   : > { %v11837_v20 = vpop.f32.mrb[0].mxu0 }
 0x624   : > { %v3526_v21 = vpop.f32.mrb[1].mxu0  ;;  %v3532_v22 = vadd.f32 %v11837_v20, %v11144_v19 }
 0x625   : > { %v3527_v23 = vadd.f32 %v11144_v19, %v3526_v21 }
 0x626   : > { %v15839_v27 = vmax.f32 %v3532_v22, 0.0 }
 0x627   : > { %v15837_v24 = vmax.f32 %v3527_v23, 0.0  ;;  %v11840_v25 = vpop.f32.mrb[2].mxu0 }
 0x628   : > { %v3536_v26 = vpop.f32.mrb[3].mxu0  ;;  %v3542_v28 = vadd.f32 %v11840_v25, %v11144_v19  ;;  %v3555_v34 = vsel %vm3551_vm4, %v15839_v27, 0.0 }
 0x629   : > { %v3537_v29 = vadd.f32 %v11144_v19, %v3536_v26  ;;  %v3552_v30 = vsel %vm3551_vm4, %v15837_v24, 0.0 }
 0x62a   : > { %3553 = vadd.xlane.f32.xlu0 %v3552_v30  ;;  %v15845_v32 = vmax.f32 %v3542_v28, 0.0  ;;  %v3427_v30 = vld [vmem:[%s16954_s8] sm:$0xff] }
 0x62b   : > { %v15843_v31 = vmax.f32 %v3537_v29, 0.0 }
 0x62c   : > { %v3561_v35 = vsel %vm3551_vm4, %v15845_v32, 0.0 }
 0x62d   : > { %v3558_v33 = vsel %vm3551_vm4, %v15843_v31, 0.0 }
 0x62e   : > { %3559 = vadd.xlane.f32.xlu1 %v3558_v33  ;;  %3556 = vadd.xlane.f32.xlu0 %v3555_v34  ;;  %v3428_v33 = vld [vmem:[%s16954_s8 + $0x8] sm:$0xff]  ;;  %v3429_v34 = vld [vmem:[%s16954_s8 + $0x10] sm:$0xff] }
 0x632   : > { %3562 = vadd.xlane.f32.xlu1 %v3561_v35  ;;  %v3430_v35 = vld [vmem:[%s16954_s8 + $0x18] sm:$0xff] }
 0x6b7   : > { %v3554_v36 = vpop.xlane.xlu0 %3553 }
 0x6b8   : > { %v3565_v37 = vmul.f32 0.0625, %v3554_v36  ;;  %v14799_v36 = vmov 0  }
 0x6b9   : > { %13297 = vset.pattern.permute.xlu1 %v14799_v36  ;;  %13296 = vset.pattern.permute.xlu0 %v14799_v36 }
 0x6ba   : > { %v3569_v38 = vsub.f32 %v15837_v24, %v3565_v37  ;;  %v11152_v37 = vld [vmem:[%s16955_s4] ss:$0 sm:$0xff]  ;;  %s16960_s4 = sld [smem:[#allocation145_spill]] }
 0x6bb   : > { %v3560_v39 = vpop.xlane.xlu1 %3559  ;;  %v3557_v40 = vpop.xlane.xlu0 %3556 }
 0x6bc   : > { %v3567_v41 = vmul.f32 0.0625, %v3560_v39  ;;  %v3566_v42 = vmul.f32 0.0625, %v3557_v40  ;;  %v3573_v43 = vmul.f32 %v3569_v38, %v3569_v38  ;;  %v3839_v39 = vld [vmem:[#allocation3 + $0x8] sm:$0xff] }
 0x6be   : > { %v3571_v44 = vsub.f32 %v15843_v31, %v3567_v41  ;;  %v3570_v45 = vsub.f32 %v15839_v27, %v3566_v42  ;;  %v3577_v46 = vsel %vm3551_vm4, %v3573_v43, 0.0  ;;  %v3838_v42 = vld [vmem:[#allocation3] sm:$0xff] }
 0x6bf   : > { %v3563_v47 = vpop.xlane.xlu1 %3562  ;;  %3578 = vadd.xlane.f32.xlu0 %v3577_v46 }
 0x6c0   : > { %v3568_v48 = vmul.f32 0.0625, %v3563_v47  ;;  %v3575_v49 = vmul.f32 %v3571_v44, %v3571_v44  ;;  %v3574_v50 = vmul.f32 %v3570_v45, %v3570_v45 }
 0x6c2   : > { %v3572_v51 = vsub.f32 %v15845_v32, %v3568_v48  ;;  %v3583_v52 = vsel %vm3551_vm4, %v3575_v49, 0.0  ;;  %v3580_v53 = vsel %vm3551_vm4, %v3574_v50, 0.0  ;;  %v3840_v48 = vld [vmem:[#allocation3 + $0x10] sm:$0xff] }
 0x6c3   : > { %3584 = vadd.xlane.f32.xlu0 %v3583_v52  ;;  %3581 = vadd.xlane.f32.xlu1 %v3580_v53  ;;  %v3731_v52 = vld [vmem:[%s16956_s6] sm:$0x3]  ;;  %s16961_s6 = sld [smem:[#allocation106_spill]] }
 0x6c4   : > { %v3576_v54 = vmul.f32 %v3572_v51, %v3572_v51  ;;  %11851 = vmatprep.subr.msk.mxu0 %vm3745_vm5, %v3731_v52 }
 0x6c5   : > { %11852 = vmatpush3.msk.msra.mxu0 %vm3745_vm5, %v3731_v52 }
 0x6c6   : > { %v3586_v55 = vsel %vm3551_vm4, %v3576_v54, 0.0  ;;  %12527 = vmatprep.subr.bf16.mxu0 %v14800_v56 }
 0x6c7   : > { %3587 = vadd.xlane.f32.xlu1 %v3586_v55  ;;  %v3422_v55 = vld [vmem:[%s16957_s11] sm:$0xff] }
 0x6c8   : > { %11853 = vmatprep.mubr.msk.f32.mxu0 %vm3732_vm6, %v3422_v55 }
 0x6c9   : > { %11854 = vmatmul.mubr.msk.f32.vlgmr.msra.gmra.mrb[4].mxu0 %vm3732_vm6, %v3423_v57 }
 0x6ca   : > { %11856 = vmatprep.mubr.msk.f32.mxu0 %vm3732_vm6, %v3424_v59 }
 0x6cd   : > { %11857 = vmatmul.mubr.msk.f32.gmra.mrb[6].mxu0 %vm3732_vm6, %v3425_v60 }
 0x74c   : > { %v3579_v62 = vpop.xlane.xlu0 %3578 }
 0x74d   : > { %v3589_v63 = vmul.f32 0.0625, %v3579_v62  ;;  %v14802_v62 = vmov 0.0  }
 0x74e   : > { %11877 = vmatprep.mubr.msk.f32.mxu0 %vm14801_vm7, %v14802_v62 }
 0x74f   : > { %v3593_v0 = vadd.f32 1e-05, %v3589_v63 }
 0x750   : > { %v3582_v1 = vpop.xlane.xlu1 %3581  ;;  %v3585_v2 = vpop.xlane.xlu0 %3584 }
 0x751   : > { %13298 = vrsqrt.f32 %v3593_v0  ;;  %v3590_v3 = vmul.f32 0.0625, %v3582_v1  ;;  %v3591_v4 = vmul.f32 0.0625, %v3585_v2 }
 0x753   : > { %v3594_v5 = vadd.f32 1e-05, %v3590_v3  ;;  %v3595_v6 = vadd.f32 1e-05, %v3591_v4 }
 0x754   : > { %v3588_v7 = vpop.xlane.xlu1 %3587 }
 0x755   : > { %13300 = vrsqrt.f32 %v3594_v5  ;;  %v3592_v8 = vmul.f32 0.0625, %v3588_v7 }
 0x756   : > { %13302 = vrsqrt.f32 %v3595_v6 }
 0x757   : > { %v3596_v9 = vadd.f32 1e-05, %v3592_v8 }
 0x759   : > { %13304 = vrsqrt.f32 %v3596_v9  ;;  %v3426_v9 = vld [vmem:[%s16958_s7] sm:$0x3] }
 0x75b   : > { %v13299_v10 = vpop.eup %13298 }
 0x75c   : > { %v3601_v12 = vmul.f32 %v13299_v10, %v3569_v38 }
 0x75e   : > { %v3611_v14 = vmul.f32 %v11150_v11, %v3601_v12 }
 0x75f   : > { %v13301_v15 = vpop.eup %13300 }
 0x760   : > { %v13303_v16 = vpop.eup %13302  ;;  %v3621_v17 = vadd.f32 %v11151_v13, %v3611_v14  ;;  %v3602_v18 = vmul.f32 %v13301_v15, %v3570_v45  ;;  %v3841_v45 = vld [vmem:[#allocation3 + $0x18] sm:$0xff] }
 0x761   : > { %v3603_v19 = vmul.f32 %v13303_v16, %v3571_v44 }
 0x762   : > { %11845 = vmatprep.mubr.msk.f32.mxu1 %vm3551_vm4, %v3621_v17  ;;  %v3612_v20 = vmul.f32 %v11150_v11, %v3602_v18 }
 0x763   : > { %v13305_v21 = vpop.eup %13304  ;;  %v3613_v22 = vmul.f32 %v11150_v11, %v3603_v19 }
 0x764   : > { %v3622_v23 = vadd.f32 %v11151_v13, %v3612_v20  ;;  %v3604_v25 = vmul.f32 %v13305_v21, %v3572_v51 }
 0x765   : > { %v3623_v26 = vadd.f32 %v11151_v13, %v3613_v22  ;;  %v4159_v22 = vld [vmem:[%s16959_s1] sm:$0xff] }
 0x766   : > { %11846 = vmatmul.mubr.msk.f32.vlgmr.msra.gmra.mrb[0].mxu1 %vm3551_vm4, %v3622_v23  ;;  %v3614_v28 = vmul.f32 %v11150_v11, %v3604_v25  ;;  %v4160_v23 = vld [vmem:[%s16959_s1 + $0x8] sm:$0xff]  ;;  %s16962_s1 = sld [smem:[#allocation109_spill]] }
 0x767   : > { %11848 = vmatprep.mubr.msk.f32.mxu1 %vm3551_vm4, %v3623_v26  ;;  %12526 = vmatpush3.bf16.msra.mxu1 %v12523_v61  ;;  %v11183_v61 = vld [vmem:[#allocation9] ss:$0 sm:$0xff]  ;;  %v12533_v25 = vpack.c.bf16 %v4160_v23, %v4159_v22 }
 0x768   : > { %v3624_v29 = vadd.f32 %v11151_v13, %v3614_v28  ;;  %v4265_v26 = vld [vmem:[%s16960_s4] sm:$0xff]  ;;  %v4266_v28 = vld [vmem:[%s16960_s4 + $0x8] sm:$0xff] }
 0x76a   : > { %11849 = vmatmul.mubr.msk.f32.gmra.mrb[2].mxu1 %vm3551_vm4, %v3624_v29  ;;  %v12537_v29 = vpack.c.bf16 %v4266_v28, %v4265_v26 }
 0x76b   : > { %11863 = vmatprep.mubr.msk.f32.mxu1 %vm3551_vm4, %v3427_v30 }
 0x76e   : > { %11864 = vmatmul.mubr.msk.f32.vlgmr.msra.gmra.mrb[4].mxu1 %vm3551_vm4, %v3428_v33 }
 0x76f   : > { %11866 = vmatprep.mubr.msk.f32.mxu1 %vm3551_vm4, %v3429_v34 }
 0x772   : > { %11867 = vmatmul.mubr.msk.f32.gmra.mrb[6].mxu1 %vm3551_vm4, %v3430_v35 }
 0x773   : > { %11882 = vmatprep.mubr.msk.f32.mxu1 %vm3732_vm6, %v3422_v55 }
 0x79c   : > { %v15914_v10 = vpop.f32.mrb[4].mxu0 }
 0x79d   : > { %v15916_v11 = vpop.f32.mrb[5].mxu0 }
 0x7a0   : > { %v15918_v12 = vpop.f32.mrb[6].mxu0 }
 0x7a1   : > { %v15920_v13 = vpop.f32.mrb[7].mxu0 }
 0x839   : > { %v11847_v38 = vpop.f32.mrb[0].mxu1 }
 0x83a   : > { %v15880_v40 = vadd.f32 %v11847_v38, %v11152_v37  ;;  %v3712_v41 = vpop.f32.mrb[1].mxu1 }
 0x83b   : > { %v15882_v43 = vadd.f32 %v11152_v37, %v3712_v41 }
 0x83c   : > { %4144 = vst.msk [vmem:[#allocation3 + $0x8] sm:$0xff] %vm3551_vm4, %v15880_v40 }
 0x83d   : > { %v11850_v44 = vpop.f32.mrb[2].mxu1  ;;  %4143 = vst.msk [vmem:[#allocation3] sm:$0xff] %vm3551_vm4, %v15882_v43 }
 0x83e   : > { %v15888_v46 = vadd.f32 %v11850_v44, %v11152_v37  ;;  %v3722_v47 = vpop.f32.mrb[3].mxu1 }
 0x83f   : > { %v15890_v49 = vadd.f32 %v11152_v37, %v3722_v47  ;;  %v4267_v37 = vld [vmem:[%s16960_s4 + $0x10] sm:$0xff]  ;;  %s16965_s4 = sld [smem:[#allocation155_spill]] }
 0x840   : > { %4146 = vst.msk [vmem:[#allocation3 + $0x18] sm:$0xff] %vm3551_vm4, %v15888_v46 }
 0x841   : > { %v11865_v50 = vpop.f32.mrb[4].mxu1  ;;  %4145 = vst.msk [vmem:[#allocation3 + $0x10] sm:$0xff] %vm3551_vm4, %v15890_v49 }
 0x842   : > { %3948 = vperm.xlu1 %13297, %v11865_v50   ;;  %v3922_v51 = vpop.f32.mrb[5].mxu1 }
 0x843   : > { %3943 = vperm.xlu0 %13296, %v3922_v51  }
 0x845   : > { %v11868_v53 = vpop.f32.mrb[6].mxu1 }
 0x846   : > { %v3932_v54 = vpop.f32.mrb[7].mxu1 }
 0x847   : > { %3953 = vperm.xlu1 %13297, %v3932_v54  }
 0x84b   : > { %3958 = vperm.xlu1 %13297, %v11868_v53  }
 0x84f   : > { %3972 = vperm.xlu1 %13297, %v11166_v58  }
 0x853   : > { %4381 = vperm.xlu1 %13297, %v11183_v61  }
 0x8c1   : > { %v3949_v63 = vpop.permute.xlu1 %3948 }
 0x8c2   : > { %v3962_v0 = vmul.f32 %v3949_v63, %v3839_v39  ;;  %v3944_v1 = vpop.permute.xlu0 %3943 }
 0x8c3   : > { %v3961_v2 = vmul.f32 %v3944_v1, %v3838_v42  ;;  %v15965_v1 = vld [vmem:[%s16961_s6] sm:$0xff] }
 0x8c5   : > { %v12528_v3 = vpack.c.bf16 %v3962_v0, %v3961_v2 }
 0x8c6   : > { %v3954_v4 = vpop.permute.xlu1 %3953 }
 0x8c7   : > { %12529 = vmatpush3.bf16.msra.mxu0 %v12528_v3  ;;  %v3963_v6 = vmul.f32 %v3954_v4, %v3840_v48 }
 0x8c8   : > { %12530 = vmatprep.subr.bf16.mxu0 %v14800_v56 }
 0x8ca   : > { %v3959_v5 = vpop.permute.xlu1 %3958 }
 0x8cb   : > { %v3964_v7 = vmul.f32 %v3959_v5, %v3841_v45 }
 0x8cd   : > { %v12531_v8 = vpack.c.bf16 %v3964_v7, %v3963_v6 }
 0x8ce   : > { %v3973_v14 = vpop.permute.xlu1 %3972 }
 0x8cf   : > { %12532 = vmatpush3.bf16.msra.mxu0 %v12531_v8  ;;  %v15970_v8 = vld [vmem:[%s16961_s6 + $0x8] sm:$0xff] }
 0x8d0   : > { %12534 = vmatprep.subr.bf16.mxu0 %v12533_v25 }
 0x8d2   : > { %11878 = vmatmul.mubr.msk.f32.vlgmr.msra.gmra.mrb[8].mxu0 %vm3975_vm8, %v3426_v9  ;;  %v4382_v45 = vpop.permute.xlu1 %4381  ;;  %v15973_v9 = vld [vmem:[%s16961_s6 + $0x10] sm:$0xff] }
 0x8d3   : > { %12536 = vmatpush3.bf16.msra.mxu0 %v12533_v25 }
 0x8d4   : > { %12538 = vmatprep.subr.bf16.mxu0 %v12537_v29 }
 0x9a5   : > { %v4045_v15 = vpop.f32.mrb[8].mxu0 }
 0x9a6   : > { %v4046_v16 = vadd.f32 %v4045_v15, %v3973_v14  ;;  %v11879_v17 = vpop.f32.mrb[9].mxu0  ;;  %v15980_v14 = vld [vmem:[%s16961_s6 + $0x18] sm:$0xff] }
 0x9a8   : > { %v11168_v18 = vmul.f32 -1.442695, %v4046_v16 }
 0x9aa   : > { %13306 = vpow2.f32 %v11168_v18 }
 0x9b4   : > { %v13307_v19 = vpop.eup %13306 }
 0x9b5   : > { %v4052_v20 = vadd.f32 1.0, %v13307_v19 }
 0x9b7   : > { %13308 = vrcp.f32 %v4052_v20 }
 0x9c1   : > { %v13309_v21 = vpop.eup %13308 }
 0x9c2   : > { %11880 = vmatprep.subr.msk.mxu1 %vm3745_vm5, %v13309_v21 }
 0x9c3   : > { %11881 = vmatpush3.msk.msra.mxu1 %vm3745_vm5, %v13309_v21 }
 0x9c4   : > { %11883 = vmatmul.mubr.msk.f32.vlgmr.msra.gmra.mrb[8].mxu1 %vm3732_vm6, %v3423_v57 }
 0x9c5   : > { %11885 = vmatprep.mubr.msk.f32.mxu1 %vm3732_vm6, %v3424_v59 }
 0x9c8   : > { %11886 = vmatmul.mubr.msk.f32.gmra.mrb[10].mxu1 %vm3732_vm6, %v3425_v60 }
 0x9c9   : > { %11918 = vmatprep.mubr.msk.f32.mxu1 %vm3975_vm8, %v15965_v1 }
 0xa97   : > { %v11884_v30 = vpop.f32.mrb[8].mxu1 }
 0xa98   : > { %v4124_v33 = vpop.f32.mrb[9].mxu1  ;;  %v15935_v35 = vmul.f32 %v11884_v30, %v15880_v40  ;;  %v11174_v40 = vld [vmem:[#allocation22] ss:$0 sm:$0xff] }
 0xa99   : > { %v15932_v34 = vmul.f32 %v4124_v33, %v15882_v43 }
 0xa9b   : > { %v11887_v36 = vpop.f32.mrb[10].mxu1  ;;  %11892 = vmatprep.mubr.msk.f32.mxu0 %vm3551_vm4, %v15932_v34 }
 0xa9c   : > { %v4134_v38 = vpop.f32.mrb[11].mxu1  ;;  %11893 = vmatmul.mubr.msk.f32.vlgmr.msra.gmra.mrb[10].mxu0 %vm3551_vm4, %v15935_v35  ;;  %v15946_v41 = vmul.f32 %v11887_v36, %v15888_v46 }
 0xa9d   : > { %v15943_v39 = vmul.f32 %v4134_v38, %v15890_v49  ;;  %12540 = vmatpush3.bf16.msra.mxu0 %v12537_v29 }
 0xa9e   : > { %11902 = vmatprep.subr.mxu0 %v4267_v37 }
 0xa9f   : > { %11895 = vmatprep.mubr.msk.f32.mxu0 %vm3551_vm4, %v15943_v39 }
 0xaa0   : > { %11896 = vmatmul.mubr.msk.f32.gmra.mrb[12].mxu0 %vm3551_vm4, %v15946_v41 }
 0xaa1   : > { %11904 = vmatprep.mubr.msk.f32.mxu0 %vm4268_vm9, %v15916_v11  ;;  %11903 = vmatpush3.msra.mxu0 %v4267_v37 }
 0xaa4   : > { %11905 = vmatmul.mubr.msk.f32.vlgmr.msra.gmra.mrb[10].mxu0 %vm4268_vm9, %v15914_v10 }
 0xaa5   : > { %11907 = vmatprep.mubr.msk.f32.mxu0 %vm4268_vm9, %v15920_v13 }
 0xaa8   : > { %11908 = vmatmul.mubr.msk.f32.gmra.mrb[12].mxu0 %vm4268_vm9, %v15918_v12 }
 0xb77   : > { %v11906_v42 = vpop.f32.mrb[10].mxu0 }
 0xb78   : > { %v12863_v43 = vadd.f32 %v11906_v42, %v11174_v40  ;;  %v4347_v44 = vpop.f32.mrb[11].mxu0 }
 0xb79   : > { %v12864_v46 = vadd.f32 %v11174_v40, %v4347_v44 }
 0xb7a   : > { %v4385_v47 = vmul.f32 %v12863_v43, %v4382_v45  ;;  %vm4372_vm10 = vcmp.gt.f32.partialorder %v12863_v43, 0.0 }
 0xb7b   : > { %v4384_v48 = vmul.f32 %v12864_v46, %v4382_v45  ;;  %v11909_v49 = vpop.f32.mrb[12].mxu0  ;;  %vm4371_vm11 = vcmp.gt.f32.partialorder %v12864_v46, 0.0 }
 0xb7c   : > { %v12865_v50 = vadd.f32 %v11909_v49, %v11174_v40  ;;  %v4357_v51 = vpop.f32.mrb[13].mxu0  ;;  %v4389_v52 = vsel %vm4372_vm10, %v12863_v43, %v4385_v47 }
 0xb7d   : > { %v12866_v53 = vadd.f32 %v11174_v40, %v4357_v51  ;;  %v4397_v54 = vsel %vm3975_vm8, %v4389_v52, 0.0  ;;  %v4388_v55 = vsel %vm4371_vm11, %v12864_v46, %v4384_v48 }
 0xb7e   : > { %4398 = vadd.xlane.f32.xlu0 %v4397_v54  ;;  %v4394_v57 = vsel %vm3975_vm8, %v4388_v55, 0.0  ;;  %v4387_v58 = vmul.f32 %v12865_v50, %v4382_v45  ;;  %vm4374_vm13 = vcmp.gt.f32.partialorder %v12865_v50, 0.0 }
 0xb7f   : > { %v4386_v59 = vmul.f32 %v12866_v53, %v4382_v45  ;;  %4395 = vadd.xlane.f32.xlu1 %v4394_v57  ;;  %vm4373_vm12 = vcmp.gt.f32.partialorder %v12866_v53, 0.0 }
 0xb80   : > { %v4391_v63 = vsel %vm4374_vm13, %v12865_v50, %v4387_v58 }
 0xb81   : > { %v4390_v60 = vsel %vm4373_vm12, %v12866_v53, %v4386_v59  ;;  %v4403_v0 = vsel %vm3975_vm8, %v4391_v63, 0.0 }
 0xb82   : > { %v4400_v61 = vsel %vm3975_vm8, %v4390_v60, 0.0 }
 0xb83   : > { %4401 = vadd.xlane.f32.xlu1 %v4400_v61 }
 0xb87   : > { %4404 = vadd.xlane.f32.xlu1 %v4403_v0 }
 0xc0b   : > { %v4399_v2 = vpop.xlane.xlu0 %4398 }
 0xc0c   : > { %v4396_v3 = vpop.xlane.xlu1 %4395 }
 0xc0d   : > { %v12541_v4 = vpack.c.bf16 %v4399_v2, %v4396_v3 }
 0xc0f   : > { %12542 = vmatprep.subr.bf16.mxu1 %v12541_v4 }
 0xc10   : > { %12544 = vmatpush3.bf16.msra.mxu1 %v12541_v4  ;;  %v4402_v5 = vpop.xlane.xlu1 %4401 }
 0xc14   : > { %v4405_v6 = vpop.xlane.xlu1 %4404 }
 0xc15   : > { %v12545_v7 = vpack.c.bf16 %v4405_v6, %v4402_v5 }
 0xc17   : > { %12546 = vmatprep.subr.bf16.mxu1 %v12545_v7 }
 0xc18   : > { %12548 = vmatpush3.bf16.msra.mxu1 %v12545_v7 }
 0xc1b   : > { %11919 = vmatmul.mubr.msk.f32.vlgmr.msra.gmra.mrb[12].mxu1 %vm3975_vm8, %v15970_v8 }
 0xc1c   : > { %11921 = vmatprep.mubr.msk.f32.mxu1 %vm3975_vm8, %v15973_v9 }
 0xc1f   : > { %11922 = vmatmul.mubr.msk.f32.gmra.mrb[14].mxu1 %vm3975_vm8, %v15980_v14 }
 0xc20   : > { %11932 = vmatprep.mubr.msk.f32.mxu1 %vm3975_vm8, %v15965_v1 }
 0xcee   : > { %v11920_v15 = vpop.f32.mrb[12].mxu1 }
 0xcef   : > { %v4504_v16 = vmul.f32 0.001953125, %v11920_v15  ;;  %v4484_v17 = vpop.f32.mrb[13].mxu1  ;;  %v11206_v15 = vld [vmem:[#allocation10] ss:$0 sm:$0xff] }
 0xcf0   : > { %v4503_v18 = vmul.f32 0.001953125, %v4484_v17  ;;  %v4155_v17 = vld [vmem:[%s16963_s2] sm:$0xff] }
 0xcf1   : > { %4514 = vperm.xlu1 %13297, %v4504_v16   ;;  %v4151_v16 = vld [vmem:[%s16962_s1] sm:$0xff] }
 0xcf2   : > { %4509 = vperm.xlu0 %13296, %v4503_v18   ;;  %v11923_v19 = vpop.f32.mrb[14].mxu1  ;;  %11946 = vmatprep.mubr.msk.f32.mxu0 %vm3975_vm8, %v4151_v16  ;;  %v11192_v18 = vld [vmem:[#allocation34] ss:$0 sm:$0xff] }
 0xcf3   : > { %v4506_v20 = vmul.f32 0.001953125, %v11923_v19  ;;  %v4494_v21 = vpop.f32.mrb[15].mxu1 }
 0xcf4   : > { %v4505_v22 = vmul.f32 0.001953125, %v4494_v21 }
 0xcf6   : > { %4524 = vperm.xlu0 %13296, %v4506_v20   ;;  %4519 = vperm.xlu1 %13297, %v4505_v22   ;;  %v11193_v22 = vld [vmem:[#allocation25] ss:$0 sm:$0xff] }
 0xd70   : > { %v4515_v23 = vpop.permute.xlu1 %4514 }
 0xd71   : > { %v15986_v25 = vsub.f32 %v4389_v52, %v4515_v23  ;;  %v4510_v26 = vpop.permute.xlu0 %4509 }
 0xd72   : > { %v15988_v28 = vsub.f32 %v4388_v55, %v4510_v26 }
 0xd73   : > { %v4532_v29 = vmul.f32 %v15986_v25, %v15986_v25 }
 0xd74   : > { %v4531_v30 = vmul.f32 %v15988_v28, %v15988_v28 }
 0xd75   : > { %v4525_v33 = vpop.permute.xlu0 %4524  ;;  %v4520_v36 = vpop.permute.xlu1 %4519  ;;  %v4538_v37 = vsel %vm3975_vm8, %v4532_v29, 0.0 }
 0xd76   : > { %v15995_v38 = vsub.f32 %v4391_v63, %v4525_v33  ;;  %v15997_v40 = vsub.f32 %v4390_v60, %v4520_v36  ;;  %4539 = vadd.xlane.f32.xlu0 %v4538_v37  ;;  %v4535_v42 = vsel %vm3975_vm8, %v4531_v30, 0.0 }
 0xd77   : > { %4536 = vadd.xlane.f32.xlu1 %v4535_v42 }
 0xd78   : > { %v4534_v43 = vmul.f32 %v15995_v38, %v15995_v38  ;;  %v4533_v44 = vmul.f32 %v15997_v40, %v15997_v40 }
 0xd7a   : > { %v4544_v45 = vsel %vm3975_vm8, %v4534_v43, 0.0  ;;  %v4541_v46 = vsel %vm3975_vm8, %v4533_v44, 0.0 }
 0xd7b   : > { %4545 = vadd.xlane.f32.xlu1 %v4544_v45  ;;  %4542 = vadd.xlane.f32.xlu0 %v4541_v46 }
 0xe03   : > { %v4540_v47 = vpop.xlane.xlu0 %4539 }
 0xe04   : > { %v4537_v48 = vpop.xlane.xlu1 %4536 }
 0xe05   : > { %v12549_v49 = vpack.c.bf16 %v4540_v47, %v4537_v48  ;;  %v4153_v48 = vld [vmem:[%s16962_s1 + $0x10] sm:$0xff] }
 0xe07   : > { %12550 = vmatprep.subr.bf16.mxu1 %v12549_v49 }
 0xe08   : > { %v4543_v50 = vpop.xlane.xlu0 %4542  ;;  %12552 = vmatpush3.bf16.msra.mxu1 %v12549_v49  ;;  %v4546_v51 = vpop.xlane.xlu1 %4545  ;;  %v4157_v49 = vld [vmem:[%s16963_s2 + $0x10] sm:$0xff] }
 0xe09   : > { %v12553_v52 = vpack.c.bf16 %v4546_v51, %v4543_v50  ;;  %v4154_v50 = vld [vmem:[%s16962_s1 + $0x18] sm:$0xff] }
 0xe0a   : > { %v4158_v51 = vld [vmem:[%s16963_s2 + $0x18] sm:$0xff] }
 0xe0b   : > { %12554 = vmatprep.subr.bf16.mxu1 %v12553_v52 }
 0xe0c   : > { %12556 = vmatpush3.bf16.msra.mxu1 %v12553_v52  ;;  %v11202_v52 = vld [vmem:[#allocation31] ss:$0 sm:$0xff] }
 0xe0f   : > { %11933 = vmatmul.mubr.msk.f32.vlgmr.msra.gmra.mrb[16].mxu1 %vm3975_vm8, %v15970_v8 }
 0xe10   : > { %11935 = vmatprep.mubr.msk.f32.mxu1 %vm3975_vm8, %v15973_v9 }
 0xe13   : > { %11936 = vmatmul.mubr.msk.f32.gmra.mrb[18].mxu1 %vm3975_vm8, %v15980_v14 }
 0xe14   : > { %11960 = vmatprep.mubr.msk.f32.mxu1 %vm3975_vm8, %v4155_v17 }
 0xee2   : > { %v11934_v53 = vpop.f32.mrb[16].mxu1 }
 0xee3   : > { %v4633_v54 = vmul.f32 0.001953125, %v11934_v53  ;;  %v4613_v55 = vpop.f32.mrb[17].mxu1  ;;  %v11203_v53 = vld [vmem:[#allocation30] ss:$0 sm:$0xff] }
 0xee4   : > { %v4632_v57 = vmul.f32 0.001953125, %v4613_v55 }
 0xee5   : > { %v4637_v58 = vadd.f32 1e-08, %v4633_v54  ;;  %v11204_v54 = vld [vmem:[#allocation33] ss:$0 sm:$0xff] }
 0xee6   : > { %v4636_v59 = vadd.f32 1e-08, %v4632_v57  ;;  %v11937_v60 = vpop.f32.mrb[18].mxu1 }
 0xee7   : > { %13310 = vrsqrt.f32 %v4637_v58  ;;  %v4635_v61 = vmul.f32 0.001953125, %v11937_v60  ;;  %v4623_v63 = vpop.f32.mrb[19].mxu1 }
 0xee8   : > { %13312 = vrsqrt.f32 %v4636_v59  ;;  %v4634_v0 = vmul.f32 0.001953125, %v4623_v63 }
 0xee9   : > { %v4639_v2 = vadd.f32 1e-08, %v4635_v61 }
 0xeea   : > { %v4638_v3 = vadd.f32 1e-08, %v4634_v0 }
 0xeeb   : > { %13314 = vrsqrt.f32 %v4639_v2 }
 0xeec   : > { %13316 = vrsqrt.f32 %v4638_v3 }
 0xef1   : > { %v13311_v4 = vpop.eup %13310 }
 0xef2   : > { %v13313_v5 = vpop.eup %13312  ;;  %4651 = vperm.xlu1 %13297, %v13311_v4  }
 0xef3   : > { %4646 = vperm.xlu0 %13296, %v13313_v5  }
 0xef5   : > { %v13315_v6 = vpop.eup %13314 }
 0xef6   : > { %v13317_v7 = vpop.eup %13316 }
 0xef7   : > { %4661 = vperm.xlu0 %13296, %v13315_v6   ;;  %4656 = vperm.xlu1 %13297, %v13317_v7   ;;  %v11205_v6 = vld [vmem:[#allocation28] ss:$0 sm:$0xff] }
 0xefb   : > { %4945 = vperm.xlu1 %13297, %v11206_v15  }
 0xf71   : > { %v4652_v19 = vpop.permute.xlu1 %4651 }
 0xf72   : > { %v4665_v20 = vmul.f32 %v4652_v19, %v15986_v25  ;;  %v4647_v21 = vpop.permute.xlu0 %4646 }
 0xf73   : > { %v4664_v23 = vmul.f32 %v4647_v21, %v15988_v28 }
 0xf74   : > { %v4675_v26 = vmul.f32 %v11192_v18, %v4665_v20 }
 0xf75   : > { %v4674_v29 = vmul.f32 %v11192_v18, %v4664_v23 }
 0xf76   : > { %v4685_v30 = vadd.f32 %v11193_v22, %v4675_v26  ;;  %v4662_v33 = vpop.permute.xlu0 %4661  ;;  %v4657_v36 = vpop.permute.xlu1 %4656 }
 0xf77   : > { %v4684_v37 = vadd.f32 %v11193_v22, %v4674_v29  ;;  %v4667_v42 = vmul.f32 %v4662_v33, %v15995_v38  ;;  %v4666_v43 = vmul.f32 %v4657_v36, %v15997_v40  ;;  %v4152_v38 = vld [vmem:[%s16962_s1 + $0x8] sm:$0xff] }
 0xf78   : > { %v4156_v40 = vld [vmem:[%s16963_s2 + $0x8] sm:$0xff]  ;;  %v4890_v58 = vmul.f32 %v11202_v52, %v4685_v30 }
 0xf79   : > { %v4677_v44 = vmul.f32 %v11192_v18, %v4667_v42  ;;  %v4676_v45 = vmul.f32 %v11192_v18, %v4666_v43  ;;  %v12557_v25 = vpack.c.bf16 %v4685_v30, %v4684_v37  ;;  %v4889_v0 = vmul.f32 %v11202_v52, %v4684_v37 }
 0xf7a   : > { %v4946_v36 = vpop.permute.xlu1 %4945 }
 0xf7b   : > { %v4687_v46 = vadd.f32 %v11193_v22, %v4677_v44  ;;  %v4686_v47 = vadd.f32 %v11193_v22, %v4676_v45  ;;  %12558 = vmatprep.subr.bf16.mxu0 %v12557_v25  ;;  %12566 = vmatprep.subr.bf16.mxu1 %v12557_v25 }
 0xf7c   : > { %12560 = vmatpush3.bf16.msra.mxu0 %v12557_v25  ;;  %12568 = vmatpush3.bf16.msra.mxu1 %v12557_v25 }
 0xf7d   : > { %v12561_v28 = vpack.c.bf16 %v4687_v46, %v4686_v47  ;;  %v4892_v17 = vmul.f32 %v11202_v52, %v4687_v46  ;;  %v4891_v23 = vmul.f32 %v11202_v52, %v4686_v47 }
 0xf7f   : > { %12562 = vmatprep.subr.bf16.mxu0 %v12561_v28  ;;  %12570 = vmatprep.subr.bf16.mxu1 %v12561_v28 }
 0xf80   : > { %12564 = vmatpush3.bf16.msra.mxu0 %v12561_v28  ;;  %12572 = vmatpush3.bf16.msra.mxu1 %v12561_v28 }
 0xf83   : > { %11947 = vmatmul.mubr.msk.f32.vlgmr.msra.gmra.mrb[14].mxu0 %vm3975_vm8, %v4152_v38  ;;  %11961 = vmatmul.mubr.msk.f32.vlgmr.msra.gmra.mrb[20].mxu1 %vm3975_vm8, %v4156_v40 }
 0xf84   : > { %11949 = vmatprep.mubr.msk.f32.mxu0 %vm3975_vm8, %v4153_v48  ;;  %11963 = vmatprep.mubr.msk.f32.mxu1 %vm3975_vm8, %v4157_v49 }
 0xf87   : > { %11950 = vmatmul.mubr.msk.f32.gmra.mrb[16].mxu0 %vm3975_vm8, %v4154_v50  ;;  %11964 = vmatmul.mubr.msk.f32.gmra.mrb[22].mxu1 %vm3975_vm8, %v4158_v51 }
 0xf88   : > { %11974 = vmatprep.mubr.msk.f32.mxu0 %vm3975_vm8, %v15965_v1  ;;  %11988 = vmatprep.mubr.msk.f32.mxu1 %vm3975_vm8, %v15965_v1 }
0x1056   : > { %v11948_v55 = vpop.f32.mrb[14].mxu0  ;;  %v11962_v57 = vpop.f32.mrb[20].mxu1 }
0x1057   : > { %v4901_v59 = vmul.f32 %v11948_v55, %v11203_v53  ;;  %v4766_v60 = vpop.f32.mrb[15].mxu0  ;;  %v4916_v61 = vmul.f32 %v11962_v57, %v11204_v54  ;;  %v4863_v63 = vpop.f32.mrb[21].mxu1 }
0x1058   : > { %v4900_v2 = vmul.f32 %v11203_v53, %v4766_v60  ;;  %v4915_v3 = vmul.f32 %v11204_v54, %v4863_v63 }
0x1059   : > { %v4905_v4 = vadd.f32 %v4901_v59, %v4890_v58 }
0x105a   : > { %v4904_v5 = vadd.f32 %v4900_v2, %v4889_v0  ;;  %v11951_v7 = vpop.f32.mrb[16].mxu0  ;;  %v11965_v15 = vpop.f32.mrb[22].mxu1 }
0x105b   : > { %v4920_v16 = vadd.f32 %v4916_v61, %v4905_v4  ;;  %v4903_v18 = vmul.f32 %v11951_v7, %v11203_v53  ;;  %v4776_v19 = vpop.f32.mrb[17].mxu0  ;;  %v4918_v20 = vmul.f32 %v11965_v15, %v11204_v54  ;;  %v4873_v21 = vpop.f32.mrb[23].mxu1 }
0x105c   : > { %v4919_v22 = vadd.f32 %v4915_v3, %v4904_v5  ;;  %v4902_v26 = vmul.f32 %v11203_v53, %v4776_v19  ;;  %v4917_v29 = vmul.f32 %v11204_v54, %v4873_v21 }
0x105d   : > { %v4931_v30 = vadd.f32 %v11205_v6, %v4920_v16  ;;  %v4907_v33 = vadd.f32 %v4903_v18, %v4892_v17 }
0x105e   : > { %v4930_v37 = vadd.f32 %v11205_v6, %v4919_v22  ;;  %v4906_v42 = vadd.f32 %v4902_v26, %v4891_v23 }
0x105f   : > { %v4922_v43 = vadd.f32 %v4918_v20, %v4907_v33  ;;  %vm4936_vm14 = vcmp.gt.f32.partialorder %v4931_v30, 0.0  ;;  %v4949_v44 = vmul.f32 %v4946_v36, %v4931_v30 }
0x1060   : > { %v4921_v45 = vadd.f32 %v4917_v29, %v4906_v42  ;;  %vm4935_vm15 = vcmp.gt.f32.partialorder %v4930_v37, 0.0  ;;  %v4948_v25 = vmul.f32 %v4946_v36, %v4930_v37 }
0x1061   : > { %v4933_v46 = vadd.f32 %v11205_v6, %v4922_v43  ;;  %v4953_v28 = vsel %vm4936_vm14, %v4931_v30, %v4949_v44 }
0x1062   : > { %v4932_v38 = vadd.f32 %v11205_v6, %v4921_v45  ;;  %v4961_v40 = vsel %vm3975_vm8, %v4953_v28, 0.0  ;;  %v4952_v48 = vsel %vm4935_vm15, %v4930_v37, %v4948_v25 }
0x1063   : > { %4962 = vadd.xlane.f32.xlu1 %v4961_v40  ;;  %v4958_v47 = vsel %vm3975_vm8, %v4952_v48, 0.0  ;;  %v4951_v50 = vmul.f32 %v4946_v36, %v4933_v46  ;;  %vm4938_vm1 = vcmp.gt.f32.partialorder %v4933_v46, 0.0 }
0x1064   : > { %4959 = vadd.xlane.f32.xlu0 %v4958_v47  ;;  %vm4937_vm0 = vcmp.gt.f32.partialorder %v4932_v38, 0.0  ;;  %v4950_v49 = vmul.f32 %v4946_v36, %v4932_v38 }
0x1065   : > { %v4955_v53 = vsel %vm4938_vm1, %v4933_v46, %v4951_v50 }
0x1066   : > { %v4954_v51 = vsel %vm4937_vm0, %v4932_v38, %v4950_v49  ;;  %v4967_v54 = vsel %vm3975_vm8, %v4955_v53, 0.0 }
0x1067   : > { %v4964_v52 = vsel %vm3975_vm8, %v4954_v51, 0.0 }
0x1068   : > { %4965 = vadd.xlane.f32.xlu0 %v4964_v52 }
0x106c   : > { %4968 = vadd.xlane.f32.xlu0 %v4967_v54 }
0x10f0   : > { %v4963_v55 = vpop.xlane.xlu1 %4962 }
0x10f1   : > { %v4960_v57 = vpop.xlane.xlu0 %4959 }
0x10f2   : > { %v12573_v58 = vpack.c.bf16 %v4963_v55, %v4960_v57 }
0x10f4   : > { %12574 = vmatprep.subr.bf16.mxu0 %v12573_v58 }
0x10f5   : > { %12576 = vmatpush3.bf16.msra.mxu0 %v12573_v58  ;;  %v4966_v59 = vpop.xlane.xlu0 %4965  ;;  %v5240_v58 = vld [vmem:[%s16964_s3] sm:$0xff] }
0x10f9   : > { %v4969_v60 = vpop.xlane.xlu0 %4968 }
0x10fa   : > { %v12577_v61 = vpack.c.bf16 %v4969_v60, %v4966_v59  ;;  %v5241_v59 = vld [vmem:[%s16964_s3 + $0x8] sm:$0xff] }
0x10fc   : > { %12578 = vmatprep.subr.bf16.mxu0 %v12577_v61 }
0x10fd   : > { %12580 = vmatpush3.bf16.msra.mxu0 %v12577_v61  ;;  %v12589_v61 = vpack.c.bf16 %v5241_v59, %v5240_v58 }
0x10ff   : > { %12590 = vmatprep.subr.bf16.mxu0 %v12589_v61 }
0x1100   : > { %11975 = vmatmul.mubr.msk.f32.vlgmr.msra.gmra.mrb[18].mxu0 %vm3975_vm8, %v15970_v8 }
0x1101   : > { %11977 = vmatprep.mubr.msk.f32.mxu0 %vm3975_vm8, %v15973_v9  ;;  %12592 = vmatpush3.bf16.msra.mxu0 %v12589_v61 }
0x1104   : > { %11978 = vmatmul.mubr.msk.f32.gmra.mrb[20].mxu0 %vm3975_vm8, %v15980_v14 }
0x11d3   : > { %v11976_v63 = vpop.f32.mrb[18].mxu0 }
0x11d4   : > { %v5056_v0 = vmul.f32 0.001953125, %v11976_v63  ;;  %v5036_v2 = vpop.f32.mrb[19].mxu0 }
0x11d5   : > { %v5055_v3 = vmul.f32 0.001953125, %v5036_v2  ;;  %v5242_v2 = vld [vmem:[%s16964_s3 + $0x10] sm:$0xff] }
0x11d6   : > { %5066 = vperm.xlu0 %13296, %v5056_v0   ;;  %v11227_v0 = vld [vmem:[#allocation11] ss:$0 sm:$0xff] }
0x11d7   : > { %5061 = vperm.xlu1 %13297, %v5055_v3   ;;  %v11979_v4 = vpop.f32.mrb[20].mxu0  ;;  %v5243_v3 = vld [vmem:[%s16964_s3 + $0x18] sm:$0xff]  ;;  %s16966_s3 = sld [smem:[#allocation111_spill]] }
0x11d8   : > { %v5046_v5 = vpop.f32.mrb[21].mxu0  ;;  %v5058_v7 = vmul.f32 0.001953125, %v11979_v4  ;;  %v12593_v4 = vpack.c.bf16 %v5243_v3, %v5242_v2 }
0x11d9   : > { %v5057_v6 = vmul.f32 0.001953125, %v5046_v5 }
0x11da   : > { %12594 = vmatprep.subr.bf16.mxu0 %v12593_v4 }
0x11db   : > { %5071 = vperm.xlu1 %13297, %v5057_v6   ;;  %12596 = vmatpush3.bf16.msra.mxu0 %v12593_v4 }
0x11df   : > { %5076 = vperm.xlu1 %13297, %v5058_v7   ;;  %v11215_v7 = vld [vmem:[#allocation36] ss:$0 sm:$0xff] }
0x1255   : > { %v5067_v15 = vpop.permute.xlu0 %5066 }
0x1256   : > { %v16046_v16 = vsub.f32 %v4953_v28, %v5067_v15  ;;  %v5062_v17 = vpop.permute.xlu1 %5061 }
0x1257   : > { %v16048_v18 = vsub.f32 %v4952_v48, %v5062_v17 }
0x1258   : > { %v5084_v19 = vmul.f32 %v16046_v16, %v16046_v16 }
0x1259   : > { %v5083_v20 = vmul.f32 %v16048_v18, %v16048_v18 }
0x125a   : > { %v5072_v21 = vpop.permute.xlu1 %5071  ;;  %v5090_v22 = vsel %vm3975_vm8, %v5084_v19, 0.0 }
0x125b   : > { %v16055_v23 = vsub.f32 %v4954_v51, %v5072_v21  ;;  %5091 = vadd.xlane.f32.xlu1 %v5090_v22  ;;  %v5087_v26 = vsel %vm3975_vm8, %v5083_v20, 0.0  ;;  %v11216_v21 = vld [vmem:[#allocation27] ss:$0 sm:$0xff] }
0x125c   : > { %5088 = vadd.xlane.f32.xlu0 %v5087_v26 }
0x125d   : > { %v5085_v29 = vmul.f32 %v16055_v23, %v16055_v23 }
0x125e   : > { %v5077_v30 = vpop.permute.xlu1 %5076 }
0x125f   : > { %v16060_v33 = vsub.f32 %v4955_v53, %v5077_v30  ;;  %v5093_v36 = vsel %vm3975_vm8, %v5085_v29, 0.0 }
0x1260   : > { %5094 = vadd.xlane.f32.xlu0 %v5093_v36 }
0x1261   : > { %v5086_v37 = vmul.f32 %v16060_v33, %v16060_v33 }
0x1263   : > { %v5096_v42 = vsel %vm3975_vm8, %v5086_v37, 0.0 }
0x1264   : > { %5097 = vadd.xlane.f32.xlu0 %v5096_v42 }
0x12e8   : > { %v5092_v43 = vpop.xlane.xlu1 %5091 }
0x12e9   : > { %v5089_v44 = vpop.xlane.xlu0 %5088 }
0x12ea   : > { %v12581_v45 = vpack.c.bf16 %v5092_v43, %v5089_v44 }
0x12ec   : > { %12582 = vmatprep.subr.bf16.mxu1 %v12581_v45 }
0x12ed   : > { %v5095_v25 = vpop.xlane.xlu0 %5094  ;;  %12584 = vmatpush3.bf16.msra.mxu1 %v12581_v45 }
0x12f1   : > { %v5098_v46 = vpop.xlane.xlu0 %5097 }
0x12f2   : > { %v12585_v28 = vpack.c.bf16 %v5098_v46, %v5095_v25  ;;  %v5361_v25 = vld [vmem:[%s16965_s4 + $0x8] sm:$0xff] }
0x12f4   : > { %12586 = vmatprep.subr.bf16.mxu1 %v12585_v28 }
0x12f5   : > { %12588 = vmatpush3.bf16.msra.mxu1 %v12585_v28  ;;  %v11217_v28 = vld [vmem:[#allocation24] ss:$0 sm:$0xff] }
0x12f8   : > { %11989 = vmatmul.mubr.msk.f32.vlgmr.msra.gmra.mrb[24].mxu1 %vm3975_vm8, %v15970_v8 }
0x12f9   : > { %11991 = vmatprep.mubr.msk.f32.mxu1 %vm3975_vm8, %v15973_v9 }
0x12fc   : > { %11992 = vmatmul.mubr.msk.f32.gmra.mrb[26].mxu1 %vm3975_vm8, %v15980_v14 }
0x13cb   : > { %v11990_v38 = vpop.f32.mrb[24].mxu1 }
0x13cc   : > { %v5185_v40 = vmul.f32 0.001953125, %v11990_v38  ;;  %v5165_v48 = vpop.f32.mrb[25].mxu1 }
0x13cd   : > { %v5184_v47 = vmul.f32 0.001953125, %v5165_v48 }
0x13ce   : > { %v5189_v49 = vadd.f32 1e-08, %v5185_v40 }
0x13cf   : > { %v5188_v50 = vadd.f32 1e-08, %v5184_v47  ;;  %v11993_v51 = vpop.f32.mrb[26].mxu1 }
0x13d0   : > { %13318 = vrsqrt.f32 %v5189_v49  ;;  %v5175_v52 = vpop.f32.mrb[27].mxu1  ;;  %v5187_v53 = vmul.f32 0.001953125, %v11993_v51 }
0x13d1   : > { %13320 = vrsqrt.f32 %v5188_v50  ;;  %v5186_v54 = vmul.f32 0.001953125, %v5175_v52 }
0x13d2   : > { %v5191_v57 = vadd.f32 1e-08, %v5187_v53 }
0x13d3   : > { %v5190_v55 = vadd.f32 1e-08, %v5186_v54 }
0x13d5   : > { %13322 = vrsqrt.f32 %v5190_v55 }
0x13d6   : > { %13324 = vrsqrt.f32 %v5191_v57 }
0x13da   : > { %v13319_v60 = vpop.eup %13318 }
0x13db   : > { %v13321_v63 = vpop.eup %13320  ;;  %5203 = vperm.xlu0 %13296, %v13319_v60  }
0x13dc   : > { %5198 = vperm.xlu1 %13297, %v13321_v63  }
0x13df   : > { %v13323_v5 = vpop.eup %13322  ;;  %5477 = vperm.xlu0 %13296, %v11227_v0  }
0x13e0   : > { %5208 = vperm.xlu1 %13297, %v13323_v5   ;;  %v13325_v6 = vpop.eup %13324 }
0x13e4   : > { %5213 = vperm.xlu1 %13297, %v13325_v6  }
0x145a   : > { %v5204_v15 = vpop.permute.xlu0 %5203 }
0x145b   : > { %v5217_v17 = vmul.f32 %v5204_v15, %v16046_v16  ;;  %v5199_v19 = vpop.permute.xlu1 %5198 }
0x145c   : > { %v5216_v20 = vmul.f32 %v5199_v19, %v16048_v18 }
0x145d   : > { %v5227_v22 = vmul.f32 %v11215_v7, %v5217_v17 }
0x145e   : > { %v5226_v26 = vmul.f32 %v11215_v7, %v5216_v20  ;;  %v5478_v59 = vpop.permute.xlu0 %5477 }
0x145f   : > { %v5209_v29 = vpop.permute.xlu1 %5208  ;;  %v5237_v37 = vadd.f32 %v11216_v21, %v5227_v22 }
0x1460   : > { %v5236_v30 = vadd.f32 %v11216_v21, %v5226_v26  ;;  %v5218_v36 = vmul.f32 %v5209_v29, %v16055_v23  ;;  %v5360_v23 = vld [vmem:[%s16965_s4] sm:$0xff]  ;;  %s16967_s4 = sld [smem:[#allocation112_spill]] }
0x1461   : > { %v12597_v46 = vpack.c.bf16 %v5361_v25, %v5360_v23 }
0x1462   : > { %v5228_v42 = vmul.f32 %v11215_v7, %v5218_v36  ;;  %12002 = vmatprep.mubr.msk.f32.mxu0 %vm3975_vm8, %v5236_v30 }
0x1463   : > { %12003 = vmatmul.mubr.msk.f32.vlgmr.msra.gmra.mrb[22].mxu0 %vm3975_vm8, %v5237_v37  ;;  %v5214_v43 = vpop.permute.xlu1 %5213  ;;  %12598 = vmatprep.subr.bf16.mxu1 %v12597_v46 }
0x1464   : > { %v5238_v16 = vadd.f32 %v11216_v21, %v5228_v42  ;;  %v5219_v44 = vmul.f32 %v5214_v43, %v16060_v33  ;;  %12600 = vmatpush3.bf16.msra.mxu1 %v12597_v46 }
0x1466   : > { %v5229_v18 = vmul.f32 %v11215_v7, %v5219_v44  ;;  %12005 = vmatprep.mubr.msk.f32.mxu0 %vm3975_vm8, %v5238_v16 }
0x1468   : > { %v5239_v45 = vadd.f32 %v11216_v21, %v5229_v18 }
0x146a   : > { %12006 = vmatmul.mubr.msk.f32.gmra.mrb[24].mxu0 %vm3975_vm8, %v5239_v45 }
0x146b   : > { %12026 = vmatprep.mubr.msk.f32.mxu0 %vm3975_vm8, %v15965_v1 }
0x1536   : > { %v12004_v38 = vpop.f32.mrb[22].mxu0 }
0x1537   : > { %v5335_v40 = vadd.f32 %v12004_v38, %v11217_v28  ;;  %v5329_v48 = vpop.f32.mrb[23].mxu0 }
0x1538   : > { %v5330_v47 = vadd.f32 %v11217_v28, %v5329_v48 }
0x1539   : > { %v16092_v49 = vadd.f32 %v5335_v40, %v15935_v35 }
0x153a   : > { %v16089_v33 = vadd.f32 %v5330_v47, %v15932_v34  ;;  %v11222_v34 = vld [vmem:[#allocation37] ss:$0 sm:$0xff] }
0x153c   : > { %12012 = vmatprep.mubr.msk.f32.mxu1 %vm3551_vm4, %v16089_v33 }
0x153d   : > { %v12007_v50 = vpop.f32.mrb[24].mxu0  ;;  %12013 = vmatmul.mubr.msk.f32.vlgmr.msra.gmra.mrb[28].mxu1 %vm3551_vm4, %v16092_v49 }
0x153e   : > { %v5345_v51 = vadd.f32 %v12007_v50, %v11217_v28  ;;  %v5339_v52 = vpop.f32.mrb[25].mxu0 }
0x153f   : > { %v5340_v53 = vadd.f32 %v11217_v28, %v5339_v52 }
0x1540   : > { %v16102_v55 = vadd.f32 %v5345_v51, %v15946_v41 }
0x1541   : > { %v16099_v54 = vadd.f32 %v5340_v53, %v15943_v39 }
0x1543   : > { %12015 = vmatprep.mubr.msk.f32.mxu1 %vm3551_vm4, %v16099_v54 }
0x1544   : > { %12016 = vmatmul.mubr.msk.f32.gmra.mrb[30].mxu1 %vm3551_vm4, %v16102_v55 }
0x1545   : > { %12040 = vmatprep.mubr.msk.f32.mxu1 %vm3975_vm8, %v15965_v1 }
0x1610   : > { %v12014_v35 = vpop.f32.mrb[28].mxu1 }
0x1611   : > { %v5453_v57 = vadd.f32 %v12014_v35, %v11222_v34  ;;  %v5447_v58 = vpop.f32.mrb[29].mxu1 }
0x1612   : > { %v5448_v60 = vadd.f32 %v11222_v34, %v5447_v58 }
0x1613   : > { %v5481_v39 = vmul.f32 %v5478_v59, %v5453_v57  ;;  %vm5468_vm2 = vcmp.gt.f32.partialorder %v5453_v57, 0.0 }
0x1614   : > { %v5480_v61 = vmul.f32 %v5478_v59, %v5448_v60  ;;  %vm5467_vm10 = vcmp.gt.f32.partialorder %v5448_v60, 0.0 }
0x1615   : > { %v5485_v41 = vsel %vm5468_vm2, %v5453_v57, %v5481_v39 }
0x1616   : > { %v5493_v63 = vsel %vm3975_vm8, %v5485_v41, 0.0  ;;  %v5484_v0 = vsel %vm5467_vm10, %v5448_v60, %v5480_v61 }
0x1617   : > { %5494 = vadd.xlane.f32.xlu0 %v5493_v63  ;;  %v12017_v2 = vpop.f32.mrb[30].mxu1  ;;  %v5490_v3 = vsel %vm3975_vm8, %v5484_v0, 0.0 }
0x1618   : > { %v5463_v4 = vadd.f32 %v12017_v2, %v11222_v34  ;;  %5491 = vadd.xlane.f32.xlu1 %v5490_v3  ;;  %v5457_v5 = vpop.f32.mrb[31].mxu1 }
0x1619   : > { %v5458_v6 = vadd.f32 %v11222_v34, %v5457_v5 }
0x161a   : > { %v5483_v7 = vmul.f32 %v5478_v59, %v5463_v4  ;;  %vm5470_vm11 = vcmp.gt.f32.partialorder %v5463_v4, 0.0 }
0x161b   : > { %v5482_v15 = vmul.f32 %v5478_v59, %v5458_v6  ;;  %vm5469_vm12 = vcmp.gt.f32.partialorder %v5458_v6, 0.0 }
0x161c   : > { %v5487_v17 = vsel %vm5470_vm11, %v5463_v4, %v5483_v7 }
0x161d   : > { %v5499_v19 = vsel %vm3975_vm8, %v5487_v17, 0.0  ;;  %v5486_v20 = vsel %vm5469_vm12, %v5458_v6, %v5482_v15 }
0x161e   : > { %5500 = vadd.xlane.f32.xlu1 %v5499_v19  ;;  %v5496_v21 = vsel %vm3975_vm8, %v5486_v20, 0.0 }
0x161f   : > { %5497 = vadd.xlane.f32.xlu0 %v5496_v21 }
0x16a4   : > { %v5495_v22 = vpop.xlane.xlu0 %5494 }
0x16a5   : > { %v5492_v26 = vpop.xlane.xlu1 %5491 }
0x16a6   : > { %v12601_v29 = vpack.c.bf16 %v5495_v22, %v5492_v26 }
0x16a8   : > { %12602 = vmatprep.subr.bf16.mxu0 %v12601_v29 }
0x16a9   : > { %12604 = vmatpush3.bf16.msra.mxu0 %v12601_v29 }
0x16ab   : > { %v5501_v30 = vpop.xlane.xlu1 %5500 }
0x16ac   : > { %v5498_v36 = vpop.xlane.xlu0 %5497 }
0x16ad   : > { %v12605_v37 = vpack.c.bf16 %v5501_v30, %v5498_v36  ;;  %v11250_v30 = vld [vmem:[#allocation12] ss:$0 sm:$0xff] }
0x16ae   : > { %v5352_v36 = vld [vmem:[%s16966_s3] sm:$0xff] }
0x16af   : > { %12606 = vmatprep.subr.bf16.mxu0 %v12605_v37 }
0x16b0   : > { %12608 = vmatpush3.bf16.msra.mxu0 %v12605_v37  ;;  %v5356_v37 = vld [vmem:[%s16967_s4] sm:$0xff] }
0x16b3   : > { %12027 = vmatmul.mubr.msk.f32.vlgmr.msra.gmra.mrb[26].mxu0 %vm3975_vm8, %v15970_v8 }
0x16b4   : > { %12029 = vmatprep.mubr.msk.f32.mxu0 %vm3975_vm8, %v15973_v9 }
0x16b7   : > { %12030 = vmatmul.mubr.msk.f32.gmra.mrb[28].mxu0 %vm3975_vm8, %v15980_v14 }
0x16b8   : > { %12054 = vmatprep.mubr.msk.f32.mxu0 %vm3975_vm8, %v5352_v36 }
0x1786   : > { %v12028_v42 = vpop.f32.mrb[26].mxu0 }
0x1787   : > { %v5588_v43 = vmul.f32 0.001953125, %v12028_v42  ;;  %v5568_v16 = vpop.f32.mrb[27].mxu0  ;;  %v11236_v42 = vld [vmem:[#allocation49] ss:$0 sm:$0xff] }
0x1788   : > { %v5587_v44 = vmul.f32 0.001953125, %v5568_v16 }
0x1789   : > { %5598 = vperm.xlu1 %13297, %v5588_v43  }
0x178a   : > { %5593 = vperm.xlu0 %13296, %v5587_v44   ;;  %v12031_v18 = vpop.f32.mrb[28].mxu0 }
0x178b   : > { %v5590_v45 = vmul.f32 0.001953125, %v12031_v18  ;;  %v5578_v23 = vpop.f32.mrb[29].mxu0  ;;  %v11237_v18 = vld [vmem:[#allocation40] ss:$0 sm:$0xff] }
0x178c   : > { %v5589_v25 = vmul.f32 0.001953125, %v5578_v23 }
0x178e   : > { %5608 = vperm.xlu0 %13296, %v5590_v45   ;;  %5603 = vperm.xlu1 %13297, %v5589_v25  }
0x1808   : > { %v5599_v46 = vpop.permute.xlu1 %5598 }
0x1809   : > { %v16120_v28 = vsub.f32 %v5485_v41, %v5599_v46  ;;  %v5594_v38 = vpop.permute.xlu0 %5593 }
0x180a   : > { %v16122_v40 = vsub.f32 %v5484_v0, %v5594_v38 }
0x180b   : > { %v5616_v48 = vmul.f32 %v16120_v28, %v16120_v28 }
0x180c   : > { %v5615_v47 = vmul.f32 %v16122_v40, %v16122_v40 }
0x180d   : > { %v5609_v50 = vpop.permute.xlu0 %5608  ;;  %v5604_v51 = vpop.permute.xlu1 %5603  ;;  %v5622_v52 = vsel %vm3975_vm8, %v5616_v48, 0.0 }
0x180e   : > { %v16129_v53 = vsub.f32 %v5487_v17, %v5609_v50  ;;  %v16131_v34 = vsub.f32 %v5486_v20, %v5604_v51  ;;  %5623 = vadd.xlane.f32.xlu0 %v5622_v52  ;;  %v5619_v35 = vsel %vm3975_vm8, %v5615_v47, 0.0 }
0x180f   : > { %5620 = vadd.xlane.f32.xlu1 %v5619_v35 }
0x1810   : > { %v5618_v57 = vmul.f32 %v16129_v53, %v16129_v53  ;;  %v5617_v58 = vmul.f32 %v16131_v34, %v16131_v34 }
0x1812   : > { %v5628_v59 = vsel %vm3975_vm8, %v5618_v57, 0.0  ;;  %v5625_v60 = vsel %vm3975_vm8, %v5617_v58, 0.0 }
0x1813   : > { %5629 = vadd.xlane.f32.xlu1 %v5628_v59  ;;  %5626 = vadd.xlane.f32.xlu0 %v5625_v60  ;;  %v5354_v59 = vld [vmem:[%s16966_s3 + $0x10] sm:$0xff] }
0x1814   : > { %v5358_v60 = vld [vmem:[%s16967_s4 + $0x10] sm:$0xff] }
0x189b   : > { %v5624_v39 = vpop.xlane.xlu0 %5623 }
0x189c   : > { %v5621_v61 = vpop.xlane.xlu1 %5620 }
0x189d   : > { %v12609_v41 = vpack.c.bf16 %v5624_v39, %v5621_v61  ;;  %v5355_v39 = vld [vmem:[%s16966_s3 + $0x18] sm:$0xff] }
0x189e   : > { %v5359_v61 = vld [vmem:[%s16967_s4 + $0x18] sm:$0xff] }
0x189f   : > { %12610 = vmatprep.subr.bf16.mxu1 %v12609_v41 }
0x18a0   : > { %v5627_v63 = vpop.xlane.xlu0 %5626  ;;  %12612 = vmatpush3.bf16.msra.mxu1 %v12609_v41  ;;  %v5630_v0 = vpop.xlane.xlu1 %5629  ;;  %v11246_v41 = vld [vmem:[#allocation46] ss:$0 sm:$0xff] }
0x18a1   : > { %v12613_v2 = vpack.c.bf16 %v5630_v0, %v5627_v63  ;;  %v11247_v63 = vld [vmem:[#allocation45] ss:$0 sm:$0xff]  ;;  %v11248_v0 = vld [vmem:[#allocation48] ss:$0 sm:$0xff] }
0x18a3   : > { %12614 = vmatprep.subr.bf16.mxu1 %v12613_v2 }
0x18a4   : > { %12616 = vmatpush3.bf16.msra.mxu1 %v12613_v2 }
0x18a7   : > { %12041 = vmatmul.mubr.msk.f32.vlgmr.msra.gmra.mrb[32].mxu1 %vm3975_vm8, %v15970_v8 }
0x18a8   : > { %12043 = vmatprep.mubr.msk.f32.mxu1 %vm3975_vm8, %v15973_v9 }
0x18ab   : > { %12044 = vmatmul.mubr.msk.f32.gmra.mrb[34].mxu1 %vm3975_vm8, %v15980_v14 }
0x18ac   : > { %12068 = vmatprep.mubr.msk.f32.mxu1 %vm3975_vm8, %v5356_v37 }
0x197a   : > { %v12042_v3 = vpop.f32.mrb[32].mxu1 }
0x197b   : > { %v5717_v4 = vmul.f32 0.001953125, %v12042_v3  ;;  %v5697_v5 = vpop.f32.mrb[33].mxu1 }
0x197c   : > { %v5716_v6 = vmul.f32 0.001953125, %v5697_v5 }
0x197d   : > { %v5721_v7 = vadd.f32 1e-08, %v5717_v4 }
0x197e   : > { %v5720_v15 = vadd.f32 1e-08, %v5716_v6  ;;  %v12045_v17 = vpop.f32.mrb[34].mxu1 }
0x197f   : > { %13326 = vrsqrt.f32 %v5721_v7  ;;  %v5719_v19 = vmul.f32 0.001953125, %v12045_v17  ;;  %v5707_v20 = vpop.f32.mrb[35].mxu1 }
0x1980   : > { %13328 = vrsqrt.f32 %v5720_v15  ;;  %v5718_v21 = vmul.f32 0.001953125, %v5707_v20 }
0x1981   : > { %v5723_v8 = vadd.f32 1e-08, %v5719_v19 }
0x1982   : > { %v5722_v22 = vadd.f32 1e-08, %v5718_v21 }
0x1983   : > { %13330 = vrsqrt.f32 %v5723_v8 }
0x1984   : > { %13332 = vrsqrt.f32 %v5722_v22  ;;  %v11249_v22 = vld [vmem:[#allocation43] ss:$0 sm:$0xff] }
0x1989   : > { %v13327_v9 = vpop.eup %13326 }
0x198a   : > { %v13329_v14 = vpop.eup %13328  ;;  %5735 = vperm.xlu1 %13297, %v13327_v9  }
0x198b   : > { %5730 = vperm.xlu0 %13296, %v13329_v14  }
0x198d   : > { %v13331_v26 = vpop.eup %13330 }
0x198e   : > { %v13333_v29 = vpop.eup %13332 }
0x198f   : > { %5745 = vperm.xlu0 %13296, %v13331_v26   ;;  %5740 = vperm.xlu1 %13297, %v13333_v29  }
0x1993   : > { %6029 = vperm.xlu1 %13297, %v11250_v30  }
0x1a09   : > { %v5736_v43 = vpop.permute.xlu1 %5735 }
0x1a0a   : > { %v5749_v16 = vmul.f32 %v5736_v43, %v16120_v28  ;;  %v5731_v44 = vpop.permute.xlu0 %5730 }
0x1a0b   : > { %v5748_v45 = vmul.f32 %v5731_v44, %v16122_v40 }
0x1a0c   : > { %v5759_v23 = vmul.f32 %v11236_v42, %v5749_v16 }
0x1a0d   : > { %v5758_v25 = vmul.f32 %v11236_v42, %v5748_v45 }
0x1a0e   : > { %v5769_v46 = vadd.f32 %v11237_v18, %v5759_v23  ;;  %v5746_v38 = vpop.permute.xlu0 %5745  ;;  %v5741_v48 = vpop.permute.xlu1 %5740 }
0x1a0f   : > { %v5768_v47 = vadd.f32 %v11237_v18, %v5758_v25  ;;  %v5751_v50 = vmul.f32 %v5746_v38, %v16129_v53  ;;  %v5750_v51 = vmul.f32 %v5741_v48, %v16131_v34  ;;  %v5353_v53 = vld [vmem:[%s16966_s3 + $0x8] sm:$0xff] }
0x1a10   : > { %v5357_v34 = vld [vmem:[%s16967_s4 + $0x8] sm:$0xff]  ;;  %v5974_v4 = vmul.f32 %v11246_v41, %v5769_v46 }
0x1a11   : > { %v5761_v52 = vmul.f32 %v11236_v42, %v5751_v50  ;;  %v5760_v35 = vmul.f32 %v11236_v42, %v5750_v51  ;;  %v12617_v28 = vpack.c.bf16 %v5769_v46, %v5768_v47  ;;  %v5973_v17 = vmul.f32 %v11246_v41, %v5768_v47 }
0x1a12   : > { %v6030_v23 = vpop.permute.xlu1 %6029 }
0x1a13   : > { %v5771_v57 = vadd.f32 %v11237_v18, %v5761_v52  ;;  %v5770_v58 = vadd.f32 %v11237_v18, %v5760_v35  ;;  %12618 = vmatprep.subr.bf16.mxu0 %v12617_v28  ;;  %12626 = vmatprep.subr.bf16.mxu1 %v12617_v28 }
0x1a14   : > { %12620 = vmatpush3.bf16.msra.mxu0 %v12617_v28  ;;  %12628 = vmatpush3.bf16.msra.mxu1 %v12617_v28 }
0x1a15   : > { %v12621_v40 = vpack.c.bf16 %v5771_v57, %v5770_v58  ;;  %v5975_v43 = vmul.f32 %v11246_v41, %v5770_v58 }
0x1a17   : > { %12622 = vmatprep.subr.bf16.mxu0 %v12621_v40  ;;  %12630 = vmatprep.subr.bf16.mxu1 %v12621_v40 }
0x1a18   : > { %12624 = vmatpush3.bf16.msra.mxu0 %v12621_v40  ;;  %12632 = vmatpush3.bf16.msra.mxu1 %v12621_v40 }
0x1a1b   : > { %12055 = vmatmul.mubr.msk.f32.vlgmr.msra.gmra.mrb[30].mxu0 %vm3975_vm8, %v5353_v53  ;;  %12069 = vmatmul.mubr.msk.f32.vlgmr.msra.gmra.mrb[36].mxu1 %vm3975_vm8, %v5357_v34 }
0x1a1c   : > { %12057 = vmatprep.mubr.msk.f32.mxu0 %vm3975_vm8, %v5354_v59  ;;  %12071 = vmatprep.mubr.msk.f32.mxu1 %vm3975_vm8, %v5358_v60 }
0x1a1f   : > { %12058 = vmatmul.mubr.msk.f32.gmra.mrb[32].mxu0 %vm3975_vm8, %v5355_v39  ;;  %12072 = vmatmul.mubr.msk.f32.gmra.mrb[38].mxu1 %vm3975_vm8, %v5359_v61 }
0x1a20   : > { %12082 = vmatprep.mubr.msk.f32.mxu0 %vm3975_vm8, %v15965_v1  ;;  %12096 = vmatprep.mubr.msk.f32.mxu1 %vm3975_vm8, %v15965_v1  ;;  %v5976_v1 = vmul.f32 %v11246_v41, %v5771_v57 }
0x1aee   : > { %v12056_v2 = vpop.f32.mrb[30].mxu0  ;;  %v12070_v3 = vpop.f32.mrb[36].mxu1 }
0x1aef   : > { %v5985_v5 = vmul.f32 %v12056_v2, %v11247_v63  ;;  %v5850_v6 = vpop.f32.mrb[31].mxu0  ;;  %v6000_v7 = vmul.f32 %v12070_v3, %v11248_v0  ;;  %v5947_v15 = vpop.f32.mrb[37].mxu1 }
0x1af0   : > { %v5984_v19 = vmul.f32 %v11247_v63, %v5850_v6  ;;  %v5999_v20 = vmul.f32 %v11248_v0, %v5947_v15  ;;  %v16185_v6 = vld [vmem:[%s16961_s6 + $0x18] sm:$0xff] }
0x1af1   : > { %v5989_v21 = vadd.f32 %v5985_v5, %v5974_v4  ;;  %v16175_v4 = vld [vmem:[%s16961_s6 + $0x8] sm:$0xff]  ;;  %v16180_v5 = vld [vmem:[%s16961_s6 + $0x10] sm:$0xff] }
0x1af2   : > { %v5988_v8 = vadd.f32 %v5984_v19, %v5973_v17  ;;  %v12059_v9 = vpop.f32.mrb[32].mxu0  ;;  %v12073_v14 = vpop.f32.mrb[38].mxu1 }
0x1af3   : > { %v6004_v26 = vadd.f32 %v6000_v7, %v5989_v21  ;;  %v5987_v29 = vmul.f32 %v12059_v9, %v11247_v63  ;;  %v5860_v30 = vpop.f32.mrb[33].mxu0  ;;  %v6002_v36 = vmul.f32 %v12073_v14, %v11248_v0  ;;  %v5957_v37 = vpop.f32.mrb[39].mxu1 }
0x1af4   : > { %v6003_v42 = vadd.f32 %v5999_v20, %v5988_v8  ;;  %v5986_v16 = vmul.f32 %v11247_v63, %v5860_v30  ;;  %v6001_v44 = vmul.f32 %v11248_v0, %v5957_v37 }
0x1af5   : > { %v6015_v18 = vadd.f32 %v11249_v22, %v6004_v26  ;;  %v5991_v45 = vadd.f32 %v5987_v29, %v5976_v1 }
0x1af6   : > { %v6014_v25 = vadd.f32 %v11249_v22, %v6003_v42  ;;  %v5990_v46 = vadd.f32 %v5986_v16, %v5975_v43 }
0x1af7   : > { %v6006_v38 = vadd.f32 %v6002_v36, %v5991_v45  ;;  %vm6020_vm13 = vcmp.gt.f32.partialorder %v6015_v18, 0.0  ;;  %v6033_v48 = vmul.f32 %v6030_v23, %v6015_v18 }
0x1af8   : > { %v6005_v47 = vadd.f32 %v6001_v44, %v5990_v46  ;;  %vm6019_vm14 = vcmp.gt.f32.partialorder %v6014_v25, 0.0  ;;  %v6032_v50 = vmul.f32 %v6030_v23, %v6014_v25 }
0x1af9   : > { %v6017_v51 = vadd.f32 %v11249_v22, %v6006_v38  ;;  %v6037_v52 = vsel %vm6020_vm13, %v6015_v18, %v6033_v48 }
0x1afa   : > { %v6016_v35 = vadd.f32 %v11249_v22, %v6005_v47  ;;  %v6045_v28 = vsel %vm3975_vm8, %v6037_v52, 0.0  ;;  %v6036_v57 = vsel %vm6019_vm14, %v6014_v25, %v6032_v50  ;;  %v6440_v50 = vld [vmem:[%s16968_s5] sm:$0xff] }
0x1afb   : > { %6046 = vadd.xlane.f32.xlu1 %v6045_v28  ;;  %v6042_v58 = vsel %vm3975_vm8, %v6036_v57, 0.0  ;;  %v6035_v53 = vmul.f32 %v6030_v23, %v6017_v51  ;;  %vm6022_vm0 = vcmp.gt.f32.partialorder %v6017_v51, 0.0 }
0x1afc   : > { %6043 = vadd.xlane.f32.xlu0 %v6042_v58  ;;  %vm6021_vm15 = vcmp.gt.f32.partialorder %v6016_v35, 0.0  ;;  %v6034_v40 = vmul.f32 %v6030_v23, %v6016_v35  ;;  %v13414_v58 = vld [vmem:[%s16954_s8 + $0x8] sm:$0xff] }
0x1afd   : > { %v6039_v60 = vsel %vm6022_vm0, %v6017_v51, %v6035_v53  ;;  %v6441_v51 = vld [vmem:[%s16968_s5 + $0x8] sm:$0xff]  ;;  %v13416_v53 = vld [vmem:[%s16954_s8 + $0x18] sm:$0xff]  ;;  %s16969_s5 = sld [smem:[#allocation156_spill]] }
0x1afe   : > { %v6038_v34 = vsel %vm6021_vm15, %v6016_v35, %v6034_v40  ;;  %v6051_v39 = vsel %vm3975_vm8, %v6039_v60, 0.0  ;;  %v12657_v28 = vpack.c.bf16 %v6441_v51, %v6440_v50  ;;  %v13415_v40 = vld [vmem:[%s16954_s8 + $0x10] sm:$0xff]  ;;  %v6437_v51 = vld [vmem:[#allocation4 + $0x8] sm:$0xff] }
0x1aff   : > { %v6048_v59 = vsel %vm3975_vm8, %v6038_v34, 0.0 }
0x1b00   : > { %6049 = vadd.xlane.f32.xlu0 %v6048_v59 }
0x1b04   : > { %6052 = vadd.xlane.f32.xlu0 %v6051_v39 }
0x1b88   : > { %v6047_v61 = vpop.xlane.xlu1 %6046 }
0x1b89   : > { %v6044_v41 = vpop.xlane.xlu0 %6043 }
0x1b8a   : > { %v12633_v63 = vpack.c.bf16 %v6047_v61, %v6044_v41 }
0x1b8c   : > { %12634 = vmatprep.subr.bf16.mxu0 %v12633_v63 }
0x1b8d   : > { %12636 = vmatpush3.bf16.msra.mxu0 %v12633_v63  ;;  %v6050_v0 = vpop.xlane.xlu0 %6049 }
0x1b91   : > { %v6053_v2 = vpop.xlane.xlu0 %6052 }
0x1b92   : > { %v12637_v3 = vpack.c.bf16 %v6053_v2, %v6050_v0 }
0x1b94   : > { %12638 = vmatprep.subr.bf16.mxu0 %v12637_v3 }
0x1b95   : > { %12640 = vmatpush3.bf16.msra.mxu0 %v12637_v3 }
0x1b98   : > { %12083 = vmatmul.mubr.msk.f32.vlgmr.msra.gmra.mrb[34].mxu0 %vm3975_vm8, %v16175_v4 }
0x1b99   : > { %12085 = vmatprep.mubr.msk.f32.mxu0 %vm3975_vm8, %v16180_v5 }
0x1b9c   : > { %12086 = vmatmul.mubr.msk.f32.gmra.mrb[36].mxu0 %vm3975_vm8, %v16185_v6 }
0x1c6b   : > { %v12084_v7 = vpop.f32.mrb[34].mxu0 }
0x1c6c   : > { %v6140_v15 = vmul.f32 0.001953125, %v12084_v7  ;;  %v6120_v17 = vpop.f32.mrb[35].mxu0 }
0x1c6d   : > { %v6139_v19 = vmul.f32 0.001953125, %v6120_v17 }
0x1c6e   : > { %6150 = vperm.xlu0 %13296, %v6140_v15  }
0x1c6f   : > { %6145 = vperm.xlu1 %13297, %v6139_v19   ;;  %v12087_v20 = vpop.f32.mrb[36].mxu0 }
0x1c70   : > { %v6130_v21 = vpop.f32.mrb[37].mxu0  ;;  %v6142_v22 = vmul.f32 0.001953125, %v12087_v20  ;;  %v6324_v20 = vld [vmem:[%s16969_s5] sm:$0xff] }
0x1c71   : > { %v6141_v8 = vmul.f32 0.001953125, %v6130_v21  ;;  %v6325_v21 = vld [vmem:[%s16969_s5 + $0x8] sm:$0xff] }
0x1c73   : > { %6155 = vperm.xlu1 %13297, %v6141_v8   ;;  %v12649_v8 = vpack.c.bf16 %v6325_v21, %v6324_v20  ;;  %v13418_v20 = vld [vmem:[%s16957_s11] sm:$0xff] }
0x1c75   : > { %12650 = vmatprep.subr.bf16.mxu0 %v12649_v8 }
0x1c76   : > { %12652 = vmatpush3.bf16.msra.mxu0 %v12649_v8 }
0x1c77   : > { %6160 = vperm.xlu1 %13297, %v6142_v22  }
0x1ced   : > { %v6151_v9 = vpop.permute.xlu0 %6150 }
0x1cee   : > { %v16189_v14 = vsub.f32 %v6037_v52, %v6151_v9  ;;  %v6146_v26 = vpop.permute.xlu1 %6145 }
0x1cef   : > { %v16191_v1 = vsub.f32 %v6036_v57, %v6146_v26  ;;  %v13413_v57 = vld [vmem:[%s16954_s8] sm:$0xff]  ;;  %s16972_s8 = sld [smem:[#allocation169_spill]] }
0x1cf0   : > { %v6168_v29 = vmul.f32 %v16189_v14, %v16189_v14 }
0x1cf1   : > { %v6167_v30 = vmul.f32 %v16191_v1, %v16191_v1 }
0x1cf2   : > { %v6156_v36 = vpop.permute.xlu1 %6155  ;;  %v6174_v37 = vsel %vm3975_vm8, %v6168_v29, 0.0 }
0x1cf3   : > { %v16198_v42 = vsub.f32 %v6038_v34, %v6156_v36  ;;  %6175 = vadd.xlane.f32.xlu1 %v6174_v37  ;;  %v6171_v43 = vsel %vm3975_vm8, %v6167_v30, 0.0  ;;  %v6326_v30 = vld [vmem:[%s16969_s5 + $0x10] sm:$0xff]  ;;  %v6327_v36 = vld [vmem:[%s16969_s5 + $0x18] sm:$0xff]  ;;  %s16970_s5 = sld [smem:[#allocation167_spill]] }
0x1cf4   : > { %6172 = vadd.xlane.f32.xlu0 %v6171_v43  ;;  %v12653_v37 = vpack.c.bf16 %v6327_v36, %v6326_v30 }
0x1cf5   : > { %v6169_v16 = vmul.f32 %v16198_v42, %v16198_v42 }
0x1cf6   : > { %v6161_v44 = vpop.permute.xlu1 %6160  ;;  %12654 = vmatprep.subr.bf16.mxu0 %v12653_v37 }
0x1cf7   : > { %v16203_v18 = vsub.f32 %v6039_v60, %v6161_v44  ;;  %v6177_v45 = vsel %vm3975_vm8, %v6169_v16, 0.0  ;;  %12656 = vmatpush3.bf16.msra.mxu0 %v12653_v37  ;;  %v11270_v44 = vld [vmem:[#allocation6] ss:$0 sm:$0xff] }
0x1cf8   : > { %6178 = vadd.xlane.f32.xlu0 %v6177_v45  ;;  %12661 = vmatprep.subr.bf16.mxu0 %v14800_v56  ;;  %v11291_v45 = vld [vmem:[#allocation13] ss:$0 sm:$0xff] }
0x1cf9   : > { %v6170_v23 = vmul.f32 %v16203_v18, %v16203_v18 }
0x1cfb   : > { %v6180_v25 = vsel %vm3975_vm8, %v6170_v23, 0.0 }
0x1cfc   : > { %6181 = vadd.xlane.f32.xlu0 %v6180_v25  ;;  %v11259_v25 = vld [vmem:[#allocation51] ss:$0 sm:$0xff] }
0x1d80   : > { %v6176_v46 = vpop.xlane.xlu1 %6175 }
0x1d81   : > { %v6173_v38 = vpop.xlane.xlu0 %6172 }
0x1d82   : > { %v12641_v48 = vpack.c.bf16 %v6176_v46, %v6173_v38 }
0x1d84   : > { %12642 = vmatprep.subr.bf16.mxu1 %v12641_v48 }
0x1d85   : > { %v6179_v47 = vpop.xlane.xlu0 %6178  ;;  %12644 = vmatpush3.bf16.msra.mxu1 %v12641_v48 }
0x1d89   : > { %v6182_v52 = vpop.xlane.xlu0 %6181 }
0x1d8a   : > { %v12645_v35 = vpack.c.bf16 %v6182_v52, %v6179_v47  ;;  %v6436_v47 = vld [vmem:[#allocation4] sm:$0xff]  ;;  %v11260_v52 = vld [vmem:[#allocation42] ss:$0 sm:$0xff] }
0x1d8c   : > { %12646 = vmatprep.subr.bf16.mxu1 %v12645_v35 }
0x1d8d   : > { %12648 = vmatpush3.bf16.msra.mxu1 %v12645_v35 }
0x1d8e   : > { %12658 = vmatprep.subr.bf16.mxu1 %v12657_v28 }
0x1d90   : > { %12097 = vmatmul.mubr.msk.f32.vlgmr.msra.gmra.mrb[40].mxu1 %vm3975_vm8, %v16175_v4 }
0x1d91   : > { %12099 = vmatprep.mubr.msk.f32.mxu1 %vm3975_vm8, %v16180_v5  ;;  %12660 = vmatpush3.bf16.msra.mxu1 %v12657_v28 }
0x1d94   : > { %12100 = vmatmul.mubr.msk.f32.gmra.mrb[42].mxu1 %vm3975_vm8, %v16185_v6 }
0x1d95   : > { %12120 = vmatprep.mubr.msk.f32.mxu1 %vm3551_vm4, %v13413_v57 }
0x1d98   : > { %12121 = vmatmul.mubr.msk.f32.vlgmr.msra.gmra.mrb[44].mxu1 %vm3551_vm4, %v13414_v58 }
0x1d99   : > { %12123 = vmatprep.mubr.msk.f32.mxu1 %vm3551_vm4, %v13415_v40 }
0x1d9c   : > { %12124 = vmatmul.mubr.msk.f32.gmra.mrb[46].mxu1 %vm3551_vm4, %v13416_v53 }
0x1e63   : > { %v12098_v34 = vpop.f32.mrb[40].mxu1 }
0x1e64   : > { %v6269_v59 = vmul.f32 0.001953125, %v12098_v34  ;;  %v6249_v60 = vpop.f32.mrb[41].mxu1 }
0x1e65   : > { %v6268_v39 = vmul.f32 0.001953125, %v6249_v60 }
0x1e66   : > { %v6273_v61 = vadd.f32 1e-08, %v6269_v59 }
0x1e67   : > { %v6272_v41 = vadd.f32 1e-08, %v6268_v39  ;;  %v12101_v63 = vpop.f32.mrb[42].mxu1 }
0x1e68   : > { %13334 = vrsqrt.f32 %v6273_v61  ;;  %v6271_v0 = vmul.f32 0.001953125, %v12101_v63  ;;  %v6259_v2 = vpop.f32.mrb[43].mxu1 }
0x1e69   : > { %13336 = vrsqrt.f32 %v6272_v41  ;;  %v6270_v3 = vmul.f32 0.001953125, %v6259_v2  ;;  %v6438_v41 = vld [vmem:[#allocation4 + $0x10] sm:$0xff] }
0x1e6a   : > { %v6275_v7 = vadd.f32 1e-08, %v6271_v0  ;;  %v6439_v0 = vld [vmem:[#allocation4 + $0x18] sm:$0xff] }
0x1e6b   : > { %v12122_v15 = vpop.f32.mrb[44].mxu1  ;;  %v6274_v19 = vadd.f32 1e-08, %v6270_v3 }
0x1e6c   : > { %13338 = vrsqrt.f32 %v6275_v7  ;;  %v6508_v17 = vpop.f32.mrb[45].mxu1 }
0x1e6d   : > { %6529 = vperm.xlu1 %13297, %v6508_v17   ;;  %13340 = vrsqrt.f32 %v6274_v19 }
0x1e6f   : > { %v12125_v22 = vpop.f32.mrb[46].mxu1 }
0x1e70   : > { %v6518_v9 = vpop.f32.mrb[47].mxu1 }
0x1e72   : > { %v13335_v26 = vpop.eup %13334 }
0x1e73   : > { %v13337_v29 = vpop.eup %13336  ;;  %6287 = vperm.xlu0 %13296, %v13335_v26  }
0x1e74   : > { %6282 = vperm.xlu1 %13297, %v13337_v29  }
0x1e76   : > { %v13339_v43 = vpop.eup %13338 }
0x1e77   : > { %6534 = vperm.xlu0 %13296, %v12122_v15   ;;  %v13341_v16 = vpop.eup %13340 }
0x1e78   : > { %6297 = vperm.xlu1 %13297, %v13339_v43  }
0x1e7b   : > { %6539 = vperm.xlu0 %13296, %v6518_v9  }
0x1e7c   : > { %6292 = vperm.xlu1 %13297, %v13341_v16  }
0x1e7f   : > { %6558 = vperm.xlu0 %13296, %v11270_v44  }
0x1e80   : > { %6544 = vperm.xlu1 %13297, %v12125_v22  }
0x1e84   : > { %7053 = vperm.xlu1 %13297, %v11291_v45  }
0x1eec   : > { %v6530_v23 = vpop.permute.xlu1 %6529 }
0x1eed   : > { %v6547_v58 = vmul.f32 %v6530_v23, %v6436_v47  ;;  %v16262_v47 = vld [vmem:[%s16961_s6] sm:$0xff] }
0x1ef2   : > { %v6288_v46 = vpop.permute.xlu0 %6287 }
0x1ef3   : > { %v6301_v38 = vmul.f32 %v6288_v46, %v16189_v14  ;;  %v6283_v48 = vpop.permute.xlu1 %6282 }
0x1ef4   : > { %v6300_v50 = vmul.f32 %v6283_v48, %v16191_v1  ;;  %v13421_v48 = vld [vmem:[%s16957_s11 + $0x18] sm:$0xff] }
0x1ef5   : > { %v6311_v35 = vmul.f32 %v11259_v25, %v6301_v38  ;;  %v13420_v38 = vld [vmem:[%s16957_s11 + $0x10] sm:$0xff] }
0x1ef6   : > { %v6310_v28 = vmul.f32 %v11259_v25, %v6300_v50  ;;  %v6535_v57 = vpop.permute.xlu0 %6534  ;;  %v6741_v50 = vld [vmem:[%s16970_s5] sm:$0xff] }
0x1ef7   : > { %v6548_v40 = vmul.f32 %v6535_v57, %v6437_v51  ;;  %v6298_v53 = vpop.permute.xlu1 %6297  ;;  %v6321_v59 = vadd.f32 %v11260_v52, %v6311_v35  ;;  %v6742_v51 = vld [vmem:[%s16970_s5 + $0x8] sm:$0xff]  ;;  %v6950_v57 = vld [vmem:[%s16972_s8] sm:$0xff]  ;;  %s16974_s5 = sld [smem:[#allocation181_spill]] }
0x1ef8   : > { %v6320_v34 = vadd.f32 %v11260_v52, %v6310_v28  ;;  %v6303_v39 = vmul.f32 %v6298_v53, %v16203_v18 }
0x1ef9   : > { %v12662_v60 = vpack.c.bf16 %v6548_v40, %v6547_v58  ;;  %v6951_v58 = vld [vmem:[%s16972_s8 + $0x8] sm:$0xff] }
0x1efa   : > { %12110 = vmatprep.mubr.msk.f32.mxu0 %vm3975_vm8, %v6320_v34  ;;  %v6313_v61 = vmul.f32 %v11259_v25, %v6303_v39  ;;  %v6540_v63 = vpop.permute.xlu0 %6539 }
0x1efb   : > { %12111 = vmatmul.mubr.msk.f32.vlgmr.msra.gmra.mrb[38].mxu0 %vm3975_vm8, %v6321_v59  ;;  %v6293_v14 = vpop.permute.xlu1 %6292  ;;  %v6549_v7 = vmul.f32 %v6540_v63, %v6438_v41  ;;  %v12671_v59 = vpack.c.bf16 %v6951_v58, %v6950_v57  ;;  %v3835_v41 = vld [vmem:[#allocation2 + $0x8] sm:$0xff]  ;;  %v3836_v63 = vld [vmem:[#allocation2 + $0x10] sm:$0xff] }
0x1efc   : > { %12663 = vmatpush3.bf16.msra.mxu0 %v12662_v60  ;;  %v6302_v1 = vmul.f32 %v6293_v14, %v16198_v42  ;;  %v6323_v17 = vadd.f32 %v11260_v52, %v6313_v61  ;;  %v13417_v42 = vld [vmem:[%s16958_s7] sm:$0x3]  ;;  %s16971_s7 = sld [smem:[#allocation168_spill]] }
0x1efd   : > { %12664 = vmatprep.subr.bf16.mxu0 %v14800_v56  ;;  %v11261_v56 = vld [vmem:[#allocation39] ss:$0 sm:$0xff]  ;;  %v3834_v61 = vld [vmem:[#allocation2] sm:$0xff] }
0x1efe   : > { %v6312_v2 = vmul.f32 %v11259_v25, %v6302_v1  ;;  %v6559_v16 = vpop.permute.xlu0 %6558 }
0x1eff   : > { %v6545_v3 = vpop.permute.xlu1 %6544 }
0x1f00   : > { %v6322_v18 = vadd.f32 %v11260_v52, %v6312_v2  ;;  %v6550_v15 = vmul.f32 %v6545_v3, %v6439_v0  ;;  %v12667_v52 = vpack.c.bf16 %v6742_v51, %v6741_v50  ;;  %v6952_v0 = vld [vmem:[%s16972_s8 + $0x10] sm:$0xff]  ;;  %v3837_v2 = vld [vmem:[#allocation2 + $0x18] sm:$0xff] }
0x1f01   : > { %v11278_v3 = vld [vmem:[#allocation52] ss:$0 sm:$0xff] }
0x1f02   : > { %v12665_v19 = vpack.c.bf16 %v6550_v15, %v6549_v7  ;;  %12113 = vmatprep.mubr.msk.f32.mxu0 %vm3975_vm8, %v6322_v18  ;;  %12668 = vmatprep.subr.bf16.mxu1 %v12667_v52  ;;  %v6847_v35 = vld [vmem:[%s16971_s7] sm:$0xff]  ;;  %s16973_s7 = sld [smem:[#allocation170_spill]] }
0x1f03   : > { %12114 = vmatmul.mubr.msk.f32.gmra.mrb[40].mxu0 %vm3975_vm8, %v6323_v17  ;;  %12670 = vmatpush3.bf16.msra.mxu1 %v12667_v52  ;;  %v7054_v17 = vpop.permute.xlu1 %7053 }
0x1f04   : > { %12666 = vmatpush3.bf16.msra.mxu0 %v12665_v19  ;;  %12134 = vmatprep.mubr.msk.f32.mxu0 %vm14801_vm7, %v14802_v62 }
0x1f05   : > { %12155 = vmatprep.subr.mxu1 %v6847_v35 }
0x1f07   : > { %12135 = vmatmul.mubr.msk.f32.vlgmr.msra.gmra.mrb[42].mxu0 %vm3975_vm8, %v13417_v42 }
0x1f08   : > { %12139 = vmatprep.mubr.msk.f32.mxu0 %vm3732_vm6, %v13418_v20 }
0x1fce   : > { %v12112_v21 = vpop.f32.mrb[38].mxu0 }
0x1fcf   : > { %v6419_v8 = vadd.f32 %v12112_v21, %v11261_v56  ;;  %v6413_v22 = vpop.f32.mrb[39].mxu0 }
0x1fd0   : > { %v6414_v9 = vadd.f32 %v11261_v56, %v6413_v22 }
0x1fd1   : > { %v6433_v26 = vadd.f32 %v6419_v8, %v16092_v49 }
0x1fd2   : > { %v6432_v29 = vadd.f32 %v6414_v9, %v16089_v33 }
0x1fd3   : > { %6726 = vst.msk [vmem:[#allocation4 + $0x8] sm:$0xff] %vm3551_vm4, %v6433_v26 }
0x1fd4   : > { %6725 = vst.msk [vmem:[#allocation4] sm:$0xff] %vm3551_vm4, %v6432_v29 }
0x1fd6   : > { %v12115_v62 = vpop.f32.mrb[40].mxu0 }
0x1fd7   : > { %v6429_v30 = vadd.f32 %v12115_v62, %v11261_v56  ;;  %v6423_v36 = vpop.f32.mrb[41].mxu0 }
0x1fd8   : > { %v6424_v37 = vadd.f32 %v11261_v56, %v6423_v36 }
0x1fd9   : > { %v6435_v43 = vadd.f32 %v6429_v30, %v16102_v55 }
0x1fda   : > { %v6627_v44 = vpop.f32.mrb[42].mxu0  ;;  %v6434_v45 = vadd.f32 %v6424_v37, %v16099_v54  ;;  %v13419_v54 = vld [vmem:[%s16957_s11 + $0x8] sm:$0xff] }
0x1fdb   : > { %v6628_v23 = vadd.f32 %v6627_v44, %v6559_v16  ;;  %v12136_v49 = vpop.f32.mrb[43].mxu0  ;;  %6728 = vst.msk [vmem:[#allocation4 + $0x18] sm:$0xff] %vm3551_vm4, %v6435_v43 }
0x1fdc   : > { %6727 = vst.msk [vmem:[#allocation4 + $0x10] sm:$0xff] %vm3551_vm4, %v6434_v45 }
0x1fdd   : > { %v11272_v33 = vmul.f32 -1.442695, %v6628_v23 }
0x1fdf   : > { %13342 = vpow2.f32 %v11272_v33 }
0x1fe9   : > { %v13343_v25 = vpop.eup %13342 }
0x1fea   : > { %v6634_v55 = vadd.f32 1.0, %v13343_v25 }
0x1fec   : > { %13344 = vrcp.f32 %v6634_v55 }
0x1ff6   : > { %v13345_v46 = vpop.eup %13344 }
0x1ff7   : > { %12137 = vmatprep.subr.msk.mxu0 %vm3745_vm5, %v13345_v46 }
0x1ff8   : > { %12138 = vmatpush3.msk.msra.mxu0 %vm3745_vm5, %v13345_v46  ;;  %vm6848_vm5 = vcmask 64512  }
0x1ff9   : > { %12140 = vmatmul.mubr.msk.f32.vlgmr.msra.gmra.mrb[44].mxu0 %vm3732_vm6, %v13419_v54 }
0x1ffa   : > { %12142 = vmatprep.mubr.msk.f32.mxu0 %vm3732_vm6, %v13420_v38 }
0x1ffd   : > { %12143 = vmatmul.mubr.msk.f32.gmra.mrb[46].mxu0 %vm3732_vm6, %v13421_v48 }
0x1ffe   : > { %12183 = vmatprep.mubr.msk.f32.mxu0 %vm3975_vm8, %v16262_v47 }
0x20cc   : > { %v12141_v28 = vpop.f32.mrb[44].mxu0 }
0x20cd   : > { %v6706_v40 = vpop.f32.mrb[45].mxu0  ;;  %v6730_v34 = vmul.f32 %v12141_v28, %v6433_v26 }
0x20ce   : > { %v6729_v53 = vmul.f32 %v6706_v40, %v6432_v29 }
0x20d0   : > { %v12144_v60 = vpop.f32.mrb[46].mxu0  ;;  %12149 = vmatprep.mubr.msk.f32.mxu1 %vm3551_vm4, %v6729_v53 }
0x20d1   : > { %v6716_v39 = vpop.f32.mrb[47].mxu0  ;;  %12150 = vmatmul.mubr.msk.f32.vlgmr.msra.gmra.mrb[48].mxu1 %vm3551_vm4, %v6730_v34  ;;  %v6732_v1 = vmul.f32 %v12144_v60, %v6435_v43 }
0x20d2   : > { %v6731_v14 = vmul.f32 %v6716_v39, %v6434_v45  ;;  %12156 = vmatpush3.msra.mxu1 %v6847_v35 }
0x20d3   : > { %12672 = vmatprep.subr.bf16.mxu1 %v12671_v59 }
0x20d4   : > { %12152 = vmatprep.mubr.msk.f32.mxu1 %vm3551_vm4, %v6731_v14 }
0x20d5   : > { %12153 = vmatmul.mubr.msk.f32.gmra.mrb[50].mxu1 %vm3551_vm4, %v6732_v1 }
0x20d6   : > { %12157 = vmatprep.mubr.msk.f32.mxu1 %vm6848_vm5, %v3834_v61 }
0x20d9   : > { %12158 = vmatmul.mubr.msk.f32.vlgmr.msra.gmra.mrb[48].mxu1 %vm6848_vm5, %v3835_v41 }
0x20da   : > { %12160 = vmatprep.mubr.msk.f32.mxu1 %vm6848_vm5, %v3836_v63  ;;  %12674 = vmatpush3.bf16.msra.mxu1 %v12671_v59 }
0x20db   : > { %12167 = vmatprep.subr.mxu1 %v6952_v0 }
0x20dd   : > { %12161 = vmatmul.mubr.msk.f32.gmra.mrb[50].mxu1 %vm6848_vm5, %v3837_v2 }
0x20de   : > { %12169 = vmatprep.mubr.msk.f32.mxu1 %vm4268_vm9, %v15916_v11  ;;  %12168 = vmatpush3.msra.mxu1 %v6952_v0 }
0x20e1   : > { %12170 = vmatmul.mubr.msk.f32.vlgmr.msra.gmra.mrb[48].mxu1 %vm4268_vm9, %v15914_v10 }
0x20e2   : > { %12172 = vmatprep.mubr.msk.f32.mxu1 %vm4268_vm9, %v15920_v13 }
0x20e5   : > { %12173 = vmatmul.mubr.msk.f32.gmra.mrb[50].mxu1 %vm4268_vm9, %v15918_v12 }
0x21b4   : > { %v12171_v7 = vpop.f32.mrb[48].mxu1 }
0x21b5   : > { %v12867_v18 = vadd.f32 %v12171_v7, %v11278_v3  ;;  %v7019_v15 = vpop.f32.mrb[49].mxu1 }
0x21b6   : > { %v12868_v19 = vadd.f32 %v11278_v3, %v7019_v15 }
0x21b7   : > { %v7057_v42 = vmul.f32 %v12867_v18, %v7054_v17  ;;  %vm7044_vm6 = vcmp.gt.f32.partialorder %v12867_v18, 0.0 }
0x21b8   : > { %v7056_v20 = vmul.f32 %v12868_v19, %v7054_v17  ;;  %v12174_v11 = vpop.f32.mrb[50].mxu1  ;;  %vm7043_vm7 = vcmp.gt.f32.partialorder %v12868_v19, 0.0 }
0x21b9   : > { %v12869_v56 = vadd.f32 %v12174_v11, %v11278_v3  ;;  %v7029_v21 = vpop.f32.mrb[51].mxu1  ;;  %v7061_v10 = vsel %vm7044_vm6, %v12867_v18, %v7057_v42 }
0x21ba   : > { %v12870_v8 = vadd.f32 %v11278_v3, %v7029_v21  ;;  %v7069_v13 = vsel %vm3975_vm8, %v7061_v10, 0.0  ;;  %v7060_v22 = vsel %vm7043_vm7, %v12868_v19, %v7056_v20 }
0x21bb   : > { %7070 = vadd.xlane.f32.xlu1 %v7069_v13  ;;  %v7066_v12 = vsel %vm3975_vm8, %v7060_v22, 0.0  ;;  %v7059_v9 = vmul.f32 %v12869_v56, %v7054_v17  ;;  %vm7046_vm1 = vcmp.gt.f32.partialorder %v12869_v56, 0.0 }
0x21bc   : > { %v7058_v26 = vmul.f32 %v12870_v8, %v7054_v17  ;;  %7067 = vadd.xlane.f32.xlu0 %v7066_v12  ;;  %vm7045_vm9 = vcmp.gt.f32.partialorder %v12870_v8, 0.0 }
0x21bd   : > { %v7063_v30 = vsel %vm7046_vm1, %v12869_v56, %v7059_v9  ;;  %v11314_v9 = vld [vmem:[#allocation14] ss:$0 sm:$0xff] }
0x21be   : > { %v7062_v29 = vsel %vm7045_vm9, %v12870_v8, %v7058_v26  ;;  %v7075_v36 = vsel %vm3975_vm8, %v7063_v30, 0.0 }
0x21bf   : > { %v7072_v62 = vsel %vm3975_vm8, %v7062_v29, 0.0 }
0x21c0   : > { %7073 = vadd.xlane.f32.xlu0 %v7072_v62  ;;  %v6733_v62 = vld [vmem:[%s16962_s1] sm:$0xff] }
0x21c4   : > { %7076 = vadd.xlane.f32.xlu0 %v7075_v36  ;;  %v11300_v36 = vld [vmem:[#allocation64] ss:$0 sm:$0xff] }
0x2248   : > { %v7071_v37 = vpop.xlane.xlu1 %7070 }
0x2249   : > { %v7068_v43 = vpop.xlane.xlu0 %7067 }
0x224a   : > { %v12675_v16 = vpack.c.bf16 %v7071_v37, %v7068_v43 }
0x224c   : > { %12676 = vmatprep.subr.bf16.mxu0 %v12675_v16 }
0x224d   : > { %12678 = vmatpush3.bf16.msra.mxu0 %v12675_v16  ;;  %v7074_v44 = vpop.xlane.xlu0 %7073 }
0x2251   : > { %v7077_v45 = vpop.xlane.xlu0 %7076 }
0x2252   : > { %v12679_v23 = vpack.c.bf16 %v7077_v45, %v7074_v44  ;;  %v11301_v44 = vld [vmem:[#allocation55] ss:$0 sm:$0xff] }
0x2254   : > { %12680 = vmatprep.subr.bf16.mxu0 %v12679_v23 }
0x2255   : > { %12682 = vmatpush3.bf16.msra.mxu0 %v12679_v23 }
0x2258   : > { %12184 = vmatmul.mubr.msk.f32.vlgmr.msra.gmra.mrb[48].mxu0 %vm3975_vm8, %v16175_v4 }
0x2259   : > { %12186 = vmatprep.mubr.msk.f32.mxu0 %vm3975_vm8, %v16180_v5 }
0x225c   : > { %12187 = vmatmul.mubr.msk.f32.gmra.mrb[50].mxu0 %vm3975_vm8, %v16185_v6 }
0x225d   : > { %12197 = vmatprep.mubr.msk.f32.mxu0 %vm3975_vm8, %v16262_v47 }
0x232b   : > { %v12185_v49 = vpop.f32.mrb[48].mxu0 }
0x232c   : > { %v7164_v33 = vmul.f32 0.001953125, %v12185_v49  ;;  %v7144_v25 = vpop.f32.mrb[49].mxu0 }
0x232d   : > { %v7163_v55 = vmul.f32 0.001953125, %v7144_v25 }
0x232e   : > { %7174 = vperm.xlu0 %13296, %v7164_v33  }
0x232f   : > { %7169 = vperm.xlu1 %13297, %v7163_v55   ;;  %v12188_v46 = vpop.f32.mrb[50].mxu0 }
0x2330   : > { %v7154_v54 = vpop.f32.mrb[51].mxu0  ;;  %v7166_v48 = vmul.f32 0.001953125, %v12188_v46 }
0x2331   : > { %v7165_v38 = vmul.f32 0.001953125, %v7154_v54 }
0x2333   : > { %7179 = vperm.xlu1 %13297, %v7165_v38  }
0x2337   : > { %7184 = vperm.xlu1 %13297, %v7166_v48  }
0x23ad   : > { %v7175_v50 = vpop.permute.xlu0 %7174 }
0x23ae   : > { %v16300_v51 = vsub.f32 %v7061_v10, %v7175_v50  ;;  %v7170_v52 = vpop.permute.xlu1 %7169 }
0x23af   : > { %v16302_v35 = vsub.f32 %v7060_v22, %v7170_v52 }
0x23b0   : > { %v7192_v28 = vmul.f32 %v16300_v51, %v16300_v51 }
0x23b1   : > { %v7191_v57 = vmul.f32 %v16302_v35, %v16302_v35 }
0x23b2   : > { %v7180_v58 = vpop.permute.xlu1 %7179  ;;  %v7198_v40 = vsel %vm3975_vm8, %v7192_v28, 0.0 }
0x23b3   : > { %v16309_v53 = vsub.f32 %v7062_v29, %v7180_v58  ;;  %7199 = vadd.xlane.f32.xlu1 %v7198_v40  ;;  %v7195_v34 = vsel %vm3975_vm8, %v7191_v57, 0.0  ;;  %v6734_v57 = vld [vmem:[%s16962_s1 + $0x8] sm:$0xff]  ;;  %v6735_v40 = vld [vmem:[%s16962_s1 + $0x10] sm:$0xff] }
0x23b4   : > { %7196 = vadd.xlane.f32.xlu0 %v7195_v34  ;;  %v6738_v58 = vld [vmem:[%s16963_s2 + $0x8] sm:$0xff]  ;;  %v6736_v34 = vld [vmem:[%s16962_s1 + $0x18] sm:$0xff] }
0x23b5   : > { %v7193_v59 = vmul.f32 %v16309_v53, %v16309_v53 }
0x23b6   : > { %v7185_v60 = vpop.permute.xlu1 %7184 }
0x23b7   : > { %v16314_v39 = vsub.f32 %v7063_v30, %v7185_v60  ;;  %v7201_v14 = vsel %vm3975_vm8, %v7193_v59, 0.0  ;;  %v6737_v30 = vld [vmem:[%s16963_s2] sm:$0xff]  ;;  %v6740_v59 = vld [vmem:[%s16963_s2 + $0x18] sm:$0xff] }
0x23b8   : > { %7202 = vadd.xlane.f32.xlu0 %v7201_v14  ;;  %12225 = vmatprep.mubr.msk.f32.mxu1 %vm3975_vm8, %v6737_v30  ;;  %v11310_v60 = vld [vmem:[#allocation61] ss:$0 sm:$0xff]  ;;  %v11312_v14 = vld [vmem:[#allocation63] ss:$0 sm:$0xff] }
0x23b9   : > { %v7194_v1 = vmul.f32 %v16314_v39, %v16314_v39 }
0x23bb   : > { %v7204_v61 = vsel %vm3975_vm8, %v7194_v1, 0.0 }
0x23bc   : > { %7205 = vadd.xlane.f32.xlu0 %v7204_v61 }
0x2440   : > { %v7200_v41 = vpop.xlane.xlu1 %7199 }
0x2441   : > { %v7197_v63 = vpop.xlane.xlu0 %7196 }
0x2442   : > { %v12683_v0 = vpack.c.bf16 %v7200_v41, %v7197_v63 }
0x2444   : > { %12684 = vmatprep.subr.bf16.mxu0 %v12683_v0 }
0x2445   : > { %v7203_v2 = vpop.xlane.xlu0 %7202  ;;  %12686 = vmatpush3.bf16.msra.mxu0 %v12683_v0 }
0x2449   : > { %v7206_v3 = vpop.xlane.xlu0 %7205 }
0x244a   : > { %v12687_v7 = vpack.c.bf16 %v7206_v3, %v7203_v2 }
0x244c   : > { %12688 = vmatprep.subr.bf16.mxu0 %v12687_v7 }
0x244d   : > { %12690 = vmatpush3.bf16.msra.mxu0 %v12687_v7 }
0x2450   : > { %12198 = vmatmul.mubr.msk.f32.vlgmr.msra.gmra.mrb[52].mxu0 %vm3975_vm8, %v16175_v4 }
0x2451   : > { %12200 = vmatprep.mubr.msk.f32.mxu0 %vm3975_vm8, %v16180_v5 }
0x2454   : > { %12201 = vmatmul.mubr.msk.f32.gmra.mrb[54].mxu0 %vm3975_vm8, %v16185_v6 }
0x2455   : > { %12211 = vmatprep.mubr.msk.f32.mxu0 %vm3975_vm8, %v6733_v62 }
0x2523   : > { %v12199_v18 = vpop.f32.mrb[52].mxu0 }
0x2524   : > { %v7293_v15 = vmul.f32 0.001953125, %v12199_v18  ;;  %v7273_v17 = vpop.f32.mrb[53].mxu0 }
0x2525   : > { %v7292_v19 = vmul.f32 0.001953125, %v7273_v17 }
0x2526   : > { %v7297_v42 = vadd.f32 1e-08, %v7293_v15 }
0x2527   : > { %v7296_v20 = vadd.f32 1e-08, %v7292_v19  ;;  %v12202_v11 = vpop.f32.mrb[54].mxu0 }
0x2528   : > { %13346 = vrsqrt.f32 %v7297_v42  ;;  %v7283_v56 = vpop.f32.mrb[55].mxu0  ;;  %v7295_v21 = vmul.f32 0.001953125, %v12202_v11  ;;  %v11313_v42 = vld [vmem:[#allocation58] ss:$0 sm:$0xff] }
0x2529   : > { %13348 = vrsqrt.f32 %v7296_v20  ;;  %v7294_v10 = vmul.f32 0.001953125, %v7283_v56 }
0x252a   : > { %v7299_v13 = vadd.f32 1e-08, %v7295_v21 }
0x252b   : > { %v7298_v8 = vadd.f32 1e-08, %v7294_v10 }
0x252d   : > { %13350 = vrsqrt.f32 %v7298_v8 }
0x252e   : > { %13352 = vrsqrt.f32 %v7299_v13 }
0x2532   : > { %v13347_v22 = vpop.eup %13346 }
0x2533   : > { %v13349_v12 = vpop.eup %13348  ;;  %7311 = vperm.xlu0 %13296, %v13347_v22  }
0x2534   : > { %7306 = vperm.xlu1 %13297, %v13349_v12  }
0x2537   : > { %v13351_v26 = vpop.eup %13350  ;;  %7605 = vperm.xlu0 %13296, %v11314_v9  }
0x2538   : > { %7316 = vperm.xlu1 %13297, %v13351_v26   ;;  %v13353_v29 = vpop.eup %13352 }
0x253c   : > { %7321 = vperm.xlu1 %13297, %v13353_v29  }
0x25b2   : > { %v7312_v37 = vpop.permute.xlu0 %7311 }
0x25b3   : > { %v7325_v43 = vmul.f32 %v7312_v37, %v16300_v51  ;;  %v7307_v16 = vpop.permute.xlu1 %7306 }
0x25b4   : > { %v7324_v45 = vmul.f32 %v7307_v16, %v16302_v35 }
0x25b5   : > { %v7335_v23 = vmul.f32 %v11300_v36, %v7325_v43 }
0x25b6   : > { %v7334_v49 = vmul.f32 %v11300_v36, %v7324_v45 }
0x25b7   : > { %v7345_v33 = vadd.f32 %v11301_v44, %v7335_v23  ;;  %v7317_v25 = vpop.permute.xlu1 %7316 }
0x25b8   : > { %v7344_v55 = vadd.f32 %v11301_v44, %v7334_v49  ;;  %v7326_v46 = vmul.f32 %v7317_v25, %v16309_v53  ;;  %v6739_v53 = vld [vmem:[%s16963_s2 + $0x10] sm:$0xff] }
0x25b9   : > { %v7550_v41 = vmul.f32 %v11310_v60, %v7345_v33 }
0x25ba   : > { %v12691_v54 = vpack.c.bf16 %v7345_v33, %v7344_v55  ;;  %v7336_v48 = vmul.f32 %v11300_v36, %v7326_v46  ;;  %v7549_v7 = vmul.f32 %v11310_v60, %v7344_v55 }
0x25bb   : > { %v7322_v38 = vpop.permute.xlu1 %7321 }
0x25bc   : > { %v7327_v50 = vmul.f32 %v7322_v38, %v16314_v39  ;;  %12692 = vmatprep.subr.bf16.mxu0 %v12691_v54  ;;  %12700 = vmatprep.subr.bf16.mxu1 %v12691_v54  ;;  %v7346_v52 = vadd.f32 %v11301_v44, %v7336_v48  ;;  %v11311_v39 = vld [vmem:[#allocation60] ss:$0 sm:$0xff] }
0x25bd   : > { %12694 = vmatpush3.bf16.msra.mxu0 %v12691_v54  ;;  %12702 = vmatpush3.bf16.msra.mxu1 %v12691_v54 }
0x25be   : > { %v7337_v51 = vmul.f32 %v11300_v36, %v7327_v50  ;;  %v7551_v9 = vmul.f32 %v11310_v60, %v7346_v52  ;;  %v7606_v36 = vpop.permute.xlu0 %7605 }
0x25c0   : > { %v7347_v35 = vadd.f32 %v11301_v44, %v7337_v51 }
0x25c2   : > { %v12695_v28 = vpack.c.bf16 %v7347_v35, %v7346_v52  ;;  %v7552_v21 = vmul.f32 %v11310_v60, %v7347_v35 }
0x25c4   : > { %12696 = vmatprep.subr.bf16.mxu0 %v12695_v28  ;;  %12704 = vmatprep.subr.bf16.mxu1 %v12695_v28 }
0x25c5   : > { %12698 = vmatpush3.bf16.msra.mxu0 %v12695_v28  ;;  %12706 = vmatpush3.bf16.msra.mxu1 %v12695_v28 }
0x25c8   : > { %12212 = vmatmul.mubr.msk.f32.vlgmr.msra.gmra.mrb[56].mxu0 %vm3975_vm8, %v6734_v57  ;;  %12226 = vmatmul.mubr.msk.f32.vlgmr.msra.gmra.mrb[52].mxu1 %vm3975_vm8, %v6738_v58 }
0x25c9   : > { %12214 = vmatprep.mubr.msk.f32.mxu0 %vm3975_vm8, %v6735_v40  ;;  %12228 = vmatprep.mubr.msk.f32.mxu1 %vm3975_vm8, %v6739_v53 }
0x25cc   : > { %12215 = vmatmul.mubr.msk.f32.gmra.mrb[58].mxu0 %vm3975_vm8, %v6736_v34  ;;  %12229 = vmatmul.mubr.msk.f32.gmra.mrb[54].mxu1 %vm3975_vm8, %v6740_v59 }
0x25cd   : > { %12239 = vmatprep.mubr.msk.f32.mxu0 %vm3975_vm8, %v16262_v47  ;;  %12253 = vmatprep.mubr.msk.f32.mxu1 %vm3975_vm8, %v16262_v47 }
0x269b   : > { %v12213_v1 = vpop.f32.mrb[56].mxu0  ;;  %v12227_v61 = vpop.f32.mrb[52].mxu1 }
0x269c   : > { %v7561_v63 = vmul.f32 %v12213_v1, %v11311_v39  ;;  %v7426_v0 = vpop.f32.mrb[57].mxu0  ;;  %v7576_v2 = vmul.f32 %v12227_v61, %v11312_v14  ;;  %v7523_v3 = vpop.f32.mrb[53].mxu1 }
0x269d   : > { %v7560_v18 = vmul.f32 %v11311_v39, %v7426_v0  ;;  %v7575_v15 = vmul.f32 %v11312_v14, %v7523_v3 }
0x269e   : > { %v7565_v17 = vadd.f32 %v7561_v63, %v7550_v41 }
0x269f   : > { %v7564_v19 = vadd.f32 %v7560_v18, %v7549_v7  ;;  %v12216_v20 = vpop.f32.mrb[58].mxu0  ;;  %v12230_v11 = vpop.f32.mrb[54].mxu1 }
0x26a0   : > { %v7580_v56 = vadd.f32 %v7576_v2, %v7565_v17  ;;  %v7563_v10 = vmul.f32 %v12216_v20, %v11311_v39  ;;  %v7436_v8 = vpop.f32.mrb[59].mxu0  ;;  %v7578_v13 = vmul.f32 %v12230_v11, %v11312_v14  ;;  %v7533_v22 = vpop.f32.mrb[55].mxu1 }
0x26a1   : > { %v7579_v12 = vadd.f32 %v7575_v15, %v7564_v19  ;;  %v7562_v26 = vmul.f32 %v11311_v39, %v7436_v8  ;;  %v7577_v29 = vmul.f32 %v11312_v14, %v7533_v22 }
0x26a2   : > { %v7591_v62 = vadd.f32 %v11313_v42, %v7580_v56  ;;  %v7567_v30 = vadd.f32 %v7563_v10, %v7552_v21 }
0x26a3   : > { %v7590_v37 = vadd.f32 %v11313_v42, %v7579_v12  ;;  %v7566_v43 = vadd.f32 %v7562_v26, %v7551_v9 }
0x26a4   : > { %v7582_v16 = vadd.f32 %v7578_v13, %v7567_v30  ;;  %vm7596_vm2 = vcmp.gt.f32.partialorder %v7591_v62, 0.0  ;;  %v7609_v44 = vmul.f32 %v7606_v36, %v7591_v62 }
0x26a5   : > { %v7581_v45 = vadd.f32 %v7577_v29, %v7566_v43  ;;  %vm7595_vm10 = vcmp.gt.f32.partialorder %v7590_v37, 0.0  ;;  %v7608_v23 = vmul.f32 %v7606_v36, %v7590_v37 }
0x26a6   : > { %v7593_v49 = vadd.f32 %v11313_v42, %v7582_v16  ;;  %v7613_v33 = vsel %vm7596_vm2, %v7591_v62, %v7609_v44 }
0x26a7   : > { %v7592_v25 = vadd.f32 %v11313_v42, %v7581_v45  ;;  %v7621_v55 = vsel %vm3975_vm8, %v7613_v33, 0.0  ;;  %v7612_v46 = vsel %vm7595_vm10, %v7590_v37, %v7608_v23 }
0x26a8   : > { %7622 = vadd.xlane.f32.xlu0 %v7621_v55  ;;  %v7618_v54 = vsel %vm3975_vm8, %v7612_v46, 0.0  ;;  %vm7598_vm11 = vcmp.gt.f32.partialorder %v7593_v49, 0.0  ;;  %v7611_v38 = vmul.f32 %v7606_v36, %v7593_v49 }
0x26a9   : > { %7619 = vadd.xlane.f32.xlu1 %v7618_v54  ;;  %vm7597_vm12 = vcmp.gt.f32.partialorder %v7592_v25, 0.0  ;;  %v7610_v48 = vmul.f32 %v7606_v36, %v7592_v25 }
0x26aa   : > { %v7615_v50 = vsel %vm7598_vm11, %v7593_v49, %v7611_v38  ;;  %v7902_v38 = vld [vmem:[%s16973_s7 + $0x10] sm:$0xff] }
0x26ab   : > { %v7627_v51 = vsel %vm3975_vm8, %v7615_v50, 0.0  ;;  %v7614_v52 = vsel %vm7597_vm12, %v7592_v25, %v7610_v48  ;;  %v7901_v25 = vld [vmem:[%s16973_s7 + $0x8] sm:$0xff]  ;;  %v7903_v48 = vld [vmem:[%s16973_s7 + $0x18] sm:$0xff] }
0x26ac   : > { %v7624_v35 = vsel %vm3975_vm8, %v7614_v52, 0.0 }
0x26ad   : > { %7628 = vadd.xlane.f32.xlu1 %v7627_v51  ;;  %7625 = vadd.xlane.f32.xlu0 %v7624_v35  ;;  %v12727_v51 = vpack.c.bf16 %v7903_v48, %v7902_v38  ;;  %v11335_v35 = vld [vmem:[#allocation15] ss:$0 sm:$0xff] }
0x2735   : > { %v7623_v28 = vpop.xlane.xlu0 %7622 }
0x2736   : > { %v7620_v57 = vpop.xlane.xlu1 %7619 }
0x2737   : > { %v12707_v58 = vpack.c.bf16 %v7623_v28, %v7620_v57  ;;  %v11323_v28 = vld [vmem:[#allocation66] ss:$0 sm:$0xff] }
0x2739   : > { %12708 = vmatprep.subr.bf16.mxu0 %v12707_v58 }
0x273a   : > { %12710 = vmatpush3.bf16.msra.mxu0 %v12707_v58  ;;  %v7629_v40 = vpop.xlane.xlu1 %7628  ;;  %v7626_v53 = vpop.xlane.xlu0 %7625 }
0x273b   : > { %v12711_v34 = vpack.c.bf16 %v7629_v40, %v7626_v53 }
0x273d   : > { %12712 = vmatprep.subr.bf16.mxu0 %v12711_v34 }
0x273e   : > { %12714 = vmatpush3.bf16.msra.mxu0 %v12711_v34  ;;  %v11324_v34 = vld [vmem:[#allocation57] ss:$0 sm:$0xff] }
0x2741   : > { %12240 = vmatmul.mubr.msk.f32.vlgmr.msra.gmra.mrb[60].mxu0 %vm3975_vm8, %v16175_v4 }
0x2742   : > { %12242 = vmatprep.mubr.msk.f32.mxu0 %vm3975_vm8, %v16180_v5 }
0x2745   : > { %12243 = vmatmul.mubr.msk.f32.gmra.mrb[62].mxu0 %vm3975_vm8, %v16185_v6 }
0x2814   : > { %v12241_v59 = vpop.f32.mrb[60].mxu0 }
0x2815   : > { %v7716_v60 = vmul.f32 0.001953125, %v12241_v59  ;;  %v7696_v39 = vpop.f32.mrb[61].mxu0 }
0x2816   : > { %v7715_v14 = vmul.f32 0.001953125, %v7696_v39 }
0x2817   : > { %7726 = vperm.xlu1 %13297, %v7716_v60  }
0x2818   : > { %7721 = vperm.xlu0 %13296, %v7715_v14   ;;  %v12244_v1 = vpop.f32.mrb[62].mxu0 }
0x2819   : > { %v7718_v61 = vmul.f32 0.001953125, %v12244_v1  ;;  %v7706_v41 = vpop.f32.mrb[63].mxu0 }
0x281a   : > { %v7717_v63 = vmul.f32 0.001953125, %v7706_v41 }
0x281c   : > { %7736 = vperm.xlu0 %13296, %v7718_v61   ;;  %7731 = vperm.xlu1 %13297, %v7717_v63  }
0x2896   : > { %v7727_v0 = vpop.permute.xlu1 %7726 }
0x2897   : > { %v16360_v2 = vsub.f32 %v7613_v33, %v7727_v0  ;;  %v7722_v3 = vpop.permute.xlu0 %7721 }
0x2898   : > { %v16362_v7 = vsub.f32 %v7612_v46, %v7722_v3 }
0x2899   : > { %v7744_v18 = vmul.f32 %v16360_v2, %v16360_v2 }
0x289a   : > { %v7743_v15 = vmul.f32 %v16362_v7, %v16362_v7 }
0x289b   : > { %v7737_v17 = vpop.permute.xlu0 %7736  ;;  %v7732_v19 = vpop.permute.xlu1 %7731  ;;  %v7750_v42 = vsel %vm3975_vm8, %v7744_v18, 0.0  ;;  %v8016_v18 = vld [vmem:[%s16974_s5] sm:$0xff] }
0x289c   : > { %v16369_v20 = vsub.f32 %v7615_v50, %v7737_v17  ;;  %v16371_v11 = vsub.f32 %v7614_v52, %v7732_v19  ;;  %7751 = vadd.xlane.f32.xlu0 %v7750_v42  ;;  %v7747_v56 = vsel %vm3975_vm8, %v7743_v15, 0.0  ;;  %v8017_v15 = vld [vmem:[%s16974_s5 + $0x8] sm:$0xff]  ;;  %v11325_v19 = vld [vmem:[#allocation54] ss:$0 sm:$0xff]  ;;  %s16982_s5 = sld [smem:[#allocation132_spill]] }
0x289d   : > { %7748 = vadd.xlane.f32.xlu1 %v7747_v56  ;;  %v12731_v17 = vpack.c.bf16 %v8017_v15, %v8016_v18 }
0x289e   : > { %v7746_v21 = vmul.f32 %v16369_v20, %v16369_v20  ;;  %v7745_v10 = vmul.f32 %v16371_v11, %v16371_v11 }
0x28a0   : > { %v7756_v8 = vsel %vm3975_vm8, %v7746_v21, 0.0  ;;  %v7753_v13 = vsel %vm3975_vm8, %v7745_v10, 0.0 }
0x28a1   : > { %7757 = vadd.xlane.f32.xlu1 %v7756_v8  ;;  %7754 = vadd.xlane.f32.xlu0 %v7753_v13 }
0x2929   : > { %v7752_v22 = vpop.xlane.xlu0 %7751 }
0x292a   : > { %v7749_v12 = vpop.xlane.xlu1 %7748 }
0x292b   : > { %v12715_v9 = vpack.c.bf16 %v7752_v22, %v7749_v12  ;;  %v11330_v22 = vld [vmem:[#allocation67] ss:$0 sm:$0xff] }
0x292d   : > { %12716 = vmatprep.subr.bf16.mxu1 %v12715_v9 }
0x292e   : > { %v7755_v26 = vpop.xlane.xlu0 %7754  ;;  %12718 = vmatpush3.bf16.msra.mxu1 %v12715_v9  ;;  %v7758_v29 = vpop.xlane.xlu1 %7757 }
0x292f   : > { %v12719_v62 = vpack.c.bf16 %v7758_v29, %v7755_v26 }
0x2931   : > { %12720 = vmatprep.subr.bf16.mxu1 %v12719_v62 }
0x2932   : > { %12722 = vmatpush3.bf16.msra.mxu1 %v12719_v62 }
0x2933   : > { %12732 = vmatprep.subr.bf16.mxu1 %v12731_v17 }
0x2935   : > { %12254 = vmatmul.mubr.msk.f32.vlgmr.msra.gmra.mrb[56].mxu1 %vm3975_vm8, %v16175_v4 }
0x2936   : > { %12256 = vmatprep.mubr.msk.f32.mxu1 %vm3975_vm8, %v16180_v5  ;;  %12734 = vmatpush3.bf16.msra.mxu1 %v12731_v17 }
0x2939   : > { %12257 = vmatmul.mubr.msk.f32.gmra.mrb[58].mxu1 %vm3975_vm8, %v16185_v6  ;;  %v7900_v6 = vld [vmem:[%s16973_s7] sm:$0xff]  ;;  %s16983_s7 = sld [smem:[#allocation129_spill]] }
0x293a   : > { %v12723_v46 = vpack.c.bf16 %v7901_v25, %v7900_v6 }
0x293c   : > { %12724 = vmatprep.subr.bf16.mxu0 %v12723_v46 }
0x293d   : > { %12726 = vmatpush3.bf16.msra.mxu0 %v12723_v46 }
0x293e   : > { %12728 = vmatprep.subr.bf16.mxu0 %v12727_v51 }
0x2941   : > { %12730 = vmatpush3.bf16.msra.mxu0 %v12727_v51 }
0x2a08   : > { %v12255_v30 = vpop.f32.mrb[56].mxu1 }
0x2a09   : > { %v7845_v36 = vmul.f32 0.001953125, %v12255_v30  ;;  %v7825_v37 = vpop.f32.mrb[57].mxu1 }
0x2a0a   : > { %v7844_v43 = vmul.f32 0.001953125, %v7825_v37 }
0x2a0b   : > { %v7849_v16 = vadd.f32 1e-08, %v7845_v36 }
0x2a0c   : > { %v7848_v44 = vadd.f32 1e-08, %v7844_v43  ;;  %v12258_v45 = vpop.f32.mrb[58].mxu1 }
0x2a0d   : > { %13354 = vrsqrt.f32 %v7849_v16  ;;  %v7847_v23 = vmul.f32 0.001953125, %v12258_v45  ;;  %v7835_v49 = vpop.f32.mrb[59].mxu1 }
0x2a0e   : > { %13356 = vrsqrt.f32 %v7848_v44  ;;  %v7846_v4 = vmul.f32 0.001953125, %v7835_v49 }
0x2a0f   : > { %v7851_v5 = vadd.f32 1e-08, %v7847_v23 }
0x2a10   : > { %v7850_v33 = vadd.f32 1e-08, %v7846_v4 }
0x2a11   : > { %13358 = vrsqrt.f32 %v7851_v5 }
0x2a12   : > { %13360 = vrsqrt.f32 %v7850_v33 }
0x2a17   : > { %v13355_v55 = vpop.eup %13354 }
0x2a18   : > { %v13357_v54 = vpop.eup %13356  ;;  %7863 = vperm.xlu1 %13297, %v13355_v55  }
0x2a19   : > { %7858 = vperm.xlu0 %13296, %v13357_v54  }
0x2a1b   : > { %v13359_v50 = vpop.eup %13358 }
0x2a1c   : > { %v13361_v52 = vpop.eup %13360 }
0x2a1d   : > { %7873 = vperm.xlu0 %13296, %v13359_v50   ;;  %7868 = vperm.xlu1 %13297, %v13361_v52   ;;  %v16425_v52 = vld [vmem:[%s16961_s6 + $0x8] sm:$0xff] }
0x2a21   : > { %8133 = vperm.xlu1 %13297, %v11335_v35   ;;  %v16430_v35 = vld [vmem:[%s16961_s6 + $0x10] sm:$0xff] }
0x2a97   : > { %v7864_v57 = vpop.permute.xlu1 %7863 }
0x2a98   : > { %v7877_v58 = vmul.f32 %v7864_v57, %v16360_v2  ;;  %v7859_v40 = vpop.permute.xlu0 %7858 }
0x2a99   : > { %v7876_v53 = vmul.f32 %v7859_v40, %v16362_v7 }
0x2a9a   : > { %v7887_v59 = vmul.f32 %v11323_v28, %v7877_v58 }
0x2a9b   : > { %v7886_v60 = vmul.f32 %v11323_v28, %v7876_v53 }
0x2a9c   : > { %v7874_v39 = vpop.permute.xlu0 %7873  ;;  %v7869_v14 = vpop.permute.xlu1 %7868  ;;  %v7897_v63 = vadd.f32 %v11324_v34, %v7887_v59 }
0x2a9d   : > { %v7896_v1 = vadd.f32 %v11324_v34, %v7886_v60  ;;  %v7879_v61 = vmul.f32 %v7874_v39, %v16369_v20  ;;  %v7878_v41 = vmul.f32 %v7869_v14, %v16371_v11 }
0x2a9f   : > { %v7889_v0 = vmul.f32 %v11323_v28, %v7879_v61  ;;  %v7888_v3 = vmul.f32 %v11323_v28, %v7878_v41  ;;  %12267 = vmatprep.mubr.msk.f32.mxu0 %vm3975_vm8, %v7896_v1  ;;  %v16435_v28 = vld [vmem:[%s16961_s6 + $0x18] sm:$0xff] }
0x2aa0   : > { %12268 = vmatmul.mubr.msk.f32.vlgmr.msra.gmra.mrb[64].mxu0 %vm3975_vm8, %v7897_v63  ;;  %v8134_v29 = vpop.permute.xlu1 %8133 }
0x2aa1   : > { %v7899_v2 = vadd.f32 %v11324_v34, %v7889_v0  ;;  %v7898_v7 = vadd.f32 %v11324_v34, %v7888_v3 }
0x2aa3   : > { %12270 = vmatprep.mubr.msk.f32.mxu0 %vm3975_vm8, %v7898_v7 }
0x2aa4   : > { %12271 = vmatmul.mubr.msk.f32.gmra.mrb[66].mxu0 %vm3975_vm8, %v7899_v2 }
0x2aa5   : > { %12291 = vmatprep.mubr.msk.f32.mxu0 %vm3975_vm8, %v16262_v47 }
0x2b73   : > { %v12269_v42 = vpop.f32.mrb[64].mxu0 }
0x2b74   : > { %v7989_v20 = vpop.f32.mrb[65].mxu0  ;;  %v16404_v56 = vadd.f32 %v12269_v42, %v11325_v19 }
0x2b75   : > { %v16402_v11 = vadd.f32 %v11325_v19, %v7989_v20 }
0x2b77   : > { %v12272_v21 = vpop.f32.mrb[66].mxu0  ;;  %12277 = vmatprep.mubr.msk.f32.mxu1 %vm3551_vm4, %v16402_v11 }
0x2b78   : > { %v7999_v10 = vpop.f32.mrb[67].mxu0  ;;  %12278 = vmatmul.mubr.msk.f32.vlgmr.msra.gmra.mrb[60].mxu1 %vm3551_vm4, %v16404_v56  ;;  %v16412_v13 = vadd.f32 %v12272_v21, %v11325_v19 }
0x2b79   : > { %v16410_v8 = vadd.f32 %v11325_v19, %v7999_v10 }
0x2b7b   : > { %12280 = vmatprep.mubr.msk.f32.mxu1 %vm3551_vm4, %v16410_v8 }
0x2b7c   : > { %12281 = vmatmul.mubr.msk.f32.gmra.mrb[62].mxu1 %vm3551_vm4, %v16412_v13 }
0x2b7d   : > { %12305 = vmatprep.mubr.msk.f32.mxu1 %vm3975_vm8, %v16262_v47 }
0x2c4b   : > { %v12279_v12 = vpop.f32.mrb[60].mxu1 }
0x2c4c   : > { %v8109_v9 = vadd.f32 %v12279_v12, %v11330_v22  ;;  %v8103_v26 = vpop.f32.mrb[61].mxu1 }
0x2c4d   : > { %v8104_v62 = vadd.f32 %v11330_v22, %v8103_v26 }
0x2c4e   : > { %v8137_v30 = vmul.f32 %v8134_v29, %v8109_v9  ;;  %vm8124_vm13 = vcmp.gt.f32.partialorder %v8109_v9, 0.0 }
0x2c4f   : > { %v8136_v36 = vmul.f32 %v8134_v29, %v8104_v62  ;;  %v12282_v37 = vpop.f32.mrb[62].mxu1  ;;  %vm8123_vm14 = vcmp.gt.f32.partialorder %v8104_v62, 0.0 }
0x2c50   : > { %v8119_v43 = vadd.f32 %v12282_v37, %v11330_v22  ;;  %v8113_v16 = vpop.f32.mrb[63].mxu1  ;;  %v8141_v44 = vsel %vm8124_vm13, %v8109_v9, %v8137_v30 }
0x2c51   : > { %v8114_v45 = vadd.f32 %v11330_v22, %v8113_v16  ;;  %v8149_v23 = vsel %vm3975_vm8, %v8141_v44, 0.0  ;;  %v8140_v49 = vsel %vm8123_vm14, %v8104_v62, %v8136_v36 }
0x2c52   : > { %8150 = vadd.xlane.f32.xlu1 %v8149_v23  ;;  %v8146_v47 = vsel %vm3975_vm8, %v8140_v49, 0.0  ;;  %v8139_v4 = vmul.f32 %v8134_v29, %v8119_v43  ;;  %vm8126_vm0 = vcmp.gt.f32.partialorder %v8119_v43, 0.0 }
0x2c53   : > { %v8138_v5 = vmul.f32 %v8134_v29, %v8114_v45  ;;  %8147 = vadd.xlane.f32.xlu0 %v8146_v47  ;;  %vm8125_vm15 = vcmp.gt.f32.partialorder %v8114_v45, 0.0 }
0x2c54   : > { %v8143_v25 = vsel %vm8126_vm0, %v8119_v43, %v8139_v4 }
0x2c55   : > { %v8142_v33 = vsel %vm8125_vm15, %v8114_v45, %v8138_v5  ;;  %v8155_v55 = vsel %vm3975_vm8, %v8143_v25, 0.0 }
0x2c56   : > { %v8152_v6 = vsel %vm3975_vm8, %v8142_v33, 0.0 }
0x2c57   : > { %8153 = vadd.xlane.f32.xlu0 %v8152_v6  ;;  %v11358_v6 = vld [vmem:[#allocation16] ss:$0 sm:$0xff] }
0x2c5b   : > { %8156 = vadd.xlane.f32.xlu0 %v8155_v55 }
0x2cdf   : > { %v8151_v46 = vpop.xlane.xlu1 %8150 }
0x2ce0   : > { %v8148_v54 = vpop.xlane.xlu0 %8147 }
0x2ce1   : > { %v12735_v38 = vpack.c.bf16 %v8151_v46, %v8148_v54  ;;  %v8008_v46 = vld [vmem:[%s16966_s3] sm:$0xff] }
0x2ce2   : > { %v8012_v54 = vld [vmem:[%s16967_s4] sm:$0xff] }
0x2ce3   : > { %12736 = vmatprep.subr.bf16.mxu0 %v12735_v38 }
0x2ce4   : > { %12738 = vmatpush3.bf16.msra.mxu0 %v12735_v38  ;;  %v8154_v48 = vpop.xlane.xlu0 %8153  ;;  %v11344_v38 = vld [vmem:[#allocation79] ss:$0 sm:$0xff] }
0x2ce8   : > { %v8157_v50 = vpop.xlane.xlu0 %8156 }
0x2ce9   : > { %v12739_v51 = vpack.c.bf16 %v8157_v50, %v8154_v48 }
0x2ceb   : > { %12740 = vmatprep.subr.bf16.mxu0 %v12739_v51 }
0x2cec   : > { %12742 = vmatpush3.bf16.msra.mxu0 %v12739_v51 }
0x2cef   : > { %12292 = vmatmul.mubr.msk.f32.vlgmr.msra.gmra.mrb[68].mxu0 %vm3975_vm8, %v16425_v52 }
0x2cf0   : > { %12294 = vmatprep.mubr.msk.f32.mxu0 %vm3975_vm8, %v16430_v35 }
0x2cf3   : > { %12295 = vmatmul.mubr.msk.f32.gmra.mrb[70].mxu0 %vm3975_vm8, %v16435_v28 }
0x2cf4   : > { %12319 = vmatprep.mubr.msk.f32.mxu0 %vm3975_vm8, %v8008_v46 }
0x2dc2   : > { %v12293_v57 = vpop.f32.mrb[68].mxu0 }
0x2dc3   : > { %v8244_v58 = vmul.f32 0.001953125, %v12293_v57  ;;  %v8224_v40 = vpop.f32.mrb[69].mxu0  ;;  %v11345_v57 = vld [vmem:[#allocation70] ss:$0 sm:$0xff] }
0x2dc4   : > { %v8243_v53 = vmul.f32 0.001953125, %v8224_v40 }
0x2dc5   : > { %8254 = vperm.xlu0 %13296, %v8244_v58  }
0x2dc6   : > { %8249 = vperm.xlu1 %13297, %v8243_v53   ;;  %v12296_v34 = vpop.f32.mrb[70].mxu0 }
0x2dc7   : > { %v8234_v59 = vpop.f32.mrb[71].mxu0  ;;  %v8246_v39 = vmul.f32 0.001953125, %v12296_v34 }
0x2dc8   : > { %v8245_v60 = vmul.f32 0.001953125, %v8234_v59 }
0x2dca   : > { %8259 = vperm.xlu1 %13297, %v8245_v60  }
0x2dce   : > { %8264 = vperm.xlu1 %13297, %v8246_v39  }
0x2e44   : > { %v8255_v14 = vpop.permute.xlu0 %8254 }
0x2e45   : > { %v16439_v1 = vsub.f32 %v8141_v44, %v8255_v14  ;;  %v8250_v61 = vpop.permute.xlu1 %8249 }
0x2e46   : > { %v16441_v41 = vsub.f32 %v8140_v49, %v8250_v61 }
0x2e47   : > { %v8272_v63 = vmul.f32 %v16439_v1, %v16439_v1 }
0x2e48   : > { %v8271_v0 = vmul.f32 %v16441_v41, %v16441_v41 }
0x2e49   : > { %v8260_v3 = vpop.permute.xlu1 %8259  ;;  %v8278_v2 = vsel %vm3975_vm8, %v8272_v63, 0.0 }
0x2e4a   : > { %v16448_v7 = vsub.f32 %v8142_v33, %v8260_v3  ;;  %8279 = vadd.xlane.f32.xlu1 %v8278_v2  ;;  %v8275_v18 = vsel %vm3975_vm8, %v8271_v0, 0.0 }
0x2e4b   : > { %8276 = vadd.xlane.f32.xlu0 %v8275_v18  ;;  %v8013_v18 = vld [vmem:[%s16967_s4 + $0x8] sm:$0xff] }
0x2e4c   : > { %v8273_v15 = vmul.f32 %v16448_v7, %v16448_v7 }
0x2e4d   : > { %v8265_v17 = vpop.permute.xlu1 %8264 }
0x2e4e   : > { %v16453_v19 = vsub.f32 %v8143_v25, %v8265_v17  ;;  %v8281_v42 = vsel %vm3975_vm8, %v8273_v15, 0.0  ;;  %v8010_v15 = vld [vmem:[%s16966_s3 + $0x10] sm:$0xff] }
0x2e4f   : > { %8282 = vadd.xlane.f32.xlu0 %v8281_v42  ;;  %v8014_v17 = vld [vmem:[%s16967_s4 + $0x10] sm:$0xff]  ;;  %v8015_v42 = vld [vmem:[%s16967_s4 + $0x18] sm:$0xff]  ;;  %s16976_s4 = sld [smem:[#allocation122_spill]] }
0x2e50   : > { %v8274_v20 = vmul.f32 %v16453_v19, %v16453_v19 }
0x2e52   : > { %v8284_v21 = vsel %vm3975_vm8, %v8274_v20, 0.0  ;;  %v16486_v20 = vld [vmem:[%s16961_s6] sm:$0xff] }
0x2e53   : > { %8285 = vadd.xlane.f32.xlu0 %v8284_v21  ;;  %v11354_v21 = vld [vmem:[#allocation76] ss:$0 sm:$0xff] }
0x2ed7   : > { %v8280_v10 = vpop.xlane.xlu1 %8279 }
0x2ed8   : > { %v8277_v22 = vpop.xlane.xlu0 %8276 }
0x2ed9   : > { %v12743_v12 = vpack.c.bf16 %v8280_v10, %v8277_v22  ;;  %v11355_v10 = vld [vmem:[#allocation75] ss:$0 sm:$0xff]  ;;  %v11356_v22 = vld [vmem:[#allocation78] ss:$0 sm:$0xff] }
0x2edb   : > { %12744 = vmatprep.subr.bf16.mxu1 %v12743_v12 }
0x2edc   : > { %v8283_v9 = vpop.xlane.xlu0 %8282  ;;  %12746 = vmatpush3.bf16.msra.mxu1 %v12743_v12 }
0x2ee0   : > { %v8286_v26 = vpop.xlane.xlu0 %8285 }
0x2ee1   : > { %v12747_v29 = vpack.c.bf16 %v8286_v26, %v8283_v9 }
0x2ee3   : > { %12748 = vmatprep.subr.bf16.mxu1 %v12747_v29 }
0x2ee4   : > { %12750 = vmatpush3.bf16.msra.mxu1 %v12747_v29 }
0x2ee7   : > { %12306 = vmatmul.mubr.msk.f32.vlgmr.msra.gmra.mrb[64].mxu1 %vm3975_vm8, %v16425_v52 }
0x2ee8   : > { %12308 = vmatprep.mubr.msk.f32.mxu1 %vm3975_vm8, %v16430_v35 }
0x2eeb   : > { %12309 = vmatmul.mubr.msk.f32.gmra.mrb[66].mxu1 %vm3975_vm8, %v16435_v28 }
0x2eec   : > { %12333 = vmatprep.mubr.msk.f32.mxu1 %vm3975_vm8, %v8012_v54 }
0x2fba   : > { %v12307_v62 = vpop.f32.mrb[64].mxu1 }
0x2fbb   : > { %v8373_v30 = vmul.f32 0.001953125, %v12307_v62  ;;  %v8353_v36 = vpop.f32.mrb[65].mxu1 }
0x2fbc   : > { %v8372_v37 = vmul.f32 0.001953125, %v8353_v36 }
0x2fbd   : > { %v8377_v43 = vadd.f32 1e-08, %v8373_v30 }
0x2fbe   : > { %v8376_v16 = vadd.f32 1e-08, %v8372_v37  ;;  %v12310_v44 = vpop.f32.mrb[66].mxu1 }
0x2fbf   : > { %13362 = vrsqrt.f32 %v8377_v43  ;;  %v8363_v45 = vpop.f32.mrb[67].mxu1  ;;  %v8375_v23 = vmul.f32 0.001953125, %v12310_v44 }
0x2fc0   : > { %13364 = vrsqrt.f32 %v8376_v16  ;;  %v8374_v49 = vmul.f32 0.001953125, %v8363_v45 }
0x2fc1   : > { %v8379_v4 = vadd.f32 1e-08, %v8375_v23  ;;  %v11357_v23 = vld [vmem:[#allocation73] ss:$0 sm:$0xff] }
0x2fc2   : > { %v8378_v47 = vadd.f32 1e-08, %v8374_v49 }
0x2fc4   : > { %13366 = vrsqrt.f32 %v8378_v47 }
0x2fc5   : > { %13368 = vrsqrt.f32 %v8379_v4 }
0x2fc9   : > { %v13363_v5 = vpop.eup %13362 }
0x2fca   : > { %v13365_v33 = vpop.eup %13364  ;;  %8391 = vperm.xlu0 %13296, %v13363_v5  }
0x2fcb   : > { %8386 = vperm.xlu1 %13297, %v13365_v33  }
0x2fce   : > { %v13367_v25 = vpop.eup %13366  ;;  %8685 = vperm.xlu0 %13296, %v11358_v6  }
0x2fcf   : > { %8396 = vperm.xlu1 %13297, %v13367_v25   ;;  %v13369_v55 = vpop.eup %13368 }
0x2fd3   : > { %8401 = vperm.xlu1 %13297, %v13369_v55  }
0x3049   : > { %v8392_v48 = vpop.permute.xlu0 %8391 }
0x304a   : > { %v8405_v50 = vmul.f32 %v8392_v48, %v16439_v1  ;;  %v8387_v51 = vpop.permute.xlu1 %8386 }
0x304b   : > { %v8404_v58 = vmul.f32 %v8387_v51, %v16441_v41 }
0x304c   : > { %v8415_v40 = vmul.f32 %v11344_v38, %v8405_v50 }
0x304d   : > { %v8414_v53 = vmul.f32 %v11344_v38, %v8404_v58 }
0x304e   : > { %v8425_v34 = vadd.f32 %v11345_v57, %v8415_v40  ;;  %v8397_v59 = vpop.permute.xlu1 %8396 }
0x304f   : > { %v8424_v60 = vadd.f32 %v11345_v57, %v8414_v53  ;;  %v8406_v39 = vmul.f32 %v8397_v59, %v16448_v7  ;;  %v8009_v7 = vld [vmem:[%s16966_s3 + $0x8] sm:$0xff] }
0x3050   : > { %v8630_v26 = vmul.f32 %v11354_v21, %v8425_v34 }
0x3051   : > { %v12751_v14 = vpack.c.bf16 %v8425_v34, %v8424_v60  ;;  %v8416_v63 = vmul.f32 %v11344_v38, %v8406_v39  ;;  %v8629_v37 = vmul.f32 %v11354_v21, %v8424_v60 }
0x3052   : > { %v8402_v61 = vpop.permute.xlu1 %8401 }
0x3053   : > { %v8407_v0 = vmul.f32 %v8402_v61, %v16453_v19  ;;  %12752 = vmatprep.subr.bf16.mxu0 %v12751_v14  ;;  %12760 = vmatprep.subr.bf16.mxu1 %v12751_v14  ;;  %v8426_v41 = vadd.f32 %v11345_v57, %v8416_v63  ;;  %v8011_v19 = vld [vmem:[%s16966_s3 + $0x18] sm:$0xff]  ;;  %s16975_s3 = sld [smem:[#allocation182_spill]] }
0x3054   : > { %12754 = vmatpush3.bf16.msra.mxu0 %v12751_v14  ;;  %12762 = vmatpush3.bf16.msra.mxu1 %v12751_v14 }
0x3055   : > { %v8417_v1 = vmul.f32 %v11344_v38, %v8407_v0  ;;  %v8631_v54 = vmul.f32 %v11354_v21, %v8426_v41 }
0x3057   : > { %v8427_v3 = vadd.f32 %v11345_v57, %v8417_v1  ;;  %v8686_v57 = vpop.permute.xlu0 %8685 }
0x3059   : > { %v12755_v2 = vpack.c.bf16 %v8427_v3, %v8426_v41  ;;  %v8632_v5 = vmul.f32 %v11354_v21, %v8427_v3 }
0x305b   : > { %12756 = vmatprep.subr.bf16.mxu0 %v12755_v2  ;;  %12764 = vmatprep.subr.bf16.mxu1 %v12755_v2 }
0x305c   : > { %12758 = vmatpush3.bf16.msra.mxu0 %v12755_v2  ;;  %12766 = vmatpush3.bf16.msra.mxu1 %v12755_v2 }
0x305f   : > { %12320 = vmatmul.mubr.msk.f32.vlgmr.msra.gmra.mrb[72].mxu0 %vm3975_vm8, %v8009_v7  ;;  %12334 = vmatmul.mubr.msk.f32.vlgmr.msra.gmra.mrb[68].mxu1 %vm3975_vm8, %v8013_v18 }
0x3060   : > { %12322 = vmatprep.mubr.msk.f32.mxu0 %vm3975_vm8, %v8010_v15  ;;  %12336 = vmatprep.mubr.msk.f32.mxu1 %vm3975_vm8, %v8014_v17 }
0x3063   : > { %12323 = vmatmul.mubr.msk.f32.gmra.mrb[74].mxu0 %vm3975_vm8, %v8011_v19  ;;  %12337 = vmatmul.mubr.msk.f32.gmra.mrb[70].mxu1 %vm3975_vm8, %v8015_v42 }
0x3064   : > { %12347 = vmatprep.mubr.msk.f32.mxu0 %vm3975_vm8, %v16486_v20  ;;  %12361 = vmatprep.mubr.msk.f32.mxu1 %vm3975_vm8, %v16486_v20 }
0x3132   : > { %v12321_v12 = vpop.f32.mrb[72].mxu0  ;;  %v12335_v9 = vpop.f32.mrb[68].mxu1 }
0x3133   : > { %v8641_v29 = vmul.f32 %v12321_v12, %v11355_v10  ;;  %v8506_v62 = vpop.f32.mrb[73].mxu0  ;;  %v8656_v30 = vmul.f32 %v12335_v9, %v11356_v22  ;;  %v8603_v36 = vpop.f32.mrb[69].mxu1 }
0x3134   : > { %v8640_v43 = vmul.f32 %v11355_v10, %v8506_v62  ;;  %v8655_v16 = vmul.f32 %v11356_v22, %v8603_v36 }
0x3135   : > { %v8645_v44 = vadd.f32 %v8641_v29, %v8630_v26 }
0x3136   : > { %v8644_v45 = vadd.f32 %v8640_v43, %v8629_v37  ;;  %v12324_v49 = vpop.f32.mrb[74].mxu0  ;;  %v12338_v47 = vpop.f32.mrb[70].mxu1 }
0x3137   : > { %v8660_v4 = vadd.f32 %v8656_v30, %v8645_v44  ;;  %v8643_v33 = vmul.f32 %v12324_v49, %v11355_v10  ;;  %v8516_v6 = vpop.f32.mrb[75].mxu0  ;;  %v8658_v25 = vmul.f32 %v12338_v47, %v11356_v22  ;;  %v8613_v55 = vpop.f32.mrb[71].mxu1 }
0x3138   : > { %v8659_v46 = vadd.f32 %v8655_v16, %v8644_v45  ;;  %v8642_v38 = vmul.f32 %v11355_v10, %v8516_v6  ;;  %v8657_v48 = vmul.f32 %v11356_v22, %v8613_v55 }
0x3139   : > { %v8671_v50 = vadd.f32 %v11357_v23, %v8660_v4  ;;  %v8647_v51 = vadd.f32 %v8643_v33, %v8632_v5 }
0x313a   : > { %v8670_v58 = vadd.f32 %v11357_v23, %v8659_v46  ;;  %v8646_v40 = vadd.f32 %v8642_v38, %v8631_v54 }
0x313b   : > { %v8662_v53 = vadd.f32 %v8658_v25, %v8647_v51  ;;  %vm8676_vm6 = vcmp.gt.f32.partialorder %v8671_v50, 0.0  ;;  %v8689_v34 = vmul.f32 %v8686_v57, %v8671_v50 }
0x313c   : > { %v8661_v59 = vadd.f32 %v8657_v48, %v8646_v40  ;;  %vm8675_vm7 = vcmp.gt.f32.partialorder %v8670_v58, 0.0  ;;  %v8688_v60 = vmul.f32 %v8686_v57, %v8670_v58 }
0x313d   : > { %v8673_v39 = vadd.f32 %v11357_v23, %v8662_v53  ;;  %v8693_v14 = vsel %vm8676_vm6, %v8671_v50, %v8689_v34 }
0x313e   : > { %v8672_v61 = vadd.f32 %v11357_v23, %v8661_v59  ;;  %v8701_v63 = vsel %vm3975_vm8, %v8693_v14, 0.0  ;;  %v8692_v0 = vsel %vm8675_vm7, %v8670_v58, %v8688_v60 }
0x313f   : > { %8702 = vadd.xlane.f32.xlu0 %v8701_v63  ;;  %v8698_v1 = vsel %vm3975_vm8, %v8692_v0, 0.0  ;;  %vm8678_vm9 = vcmp.gt.f32.partialorder %v8673_v39, 0.0  ;;  %v8691_v41 = vmul.f32 %v8686_v57, %v8673_v39 }
0x3140   : > { %8699 = vadd.xlane.f32.xlu1 %v8698_v1  ;;  %vm8677_vm1 = vcmp.gt.f32.partialorder %v8672_v61, 0.0  ;;  %v8690_v3 = vmul.f32 %v8686_v57, %v8672_v61 }
0x3141   : > { %v8695_v2 = vsel %vm8678_vm9, %v8673_v39, %v8691_v41 }
0x3142   : > { %v8707_v7 = vsel %vm3975_vm8, %v8695_v2, 0.0  ;;  %v8694_v18 = vsel %vm8677_vm1, %v8672_v61, %v8690_v3 }
0x3143   : > { %v8704_v15 = vsel %vm3975_vm8, %v8694_v18, 0.0 }
0x3144   : > { %8708 = vadd.xlane.f32.xlu1 %v8707_v7  ;;  %8705 = vadd.xlane.f32.xlu0 %v8704_v15  ;;  %v8981_v7 = vld [vmem:[%s16975_s3 + $0x8] sm:$0xff] }
0x31cc   : > { %v8703_v17 = vpop.xlane.xlu0 %8702 }
0x31cd   : > { %v8700_v19 = vpop.xlane.xlu1 %8699 }
0x31ce   : > { %v12767_v42 = vpack.c.bf16 %v8703_v17, %v8700_v19  ;;  %v8982_v19 = vld [vmem:[%s16975_s3 + $0x10] sm:$0xff] }
0x31d0   : > { %12768 = vmatprep.subr.bf16.mxu0 %v12767_v42 }
0x31d1   : > { %12770 = vmatpush3.bf16.msra.mxu0 %v12767_v42  ;;  %v8709_v21 = vpop.xlane.xlu1 %8708  ;;  %v8706_v10 = vpop.xlane.xlu0 %8705  ;;  %v8983_v42 = vld [vmem:[%s16975_s3 + $0x18] sm:$0xff] }
0x31d2   : > { %v12771_v22 = vpack.c.bf16 %v8709_v21, %v8706_v10  ;;  %v12787_v10 = vpack.c.bf16 %v8983_v42, %v8982_v19 }
0x31d4   : > { %12772 = vmatprep.subr.bf16.mxu0 %v12771_v22 }
0x31d5   : > { %12774 = vmatpush3.bf16.msra.mxu0 %v12771_v22 }
0x31d8   : > { %12348 = vmatmul.mubr.msk.f32.vlgmr.msra.gmra.mrb[76].mxu0 %vm3975_vm8, %v16425_v52 }
0x31d9   : > { %12350 = vmatprep.mubr.msk.f32.mxu0 %vm3975_vm8, %v16430_v35 }
0x31dc   : > { %12351 = vmatmul.mubr.msk.f32.gmra.mrb[78].mxu0 %vm3975_vm8, %v16435_v28 }
0x32ab   : > { %v12349_v12 = vpop.f32.mrb[76].mxu0 }
0x32ac   : > { %v8796_v9 = vmul.f32 0.001953125, %v12349_v12  ;;  %v8776_v26 = vpop.f32.mrb[77].mxu0  ;;  %v11388_v12 = vld [vmem:[#allocation7] ss:$0 sm:$0xff] }
0x32ad   : > { %v8795_v29 = vmul.f32 0.001953125, %v8776_v26 }
0x32ae   : > { %8806 = vperm.xlu1 %13297, %v8796_v9   ;;  %v11367_v9 = vld [vmem:[#allocation81] ss:$0 sm:$0xff] }
0x32af   : > { %8801 = vperm.xlu0 %13296, %v8795_v29   ;;  %v12352_v62 = vpop.f32.mrb[78].mxu0 }
0x32b0   : > { %v8798_v30 = vmul.f32 0.001953125, %v12352_v62  ;;  %v8786_v36 = vpop.f32.mrb[79].mxu0 }
0x32b1   : > { %v8797_v37 = vmul.f32 0.001953125, %v8786_v36  ;;  %v11368_v36 = vld [vmem:[#allocation72] ss:$0 sm:$0xff] }
0x32b3   : > { %8816 = vperm.xlu0 %13296, %v8798_v30   ;;  %8811 = vperm.xlu1 %13297, %v8797_v37  }
0x332d   : > { %v8807_v43 = vpop.permute.xlu1 %8806 }
0x332e   : > { %v16502_v16 = vsub.f32 %v8693_v14, %v8807_v43  ;;  %v8802_v44 = vpop.permute.xlu0 %8801 }
0x332f   : > { %v16504_v45 = vsub.f32 %v8692_v0, %v8802_v44 }
0x3330   : > { %v8824_v23 = vmul.f32 %v16502_v16, %v16502_v16 }
0x3331   : > { %v8823_v49 = vmul.f32 %v16504_v45, %v16504_v45 }
0x3332   : > { %v8817_v47 = vpop.permute.xlu0 %8816  ;;  %v8812_v4 = vpop.permute.xlu1 %8811  ;;  %v8830_v5 = vsel %vm3975_vm8, %v8824_v23, 0.0 }
0x3333   : > { %v16511_v33 = vsub.f32 %v8695_v2, %v8817_v47  ;;  %v16513_v6 = vsub.f32 %v8694_v18, %v8812_v4  ;;  %8831 = vadd.xlane.f32.xlu0 %v8830_v5  ;;  %v8827_v25 = vsel %vm3975_vm8, %v8823_v49, 0.0  ;;  %v8980_v2 = vld [vmem:[%s16975_s3] sm:$0xff]  ;;  %s16977_s3 = sld [smem:[#allocation134_spill]] }
0x3334   : > { %8828 = vadd.xlane.f32.xlu1 %v8827_v25  ;;  %v12783_v15 = vpack.c.bf16 %v8981_v7, %v8980_v2 }
0x3335   : > { %v8826_v55 = vmul.f32 %v16511_v33, %v16511_v33  ;;  %v8825_v46 = vmul.f32 %v16513_v6, %v16513_v6 }
0x3336   : > { %12784 = vmatprep.subr.bf16.mxu0 %v12783_v15 }
0x3337   : > { %v8836_v54 = vsel %vm3975_vm8, %v8826_v55, 0.0  ;;  %v8833_v38 = vsel %vm3975_vm8, %v8825_v46, 0.0  ;;  %12786 = vmatpush3.bf16.msra.mxu0 %v12783_v15  ;;  %v9092_v46 = vld [vmem:[%s16976_s4] sm:$0xff] }
0x3338   : > { %8837 = vadd.xlane.f32.xlu1 %v8836_v54  ;;  %8834 = vadd.xlane.f32.xlu0 %v8833_v38  ;;  %v9093_v54 = vld [vmem:[%s16976_s4 + $0x8] sm:$0xff]  ;;  %s16978_s4 = sld [smem:[#allocation125_spill]] }
0x3339   : > { %12788 = vmatprep.subr.bf16.mxu0 %v12787_v10  ;;  %v9222_v38 = vld [vmem:[%s16977_s3] sm:$0xff] }
0x333b   : > { %12790 = vmatpush3.bf16.msra.mxu0 %v12787_v10 }
0x33c0   : > { %v8832_v48 = vpop.xlane.xlu0 %8831 }
0x33c1   : > { %v8829_v50 = vpop.xlane.xlu1 %8828 }
0x33c2   : > { %v12775_v51 = vpack.c.bf16 %v8832_v48, %v8829_v50  ;;  %v12791_v48 = vpack.c.bf16 %v9093_v54, %v9092_v46 }
0x33c4   : > { %12776 = vmatprep.subr.bf16.mxu1 %v12775_v51 }
0x33c5   : > { %v8835_v57 = vpop.xlane.xlu0 %8834  ;;  %12778 = vmatpush3.bf16.msra.mxu1 %v12775_v51  ;;  %v8838_v58 = vpop.xlane.xlu1 %8837 }
0x33c6   : > { %v12779_v40 = vpack.c.bf16 %v8838_v58, %v8835_v57 }
0x33c8   : > { %12780 = vmatprep.subr.bf16.mxu1 %v12779_v40 }
0x33c9   : > { %12782 = vmatpush3.bf16.msra.mxu1 %v12779_v40 }
0x33ca   : > { %12792 = vmatprep.subr.bf16.mxu1 %v12791_v48 }
0x33cc   : > { %12362 = vmatmul.mubr.msk.f32.vlgmr.msra.gmra.mrb[72].mxu1 %vm3975_vm8, %v16425_v52 }
0x33cd   : > { %12364 = vmatprep.mubr.msk.f32.mxu1 %vm3975_vm8, %v16430_v35  ;;  %12794 = vmatpush3.bf16.msra.mxu1 %v12791_v48 }
0x33d0   : > { %12365 = vmatmul.mubr.msk.f32.gmra.mrb[74].mxu1 %vm3975_vm8, %v16435_v28 }
0x349f   : > { %v12363_v53 = vpop.f32.mrb[72].mxu1 }
0x34a0   : > { %v8925_v34 = vmul.f32 0.001953125, %v12363_v53  ;;  %v8905_v59 = vpop.f32.mrb[73].mxu1 }
0x34a1   : > { %v8924_v60 = vmul.f32 0.001953125, %v8905_v59 }
0x34a2   : > { %v8929_v39 = vadd.f32 1e-08, %v8925_v34 }
0x34a3   : > { %v8928_v14 = vadd.f32 1e-08, %v8924_v60  ;;  %v12366_v61 = vpop.f32.mrb[74].mxu1 }
0x34a4   : > { %13370 = vrsqrt.f32 %v8929_v39  ;;  %v8927_v63 = vmul.f32 0.001953125, %v12366_v61  ;;  %v8915_v0 = vpop.f32.mrb[75].mxu1 }
0x34a5   : > { %13372 = vrsqrt.f32 %v8928_v14  ;;  %v8926_v1 = vmul.f32 0.001953125, %v8915_v0 }
0x34a6   : > { %v8931_v41 = vadd.f32 1e-08, %v8927_v63 }
0x34a7   : > { %v8930_v3 = vadd.f32 1e-08, %v8926_v1 }
0x34a8   : > { %13374 = vrsqrt.f32 %v8931_v41 }
0x34a9   : > { %13376 = vrsqrt.f32 %v8930_v3 }
0x34ae   : > { %v13371_v18 = vpop.eup %13370 }
0x34af   : > { %v13373_v17 = vpop.eup %13372  ;;  %8943 = vperm.xlu1 %13297, %v13371_v18  }
0x34b0   : > { %8938 = vperm.xlu0 %13296, %v13373_v17  }
0x34b2   : > { %v13375_v21 = vpop.eup %13374 }
0x34b3   : > { %v13377_v22 = vpop.eup %13376 }
0x34b4   : > { %8953 = vperm.xlu0 %13296, %v13375_v21   ;;  %8948 = vperm.xlu1 %13297, %v13377_v22  }
0x34b8   : > { %9327 = vperm.xlu1 %13297, %v11388_v12  }
0x352e   : > { %v8944_v26 = vpop.permute.xlu1 %8943 }
0x352f   : > { %v8957_v29 = vmul.f32 %v8944_v26, %v16502_v16  ;;  %v8939_v62 = vpop.permute.xlu0 %8938 }
0x3530   : > { %v8956_v30 = vmul.f32 %v8939_v62, %v16504_v45 }
0x3531   : > { %v8967_v37 = vmul.f32 %v11367_v9, %v8957_v29 }
0x3532   : > { %v8966_v43 = vmul.f32 %v11367_v9, %v8956_v30 }
0x3533   : > { %v8954_v44 = vpop.permute.xlu0 %8953  ;;  %v8949_v23 = vpop.permute.xlu1 %8948  ;;  %v8977_v5 = vadd.f32 %v11368_v36, %v8967_v37 }
0x3534   : > { %v8976_v49 = vadd.f32 %v11368_v36, %v8966_v43  ;;  %v8959_v47 = vmul.f32 %v8954_v44, %v16511_v33  ;;  %v8958_v4 = vmul.f32 %v8949_v23, %v16513_v6  ;;  %v9223_v33 = vld [vmem:[%s16977_s3 + $0x8] sm:$0xff]  ;;  %v11369_v6 = vld [vmem:[#allocation69] ss:$0 sm:$0xff]  ;;  %s16981_s3 = sld [smem:[#allocation130_spill]] }
0x3535   : > { %v12795_v50 = vpack.c.bf16 %v9223_v33, %v9222_v38 }
0x3536   : > { %v8969_v25 = vmul.f32 %v11367_v9, %v8959_v47  ;;  %v8968_v16 = vmul.f32 %v11367_v9, %v8958_v4  ;;  %12375 = vmatprep.mubr.msk.f32.mxu0 %vm3975_vm8, %v8976_v49 }
0x3537   : > { %12376 = vmatmul.mubr.msk.f32.vlgmr.msra.gmra.mrb[80].mxu0 %vm3975_vm8, %v8977_v5  ;;  %12796 = vmatprep.subr.bf16.mxu0 %v12795_v50  ;;  %v9328_v41 = vpop.permute.xlu1 %9327  ;;  %v13427_v5 = vld [vmem:[%s16962_s1] sm:$0xff] }
0x3538   : > { %v8979_v45 = vadd.f32 %v11368_v36, %v8969_v25  ;;  %v8978_v55 = vadd.f32 %v11368_v36, %v8968_v16  ;;  %12798 = vmatpush3.bf16.msra.mxu0 %v12795_v50 }
0x353a   : > { %12378 = vmatprep.mubr.msk.f32.mxu0 %vm3975_vm8, %v8978_v55 }
0x353b   : > { %12379 = vmatmul.mubr.msk.f32.gmra.mrb[82].mxu0 %vm3975_vm8, %v8979_v45 }
0x360a   : > { %v12377_v51 = vpop.f32.mrb[80].mxu0 }
0x360b   : > { %v9075_v57 = vadd.f32 %v12377_v51, %v11369_v6  ;;  %v9069_v58 = vpop.f32.mrb[81].mxu0 }
0x360c   : > { %v9070_v40 = vadd.f32 %v11369_v6, %v9069_v58 }
0x360d   : > { %v16548_v59 = vadd.f32 %v9075_v57, %v16404_v56 }
0x360e   : > { %v16545_v53 = vadd.f32 %v9070_v40, %v16402_v11  ;;  %v12380_v34 = vpop.f32.mrb[82].mxu0 }
0x360f   : > { %v9085_v60 = vadd.f32 %v12380_v34, %v11369_v6  ;;  %v9079_v39 = vpop.f32.mrb[83].mxu0 }
0x3610   : > { %v9080_v14 = vadd.f32 %v11369_v6, %v9079_v39  ;;  %12385 = vmatprep.mubr.msk.f32.mxu1 %vm3551_vm4, %v16545_v53  ;;  %12395 = vmatprep.mubr.msk.f32.mxu0 %vm3551_vm4, %v16545_v53 }
0x3611   : > { %12386 = vmatmul.mubr.msk.f32.vlgmr.msra.gmra.mrb[76].mxu1 %vm3551_vm4, %v16548_v59  ;;  %12396 = vmatmul.mubr.msk.f32.vlgmr.msra.gmra.mrb[84].mxu0 %vm3551_vm4, %v16548_v59  ;;  %v16562_v56 = vadd.f32 %v9085_v60, %v16412_v13 }
0x3612   : > { %v16559_v11 = vadd.f32 %v9080_v14, %v16410_v8  ;;  %v11383_v8 = vld [vmem:[%s16978_s4] ss:$0 sm:$0xff]  ;;  %s16979_s4 = sld [smem:[#allocation127_spill]] }
0x3614   : > { %12388 = vmatprep.mubr.msk.f32.mxu1 %vm3551_vm4, %v16559_v11  ;;  %12398 = vmatprep.mubr.msk.f32.mxu0 %vm3551_vm4, %v16559_v11 }
0x3615   : > { %12389 = vmatmul.mubr.msk.f32.gmra.mrb[78].mxu1 %vm3551_vm4, %v16562_v56  ;;  %12399 = vmatmul.mubr.msk.f32.gmra.mrb[86].mxu0 %vm3551_vm4, %v16562_v56 }
0x3616   : > { %12409 = vmatprep.mubr.msk.f32.mxu1 %vm3975_vm8, %v16486_v20  ;;  %12423 = vmatprep.mubr.msk.f32.mxu0 %vm3975_vm8, %v16486_v20 }
0x36e4   : > { %v16577_v13 = vpop.f32.mrb[76].mxu1  ;;  %v12397_v61 = vpop.f32.mrb[84].mxu0 }
0x36e5   : > { %v9303_v63 = vadd.f32 %v12397_v61, %v11383_v8  ;;  %v16579_v0 = vpop.f32.mrb[77].mxu1  ;;  %v9297_v1 = vpop.f32.mrb[85].mxu0 }
0x36e6   : > { %v9298_v3 = vadd.f32 %v11383_v8, %v9297_v1 }
0x36e7   : > { %v9331_v2 = vmul.f32 %v9328_v41, %v9303_v63  ;;  %vm9318_vm2 = vcmp.gt.f32.partialorder %v9303_v63, 0.0 }
0x36e8   : > { %v9330_v7 = vmul.f32 %v9328_v41, %v9298_v3  ;;  %v16581_v18 = vpop.f32.mrb[78].mxu1  ;;  %v12400_v15 = vpop.f32.mrb[86].mxu0  ;;  %vm9317_vm10 = vcmp.gt.f32.partialorder %v9298_v3, 0.0 }
0x36e9   : > { %v9313_v17 = vadd.f32 %v12400_v15, %v11383_v8  ;;  %v16583_v19 = vpop.f32.mrb[79].mxu1  ;;  %v9307_v42 = vpop.f32.mrb[87].mxu0  ;;  %v9335_v21 = vsel %vm9318_vm2, %v9303_v63, %v9331_v2 }
0x36ea   : > { %v9308_v10 = vadd.f32 %v11383_v8, %v9307_v42  ;;  %v9343_v22 = vsel %vm3975_vm8, %v9335_v21, 0.0  ;;  %v9334_v12 = vsel %vm9317_vm10, %v9298_v3, %v9330_v7 }
0x36eb   : > { %9344 = vadd.xlane.f32.xlu1 %v9343_v22  ;;  %v9340_v26 = vsel %vm3975_vm8, %v9334_v12, 0.0  ;;  %v9333_v29 = vmul.f32 %v9328_v41, %v9313_v17  ;;  %vm9320_vm12 = vcmp.gt.f32.partialorder %v9313_v17, 0.0 }
0x36ec   : > { %v9332_v9 = vmul.f32 %v9328_v41, %v9308_v10  ;;  %vm9319_vm11 = vcmp.gt.f32.partialorder %v9308_v10, 0.0  ;;  %9341 = vadd.xlane.f32.xlu0 %v9340_v26 }
0x36ed   : > { %v9337_v36 = vsel %vm9320_vm12, %v9313_v17, %v9333_v29 }
0x36ee   : > { %v9336_v62 = vsel %vm9319_vm11, %v9308_v10, %v9332_v9  ;;  %v9349_v37 = vsel %vm3975_vm8, %v9337_v36, 0.0 }
0x36ef   : > { %v9346_v30 = vsel %vm3975_vm8, %v9336_v62, 0.0 }
0x36f0   : > { %9347 = vadd.xlane.f32.xlu0 %v9346_v30 }
0x36f4   : > { %9350 = vadd.xlane.f32.xlu0 %v9349_v37 }
0x3778   : > { %v9345_v43 = vpop.xlane.xlu1 %9344 }
0x3779   : > { %v9342_v44 = vpop.xlane.xlu0 %9341 }
0x377a   : > { %v12799_v23 = vpack.c.bf16 %v9345_v43, %v9342_v44  ;;  %v11411_v44 = vld [vmem:[#allocation8] ss:$0 sm:$0xff] }
0x377c   : > { %12800 = vmatprep.subr.bf16.mxu1 %v12799_v23 }
0x377d   : > { %12802 = vmatpush3.bf16.msra.mxu1 %v12799_v23  ;;  %v9348_v49 = vpop.xlane.xlu0 %9347 }
0x3781   : > { %v9351_v47 = vpop.xlane.xlu0 %9350 }
0x3782   : > { %v12803_v4 = vpack.c.bf16 %v9351_v47, %v9348_v49  ;;  %v11397_v47 = vld [vmem:[#allocation17] ss:$0 sm:$0xff] }
0x3784   : > { %12804 = vmatprep.subr.bf16.mxu1 %v12803_v4 }
0x3785   : > { %12806 = vmatpush3.bf16.msra.mxu1 %v12803_v4 }
0x3788   : > { %12410 = vmatmul.mubr.msk.f32.vlgmr.msra.gmra.mrb[80].mxu1 %vm3975_vm8, %v16425_v52 }
0x3789   : > { %12412 = vmatprep.mubr.msk.f32.mxu1 %vm3975_vm8, %v16430_v35 }
0x378c   : > { %12413 = vmatmul.mubr.msk.f32.gmra.mrb[82].mxu1 %vm3975_vm8, %v16435_v28 }
0x378d   : > { %12437 = vmatprep.mubr.msk.f32.mxu1 %vm3975_vm8, %v13427_v5 }
0x385b   : > { %v12411_v25 = vpop.f32.mrb[80].mxu1 }
0x385c   : > { %v9438_v16 = vmul.f32 0.001953125, %v12411_v25  ;;  %v9418_v45 = vpop.f32.mrb[81].mxu1 }
0x385d   : > { %v9437_v55 = vmul.f32 0.001953125, %v9418_v45 }
0x385e   : > { %9448 = vperm.xlu0 %13296, %v9438_v16   ;;  %v11398_v16 = vld [vmem:[%s16979_s4] ss:$0 sm:$0xff]  ;;  %s16980_s4 = sld [smem:[#allocation131_spill]] }
0x385f   : > { %9443 = vperm.xlu1 %13297, %v9437_v55   ;;  %v12414_v46 = vpop.f32.mrb[82].mxu1 }
0x3860   : > { %v9428_v54 = vpop.f32.mrb[83].mxu1  ;;  %v9440_v48 = vmul.f32 0.001953125, %v12414_v46 }
0x3861   : > { %v9439_v38 = vmul.f32 0.001953125, %v9428_v54 }
0x3863   : > { %9453 = vperm.xlu1 %13297, %v9439_v38  }
0x3867   : > { %9458 = vperm.xlu1 %13297, %v9440_v48  }
0x38dd   : > { %v9449_v33 = vpop.permute.xlu0 %9448 }
0x38de   : > { %v9462_v50 = vsub.f32 %v9335_v21, %v9449_v33  ;;  %v9444_v6 = vpop.permute.xlu1 %9443  ;;  %v13428_v21 = vld [vmem:[%s16963_s2] sm:$0xff] }
0x38df   : > { %v16597_v51 = vsub.f32 %v9334_v12, %v9444_v6 }
0x38e0   : > { %v9466_v57 = vmul.f32 %v9462_v50, %v9462_v50 }
0x38e1   : > { %v9465_v58 = vmul.f32 %v16597_v51, %v16597_v51 }
0x38e2   : > { %v9454_v40 = vpop.permute.xlu1 %9453  ;;  %v9472_v34 = vsel %vm3975_vm8, %v9466_v57, 0.0 }
0x38e3   : > { %v16602_v60 = vsub.f32 %v9336_v62, %v9454_v40  ;;  %9473 = vadd.xlane.f32.xlu1 %v9472_v34  ;;  %v9469_v39 = vsel %vm3975_vm8, %v9465_v58, 0.0 }
0x38e4   : > { %9470 = vadd.xlane.f32.xlu0 %v9469_v39 }
0x38e5   : > { %v9467_v14 = vmul.f32 %v16602_v60, %v16602_v60 }
0x38e6   : > { %v9459_v8 = vpop.permute.xlu1 %9458 }
0x38e7   : > { %v9464_v61 = vsub.f32 %v9337_v36, %v9459_v8  ;;  %v9475_v63 = vsel %vm3975_vm8, %v9467_v14, 0.0  ;;  %v13430_v14 = vld [vmem:[%s16963_s2 + $0x8] sm:$0xff]  ;;  %v13431_v8 = vld [vmem:[%s16962_s1 + $0x10] sm:$0xff] }
0x38e8   : > { %9476 = vadd.xlane.f32.xlu0 %v9475_v63  ;;  %v13433_v63 = vld [vmem:[%s16962_s1 + $0x18] sm:$0xff] }
0x38e9   : > { %v9468_v1 = vmul.f32 %v9464_v61, %v9464_v61 }
0x38eb   : > { %v9478_v41 = vsel %vm3975_vm8, %v9468_v1, 0.0  ;;  %v13434_v1 = vld [vmem:[%s16963_s2 + $0x18] sm:$0xff] }
0x38ec   : > { %9479 = vadd.xlane.f32.xlu0 %v9478_v41  ;;  %v11407_v41 = vld [vmem:[%s16980_s4] ss:$0 sm:$0xff]  ;;  %s16987_s4 = sld [smem:[#allocation128_spill]] }
0x3970   : > { %v9474_v3 = vpop.xlane.xlu1 %9473 }
0x3971   : > { %v9471_v2 = vpop.xlane.xlu0 %9470 }
0x3972   : > { %v12807_v7 = vpack.c.bf16 %v9474_v3, %v9471_v2  ;;  %v11408_v3 = vld [vmem:[%s16981_s3] ss:$0 sm:$0xff]  ;;  %s16984_s3 = sld [smem:[#allocation137_spill]] }
0x3973   : > { %v11409_v2 = vld [vmem:[%s16982_s5] ss:$0 sm:$0xff]  ;;  %s16985_s5 = sld [smem:[#allocation135_spill]] }
0x3974   : > { %12808 = vmatprep.subr.bf16.mxu0 %v12807_v7 }
0x3975   : > { %v9477_v15 = vpop.xlane.xlu0 %9476  ;;  %12810 = vmatpush3.bf16.msra.mxu0 %v12807_v7 }
0x3979   : > { %v9480_v17 = vpop.xlane.xlu0 %9479 }
0x397a   : > { %v12811_v42 = vpack.c.bf16 %v9480_v17, %v9477_v15 }
0x397c   : > { %12812 = vmatprep.subr.bf16.mxu0 %v12811_v42 }
0x397d   : > { %12814 = vmatpush3.bf16.msra.mxu0 %v12811_v42 }
0x3980   : > { %12424 = vmatmul.mubr.msk.f32.vlgmr.msra.gmra.mrb[88].mxu0 %vm3975_vm8, %v16425_v52 }
0x3981   : > { %12426 = vmatprep.mubr.msk.f32.mxu0 %vm3975_vm8, %v16430_v35 }
0x3984   : > { %12427 = vmatmul.mubr.msk.f32.gmra.mrb[90].mxu0 %vm3975_vm8, %v16435_v28 }
0x3985   : > { %12451 = vmatprep.mubr.msk.f32.mxu0 %vm3975_vm8, %v13428_v21 }
0x3a53   : > { %v12425_v10 = vpop.f32.mrb[88].mxu0 }
0x3a54   : > { %v9567_v22 = vmul.f32 0.001953125, %v12425_v10  ;;  %v9547_v12 = vpop.f32.mrb[89].mxu0 }
0x3a55   : > { %v9566_v9 = vmul.f32 0.001953125, %v9547_v12 }
0x3a56   : > { %v9571_v26 = vadd.f32 1e-08, %v9567_v22 }
0x3a57   : > { %v9570_v29 = vadd.f32 1e-08, %v9566_v9  ;;  %v12428_v62 = vpop.f32.mrb[90].mxu0 }
0x3a58   : > { %13378 = vrsqrt.f32 %v9571_v26  ;;  %v9557_v30 = vpop.f32.mrb[91].mxu0  ;;  %v9569_v52 = vmul.f32 0.001953125, %v12428_v62 }
0x3a59   : > { %13380 = vrsqrt.f32 %v9570_v29  ;;  %v9568_v36 = vmul.f32 0.001953125, %v9557_v30  ;;  %v11410_v30 = vld [vmem:[%s16983_s7] ss:$0 sm:$0xff]  ;;  %s16986_s7 = sld [smem:[#allocation116_spill]] }
0x3a5a   : > { %v9573_v35 = vadd.f32 1e-08, %v9569_v52 }
0x3a5b   : > { %v9572_v37 = vadd.f32 1e-08, %v9568_v36 }
0x3a5d   : > { %13382 = vrsqrt.f32 %v9572_v37 }
0x3a5e   : > { %13384 = vrsqrt.f32 %v9573_v35 }
0x3a62   : > { %v13379_v28 = vpop.eup %13378 }
0x3a63   : > { %v13381_v43 = vpop.eup %13380  ;;  %9585 = vperm.xlu0 %13296, %v13379_v28  }
0x3a64   : > { %9580 = vperm.xlu1 %13297, %v13381_v43  }
0x3a67   : > { %v13383_v23 = vpop.eup %13382  ;;  %9855 = vperm.xlu0 %13296, %v11411_v44  }
0x3a68   : > { %9590 = vperm.xlu1 %13297, %v13383_v23   ;;  %v13385_v49 = vpop.eup %13384 }
0x3a6c   : > { %9595 = vperm.xlu1 %13297, %v13385_v49  }
0x3ae2   : > { %v9586_v4 = vpop.permute.xlu0 %9585 }
0x3ae3   : > { %v9599_v5 = vmul.f32 %v9586_v4, %v9462_v50  ;;  %v9581_v25 = vpop.permute.xlu1 %9580 }
0x3ae4   : > { %v9598_v45 = vmul.f32 %v9581_v25, %v16597_v51 }
0x3ae5   : > { %v9609_v55 = vmul.f32 %v11397_v47, %v9599_v5 }
0x3ae6   : > { %v9608_v46 = vmul.f32 %v11397_v47, %v9598_v45 }
0x3ae7   : > { %v9619_v54 = vadd.f32 %v11398_v16, %v9609_v55  ;;  %v9591_v38 = vpop.permute.xlu1 %9590 }
0x3ae8   : > { %v9618_v48 = vadd.f32 %v11398_v16, %v9608_v46  ;;  %v9600_v33 = vmul.f32 %v9591_v38, %v16602_v60  ;;  %v13429_v60 = vld [vmem:[%s16962_s1 + $0x8] sm:$0xff]  ;;  %s16989_s1 = sld [smem:[#allocation126_spill]] }
0x3ae9   : > { %v9800_v17 = vmul.f32 %v11407_v41, %v9619_v54 }
0x3aea   : > { %v12815_v6 = vpack.c.bf16 %v9619_v54, %v9618_v48  ;;  %v9610_v58 = vmul.f32 %v11397_v47, %v9600_v33  ;;  %v9799_v12 = vmul.f32 %v11407_v41, %v9618_v48 }
0x3aeb   : > { %v9596_v57 = vpop.permute.xlu1 %9595 }
0x3aec   : > { %v9601_v40 = vmul.f32 %v9596_v57, %v9464_v61  ;;  %12816 = vmatprep.subr.bf16.mxu1 %v12815_v6  ;;  %12824 = vmatprep.subr.bf16.mxu0 %v12815_v6  ;;  %v9620_v51 = vadd.f32 %v11398_v16, %v9610_v58  ;;  %v13432_v61 = vld [vmem:[%s16963_s2 + $0x10] sm:$0xff] }
0x3aed   : > { %12818 = vmatpush3.bf16.msra.mxu1 %v12815_v6  ;;  %12826 = vmatpush3.bf16.msra.mxu0 %v12815_v6 }
0x3aee   : > { %v9611_v50 = vmul.f32 %v11397_v47, %v9601_v40  ;;  %v9801_v49 = vmul.f32 %v11407_v41, %v9620_v51 }
0x3af0   : > { %v9621_v34 = vadd.f32 %v11398_v16, %v9611_v50  ;;  %v9856_v16 = vpop.permute.xlu0 %9855 }
0x3af2   : > { %v12819_v39 = vpack.c.bf16 %v9621_v34, %v9620_v51  ;;  %v9802_v37 = vmul.f32 %v11407_v41, %v9621_v34 }
0x3af4   : > { %12820 = vmatprep.subr.bf16.mxu1 %v12819_v39  ;;  %12828 = vmatprep.subr.bf16.mxu0 %v12819_v39 }
0x3af5   : > { %12822 = vmatpush3.bf16.msra.mxu1 %v12819_v39  ;;  %12830 = vmatpush3.bf16.msra.mxu0 %v12819_v39 }
0x3af8   : > { %12438 = vmatmul.mubr.msk.f32.vlgmr.msra.gmra.mrb[84].mxu1 %vm3975_vm8, %v13429_v60  ;;  %12452 = vmatmul.mubr.msk.f32.vlgmr.msra.gmra.mrb[92].mxu0 %vm3975_vm8, %v13430_v14 }
0x3af9   : > { %12440 = vmatprep.mubr.msk.f32.mxu1 %vm3975_vm8, %v13431_v8  ;;  %12454 = vmatprep.mubr.msk.f32.mxu0 %vm3975_vm8, %v13432_v61 }
0x3afc   : > { %12441 = vmatmul.mubr.msk.f32.gmra.mrb[86].mxu1 %vm3975_vm8, %v13433_v63  ;;  %12455 = vmatmul.mubr.msk.f32.gmra.mrb[94].mxu0 %vm3975_vm8, %v13434_v1 }
0x3afd   : > { %12465 = vmatprep.mubr.msk.f32.mxu1 %vm3975_vm8, %v16486_v20  ;;  %12479 = vmatprep.mubr.msk.f32.mxu0 %vm3975_vm8, %v16486_v20 }
0x3bcb   : > { %v12439_v7 = vpop.f32.mrb[84].mxu1  ;;  %v12453_v15 = vpop.f32.mrb[92].mxu0 }
0x3bcc   : > { %v9811_v42 = vmul.f32 %v12439_v7, %v11408_v3  ;;  %v9688_v21 = vpop.f32.mrb[85].mxu1  ;;  %v9826_v10 = vmul.f32 %v12453_v15, %v11409_v2  ;;  %v9773_v22 = vpop.f32.mrb[93].mxu0  ;;  %v13435_v7 = vld [vmem:[%s16961_s6 + $0x8] sm:$0xff]  ;;  %v13436_v15 = vld [vmem:[%s16961_s6 + $0x10] sm:$0xff] }
0x3bcd   : > { %v9810_v9 = vmul.f32 %v11408_v3, %v9688_v21  ;;  %v9825_v26 = vmul.f32 %v11409_v2, %v9773_v22 }
0x3bce   : > { %v9815_v29 = vadd.f32 %v9811_v42, %v9800_v17  ;;  %v13437_v17 = vld [vmem:[%s16961_s6 + $0x18] sm:$0xff] }
0x3bcf   : > { %v9814_v62 = vadd.f32 %v9810_v9, %v9799_v12  ;;  %v12442_v52 = vpop.f32.mrb[86].mxu1  ;;  %v12456_v36 = vpop.f32.mrb[94].mxu0 }
0x3bd0   : > { %v9830_v20 = vadd.f32 %v9826_v10, %v9815_v29  ;;  %v9813_v35 = vmul.f32 %v12442_v52, %v11408_v3  ;;  %v9698_v28 = vpop.f32.mrb[87].mxu1  ;;  %v9828_v43 = vmul.f32 %v12456_v36, %v11409_v2  ;;  %v9783_v44 = vpop.f32.mrb[95].mxu0 }
0x3bd1   : > { %v9829_v23 = vadd.f32 %v9825_v26, %v9814_v62  ;;  %v9812_v47 = vmul.f32 %v11408_v3, %v9698_v28  ;;  %v9827_v4 = vmul.f32 %v11409_v2, %v9783_v44 }
0x3bd2   : > { %v9841_v5 = vadd.f32 %v11410_v30, %v9830_v20  ;;  %v9817_v25 = vadd.f32 %v9813_v35, %v9802_v37 }
0x3bd3   : > { %v9840_v45 = vadd.f32 %v11410_v30, %v9829_v23  ;;  %v9816_v55 = vadd.f32 %v9812_v47, %v9801_v49 }
0x3bd4   : > { %v9832_v46 = vadd.f32 %v9828_v43, %v9817_v25  ;;  %vm9846_vm13 = vcmp.gt.f32.partialorder %v9841_v5, 0.0  ;;  %v9859_v54 = vmul.f32 %v9856_v16, %v9841_v5 }
0x3bd5   : > { %v9831_v38 = vadd.f32 %v9827_v4, %v9816_v55  ;;  %vm9845_vm14 = vcmp.gt.f32.partialorder %v9840_v45, 0.0  ;;  %v9858_v48 = vmul.f32 %v9856_v16, %v9840_v45 }
0x3bd6   : > { %v9843_v33 = vadd.f32 %v11410_v30, %v9832_v46  ;;  %v9863_v6 = vsel %vm9846_vm13, %v9841_v5, %v9859_v54  ;;  %v10278_v46 = vld [vmem:[%s16984_s3] sm:$0xff]  ;;  %v10279_v54 = vld [vmem:[%s16984_s3 + $0x8] sm:$0xff] }
0x3bd7   : > { %v9842_v57 = vadd.f32 %v11410_v30, %v9831_v38  ;;  %v9871_v58 = vsel %vm3975_vm8, %v9863_v6, 0.0  ;;  %v9862_v40 = vsel %vm9845_vm14, %v9840_v45, %v9858_v48 }
0x3bd8   : > { %9872 = vadd.xlane.f32.xlu0 %v9871_v58  ;;  %v9868_v50 = vsel %vm3975_vm8, %v9862_v40, 0.0  ;;  %vm9848_vm15 = vcmp.gt.f32.partialorder %v9843_v33, 0.0  ;;  %v9861_v51 = vmul.f32 %v9856_v16, %v9843_v33 }
0x3bd9   : > { %9869 = vadd.xlane.f32.xlu1 %v9868_v50  ;;  %vm9847_vm0 = vcmp.gt.f32.partialorder %v9842_v57, 0.0  ;;  %v9860_v34 = vmul.f32 %v9856_v16, %v9842_v57 }
0x3bda   : > { %v9865_v39 = vsel %vm9848_vm15, %v9843_v33, %v9861_v51 }
0x3bdb   : > { %v9877_v60 = vsel %vm3975_vm8, %v9865_v39, 0.0  ;;  %v9864_v14 = vsel %vm9847_vm0, %v9842_v57, %v9860_v34 }
0x3bdc   : > { %v9874_v8 = vsel %vm3975_vm8, %v9864_v14, 0.0 }
0x3bdd   : > { %9878 = vadd.xlane.f32.xlu1 %v9877_v60  ;;  %9875 = vadd.xlane.f32.xlu0 %v9874_v8 }
0x3c65   : > { %v9873_v61 = vpop.xlane.xlu0 %9872 }
0x3c66   : > { %v9870_v63 = vpop.xlane.xlu1 %9869 }
0x3c67   : > { %v12831_v1 = vpack.c.bf16 %v9873_v61, %v9870_v63 }
0x3c69   : > { %12832 = vmatprep.subr.bf16.mxu1 %v12831_v1 }
0x3c6a   : > { %12834 = vmatpush3.bf16.msra.mxu1 %v12831_v1  ;;  %v9879_v41 = vpop.xlane.xlu1 %9878  ;;  %v9876_v3 = vpop.xlane.xlu0 %9875  ;;  %v10150_v1 = vld [vmem:[%s16985_s5] sm:$0xff] }
0x3c6b   : > { %v12835_v2 = vpack.c.bf16 %v9879_v41, %v9876_v3  ;;  %v10151_v41 = vld [vmem:[%s16985_s5 + $0x8] sm:$0xff] }
0x3c6c   : > { %v12847_v3 = vpack.c.bf16 %v10151_v41, %v10150_v1 }
0x3c6d   : > { %12836 = vmatprep.subr.bf16.mxu1 %v12835_v2 }
0x3c6e   : > { %12838 = vmatpush3.bf16.msra.mxu1 %v12835_v2 }
0x3c6f   : > { %12848 = vmatprep.subr.bf16.mxu1 %v12847_v3 }
0x3c71   : > { %12466 = vmatmul.mubr.msk.f32.vlgmr.msra.gmra.mrb[88].mxu1 %vm3975_vm8, %v13435_v7 }
0x3c72   : > { %12468 = vmatprep.mubr.msk.f32.mxu1 %vm3975_vm8, %v13436_v15  ;;  %12850 = vmatpush3.bf16.msra.mxu1 %v12847_v3 }
0x3c75   : > { %12469 = vmatmul.mubr.msk.f32.gmra.mrb[90].mxu1 %vm3975_vm8, %v13437_v17 }
0x3d44   : > { %v12467_v42 = vpop.f32.mrb[88].mxu1 }
0x3d45   : > { %v9966_v21 = vmul.f32 0.001953125, %v12467_v42  ;;  %v9946_v10 = vpop.f32.mrb[89].mxu1 }
0x3d46   : > { %v9965_v22 = vmul.f32 0.001953125, %v9946_v10 }
0x3d47   : > { %9976 = vperm.xlu1 %13297, %v9966_v21  }
0x3d48   : > { %9971 = vperm.xlu0 %13296, %v9965_v22   ;;  %v12470_v12 = vpop.f32.mrb[90].mxu1  ;;  %v10380_v22 = vld [vmem:[%s16986_s7] sm:$0xff] }
0x3d49   : > { %v9968_v9 = vmul.f32 0.001953125, %v12470_v12  ;;  %v9956_v26 = vpop.f32.mrb[91].mxu1  ;;  %v10381_v12 = vld [vmem:[%s16986_s7 + $0x8] sm:$0xff] }
0x3d4a   : > { %v9967_v29 = vmul.f32 0.001953125, %v9956_v26  ;;  %v11420_v26 = vld [vmem:[#allocation19] ss:$0 sm:$0xff] }
0x3d4c   : > { %9986 = vperm.xlu0 %13296, %v9968_v9   ;;  %9981 = vperm.xlu1 %13297, %v9967_v29   ;;  %v12859_v9 = vpack.c.bf16 %v10381_v12, %v10380_v22 }
0x3dc6   : > { %v9977_v62 = vpop.permute.xlu1 %9976 }
0x3dc7   : > { %v16650_v30 = vsub.f32 %v9863_v6, %v9977_v62  ;;  %v9972_v52 = vpop.permute.xlu0 %9971  ;;  %v12855_v6 = vpack.c.bf16 %v10279_v54, %v10278_v46  ;;  %v11427_v62 = vld [vmem:[#allocation21] ss:$0 sm:$0xff] }
0x3dc8   : > { %v16652_v36 = vsub.f32 %v9862_v40, %v9972_v52 }
0x3dc9   : > { %v9994_v20 = vmul.f32 %v16650_v30, %v16650_v30 }
0x3dca   : > { %v9993_v37 = vmul.f32 %v16652_v36, %v16652_v36 }
0x3dcb   : > { %v9987_v35 = vpop.permute.xlu0 %9986  ;;  %v9982_v28 = vpop.permute.xlu1 %9981  ;;  %v10000_v43 = vsel %vm3975_vm8, %v9994_v20, 0.0 }
0x3dcc   : > { %v16659_v44 = vsub.f32 %v9865_v39, %v9987_v35  ;;  %v16661_v23 = vsub.f32 %v9864_v14, %v9982_v28  ;;  %10001 = vadd.xlane.f32.xlu0 %v10000_v43  ;;  %v9997_v49 = vsel %vm3975_vm8, %v9993_v37, 0.0  ;;  %v11421_v35 = vld [vmem:[%s16987_s4] ss:$0 sm:$0xff]  ;;  %s16988_s4 = sld [smem:[#allocation121_spill]] }
0x3dcd   : > { %9998 = vadd.xlane.f32.xlu1 %v9997_v49 }
0x3dce   : > { %v9996_v47 = vmul.f32 %v16659_v44, %v16659_v44  ;;  %v9995_v4 = vmul.f32 %v16661_v23, %v16661_v23 }
0x3dd0   : > { %v10006_v5 = vsel %vm3975_vm8, %v9996_v47, 0.0  ;;  %v10003_v25 = vsel %vm3975_vm8, %v9995_v4, 0.0 }
0x3dd1   : > { %10007 = vadd.xlane.f32.xlu1 %v10006_v5  ;;  %10004 = vadd.xlane.f32.xlu0 %v10003_v25 }
0x3e59   : > { %v10002_v16 = vpop.xlane.xlu0 %10001 }
0x3e5a   : > { %v9999_v45 = vpop.xlane.xlu1 %9998 }
0x3e5b   : > { %v12839_v55 = vpack.c.bf16 %v10002_v16, %v9999_v45 }
0x3e5d   : > { %12840 = vmatprep.subr.bf16.mxu0 %v12839_v55 }
0x3e5e   : > { %v10005_v38 = vpop.xlane.xlu0 %10004  ;;  %12842 = vmatpush3.bf16.msra.mxu0 %v12839_v55  ;;  %v10008_v48 = vpop.xlane.xlu1 %10007 }
0x3e5f   : > { %v12843_v33 = vpack.c.bf16 %v10008_v48, %v10005_v38 }
0x3e61   : > { %12844 = vmatprep.subr.bf16.mxu0 %v12843_v33 }
0x3e62   : > { %12846 = vmatpush3.bf16.msra.mxu0 %v12843_v33 }
0x3e63   : > { %12856 = vmatprep.subr.bf16.mxu0 %v12855_v6 }
0x3e65   : > { %12480 = vmatmul.mubr.msk.f32.vlgmr.msra.gmra.mrb[96].mxu0 %vm3975_vm8, %v13435_v7 }
0x3e66   : > { %12482 = vmatprep.mubr.msk.f32.mxu0 %vm3975_vm8, %v13436_v15  ;;  %12858 = vmatpush3.bf16.msra.mxu0 %v12855_v6  ;;  %v10152_v15 = vld [vmem:[%s16985_s5 + $0x10] sm:$0xff] }
0x3e69   : > { %12483 = vmatmul.mubr.msk.f32.gmra.mrb[98].mxu0 %vm3975_vm8, %v13437_v17  ;;  %v10153_v17 = vld [vmem:[%s16985_s5 + $0x18] sm:$0xff] }
0x3e6a   : > { %12503 = vmatprep.mubr.msk.f32.mxu0 %vm3551_vm4, %v16545_v53  ;;  %v12851_v42 = vpack.c.bf16 %v10153_v17, %v10152_v15 }
0x3e6c   : > { %12852 = vmatprep.subr.bf16.mxu1 %v12851_v42 }
0x3e6d   : > { %12504 = vmatmul.mubr.msk.f32.vlgmr.msra.gmra.mrb[100].mxu0 %vm3551_vm4, %v16548_v59  ;;  %12854 = vmatpush3.bf16.msra.mxu1 %v12851_v42 }
0x3e6e   : > { %12506 = vmatprep.mubr.msk.f32.mxu0 %vm3551_vm4, %v16559_v11  ;;  %12860 = vmatprep.subr.bf16.mxu1 %v12859_v9 }
0x3e71   : > { %12507 = vmatmul.mubr.msk.f32.gmra.mrb[102].mxu0 %vm3551_vm4, %v16562_v56 }
0x3f38   : > { %v12481_v57 = vpop.f32.mrb[96].mxu0 }
0x3f39   : > { %v10095_v58 = vmul.f32 0.001953125, %v12481_v57  ;;  %v10075_v40 = vpop.f32.mrb[97].mxu0 }
0x3f3a   : > { %v10094_v50 = vmul.f32 0.001953125, %v10075_v40 }
0x3f3b   : > { %v10099_v51 = vadd.f32 1e-08, %v10095_v58 }
0x3f3c   : > { %v10098_v34 = vadd.f32 1e-08, %v10094_v50  ;;  %v12484_v39 = vpop.f32.mrb[98].mxu0 }
0x3f3d   : > { %13386 = vrsqrt.f32 %v10099_v51  ;;  %v10097_v53 = vmul.f32 0.001953125, %v12484_v39  ;;  %v10085_v60 = vpop.f32.mrb[99].mxu0 }
0x3f3e   : > { %13388 = vrsqrt.f32 %v10098_v34  ;;  %v10096_v59 = vmul.f32 0.001953125, %v10085_v60 }
0x3f3f   : > { %v10101_v14 = vadd.f32 1e-08, %v10097_v53 }
0x3f40   : > { %v10100_v8 = vadd.f32 1e-08, %v10096_v59  ;;  %v12505_v11 = vpop.f32.mrb[100].mxu0 }
0x3f41   : > { %13390 = vrsqrt.f32 %v10101_v14  ;;  %v10353_v56 = vpop.f32.mrb[101].mxu0  ;;  %v10359_v45 = vadd.f32 %v12505_v11, %v11427_v62 }
0x3f42   : > { %13392 = vrsqrt.f32 %v10100_v8  ;;  %v10354_v43 = vadd.f32 %v11427_v62, %v10353_v56 }
0x3f43   : > { %v10373_v33 = vmax.f32 %v10359_v45, 0.0 }
0x3f44   : > { %v12508_v61 = vpop.f32.mrb[102].mxu0  ;;  %v10372_v46 = vmax.f32 %v10354_v43, 0.0 }
0x3f45   : > { %v10363_v63 = vpop.f32.mrb[103].mxu0  ;;  %v10369_v6 = vadd.f32 %v12508_v61, %v11427_v62  ;;  %v11422_v61 = vld [vmem:[%s16989_s1] ss:$0 sm:$0xff] }
0x3f46   : > { %v10364_v54 = vadd.f32 %v11427_v62, %v10363_v63 }
0x3f47   : > { %v13387_v2 = vpop.eup %13386  ;;  %v10375_v58 = vmax.f32 %v10369_v6, 0.0 }
0x3f48   : > { %v13389_v7 = vpop.eup %13388  ;;  %10113 = vperm.xlu1 %13297, %v13387_v2   ;;  %v10374_v57 = vmax.f32 %v10364_v54, 0.0 }
0x3f49   : > { %10108 = vperm.xlu0 %13296, %v13389_v7   ;;  %v10379_v50 = vmul.f32 %v10375_v58, %v15845_v32 }
0x3f4a   : > { %v10378_v40 = vmul.f32 %v10374_v57, %v15843_v31 }
0x3f4b   : > { %v13391_v21 = vpop.eup %13390 }
0x3f4c   : > { %v13393_v10 = vpop.eup %13392 }
0x3f4d   : > { %10123 = vperm.xlu0 %13296, %v13391_v21   ;;  %10118 = vperm.xlu1 %13297, %v13393_v10   ;;  %v13438_v10 = vld [vmem:[#allocation2 + $0x8] sm:$0xff] }
0x3fc7   : > { %v10114_v29 = vpop.permute.xlu1 %10113 }
0x3fc8   : > { %v10127_v52 = vmul.f32 %v10114_v29, %v16650_v30  ;;  %v10109_v20 = vpop.permute.xlu0 %10108 }
0x3fc9   : > { %v10126_v37 = vmul.f32 %v10109_v20, %v16652_v36 }
0x3fca   : > { %v10137_v28 = vmul.f32 %v11420_v26, %v10127_v52 }
0x3fcb   : > { %v10136_v49 = vmul.f32 %v11420_v26, %v10126_v37 }
0x3fcc   : > { %v10124_v47 = vpop.permute.xlu0 %10123  ;;  %v10119_v4 = vpop.permute.xlu1 %10118  ;;  %v10147_v55 = vadd.f32 %v11421_v35, %v10137_v28 }
0x3fcd   : > { %v10146_v5 = vadd.f32 %v11421_v35, %v10136_v49  ;;  %v10129_v25 = vmul.f32 %v10124_v47, %v16659_v44  ;;  %v10128_v16 = vmul.f32 %v10119_v4, %v16661_v23  ;;  %v10376_v44 = vmul.f32 %v10372_v46, %v15837_v24  ;;  %v11374_v24 = vld [vmem:[%s16988_s4] ss:$0 sm:$0xff]  ;;  %v13440_v47 = vld [vmem:[#allocation2 + $0x18] sm:$0xff] }
0x3fce   : > { %v10377_v23 = vmul.f32 %v10373_v33, %v15839_v27  ;;  %v9185_v51 = vadd.f32 %v16577_v13, %v11374_v24  ;;  %v9180_v34 = vadd.f32 %v11374_v24, %v16579_v0  ;;  %v9195_v53 = vadd.f32 %v16581_v18, %v11374_v24 }
0x3fcf   : > { %v10139_v38 = vmul.f32 %v11420_v26, %v10129_v25  ;;  %v10138_v30 = vmul.f32 %v11420_v26, %v10128_v16  ;;  %12493 = vmatprep.mubr.msk.f32.mxu1 %vm3975_vm8, %v10146_v5  ;;  %v9190_v60 = vadd.f32 %v11374_v24, %v16583_v19  ;;  %v13441_v25 = vld [vmem:[#allocation2 + $0x10] sm:$0xff] }
0x3fd0   : > { %12494 = vmatmul.mubr.msk.f32.vlgmr.msra.gmra.mrb[92].mxu1 %vm3975_vm8, %v10147_v55  ;;  %v11380_v39 = vmul.f32 -1.442695, %v9185_v51  ;;  %v11379_v27 = vmul.f32 -1.442695, %v9180_v34  ;;  %v11382_v31 = vmul.f32 -1.442695, %v9195_v53 }
0x3fd1   : > { %v10149_v36 = vadd.f32 %v11421_v35, %v10139_v38  ;;  %v10148_v48 = vadd.f32 %v11421_v35, %v10138_v30  ;;  %12862 = vmatpush3.bf16.msra.mxu1 %v12859_v9  ;;  %v11381_v59 = vmul.f32 -1.442695, %v9190_v60  ;;  %v13439_v9 = vld [vmem:[#allocation2] sm:$0xff] }
0x3fd2   : > { %13394 = vpow2.f32 %v11380_v39 }
0x3fd3   : > { %12496 = vmatprep.mubr.msk.f32.mxu1 %vm3975_vm8, %v10148_v48  ;;  %13396 = vpow2.f32 %v11379_v27 }
0x3fd4   : > { %12497 = vmatmul.mubr.msk.f32.gmra.mrb[94].mxu1 %vm3975_vm8, %v10149_v36  ;;  %13398 = vpow2.f32 %v11382_v31 }
0x3fd5   : > { %12513 = vmatprep.mubr.msk.f32.mxu1 %vm3551_vm4, %v10376_v44  ;;  %13400 = vpow2.f32 %v11381_v59 }
0x3fd8   : > { %12514 = vmatmul.mubr.msk.f32.vlgmr.msra.gmra.mrb[96].mxu1 %vm3551_vm4, %v10377_v23 }
0x3fd9   : > { %12516 = vmatprep.mubr.msk.f32.mxu1 %vm3551_vm4, %v10378_v40 }
0x3fdc   : > { %12517 = vmatmul.mubr.msk.f32.gmra.mrb[98].mxu1 %vm3551_vm4, %v10379_v50  ;;  %v13395_v32 = vpop.eup %13394 }
0x3fdd   : > { %v13397_v14 = vpop.eup %13396  ;;  %v9211_v8 = vadd.f32 1.0, %v13395_v32 }
0x3fde   : > { %v13399_v11 = vpop.eup %13398  ;;  %v9210_v13 = vadd.f32 1.0, %v13397_v14 }
0x3fdf   : > { %v13401_v56 = vpop.eup %13400  ;;  %13402 = vrcp.f32 %v9211_v8  ;;  %v9213_v0 = vadd.f32 1.0, %v13399_v11 }
0x3fe0   : > { %13404 = vrcp.f32 %v9210_v13  ;;  %v9212_v18 = vadd.f32 1.0, %v13401_v56 }
0x3fe1   : > { %13406 = vrcp.f32 %v9213_v0 }
0x3fe2   : > { %13408 = vrcp.f32 %v9212_v18 }
0x3fe9   : > { %v13403_v19 = vpop.eup %13402 }
0x3fea   : > { %v13405_v63 = vpop.eup %13404  ;;  %v10259_v3 = vsub.f32 1.0, %v13403_v19  ;;  %v10267_v22 = vmul.f32 %v13438_v10, %v13403_v19 }
0x3feb   : > { %v13407_v7 = vpop.eup %13406  ;;  %v10258_v17 = vsub.f32 1.0, %v13405_v63  ;;  %v10266_v26 = vmul.f32 %v13439_v9, %v13405_v63 }
0x3fec   : > { %v13409_v42 = vpop.eup %13408  ;;  %v10261_v20 = vsub.f32 1.0, %v13407_v7  ;;  %v10269_v4 = vmul.f32 %v13440_v47, %v13407_v7 }
0x3fed   : > { %v10260_v43 = vsub.f32 1.0, %v13409_v42  ;;  %v10268_v16 = vmul.f32 %v13441_v25, %v13409_v42 }
0x40a3   : > { %v12495_v1 = vpop.f32.mrb[92].mxu1 }
0x40a4   : > { %v10245_v41 = vadd.f32 %v12495_v1, %v11422_v61  ;;  %v10239_v2 = vpop.f32.mrb[93].mxu1 }
0x40a5   : > { %v10240_v15 = vadd.f32 %v11422_v61, %v10239_v2 }
0x40a6   : > { %v10263_v21 = vmul.f32 %v10259_v3, %v10245_v41 }
0x40a7   : > { %v10262_v12 = vmul.f32 %v10258_v17, %v10240_v15  ;;  %v12498_v29 = vpop.f32.mrb[94].mxu1 }
0x40a8   : > { %v10271_v62 = vadd.f32 %v10267_v22, %v10263_v21  ;;  %v10255_v52 = vadd.f32 %v12498_v29, %v11422_v61  ;;  %v10249_v37 = vpop.f32.mrb[95].mxu1 }
0x40a9   : > { %v10270_v35 = vadd.f32 %v10266_v26, %v10262_v12  ;;  %v10250_v28 = vadd.f32 %v11422_v61, %v10249_v37 }
0x40aa   : > { %10275 = vst.msk [vmem:[#allocation2 + $0x8] sm:$0xff] %vm6848_vm5, %v10271_v62  ;;  %v10265_v49 = vmul.f32 %v10261_v20, %v10255_v52 }
0x40ab   : > { %10274 = vst.msk [vmem:[#allocation2] sm:$0xff] %vm6848_vm5, %v10270_v35  ;;  %v10264_v5 = vmul.f32 %v10260_v43, %v10250_v28  ;;  %v12515_v45 = vpop.f32.mrb[96].mxu1 }
0x40ac   : > { %v10273_v55 = vadd.f32 %v10269_v4, %v10265_v49  ;;  %10480 = vst.msk [vmem:[%s15823_s9 + $0x8] sm:$0xff] %vm3443_vm3, %v12515_v45  ;;  %v10460_v46 = vpop.f32.mrb[97].mxu1 }
0x40ad   : > { %v10272_v54 = vadd.f32 %v10268_v16, %v10264_v5  ;;  %10479 = vst.msk [vmem:[%s15823_s9] sm:$0xff] %vm3443_vm3, %v10460_v46 }
0x40ae   : > { %10277 = vst.msk [vmem:[#allocation2 + $0x18] sm:$0xff] %vm6848_vm5, %v10273_v55 }
0x40af   : > { %10276 = vst.msk [vmem:[#allocation2 + $0x10] sm:$0xff] %vm6848_vm5, %v10272_v54  ;;  %v12518_v38 = vpop.f32.mrb[98].mxu1 }
0x40b0   : > { %10482 = vst.msk [vmem:[%s15823_s9 + $0x18] sm:$0xff] %vm3443_vm3, %v12518_v38  ;;  %v10470_v30 = vpop.f32.mrb[99].mxu1 }
0x40b1   : > { %10481 = vst.msk [vmem:[%s15823_s9 + $0x10] sm:$0xff] %vm3443_vm3, %v10470_v30 }
0x40b2 PF: > { %s253_s0 = sadd.s32 1, %s14654_s0  }
0x40b3   : > { %p250_p3 = scmp.ge.s32.totalorder %s253_s0, 4  }
0x40b5   :  { %252 = sbr.rel (!%p250_p3) target bundleno = 210 (0xd2), region = 717 }
0x40bc   :  { %10505 = vsyncpa [#allocation18], 1 }
0x40bd   :  { %10507 = vsyncpa [#allocation18 + $0x1], 1 }
0x40be   :  { %10508 = vsyncpa [#allocation20], 1 }
0x40bf   :  { %10509 = vsyncpa [#allocation23], 1 }
0x40c0   :  { %10510 = vsyncpa [#allocation26], 1 }
0x40c1   :  { %10511 = vsyncpa [#allocation29], 1 }
0x40c2   :  { %10512 = vsyncpa [#allocation32], 1 }
0x40c3   :  { %10513 = vsyncpa [#allocation35], 1 }
0x40c4   :  { %10514 = vsyncpa [#allocation38], 1 }
0x40c5   :  { %10515 = vsyncpa [#allocation41], 1 }
0x40c6   :  { %10516 = vsyncpa [#allocation44], 1 }
0x40c7   :  { %10517 = vsyncpa [#allocation47], 1 }
0x40c8   :  { %10518 = vsyncpa [#allocation50], 1 }
0x40c9   :  { %10519 = vsyncpa [#allocation53], 1 }
0x40ca   :  { %10520 = vsyncpa [#allocation56], 1 }
0x40cb   :  { %10521 = vsyncpa [#allocation59], 1 }
0x40cc   :  { %10522 = vsyncpa [#allocation62], 1 }
0x40cd   :  { %10523 = vsyncpa [#allocation65], 1 }
0x40ce   :  { %10524 = vsyncpa [#allocation68], 1 }
0x40cf   :  { %10525 = vsyncpa [#allocation71], 1 }
0x40d0   :  { %10526 = vsyncpa [#allocation74], 1 }
0x40d1   :  { %10527 = vsyncpa [#allocation77], 1 }
0x40d2   :  { %10528 = vsyncpa [#allocation80], 1 }

</bundles_post_ra>
